<compile_context>
chip_gen: v7x
topology: tpu7x:2x2x1
jax: 0.10.0
libtpu: 0.0.40
codegen_flags: <defaults>
</compile_context>

<pallas_src>
from functools import partial
from collections import namedtuple

import jax
import jax.numpy as jnp
from jax.experimental import pallas as pl
from jax.experimental.pallas import tpu as pltpu


# ----------------------------------------------------------------------------
# Config
# ----------------------------------------------------------------------------
Cfg = namedtuple(
    "Cfg",
    "in_channels expand_channels out_channels kernel_size stride dilation use_se use_hs",
)

# A small MobileNetV3-small-style inverted-residual setting.
SETTING = [
    Cfg(16, 16, 16, 3, 2, 1, True, False),
    Cfg(16, 72, 24, 3, 2, 1, False, False),
    Cfg(24, 88, 24, 3, 1, 1, False, False),   # stride 1, in==out -> residual
    Cfg(24, 96, 40, 5, 2, 1, True, True),
]

BN_EPS = 1e-3
STEM_KPAD = 32                      # stem contraction dim 27 -> 32 (sublane aligned)
VMEM_LIMIT = 32 * 1024 * 1024       # safe on v5e/v6e/v7x (v7x physical VMEM = 64 MiB)
ROW_TILE = 256                      # row tile for the flat (N*HW, K) matmuls


def _make_divisible(v, divisor, min_value=None):
    if min_value is None:
        min_value = divisor
    new_v = max(min_value, int(v + divisor / 2) // divisor * divisor)
    if new_v < 0.9 * v:
        new_v += divisor
    return new_v


def _round_up(x, m):
    return (x + m - 1) // m * m


# ----------------------------------------------------------------------------
# Activation helpers (f32 math inside kernels)
# ----------------------------------------------------------------------------
def _hardswish(x):
    return x * jnp.clip(x + 3.0, 0.0, 6.0) * (1.0 / 6.0)


def _hardsigmoid(x):
    return jnp.clip(x + 3.0, 0.0, 6.0) * (1.0 / 6.0)


def _apply_act(y, act):
    if act == "relu":
        return jnp.maximum(y, 0.0)
    if act == "hardswish":
        return _hardswish(y)
    return y


# ----------------------------------------------------------------------------
# Pallas kernels
# ----------------------------------------------------------------------------
def _mm_kernel(x_ref, w_ref, shift_ref, o_ref, *, act):
    """Flat-row matmul (MXU, bf16 in / f32 acc) + folded-BN shift + activation."""
    y = jnp.dot(x_ref[...], w_ref[...], preferred_element_type=jnp.float32)
    y = _apply_act(y + shift_ref[...], act)
    o_ref[...] = y.astype(o_ref.dtype)


def _block_kernel(*refs, H, W, Cexp, k, stride, dil, Ho, Wo,
                  has_expand, use_se, use_res, act):
    """One fused inverted-residual block per grid step (grid = batch).

    expand 1x1 -> zero-padded spatial scratch -> depthwise kxk -> SE ->
    project 1x1 (+ residual).  The expanded activation stays in VMEM.
    """
    refs = list(refs)
    x_ref = refs.pop(0)                                  # (1, H*W, Cin) bf16
    if has_expand:
        we_ref = refs.pop(0)                             # (Cin, Cexp) bf16
        es_ref = refs.pop(0)                             # (1, Cexp) f32
    wd_ref = refs.pop(0)                                 # (k*k, 1, Cexp) f32
    ds_ref = refs.pop(0)                                 # (1, Cexp) f32
    if use_se:
        w1_ref = refs.pop(0)                             # (Cexp, Cs) f32
        b1_ref = refs.pop(0)                             # (1, Cs) f32
        w2_ref = refs.pop(0)                             # (Cs, Cexp) f32
        b2_ref = refs.pop(0)                             # (1, Cexp) f32
    if stride > 1:
        sel_ref = refs.pop(0)                            # (Wo, Ls) f32 subsample
    wp_ref = refs.pop(0)                                 # (Cexp, Cout) bf16
    ps_ref = refs.pop(0)                                 # (1, Cout) f32
    o_ref = refs.pop(0)                                  # (1, Ho*Wo, Cout) bf16
    pad_ref = refs.pop(0)                                # (Hp, Wp, Cexp) f32 scratch
    dw_ref = refs.pop(0)                                 # (Ho*Wo, Cexp) f32 scratch

    p = (k - 1) // 2 * dil
    x2 = x_ref[0]                                        # (H*W, Cin) bf16

    # ---- expand 1x1 (MXU) + BN shift + activation; result stays in VMEM ----
    if has_expand:
        y = jnp.dot(x2, we_ref[...], preferred_element_type=jnp.float32)
        y = _apply_act(y + es_ref[...], act)             # (H*W, Cexp) f32
    else:
        y = x2.astype(jnp.float32)

    # ---- scatter rows into a zero-padded spatial scratch (depthwise halo) ----
    pad_ref[...] = jnp.zeros(pad_ref.shape, pad_ref.dtype)
    for h in range(H):
        pad_ref[h + p, p:p + W, :] = y[h * W:(h + 1) * W, :]

    # ---- depthwise kxk conv + BN shift + activation (VPU tap accumulation) ----
    Ls = stride * (Wo - 1) + 1
    wtaps = [wd_ref[t] for t in range(k * k)]            # each (1, Cexp) f32
    dshift = ds_ref[...]                                 # (1, Cexp) f32
    for ho in range(Ho):
        acc = jnp.zeros((Ls, Cexp), jnp.float32)
        for di in range(k):
            row = pad_ref[stride * ho + di * dil]        # (Wp, Cexp) f32
            for dj in range(k):
                c0 = dj * dil
                acc = acc + wtaps[di * k + dj] * row[c0:c0 + Ls, :]
        if stride > 1:
            # stride-s column subsample as a tiny static selection matmul
            acc = jnp.dot(sel_ref[...], acc, preferred_element_type=jnp.float32)
        dw_ref[ho * Wo:(ho + 1) * Wo, :] = _apply_act(acc + dshift, act)

    z = dw_ref[...]                                      # (Ho*Wo, Cexp) f32

    # ---- squeeze-excitation (global mean + fc1/ReLU/fc2/Hardsigmoid), fused ----
    if use_se:
        s = jnp.sum(z, axis=0, keepdims=True) * (1.0 / float(Ho * Wo))
        s = jnp.dot(s, w1_ref[...], preferred_element_type=jnp.float32) + b1_ref[...]
        s = jnp.maximum(s, 0.0)
        s = jnp.dot(s, w2_ref[...], preferred_element_type=jnp.float32) + b2_ref[...]
        z = z * _hardsigmoid(s)

    # ---- projection 1x1 (MXU) + BN shift (+ residual, no activation) ----
    out = jnp.dot(z.astype(jnp.bfloat16), wp_ref[...],
                  preferred_element_type=jnp.float32) + ps_ref[...]
    if use_res:
        out = out + x2.astype(jnp.float32)
    o_ref[0] = out.astype(o_ref.dtype)


# ----------------------------------------------------------------------------
# Pallas wrappers
# ----------------------------------------------------------------------------
def matmul_bn_act(x2, w, shift, act):
    """x2: (R, K) bf16 flat rows, w: (K, C) bf16 (BN folded), shift: (1, C) f32."""
    R, K = x2.shape
    C = w.shape[1]
    tr = ROW_TILE if (R % ROW_TILE == 0) else _round_up(R, 8)
    Rp = _round_up(R, tr)
    xp = x2 if Rp == R else jnp.pad(x2, ((0, Rp - R), (0, 0)))
    out = pl.pallas_call(
        partial(_mm_kernel, act=act),
        out_shape=jax.ShapeDtypeStruct((Rp, C), jnp.bfloat16),
        grid=(Rp // tr,),
        in_specs=[pl.BlockSpec((tr, K), lambda i: (i, 0)),
                  pl.BlockSpec((K, C), lambda i: (0, 0)),
                  pl.BlockSpec((1, C), lambda i: (0, 0))],
        out_specs=pl.BlockSpec((tr, C), lambda i: (i, 0)),
        compiler_params=pltpu.CompilerParams(
            dimension_semantics=("parallel",),
            vmem_limit_bytes=VMEM_LIMIT),
    )(xp, w, shift)
    return out if Rp == R else out[:R]


def _const_spec(shape):
    nd = len(shape)
    return pl.BlockSpec(shape, lambda n: (0,) * nd)


def block_forward(x3, cfg, bp, H, W):
    """x3: (N, H*W, Cin) bf16 -> (N, Ho*Wo, Cout) bf16, fused block kernel."""
    N, HW, Cin = x3.shape
    assert HW == H * W
    act = "hardswish" if cfg.use_hs else "relu"
    k, dil = cfg.kernel_size, cfg.dilation
    stride = 1 if dil > 1 else cfg.stride
    p = (k - 1) // 2 * dil
    Ho = (H + 2 * p - dil * (k - 1) - 1) // stride + 1
    Wo = (W + 2 * p - dil * (k - 1) - 1) // stride + 1
    Cexp, Cout = cfg.expand_channels, cfg.out_channels
    has_expand = cfg.expand_channels != cfg.in_channels
    use_res = cfg.stride == 1 and cfg.in_channels == cfg.out_channels

    args = [x3]
    in_specs = [pl.BlockSpec((1, HW, Cin), lambda n: (n, 0, 0))]

    def add(arr):
        args.append(arr)
        in_specs.append(_const_spec(arr.shape))

    if has_expand:
        add(bp["expand"]["w"]); add(bp["expand"]["shift"])
    add(bp["dw"]["w"]); add(bp["dw"]["shift"])
    if cfg.use_se:
        sep = bp["se"]
        add(sep["w1"]); add(sep["b1"]); add(sep["w2"]); add(sep["b2"])
    if stride > 1:
        Ls = stride * (Wo - 1) + 1
        sel = (jnp.arange(Ls)[None, :] == stride * jnp.arange(Wo)[:, None]
               ).astype(jnp.float32)
        add(sel)
    add(bp["proj"]["w"]); add(bp["proj"]["shift"])

    kernel = partial(_block_kernel, H=H, W=W, Cexp=Cexp, k=k, stride=stride,
                     dil=dil, Ho=Ho, Wo=Wo, has_expand=has_expand,
                     use_se=cfg.use_se, use_res=use_res, act=act)
    out = pl.pallas_call(
        kernel,
        out_shape=jax.ShapeDtypeStruct((N, Ho * Wo, Cout), jnp.bfloat16),
        grid=(N,),
        in_specs=in_specs,
        out_specs=pl.BlockSpec((1, Ho * Wo, Cout), lambda n: (n, 0, 0)),
        scratch_shapes=[
            pltpu.VMEM((H + 2 * p, W + 2 * p, Cexp), jnp.float32),
            pltpu.VMEM((Ho * Wo, Cexp), jnp.float32),
        ],
        compiler_params=pltpu.CompilerParams(
            dimension_semantics=("parallel",),
            vmem_limit_bytes=VMEM_LIMIT),
    )(*args)
    return out, Ho, Wo


# ----------------------------------------------------------------------------
# JAX glue: stem im2col / network composition
# ----------------------------------------------------------------------------
def im2col(x, k, stride, dilation, padding):
    """x: (N, H, W, C) -> (N, Ho, Wo, k*k, C) patch taps (XLA side)."""
    N, H, W, C = x.shape
    Ho = (H + 2 * padding - dilation * (k - 1) - 1) // stride + 1
    Wo = (W + 2 * padding - dilation * (k - 1) - 1) // stride + 1
    xp = jnp.pad(x, ((0, 0), (padding, padding), (padding, padding), (0, 0)))
    cols = []
    for i in range(k):
        for j in range(k):
            r0, c0 = i * dilation, j * dilation
            sl = xp[:, r0: r0 + (Ho - 1) * stride + 1: stride,
                       c0: c0 + (Wo - 1) * stride + 1: stride, :]
            cols.append(sl)
    return jnp.stack(cols, axis=3)  # (N, Ho, Wo, k*k, C)


def stem_forward(x_nhwc, p):
    # TODO(synk): the stem is the only remaining JAX-side im2col; with 3 input
    # channels the blow-up is just 27 values/pixel, so it is left in XLA.
    patches = im2col(x_nhwc, 3, 2, 1, 1)                 # (N, Ho, Wo, 9, 3)
    N, Ho, Wo, T, C = patches.shape
    xm = patches.reshape(N * Ho * Wo, T * C)
    kpad = p["w"].shape[0]
    if xm.shape[-1] < kpad:                              # 27 -> 32 zero pad
        xm = jnp.pad(xm, ((0, 0), (0, kpad - xm.shape[-1])))
    y = matmul_bn_act(xm, p["w"], p["shift"], "hardswish")
    return y.reshape(N, Ho * Wo, -1), Ho, Wo


def mobilenetv3_forward(x_nchw, params, setting):
    # NCHW (PyTorch) at the API boundary; flat (N, HW, C) bf16 between kernels.
    x = jnp.transpose(x_nchw, (0, 2, 3, 1)).astype(jnp.bfloat16)
    x3, H, W = stem_forward(x, params["stem"])
    for cfg, bp in zip(setting, params["blocks"]):
        x3, H, W = block_forward(x3, cfg, bp, H, W)
    N, HW, C = x3.shape
    y = matmul_bn_act(x3.reshape(N * HW, C), params["last"]["w"],
                      params["last"]["shift"], "hardswish")
    y = y.reshape(N, H, W, -1)
    return jnp.transpose(y, (0, 3, 1, 2)).astype(jnp.float32)


# ----------------------------------------------------------------------------
# Deterministic parameter construction (matches the module's _init_weights;
# BN folded in f32 at build time: eval-mode mean=0, var=1, gamma=1, beta=0)
# ----------------------------------------------------------------------------
def _kaiming_out(key, shape, fan_out):
    return jax.random.normal(key, shape, jnp.float32) * jnp.sqrt(2.0 / fan_out)


def _bn_scale_shift(c, eps=BN_EPS):
    gamma = jnp.ones((c,), jnp.float32)
    beta = jnp.zeros((c,), jnp.float32)
    running_mean = jnp.zeros((c,), jnp.float32)
    running_var = jnp.ones((c,), jnp.float32)
    scale = gamma / jnp.sqrt(running_var + eps)
    shift = beta - running_mean * scale
    return scale.reshape(1, c), shift.reshape(1, c)


def _fold_mm(w, c):
    """Fold BN scale into a (K, C) matmul weight in f32; cast product to bf16."""
    scale, shift = _bn_scale_shift(c)
    return (w * scale).astype(jnp.bfloat16), shift


def _fold_dw(w, c):
    """Fold BN scale into a (k*k, 1, C) depthwise weight; keep f32 (VPU path)."""
    scale, shift = _bn_scale_shift(c)
    return (w * scale).astype(jnp.float32), shift


def build_params(key, setting):
    keys = iter(jax.random.split(key, 256))
    params = {}

    c0 = setting[0].in_channels
    # Stem 3x3 stride-2 conv, stored (K_pad=32, Cout) matching im2col ordering
    # (tap-major, channel-minor) with a sublane-aligned contraction dim.
    w27 = _kaiming_out(next(keys), (27, c0), fan_out=c0 * 9)
    w = jnp.zeros((STEM_KPAD, c0), jnp.float32).at[:27].set(w27)
    wf, shift = _fold_mm(w, c0)
    params["stem"] = dict(w=wf, shift=shift)

    blocks = []
    for cfg in setting:
        bp = {}
        if cfg.expand_channels != cfg.in_channels:
            w = _kaiming_out(next(keys), (cfg.in_channels, cfg.expand_channels),
                             fan_out=cfg.expand_channels)
            wf, sh = _fold_mm(w, cfg.expand_channels)
            bp["expand"] = dict(w=wf, shift=sh)

        k = cfg.kernel_size
        wdw = _kaiming_out(next(keys), (k * k, 1, cfg.expand_channels),
                           fan_out=cfg.expand_channels * k * k)
        wf, sh = _fold_dw(wdw, cfg.expand_channels)
        bp["dw"] = dict(w=wf, shift=sh)

        if cfg.use_se:
            sq = _make_divisible(cfg.expand_channels // 4, 8)
            w1 = _kaiming_out(next(keys), (cfg.expand_channels, sq), fan_out=sq)
            w2 = _kaiming_out(next(keys), (sq, cfg.expand_channels),
                              fan_out=cfg.expand_channels)
            bp["se"] = dict(w1=w1, b1=jnp.zeros((1, sq), jnp.float32),
                            w2=w2, b2=jnp.zeros((1, cfg.expand_channels), jnp.float32))

        wp = _kaiming_out(next(keys), (cfg.expand_channels, cfg.out_channels),
                          fan_out=cfg.out_channels)
        wf, sh = _fold_mm(wp, cfg.out_channels)
        bp["proj"] = dict(w=wf, shift=sh)
        blocks.append(bp)
    params["blocks"] = blocks

    cin = setting[-1].out_channels
    cout = 6 * cin
    w = _kaiming_out(next(keys), (cin, cout), fan_out=cout)
    wf, sh = _fold_mm(w, cout)
    params["last"] = dict(w=wf, shift=sh)
    # TODO(synk): layer_getter_idx is metadata only (unused by forward); not modeled.
    return params, cout


# ----------------------------------------------------------------------------
if __name__ == "__main__":
    key = jax.random.PRNGKey(0)
    kx, kp = jax.random.split(key)

    x = jax.random.normal(kx, (2, 3, 32, 32), jnp.float32)   # NCHW like PyTorch
    params, num_channels = build_params(kp, SETTING)

    fwd = jax.jit(lambda xin, p: mobilenetv3_forward(xin, p, SETTING))
    out = jax.block_until_ready(fwd(x, params))

    # 32 -> 16 (stem s2) -> 8 -> 4 -> 4 -> 2 spatial; channels 6 * 40 = 240
    assert out.shape == (2, num_channels, 2, 2), out.shape
    assert bool(jnp.isfinite(out).all())
    print("KERNEL_OK")
</pallas_src>

<mosaic_0001>
module attributes {stable_mosaic.version = 11 : i64} {
  func.func @_mm_kernel(%arg0: i32, %arg1: memref<256x32xbf16, #tpu.memory_space<vmem>>, %arg2: memref<32x16xbf16, #tpu.memory_space<vmem>>, %arg3: memref<1x16xf32, #tpu.memory_space<vmem>>, %arg4: memref<256x16xbf16, #tpu.memory_space<vmem>>) attributes {dimension_semantics = [#tpu.dimension_semantics<parallel>], iteration_bounds = array<i64: 2>, scalar_prefetch = 0 : i64, scratch_operands = 0 : i64, tpu.core_type = #tpu.core_type<tc>, window_params = [{transform_indices = @transform_0, window_bounds = array<i64: 256, 32>}, {pipeline_mode = #tpu.pipeline_mode<synchronous>, transform_indices = @transform_1, window_bounds = array<i64: 32, 16>}, {pipeline_mode = #tpu.pipeline_mode<synchronous>, transform_indices = @transform_2, window_bounds = array<i64: 1, 16>}, {transform_indices = @transform_3, window_bounds = array<i64: 256, 16>}]} {
    %c0 = arith.constant 0 : index
    %c0_0 = arith.constant 0 : index
    %0 = vector.load %arg1[%c0, %c0_0] : memref<256x32xbf16, #tpu.memory_space<vmem>>, vector<256x32xbf16>
    %c0_1 = arith.constant 0 : index
    %c0_2 = arith.constant 0 : index
    %1 = vector.load %arg2[%c0_1, %c0_2] : memref<32x16xbf16, #tpu.memory_space<vmem>>, vector<32x16xbf16>
    %cst = arith.constant dense<0.000000e+00> : vector<256x16xf32>
    %2 = tpu.matmul %0, %1, %cst {dimension_numbers = #tpu.dot_dimension_numbers<[1], [0], [0], [1], [0, 0, 1, 1], [], []>} : vector<256x32xbf16>, vector<32x16xbf16>, vector<256x16xf32> -> vector<256x16xf32>
    %c0_3 = arith.constant 0 : index
    %c0_4 = arith.constant 0 : index
    %3 = vector.load %arg3[%c0_3, %c0_4] : memref<1x16xf32, #tpu.memory_space<vmem>>, vector<1x16xf32>
    %4 = vector.broadcast %3 : vector<1x16xf32> to vector<256x16xf32>
    %5 = arith.addf %2, %4 : vector<256x16xf32>
    %cst_5 = arith.constant 3.000000e+00 : f32
    %6 = vector.broadcast %cst_5 : f32 to vector<256x16xf32>
    %7 = arith.addf %5, %6 : vector<256x16xf32>
    %cst_6 = arith.constant 0.000000e+00 : f32
    %cst_7 = arith.constant 6.000000e+00 : f32
    %8 = vector.broadcast %cst_6 : f32 to vector<256x16xf32>
    %9 = arith.maximumf %8, %7 : vector<256x16xf32>
    %10 = vector.broadcast %cst_7 : f32 to vector<256x16xf32>
    %11 = arith.minimumf %10, %9 : vector<256x16xf32>
    %12 = arith.mulf %5, %11 : vector<256x16xf32>
    %cst_8 = arith.constant 0.166666672 : f32
    %13 = vector.broadcast %cst_8 : f32 to vector<256x16xf32>
    %14 = arith.mulf %12, %13 : vector<256x16xf32>
    %15 = arith.truncf %14 : vector<256x16xf32> to vector<256x16xbf16>
    %c0_9 = arith.constant 0 : index
    %c0_10 = arith.constant 0 : index
    %16 = vector.load %arg4[%c0_9, %c0_10] : memref<256x16xbf16, #tpu.memory_space<vmem>>, vector<256x16xbf16>
    tpu.vector_store %arg4[%c0_9, %c0_10], %15 {strides = array<i32>} : memref<256x16xbf16, #tpu.memory_space<vmem>>, vector<256x16xbf16>,
    return
  }
  func.func @transform_0(%arg0: i32) -> (i32, i32) {
    %c0_i32 = arith.constant 0 : i32
    %c0_i32_0 = arith.constant 0 : i32
    return %arg0, %c0_i32 : i32, i32
  }
  func.func @transform_1(%arg0: i32) -> (i32, i32) {
    %c0_i32 = arith.constant 0 : i32
    %c0_i32_0 = arith.constant 0 : i32
    %c0_i32_1 = arith.constant 0 : i32
    return %c0_i32, %c0_i32_0 : i32, i32
  }
  func.func @transform_2(%arg0: i32) -> (i32, i32) {
    %c0_i32 = arith.constant 0 : i32
    %c0_i32_0 = arith.constant 0 : i32
    %c0_i32_1 = arith.constant 0 : i32
    return %c0_i32, %c0_i32_0 : i32, i32
  }
  func.func @transform_3(%arg0: i32) -> (i32, i32) {
    %c0_i32 = arith.constant 0 : i32
    %c0_i32_0 = arith.constant 0 : i32
    return %arg0, %c0_i32 : i32, i32
  }
}

module attributes {stable_mosaic.version = 11 : i64} {
  func.func @_block_kernel(%arg0: i32, %arg1: memref<1x256x16xbf16, #tpu.memory_space<vmem>>, %arg2: memref<9x1x16xf32, #tpu.memory_space<vmem>>, %arg3: memref<1x16xf32, #tpu.memory_space<vmem>>, %arg4: memref<16x8xf32, #tpu.memory_space<vmem>>, %arg5: memref<1x8xf32, #tpu.memory_space<vmem>>, %arg6: memref<8x16xf32, #tpu.memory_space<vmem>>, %arg7: memref<1x16xf32, #tpu.memory_space<vmem>>, %arg8: memref<8x15xf32, #tpu.memory_space<vmem>>, %arg9: memref<16x16xbf16, #tpu.memory_space<vmem>>, %arg10: memref<1x16xf32, #tpu.memory_space<vmem>>, %arg11: memref<1x64x16xbf16, #tpu.memory_space<vmem>>, %arg12: memref<18x18x16xf32, #tpu.memory_space<vmem>>, %arg13: memref<64x16xf32, #tpu.memory_space<vmem>>) attributes {dimension_semantics = [#tpu.dimension_semantics<parallel>], iteration_bounds = array<i64: 2>, scalar_prefetch = 0 : i64, scratch_operands = 2 : i64, tpu.core_type = #tpu.core_type<tc>, window_params = [{transform_indices = @transform_0, window_bounds = array<i64: 1, 256, 16>}, {pipeline_mode = #tpu.pipeline_mode<synchronous>, transform_indices = @transform_1, window_bounds = array<i64: 9, 1, 16>}, {pipeline_mode = #tpu.pipeline_mode<synchronous>, transform_indices = @transform_2, window_bounds = array<i64: 1, 16>}, {pipeline_mode = #tpu.pipeline_mode<synchronous>, transform_indices = @transform_3, window_bounds = array<i64: 16, 8>}, {pipeline_mode = #tpu.pipeline_mode<synchronous>, transform_indices = @transform_4, window_bounds = array<i64: 1, 8>}, {pipeline_mode = #tpu.pipeline_mode<synchronous>, transform_indices = @transform_5, window_bounds = array<i64: 8, 16>}, {pipeline_mode = #tpu.pipeline_mode<synchronous>, transform_indices = @transform_6, window_bounds = array<i64: 1, 16>}, {pipeline_mode = #tpu.pipeline_mode<synchronous>, transform_indices = @transform_7, window_bounds = array<i64: 8, 15>}, {pipeline_mode = #tpu.pipeline_mode<synchronous>, transform_indices = @transform_8, window_bounds = array<i64: 16, 16>}, {pipeline_mode = #tpu.pipeline_mode<synchronous>, transform_indices = @transform_9, window_bounds = array<i64: 1, 16>}, {transform_indices = @transform_10, window_bounds = array<i64: 1, 64, 16>}]} {
    %c0 = arith.constant 0 : index
    %c0_0 = arith.constant 0 : index
    %c0_1 = arith.constant 0 : index
    %0 = vector.load %arg1[%c0, %c0_0, %c0_1] : memref<1x256x16xbf16, #tpu.memory_space<vmem>>, vector<1x256x16xbf16>
    %1 = vector.shape_cast %0 : vector<1x256x16xbf16> to vector<256x16xbf16>
    %2 = arith.extf %1 : vector<256x16xbf16> to vector<256x16xf32>
    %cst = arith.constant 0.000000e+00 : f32
    %3 = vector.broadcast %cst : f32 to vector<18x18x16xf32>
    %c0_2 = arith.constant 0 : index
    %c0_3 = arith.constant 0 : index
    %c0_4 = arith.constant 0 : index
    %4 = vector.load %arg12[%c0_2, %c0_3, %c0_4] : memref<18x18x16xf32, #tpu.memory_space<vmem>>, vector<18x18x16xf32>
    tpu.vector_store %arg12[%c0_2, %c0_3, %c0_4], %3 {strides = array<i32>} : memref<18x18x16xf32, #tpu.memory_space<vmem>>, vector<18x18x16xf32>,
    %5 = vector.extract_strided_slice %2 {offsets = [0, 0], sizes = [16, 16], strides = [1, 1]} : vector<256x16xf32> to vector<16x16xf32>
    %c1 = arith.constant 1 : index
    %c1_5 = arith.constant 1 : index
    %c0_6 = arith.constant 0 : index
    %6 = vector.load %arg12[%c1, %c1_5, %c0_6] : memref<18x18x16xf32, #tpu.memory_space<vmem>>, vector<1x16x16xf32>
    %7 = vector.shape_cast %6 : vector<1x16x16xf32> to vector<16x16xf32>
    %8 = vector.shape_cast %5 : vector<16x16xf32> to vector<1x16x16xf32>
    tpu.vector_store %arg12[%c1, %c1_5, %c0_6], %8 {strides = array<i32>} : memref<18x18x16xf32, #tpu.memory_space<vmem>>, vector<1x16x16xf32>,
    %9 = vector.extract_strided_slice %2 {offsets = [16, 0], sizes = [16, 16], strides = [1, 1]} : vector<256x16xf32> to vector<16x16xf32>
    %c2 = arith.constant 2 : index
    %c1_7 = arith.constant 1 : index
    %c0_8 = arith.constant 0 : index
    %10 = vector.load %arg12[%c2, %c1_7, %c0_8] : memref<18x18x16xf32, #tpu.memory_space<vmem>>, vector<1x16x16xf32>
    %11 = vector.shape_cast %10 : vector<1x16x16xf32> to vector<16x16xf32>
    %12 = vector.shape_cast %9 : vector<16x16xf32> to vector<1x16x16xf32>
    tpu.vector_store %arg12[%c2, %c1_7, %c0_8], %12 {strides = array<i32>} : memref<18x18x16xf32, #tpu.memory_space<vmem>>, vector<1x16x16xf32>,
    %13 = vector.extract_strided_slice %2 {offsets = [32, 0], sizes = [16, 16], strides = [1, 1]} : vector<256x16xf32> to vector<16x16xf32>
    %c3 = arith.constant 3 : index
    %c1_9 = arith.constant 1 : index
    %c0_10 = arith.constant 0 : index
    %14 = vector.load %arg12[%c3, %c1_9, %c0_10] : memref<18x18x16xf32, #tpu.memory_space<vmem>>, vector<1x16x16xf32>
    %15 = vector.shape_cast %14 : vector<1x16x16xf32> to vector<16x16xf32>
    %16 = vector.shape_cast %13 : vector<16x16xf32> to vector<1x16x16xf32>
    tpu.vector_store %arg12[%c3, %c1_9, %c0_10], %16 {strides = array<i32>} : memref<18x18x16xf32, #tpu.memory_space<vmem>>, vector<1x16x16xf32>,
    %17 = vector.extract_strided_slice %2 {offsets = [48, 0], sizes = [16, 16], strides = [1, 1]} : vector<256x16xf32> to vector<16x16xf32>
    %c4 = arith.constant 4 : index
    %c1_11 = arith.constant 1 : index
    %c0_12 = arith.constant 0 : index
    %18 = vector.load %arg12[%c4, %c1_11, %c0_12] : memref<18x18x16xf32, #tpu.memory_space<vmem>>, vector<1x16x16xf32>
    %19 = vector.shape_cast %18 : vector<1x16x16xf32> to vector<16x16xf32>
    %20 = vector.shape_cast %17 : vector<16x16xf32> to vector<1x16x16xf32>
    tpu.vector_store %arg12[%c4, %c1_11, %c0_12], %20 {strides = array<i32>} : memref<18x18x16xf32, #tpu.memory_space<vmem>>, vector<1x16x16xf32>,
    %21 = vector.extract_strided_slice %2 {offsets = [64, 0], sizes = [16, 16], strides = [1, 1]} : vector<256x16xf32> to vector<16x16xf32>
    %c5 = arith.constant 5 : index
    %c1_13 = arith.constant 1 : index
    %c0_14 = arith.constant 0 : index
    %22 = vector.load %arg12[%c5, %c1_13, %c0_14] : memref<18x18x16xf32, #tpu.memory_space<vmem>>, vector<1x16x16xf32>
    %23 = vector.shape_cast %22 : vector<1x16x16xf32> to vector<16x16xf32>
    %24 = vector.shape_cast %21 : vector<16x16xf32> to vector<1x16x16xf32>
    tpu.vector_store %arg12[%c5, %c1_13, %c0_14], %24 {strides = array<i32>} : memref<18x18x16xf32, #tpu.memory_space<vmem>>, vector<1x16x16xf32>,
    %25 = vector.extract_strided_slice %2 {offsets = [80, 0], sizes = [16, 16], strides = [1, 1]} : vector<256x16xf32> to vector<16x16xf32>
    %c6 = arith.constant 6 : index
    %c1_15 = arith.constant 1 : index
    %c0_16 = arith.constant 0 : index
    %26 = vector.load %arg12[%c6, %c1_15, %c0_16] : memref<18x18x16xf32, #tpu.memory_space<vmem>>, vector<1x16x16xf32>
    %27 = vector.shape_cast %26 : vector<1x16x16xf32> to vector<16x16xf32>
    %28 = vector.shape_cast %25 : vector<16x16xf32> to vector<1x16x16xf32>
    tpu.vector_store %arg12[%c6, %c1_15, %c0_16], %28 {strides = array<i32>} : memref<18x18x16xf32, #tpu.memory_space<vmem>>, vector<1x16x16xf32>,
    %29 = vector.extract_strided_slice %2 {offsets = [96, 0], sizes = [16, 16], strides = [1, 1]} : vector<256x16xf32> to vector<16x16xf32>
    %c7 = arith.constant 7 : index
    %c1_17 = arith.constant 1 : index
    %c0_18 = arith.constant 0 : index
    %30 = vector.load %arg12[%c7, %c1_17, %c0_18] : memref<18x18x16xf32, #tpu.memory_space<vmem>>, vector<1x16x16xf32>
    %31 = vector.shape_cast %30 : vector<1x16x16xf32> to vector<16x16xf32>
    %32 = vector.shape_cast %29 : vector<16x16xf32> to vector<1x16x16xf32>
    tpu.vector_store %arg12[%c7, %c1_17, %c0_18], %32 {strides = array<i32>} : memref<18x18x16xf32, #tpu.memory_space<vmem>>, vector<1x16x16xf32>,
    %33 = vector.extract_strided_slice %2 {offsets = [112, 0], sizes = [16, 16], strides = [1, 1]} : vector<256x16xf32> to vector<16x16xf32>
    %c8 = arith.constant 8 : index
    %c1_19 = arith.constant 1 : index
    %c0_20 = arith.constant 0 : index
    %34 = vector.load %arg12[%c8, %c1_19, %c0_20] : memref<18x18x16xf32, #tpu.memory_space<vmem>>, vector<1x16x16xf32>
    %35 = vector.shape_cast %34 : vector<1x16x16xf32> to vector<16x16xf32>
    %36 = vector.shape_cast %33 : vector<16x16xf32> to vector<1x16x16xf32>
    tpu.vector_store %arg12[%c8, %c1_19, %c0_20], %36 {strides = array<i32>} : memref<18x18x16xf32, #tpu.memory_space<vmem>>, vector<1x16x16xf32>,
    %37 = vector.extract_strided_slice %2 {offsets = [128, 0], sizes = [16, 16], strides = [1, 1]} : vector<256x16xf32> to vector<16x16xf32>
    %c9 = arith.constant 9 : index
    %c1_21 = arith.constant 1 : index
    %c0_22 = arith.constant 0 : index
    %38 = vector.load %arg12[%c9, %c1_21, %c0_22] : memref<18x18x16xf32, #tpu.memory_space<vmem>>, vector<1x16x16xf32>
    %39 = vector.shape_cast %38 : vector<1x16x16xf32> to vector<16x16xf32>
    %40 = vector.shape_cast %37 : vector<16x16xf32> to vector<1x16x16xf32>
    tpu.vector_store %arg12[%c9, %c1_21, %c0_22], %40 {strides = array<i32>} : memref<18x18x16xf32, #tpu.memory_space<vmem>>, vector<1x16x16xf32>,
    %41 = vector.extract_strided_slice %2 {offsets = [144, 0], sizes = [16, 16], strides = [1, 1]} : vector<256x16xf32> to vector<16x16xf32>
    %c10 = arith.constant 10 : index
    %c1_23 = arith.constant 1 : index
    %c0_24 = arith.constant 0 : index
    %42 = vector.load %arg12[%c10, %c1_23, %c0_24] : memref<18x18x16xf32, #tpu.memory_space<vmem>>, vector<1x16x16xf32>
    %43 = vector.shape_cast %42 : vector<1x16x16xf32> to vector<16x16xf32>
    %44 = vector.shape_cast %41 : vector<16x16xf32> to vector<1x16x16xf32>
    tpu.vector_store %arg12[%c10, %c1_23, %c0_24], %44 {strides = array<i32>} : memref<18x18x16xf32, #tpu.memory_space<vmem>>, vector<1x16x16xf32>,
    %45 = vector.extract_strided_slice %2 {offsets = [160, 0], sizes = [16, 16], strides = [1, 1]} : vector<256x16xf32> to vector<16x16xf32>
    %c11 = arith.constant 11 : index
    %c1_25 = arith.constant 1 : index
    %c0_26 = arith.constant 0 : index
    %46 = vector.load %arg12[%c11, %c1_25, %c0_26] : memref<18x18x16xf32, #tpu.memory_space<vmem>>, vector<1x16x16xf32>
    %47 = vector.shape_cast %46 : vector<1x16x16xf32> to vector<16x16xf32>
    %48 = vector.shape_cast %45 : vector<16x16xf32> to vector<1x16x16xf32>
    tpu.vector_store %arg12[%c11, %c1_25, %c0_26], %48 {strides = array<i32>} : memref<18x18x16xf32, #tpu.memory_space<vmem>>, vector<1x16x16xf32>,
    %49 = vector.extract_strided_slice %2 {offsets = [176, 0], sizes = [16, 16], strides = [1, 1]} : vector<256x16xf32> to vector<16x16xf32>
    %c12 = arith.constant 12 : index
    %c1_27 = arith.constant 1 : index
    %c0_28 = arith.constant 0 : index
    %50 = vector.load %arg12[%c12, %c1_27, %c0_28] : memref<18x18x16xf32, #tpu.memory_space<vmem>>, vector<1x16x16xf32>
    %51 = vector.shape_cast %50 : vector<1x16x16xf32> to vector<16x16xf32>
    %52 = vector.shape_cast %49 : vector<16x16xf32> to vector<1x16x16xf32>
    tpu.vector_store %arg12[%c12, %c1_27, %c0_28], %52 {strides = array<i32>} : memref<18x18x16xf32, #tpu.memory_space<vmem>>, vector<1x16x16xf32>,
    %53 = vector.extract_strided_slice %2 {offsets = [192, 0], sizes = [16, 16], strides = [1, 1]} : vector<256x16xf32> to vector<16x16xf32>
    %c13 = arith.constant 13 : index
    %c1_29 = arith.constant 1 : index
    %c0_30 = arith.constant 0 : index
    %54 = vector.load %arg12[%c13, %c1_29, %c0_30] : memref<18x18x16xf32, #tpu.memory_space<vmem>>, vector<1x16x16xf32>
    %55 = vector.shape_cast %54 : vector<1x16x16xf32> to vector<16x16xf32>
    %56 = vector.shape_cast %53 : vector<16x16xf32> to vector<1x16x16xf32>
    tpu.vector_store %arg12[%c13, %c1_29, %c0_30], %56 {strides = array<i32>} : memref<18x18x16xf32, #tpu.memory_space<vmem>>, vector<1x16x16xf32>,
    %57 = vector.extract_strided_slice %2 {offsets = [208, 0], sizes = [16, 16], strides = [1, 1]} : vector<256x16xf32> to vector<16x16xf32>
    %c14 = arith.constant 14 : index
    %c1_31 = arith.constant 1 : index
    %c0_32 = arith.constant 0 : index
    %58 = vector.load %arg12[%c14, %c1_31, %c0_32] : memref<18x18x16xf32, #tpu.memory_space<vmem>>, vector<1x16x16xf32>
    %59 = vector.shape_cast %58 : vector<1x16x16xf32> to vector<16x16xf32>
    %60 = vector.shape_cast %57 : vector<16x16xf32> to vector<1x16x16xf32>
    tpu.vector_store %arg12[%c14, %c1_31, %c0_32], %60 {strides = array<i32>} : memref<18x18x16xf32, #tpu.memory_space<vmem>>, vector<1x16x16xf32>,
    %61 = vector.extract_strided_slice %2 {offsets = [224, 0], sizes = [16, 16], strides = [1, 1]} : vector<256x16xf32> to vector<16x16xf32>
    %c15 = arith.constant 15 : index
    %c1_33 = arith.constant 1 : index
    %c0_34 = arith.constant 0 : index
    %62 = vector.load %arg12[%c15, %c1_33, %c0_34] : memref<18x18x16xf32, #tpu.memory_space<vmem>>, vector<1x16x16xf32>
    %63 = vector.shape_cast %62 : vector<1x16x16xf32> to vector<16x16xf32>
    %64 = vector.shape_cast %61 : vector<16x16xf32> to vector<1x16x16xf32>
    tpu.vector_store %arg12[%c15, %c1_33, %c0_34], %64 {strides = array<i32>} : memref<18x18x16xf32, #tpu.memory_space<vmem>>, vector<1x16x16xf32>,
    %65 = vector.extract_strided_slice %2 {offsets = [240, 0], sizes = [16, 16], strides = [1, 1]} : vector<256x16xf32> to vector<16x16xf32>
    %c16 = arith.constant 16 : index
    %c1_35 = arith.constant 1 : index
    %c0_36 = arith.constant 0 : index
    %66 = vector.load %arg12[%c16, %c1_35, %c0_36] : memref<18x18x16xf32, #tpu.memory_space<vmem>>, vector<1x16x16xf32>
    %67 = vector.shape_cast %66 : vector<1x16x16xf32> to vector<16x16xf32>
    %68 = vector.shape_cast %65 : vector<16x16xf32> to vector<1x16x16xf32>
    tpu.vector_store %arg12[%c16, %c1_35, %c0_36], %68 {strides = array<i32>} : memref<18x18x16xf32, #tpu.memory_space<vmem>>, vector<1x16x16xf32>,
    %c0_37 = arith.constant 0 : index
    %c0_38 = arith.constant 0 : index
    %c0_39 = arith.constant 0 : index
    %69 = vector.load %arg2[%c0_37, %c0_38, %c0_39] : memref<9x1x16xf32, #tpu.memory_space<vmem>>, vector<1x1x16xf32>
    %70 = vector.shape_cast %69 : vector<1x1x16xf32> to vector<1x16xf32>
    %c1_40 = arith.constant 1 : index
    %c0_41 = arith.constant 0 : index
    %c0_42 = arith.constant 0 : index
    %71 = vector.load %arg2[%c1_40, %c0_41, %c0_42] : memref<9x1x16xf32, #tpu.memory_space<vmem>>, vector<1x1x16xf32>
    %72 = vector.shape_cast %71 : vector<1x1x16xf32> to vector<1x16xf32>
    %c2_43 = arith.constant 2 : index
    %c0_44 = arith.constant 0 : index
    %c0_45 = arith.constant 0 : index
    %73 = vector.load %arg2[%c2_43, %c0_44, %c0_45] : memref<9x1x16xf32, #tpu.memory_space<vmem>>, vector<1x1x16xf32>
    %74 = vector.shape_cast %73 : vector<1x1x16xf32> to vector<1x16xf32>
    %c3_46 = arith.constant 3 : index
    %c0_47 = arith.constant 0 : index
    %c0_48 = arith.constant 0 : index
    %75 = vector.load %arg2[%c3_46, %c0_47, %c0_48] : memref<9x1x16xf32, #tpu.memory_space<vmem>>, vector<1x1x16xf32>
    %76 = vector.shape_cast %75 : vector<1x1x16xf32> to vector<1x16xf32>
    %c4_49 = arith.constant 4 : index
    %c0_50 = arith.constant 0 : index
    %c0_51 = arith.constant 0 : index
    %77 = vector.load %arg2[%c4_49, %c0_50, %c0_51] : memref<9x1x16xf32, #tpu.memory_space<vmem>>, vector<1x1x16xf32>
    %78 = vector.shape_cast %77 : vector<1x1x16xf32> to vector<1x16xf32>
    %c5_52 = arith.constant 5 : index
    %c0_53 = arith.constant 0 : index
    %c0_54 = arith.constant 0 : index
    %79 = vector.load %arg2[%c5_52, %c0_53, %c0_54] : memref<9x1x16xf32, #tpu.memory_space<vmem>>, vector<1x1x16xf32>
    %80 = vector.shape_cast %79 : vector<1x1x16xf32> to vector<1x16xf32>
    %c6_55 = arith.constant 6 : index
    %c0_56 = arith.constant 0 : index
    %c0_57 = arith.constant 0 : index
    %81 = vector.load %arg2[%c6_55, %c0_56, %c0_57] : memref<9x1x16xf32, #tpu.memory_space<vmem>>, vector<1x1x16xf32>
    %82 = vector.shape_cast %81 : vector<1x1x16xf32> to vector<1x16xf32>
    %c7_58 = arith.constant 7 : index
    %c0_59 = arith.constant 0 : index
    %c0_60 = arith.constant 0 : index
    %83 = vector.load %arg2[%c7_58, %c0_59, %c0_60] : memref<9x1x16xf32, #tpu.memory_space<vmem>>, vector<1x1x16xf32>
    %84 = vector.shape_cast %83 : vector<1x1x16xf32> to vector<1x16xf32>
    %c8_61 = arith.constant 8 : index
    %c0_62 = arith.constant 0 : index
    %c0_63 = arith.constant 0 : index
    %85 = vector.load %arg2[%c8_61, %c0_62, %c0_63] : memref<9x1x16xf32, #tpu.memory_space<vmem>>, vector<1x1x16xf32>
    %86 = vector.shape_cast %85 : vector<1x1x16xf32> to vector<1x16xf32>
    %c0_64 = arith.constant 0 : index
    %c0_65 = arith.constant 0 : index
    %87 = vector.load %arg3[%c0_64, %c0_65] : memref<1x16xf32, #tpu.memory_space<vmem>>, vector<1x16xf32>
    %cst_66 = arith.constant 0.000000e+00 : f32
    %88 = vector.broadcast %cst_66 : f32 to vector<15x16xf32>
    %c0_67 = arith.constant 0 : index
    %c0_68 = arith.constant 0 : index
    %c0_69 = arith.constant 0 : index
    %89 = vector.load %arg12[%c0_67, %c0_68, %c0_69] : memref<18x18x16xf32, #tpu.memory_space<vmem>>, vector<1x18x16xf32>
    %90 = vector.shape_cast %89 : vector<1x18x16xf32> to vector<18x16xf32>
    %91 = vector.extract_strided_slice %90 {offsets = [0, 0], sizes = [15, 16], strides = [1, 1]} : vector<18x16xf32> to vector<15x16xf32>
    %92 = vector.broadcast %70 : vector<1x16xf32> to vector<15x16xf32>
    %93 = arith.mulf %92, %91 : vector<15x16xf32>
    %94 = arith.addf %88, %93 : vector<15x16xf32>
    %95 = vector.extract_strided_slice %90 {offsets = [1, 0], sizes = [15, 16], strides = [1, 1]} : vector<18x16xf32> to vector<15x16xf32>
    %96 = vector.broadcast %72 : vector<1x16xf32> to vector<15x16xf32>
    %97 = arith.mulf %96, %95 : vector<15x16xf32>
    %98 = arith.addf %94, %97 : vector<15x16xf32>
    %99 = vector.extract_strided_slice %90 {offsets = [2, 0], sizes = [15, 16], strides = [1, 1]} : vector<18x16xf32> to vector<15x16xf32>
    %100 = vector.broadcast %74 : vector<1x16xf32> to vector<15x16xf32>
    %101 = arith.mulf %100, %99 : vector<15x16xf32>
    %102 = arith.addf %98, %101 : vector<15x16xf32>
    %c1_70 = arith.constant 1 : index
    %c0_71 = arith.constant 0 : index
    %c0_72 = arith.constant 0 : index
    %103 = vector.load %arg12[%c1_70, %c0_71, %c0_72] : memref<18x18x16xf32, #tpu.memory_space<vmem>>, vector<1x18x16xf32>
    %104 = vector.shape_cast %103 : vector<1x18x16xf32> to vector<18x16xf32>
    %105 = vector.extract_strided_slice %104 {offsets = [0, 0], sizes = [15, 16], strides = [1, 1]} : vector<18x16xf32> to vector<15x16xf32>
    %106 = vector.broadcast %76 : vector<1x16xf32> to vector<15x16xf32>
    %107 = arith.mulf %106, %105 : vector<15x16xf32>
    %108 = arith.addf %102, %107 : vector<15x16xf32>
    %109 = vector.extract_strided_slice %104 {offsets = [1, 0], sizes = [15, 16], strides = [1, 1]} : vector<18x16xf32> to vector<15x16xf32>
    %110 = vector.broadcast %78 : vector<1x16xf32> to vector<15x16xf32>
    %111 = arith.mulf %110, %109 : vector<15x16xf32>
    %112 = arith.addf %108, %111 : vector<15x16xf32>
    %113 = vector.extract_strided_slice %104 {offsets = [2, 0], sizes = [15, 16], strides = [1, 1]} : vector<18x16xf32> to vector<15x16xf32>
    %114 = vector.broadcast %80 : vector<1x16xf32> to vector<15x16xf32>
    %115 = arith.mulf %114, %113 : vector<15x16xf32>
    %116 = arith.addf %112, %115 : vector<15x16xf32>
    %c2_73 = arith.constant 2 : index
    %c0_74 = arith.constant 0 : index
    %c0_75 = arith.constant 0 : index
    %117 = vector.load %arg12[%c2_73, %c0_74, %c0_75] : memref<18x18x16xf32, #tpu.memory_space<vmem>>, vector<1x18x16xf32>
    %118 = vector.shape_cast %117 : vector<1x18x16xf32> to vector<18x16xf32>
    %119 = vector.extract_strided_slice %118 {offsets = [0, 0], sizes = [15, 16], strides = [1, 1]} : vector<18x16xf32> to vector<15x16xf32>
    %120 = vector.broadcast %82 : vector<1x16xf32> to vector<15x16xf32>
    %121 = arith.mulf %120, %119 : vector<15x16xf32>
    %122 = arith.addf %116, %121 : vector<15x16xf32>
    %123 = vector.extract_strided_slice %118 {offsets = [1, 0], sizes = [15, 16], strides = [1, 1]} : vector<18x16xf32> to vector<15x16xf32>
    %124 = vector.broadcast %84 : vector<1x16xf32> to vector<15x16xf32>
    %125 = arith.mulf %124, %123 : vector<15x16xf32>
    %126 = arith.addf %122, %125 : vector<15x16xf32>
    %127 = vector.extract_strided_slice %118 {offsets = [2, 0], sizes = [15, 16], strides = [1, 1]} : vector<18x16xf32> to vector<15x16xf32>
    %128 = vector.broadcast %86 : vector<1x16xf32> to vector<15x16xf32>
    %129 = arith.mulf %128, %127 : vector<15x16xf32>
    %130 = arith.addf %126, %129 : vector<15x16xf32>
    %c0_76 = arith.constant 0 : index
    %c0_77 = arith.constant 0 : index
    %131 = vector.load %arg8[%c0_76, %c0_77] : memref<8x15xf32, #tpu.memory_space<vmem>>, vector<8x15xf32>
    %cst_78 = arith.constant dense<0.000000e+00> : vector<8x16xf32>
    %132 = tpu.matmul %131, %130, %cst_78 {dimension_numbers = #tpu.dot_dimension_numbers<[1], [0], [0], [1], [0, 0, 1, 1], [], []>} : vector<8x15xf32>, vector<15x16xf32>, vector<8x16xf32> -> vector<8x16xf32>
    %133 = vector.broadcast %87 : vector<1x16xf32> to vector<8x16xf32>
    %134 = arith.addf %132, %133 : vector<8x16xf32>
    %cst_79 = arith.constant 0.000000e+00 : f32
    %135 = vector.broadcast %cst_79 : f32 to vector<8x16xf32>
    %136 = arith.maximumf %134, %135 : vector<8x16xf32>
    %c0_80 = arith.constant 0 : index
    %c0_81 = arith.constant 0 : index
    %137 = vector.load %arg13[%c0_80, %c0_81] : memref<64x16xf32, #tpu.memory_space<vmem>>, vector<8x16xf32>
    tpu.vector_store %arg13[%c0_80, %c0_81], %136 {strides = array<i32>} : memref<64x16xf32, #tpu.memory_space<vmem>>, vector<8x16xf32>,
    %cst_82 = arith.constant 0.000000e+00 : f32
    %138 = vector.broadcast %cst_82 : f32 to vector<15x16xf32>
    %c2_83 = arith.constant 2 : index
    %c0_84 = arith.constant 0 : index
    %c0_85 = arith.constant 0 : index
    %139 = vector.load %arg12[%c2_83, %c0_84, %c0_85] : memref<18x18x16xf32, #tpu.memory_space<vmem>>, vector<1x18x16xf32>
    %140 = vector.shape_cast %139 : vector<1x18x16xf32> to vector<18x16xf32>
    %141 = vector.extract_strided_slice %140 {offsets = [0, 0], sizes = [15, 16], strides = [1, 1]} : vector<18x16xf32> to vector<15x16xf32>
    %142 = vector.broadcast %70 : vector<1x16xf32> to vector<15x16xf32>
    %143 = arith.mulf %142, %141 : vector<15x16xf32>
    %144 = arith.addf %138, %143 : vector<15x16xf32>
    %145 = vector.extract_strided_slice %140 {offsets = [1, 0], sizes = [15, 16], strides = [1, 1]} : vector<18x16xf32> to vector<15x16xf32>
    %146 = vector.broadcast %72 : vector<1x16xf32> to vector<15x16xf32>
    %147 = arith.mulf %146, %145 : vector<15x16xf32>
    %148 = arith.addf %144, %147 : vector<15x16xf32>
    %149 = vector.extract_strided_slice %140 {offsets = [2, 0], sizes = [15, 16], strides = [1, 1]} : vector<18x16xf32> to vector<15x16xf32>
    %150 = vector.broadcast %74 : vector<1x16xf32> to vector<15x16xf32>
    %151 = arith.mulf %150, %149 : vector<15x16xf32>
    %152 = arith.addf %148, %151 : vector<15x16xf32>
    %c3_86 = arith.constant 3 : index
    %c0_87 = arith.constant 0 : index
    %c0_88 = arith.constant 0 : index
    %153 = vector.load %arg12[%c3_86, %c0_87, %c0_88] : memref<18x18x16xf32, #tpu.memory_space<vmem>>, vector<1x18x16xf32>
    %154 = vector.shape_cast %153 : vector<1x18x16xf32> to vector<18x16xf32>
    %155 = vector.extract_strided_slice %154 {offsets = [0, 0], sizes = [15, 16], strides = [1, 1]} : vector<18x16xf32> to vector<15x16xf32>
    %156 = vector.broadcast %76 : vector<1x16xf32> to vector<15x16xf32>
    %157 = arith.mulf %156, %155 : vector<15x16xf32>
    %158 = arith.addf %152, %157 : vector<15x16xf32>
    %159 = vector.extract_strided_slice %154 {offsets = [1, 0], sizes = [15, 16], strides = [1, 1]} : vector<18x16xf32> to vector<15x16xf32>
    %160 = vector.broadcast %78 : vector<1x16xf32> to vector<15x16xf32>
    %161 = arith.mulf %160, %159 : vector<15x16xf32>
    %162 = arith.addf %158, %161 : vector<15x16xf32>
    %163 = vector.extract_strided_slice %154 {offsets = [2, 0], sizes = [15, 16], strides = [1, 1]} : vector<18x16xf32> to vector<15x16xf32>
    %164 = vector.broadcast %80 : vector<1x16xf32> to vector<15x16xf32>
    %165 = arith.mulf %164, %163 : vector<15x16xf32>
    %166 = arith.addf %162, %165 : vector<15x16xf32>
    %c4_89 = arith.constant 4 : index
    %c0_90 = arith.constant 0 : index
    %c0_91 = arith.constant 0 : index
    %167 = vector.load %arg12[%c4_89, %c0_90, %c0_91] : memref<18x18x16xf32, #tpu.memory_space<vmem>>, vector<1x18x16xf32>
    %168 = vector.shape_cast %167 : vector<1x18x16xf32> to vector<18x16xf32>
    %169 = vector.extract_strided_slice %168 {offsets = [0, 0], sizes = [15, 16], strides = [1, 1]} : vector<18x16xf32> to vector<15x16xf32>
    %170 = vector.broadcast %82 : vector<1x16xf32> to vector<15x16xf32>
    %171 = arith.mulf %170, %169 : vector<15x16xf32>
    %172 = arith.addf %166, %171 : vector<15x16xf32>
    %173 = vector.extract_strided_slice %168 {offsets = [1, 0], sizes = [15, 16], strides = [1, 1]} : vector<18x16xf32> to vector<15x16xf32>
    %174 = vector.broadcast %84 : vector<1x16xf32> to vector<15x16xf32>
    %175 = arith.mulf %174, %173 : vector<15x16xf32>
    %176 = arith.addf %172, %175 : vector<15x16xf32>
    %177 = vector.extract_strided_slice %168 {offsets = [2, 0], sizes = [15, 16], strides = [1, 1]} : vector<18x16xf32> to vector<15x16xf32>
    %178 = vector.broadcast %86 : vector<1x16xf32> to vector<15x16xf32>
    %179 = arith.mulf %178, %177 : vector<15x16xf32>
    %180 = arith.addf %176, %179 : vector<15x16xf32>
    %c0_92 = arith.constant 0 : index
    %c0_93 = arith.constant 0 : index
    %181 = vector.load %arg8[%c0_92, %c0_93] : memref<8x15xf32, #tpu.memory_space<vmem>>, vector<8x15xf32>
    %cst_94 = arith.constant dense<0.000000e+00> : vector<8x16xf32>
    %182 = tpu.matmul %181, %180, %cst_94 {dimension_numbers = #tpu.dot_dimension_numbers<[1], [0], [0], [1], [0, 0, 1, 1], [], []>} : vector<8x15xf32>, vector<15x16xf32>, vector<8x16xf32> -> vector<8x16xf32>
    %183 = vector.broadcast %87 : vector<1x16xf32> to vector<8x16xf32>
    %184 = arith.addf %182, %183 : vector<8x16xf32>
    %cst_95 = arith.constant 0.000000e+00 : f32
    %185 = vector.broadcast %cst_95 : f32 to vector<8x16xf32>
    %186 = arith.maximumf %184, %185 : vector<8x16xf32>
    %c8_96 = arith.constant 8 : index
    %c0_97 = arith.constant 0 : index
    %187 = vector.load %arg13[%c8_96, %c0_97] : memref<64x16xf32, #tpu.memory_space<vmem>>, vector<8x16xf32>
    tpu.vector_store %arg13[%c8_96, %c0_97], %186 {strides = array<i32>} : memref<64x16xf32, #tpu.memory_space<vmem>>, vector<8x16xf32>,
    %cst_98 = arith.constant 0.000000e+00 : f32
    %188 = vector.broadcast %cst_98 : f32 to vector<15x16xf32>
    %c4_99 = arith.constant 4 : index
    %c0_100 = arith.constant 0 : index
    %c0_101 = arith.constant 0 : index
    %189 = vector.load %arg12[%c4_99, %c0_100, %c0_101] : memref<18x18x16xf32, #tpu.memory_space<vmem>>, vector<1x18x16xf32>
    %190 = vector.shape_cast %189 : vector<1x18x16xf32> to vector<18x16xf32>
    %191 = vector.extract_strided_slice %190 {offsets = [0, 0], sizes = [15, 16], strides = [1, 1]} : vector<18x16xf32> to vector<15x16xf32>
    %192 = vector.broadcast %70 : vector<1x16xf32> to vector<15x16xf32>
    %193 = arith.mulf %192, %191 : vector<15x16xf32>
    %194 = arith.addf %188, %193 : vector<15x16xf32>
    %195 = vector.extract_strided_slice %190 {offsets = [1, 0], sizes = [15, 16], strides = [1, 1]} : vector<18x16xf32> to vector<15x16xf32>
    %196 = vector.broadcast %72 : vector<1x16xf32> to vector<15x16xf32>
    %197 = arith.mulf %196, %195 : vector<15x16xf32>
    %198 = arith.addf %194, %197 : vector<15x16xf32>
    %199 = vector.extract_strided_slice %190 {offsets = [2, 0], sizes = [15, 16], strides = [1, 1]} : vector<18x16xf32> to vector<15x16xf32>
    %200 = vector.broadcast %74 : vector<1x16xf32> to vector<15x16xf32>
    %201 = arith.mulf %200, %199 : vector<15x16xf32>
    %202 = arith.addf %198, %201 : vector<15x16xf32>
    %c5_102 = arith.constant 5 : index
    %c0_103 = arith.constant 0 : index
    %c0_104 = arith.constant 0 : index
    %203 = vector.load %arg12[%c5_102, %c0_103, %c0_104] : memref<18x18x16xf32, #tpu.memory_space<vmem>>, vector<1x18x16xf32>
    %204 = vector.shape_cast %203 : vector<1x18x16xf32> to vector<18x16xf32>
    %205 = vector.extract_strided_slice %204 {offsets = [0, 0], sizes = [15, 16], strides = [1, 1]} : vector<18x16xf32> to vector<15x16xf32>
    %206 = vector.broadcast %76 : vector<1x16xf32> to vector<15x16xf32>
    %207 = arith.mulf %206, %205 : vector<15x16xf32>
    %208 = arith.addf %202, %207 : vector<15x16xf32>
    %209 = vector.extract_strided_slice %204 {offsets = [1, 0], sizes = [15, 16], strides = [1, 1]} : vector<18x16xf32> to vector<15x16xf32>
    %210 = vector.broadcast %78 : vector<1x16xf32> to vector<15x16xf32>
    %211 = arith.mulf %210, %209 : vector<15x16xf32>
    %212 = arith.addf %208, %211 : vector<15x16xf32>
    %213 = vector.extract_strided_slice %204 {offsets = [2, 0], sizes = [15, 16], strides = [1, 1]} : vector<18x16xf32> to vector<15x16xf32>
    %214 = vector.broadcast %80 : vector<1x16xf32> to vector<15x16xf32>
    %215 = arith.mulf %214, %213 : vector<15x16xf32>
    %216 = arith.addf %212, %215 : vector<15x16xf32>
    %c6_105 = arith.constant 6 : index
    %c0_106 = arith.constant 0 : index
    %c0_107 = arith.constant 0 : index
    %217 = vector.load %arg12[%c6_105, %c0_106, %c0_107] : memref<18x18x16xf32, #tpu.memory_space<vmem>>, vector<1x18x16xf32>
    %218 = vector.shape_cast %217 : vector<1x18x16xf32> to vector<18x16xf32>
    %219 = vector.extract_strided_slice %218 {offsets = [0, 0], sizes = [15, 16], strides = [1, 1]} : vector<18x16xf32> to vector<15x16xf32>
    %220 = vector.broadcast %82 : vector<1x16xf32> to vector<15x16xf32>
    %221 = arith.mulf %220, %219 : vector<15x16xf32>
    %222 = arith.addf %216, %221 : vector<15x16xf32>
    %223 = vector.extract_strided_slice %218 {offsets = [1, 0], sizes = [15, 16], strides = [1, 1]} : vector<18x16xf32> to vector<15x16xf32>
    %224 = vector.broadcast %84 : vector<1x16xf32> to vector<15x16xf32>
    %225 = arith.mulf %224, %223 : vector<15x16xf32>
    %226 = arith.addf %222, %225 : vector<15x16xf32>
    %227 = vector.extract_strided_slice %218 {offsets = [2, 0], sizes = [15, 16], strides = [1, 1]} : vector<18x16xf32> to vector<15x16xf32>
    %228 = vector.broadcast %86 : vector<1x16xf32> to vector<15x16xf32>
    %229 = arith.mulf %228, %227 : vector<15x16xf32>
    %230 = arith.addf %226, %229 : vector<15x16xf32>
    %c0_108 = arith.constant 0 : index
    %c0_109 = arith.constant 0 : index
    %231 = vector.load %arg8[%c0_108, %c0_109] : memref<8x15xf32, #tpu.memory_space<vmem>>, vector<8x15xf32>
    %cst_110 = arith.constant dense<0.000000e+00> : vector<8x16xf32>
    %232 = tpu.matmul %231, %230, %cst_110 {dimension_numbers = #tpu.dot_dimension_numbers<[1], [0], [0], [1], [0, 0, 1, 1], [], []>} : vector<8x15xf32>, vector<15x16xf32>, vector<8x16xf32> -> vector<8x16xf32>
    %233 = vector.broadcast %87 : vector<1x16xf32> to vector<8x16xf32>
    %234 = arith.addf %232, %233 : vector<8x16xf32>
    %cst_111 = arith.constant 0.000000e+00 : f32
    %235 = vector.broadcast %cst_111 : f32 to vector<8x16xf32>
    %236 = arith.maximumf %234, %235 : vector<8x16xf32>
    %c16_112 = arith.constant 16 : index
    %c0_113 = arith.constant 0 : index
    %237 = vector.load %arg13[%c16_112, %c0_113] : memref<64x16xf32, #tpu.memory_space<vmem>>, vector<8x16xf32>
    tpu.vector_store %arg13[%c16_112, %c0_113], %236 {strides = array<i32>} : memref<64x16xf32, #tpu.memory_space<vmem>>, vector<8x16xf32>,
    %cst_114 = arith.constant 0.000000e+00 : f32
    %238 = vector.broadcast %cst_114 : f32 to vector<15x16xf32>
    %c6_115 = arith.constant 6 : index
    %c0_116 = arith.constant 0 : index
    %c0_117 = arith.constant 0 : index
    %239 = vector.load %arg12[%c6_115, %c0_116, %c0_117] : memref<18x18x16xf32, #tpu.memory_space<vmem>>, vector<1x18x16xf32>
    %240 = vector.shape_cast %239 : vector<1x18x16xf32> to vector<18x16xf32>
    %241 = vector.extract_strided_slice %240 {offsets = [0, 0], sizes = [15, 16], strides = [1, 1]} : vector<18x16xf32> to vector<15x16xf32>
    %242 = vector.broadcast %70 : vector<1x16xf32> to vector<15x16xf32>
    %243 = arith.mulf %242, %241 : vector<15x16xf32>
    %244 = arith.addf %238, %243 : vector<15x16xf32>
    %245 = vector.extract_strided_slice %240 {offsets = [1, 0], sizes = [15, 16], strides = [1, 1]} : vector<18x16xf32> to vector<15x16xf32>
    %246 = vector.broadcast %72 : vector<1x16xf32> to vector<15x16xf32>
    %247 = arith.mulf %246, %245 : vector<15x16xf32>
    %248 = arith.addf %244, %247 : vector<15x16xf32>
    %249 = vector.extract_strided_slice %240 {offsets = [2, 0], sizes = [15, 16], strides = [1, 1]} : vector<18x16xf32> to vector<15x16xf32>
    %250 = vector.broadcast %74 : vector<1x16xf32> to vector<15x16xf32>
    %251 = arith.mulf %250, %249 : vector<15x16xf32>
    %252 = arith.addf %248, %251 : vector<15x16xf32>
    %c7_118 = arith.constant 7 : index
    %c0_119 = arith.constant 0 : index
    %c0_120 = arith.constant 0 : index
    %253 = vector.load %arg12[%c7_118, %c0_119, %c0_120] : memref<18x18x16xf32, #tpu.memory_space<vmem>>, vector<1x18x16xf32>
    %254 = vector.shape_cast %253 : vector<1x18x16xf32> to vector<18x16xf32>
    %255 = vector.extract_strided_slice %254 {offsets = [0, 0], sizes = [15, 16], strides = [1, 1]} : vector<18x16xf32> to vector<15x16xf32>
    %256 = vector.broadcast %76 : vector<1x16xf32> to vector<15x16xf32>
    %257 = arith.mulf %256, %255 : vector<15x16xf32>
    %258 = arith.addf %252, %257 : vector<15x16xf32>
    %259 = vector.extract_strided_slice %254 {offsets = [1, 0], sizes = [15, 16], strides = [1, 1]} : vector<18x16xf32> to vector<15x16xf32>
    %260 = vector.broadcast %78 : vector<1x16xf32> to vector<15x16xf32>
    %261 = arith.mulf %260, %259 : vector<15x16xf32>
    %262 = arith.addf %258, %261 : vector<15x16xf32>
    %263 = vector.extract_strided_slice %254 {offsets = [2, 0], sizes = [15, 16], strides = [1, 1]} : vector<18x16xf32> to vector<15x16xf32>
    %264 = vector.broadcast %80 : vector<1x16xf32> to vector<15x16xf32>
    %265 = arith.mulf %264, %263 : vector<15x16xf32>
    %266 = arith.addf %262, %265 : vector<15x16xf32>
    %c8_121 = arith.constant 8 : index
    %c0_122 = arith.constant 0 : index
    %c0_123 = arith.constant 0 : index
    %267 = vector.load %arg12[%c8_121, %c0_122, %c0_123] : memref<18x18x16xf32, #tpu.memory_space<vmem>>, vector<1x18x16xf32>
    %268 = vector.shape_cast %267 : vector<1x18x16xf32> to vector<18x16xf32>
    %269 = vector.extract_strided_slice %268 {offsets = [0, 0], sizes = [15, 16], strides = [1, 1]} : vector<18x16xf32> to vector<15x16xf32>
    %270 = vector.broadcast %82 : vector<1x16xf32> to vector<15x16xf32>
    %271 = arith.mulf %270, %269 : vector<15x16xf32>
    %272 = arith.addf %266, %271 : vector<15x16xf32>
    %273 = vector.extract_strided_slice %268 {offsets = [1, 0], sizes = [15, 16], strides = [1, 1]} : vector<18x16xf32> to vector<15x16xf32>
    %274 = vector.broadcast %84 : vector<1x16xf32> to vector<15x16xf32>
    %275 = arith.mulf %274, %273 : vector<15x16xf32>
    %276 = arith.addf %272, %275 : vector<15x16xf32>
    %277 = vector.extract_strided_slice %268 {offsets = [2, 0], sizes = [15, 16], strides = [1, 1]} : vector<18x16xf32> to vector<15x16xf32>
    %278 = vector.broadcast %86 : vector<1x16xf32> to vector<15x16xf32>
    %279 = arith.mulf %278, %277 : vector<15x16xf32>
    %280 = arith.addf %276, %279 : vector<15x16xf32>
    %c0_124 = arith.constant 0 : index
    %c0_125 = arith.constant 0 : index
    %281 = vector.load %arg8[%c0_124, %c0_125] : memref<8x15xf32, #tpu.memory_space<vmem>>, vector<8x15xf32>
    %cst_126 = arith.constant dense<0.000000e+00> : vector<8x16xf32>
    %282 = tpu.matmul %281, %280, %cst_126 {dimension_numbers = #tpu.dot_dimension_numbers<[1], [0], [0], [1], [0, 0, 1, 1], [], []>} : vector<8x15xf32>, vector<15x16xf32>, vector<8x16xf32> -> vector<8x16xf32>
    %283 = vector.broadcast %87 : vector<1x16xf32> to vector<8x16xf32>
    %284 = arith.addf %282, %283 : vector<8x16xf32>
    %cst_127 = arith.constant 0.000000e+00 : f32
    %285 = vector.broadcast %cst_127 : f32 to vector<8x16xf32>
    %286 = arith.maximumf %284, %285 : vector<8x16xf32>
    %c24 = arith.constant 24 : index
    %c0_128 = arith.constant 0 : index
    %287 = vector.load %arg13[%c24, %c0_128] : memref<64x16xf32, #tpu.memory_space<vmem>>, vector<8x16xf32>
    tpu.vector_store %arg13[%c24, %c0_128], %286 {strides = array<i32>} : memref<64x16xf32, #tpu.memory_space<vmem>>, vector<8x16xf32>,
    %cst_129 = arith.constant 0.000000e+00 : f32
    %288 = vector.broadcast %cst_129 : f32 to vector<15x16xf32>
    %c8_130 = arith.constant 8 : index
    %c0_131 = arith.constant 0 : index
    %c0_132 = arith.constant 0 : index
    %289 = vector.load %arg12[%c8_130, %c0_131, %c0_132] : memref<18x18x16xf32, #tpu.memory_space<vmem>>, vector<1x18x16xf32>
    %290 = vector.shape_cast %289 : vector<1x18x16xf32> to vector<18x16xf32>
    %291 = vector.extract_strided_slice %290 {offsets = [0, 0], sizes = [15, 16], strides = [1, 1]} : vector<18x16xf32> to vector<15x16xf32>
    %292 = vector.broadcast %70 : vector<1x16xf32> to vector<15x16xf32>
    %293 = arith.mulf %292, %291 : vector<15x16xf32>
    %294 = arith.addf %288, %293 : vector<15x16xf32>
    %295 = vector.extract_strided_slice %290 {offsets = [1, 0], sizes = [15, 16], strides = [1, 1]} : vector<18x16xf32> to vector<15x16xf32>
    %296 = vector.broadcast %72 : vector<1x16xf32> to vector<15x16xf32>
    %297 = arith.mulf %296, %295 : vector<15x16xf32>
    %298 = arith.addf %294, %297 : vector<15x16xf32>
    %299 = vector.extract_strided_slice %290 {offsets = [2, 0], sizes = [15, 16], strides = [1, 1]} : vector<18x16xf32> to vector<15x16xf32>
    %300 = vector.broadcast %74 : vector<1x16xf32> to vector<15x16xf32>
    %301 = arith.mulf %300, %299 : vector<15x16xf32>
    %302 = arith.addf %298, %301 : vector<15x16xf32>
    %c9_133 = arith.constant 9 : index
    %c0_134 = arith.constant 0 : index
    %c0_135 = arith.constant 0 : index
    %303 = vector.load %arg12[%c9_133, %c0_134, %c0_135] : memref<18x18x16xf32, #tpu.memory_space<vmem>>, vector<1x18x16xf32>
    %304 = vector.shape_cast %303 : vector<1x18x16xf32> to vector<18x16xf32>
    %305 = vector.extract_strided_slice %304 {offsets = [0, 0], sizes = [15, 16], strides = [1, 1]} : vector<18x16xf32> to vector<15x16xf32>
    %306 = vector.broadcast %76 : vector<1x16xf32> to vector<15x16xf32>
    %307 = arith.mulf %306, %305 : vector<15x16xf32>
    %308 = arith.addf %302, %307 : vector<15x16xf32>
    %309 = vector.extract_strided_slice %304 {offsets = [1, 0], sizes = [15, 16], strides = [1, 1]} : vector<18x16xf32> to vector<15x16xf32>
    %310 = vector.broadcast %78 : vector<1x16xf32> to vector<15x16xf32>
    %311 = arith.mulf %310, %309 : vector<15x16xf32>
    %312 = arith.addf %308, %311 : vector<15x16xf32>
    %313 = vector.extract_strided_slice %304 {offsets = [2, 0], sizes = [15, 16], strides = [1, 1]} : vector<18x16xf32> to vector<15x16xf32>
    %314 = vector.broadcast %80 : vector<1x16xf32> to vector<15x16xf32>
    %315 = arith.mulf %314, %313 : vector<15x16xf32>
    %316 = arith.addf %312, %315 : vector<15x16xf32>
    %c10_136 = arith.constant 10 : index
    %c0_137 = arith.constant 0 : index
    %c0_138 = arith.constant 0 : index
    %317 = vector.load %arg12[%c10_136, %c0_137, %c0_138] : memref<18x18x16xf32, #tpu.memory_space<vmem>>, vector<1x18x16xf32>
    %318 = vector.shape_cast %317 : vector<1x18x16xf32> to vector<18x16xf32>
    %319 = vector.extract_strided_slice %318 {offsets = [0, 0], sizes = [15, 16], strides = [1, 1]} : vector<18x16xf32> to vector<15x16xf32>
    %320 = vector.broadcast %82 : vector<1x16xf32> to vector<15x16xf32>
    %321 = arith.mulf %320, %319 : vector<15x16xf32>
    %322 = arith.addf %316, %321 : vector<15x16xf32>
    %323 = vector.extract_strided_slice %318 {offsets = [1, 0], sizes = [15, 16], strides = [1, 1]} : vector<18x16xf32> to vector<15x16xf32>
    %324 = vector.broadcast %84 : vector<1x16xf32> to vector<15x16xf32>
    %325 = arith.mulf %324, %323 : vector<15x16xf32>
    %326 = arith.addf %322, %325 : vector<15x16xf32>
    %327 = vector.extract_strided_slice %318 {offsets = [2, 0], sizes = [15, 16], strides = [1, 1]} : vector<18x16xf32> to vector<15x16xf32>
    %328 = vector.broadcast %86 : vector<1x16xf32> to vector<15x16xf32>
    %329 = arith.mulf %328, %327 : vector<15x16xf32>
    %330 = arith.addf %326, %329 : vector<15x16xf32>
    %c0_139 = arith.constant 0 : index
    %c0_140 = arith.constant 0 : index
    %331 = vector.load %arg8[%c0_139, %c0_140] : memref<8x15xf32, #tpu.memory_space<vmem>>, vector<8x15xf32>
    %cst_141 = arith.constant dense<0.000000e+00> : vector<8x16xf32>
    %332 = tpu.matmul %331, %330, %cst_141 {dimension_numbers = #tpu.dot_dimension_numbers<[1], [0], [0], [1], [0, 0, 1, 1], [], []>} : vector<8x15xf32>, vector<15x16xf32>, vector<8x16xf32> -> vector<8x16xf32>
    %333 = vector.broadcast %87 : vector<1x16xf32> to vector<8x16xf32>
    %334 = arith.addf %332, %333 : vector<8x16xf32>
    %cst_142 = arith.constant 0.000000e+00 : f32
    %335 = vector.broadcast %cst_142 : f32 to vector<8x16xf32>
    %336 = arith.maximumf %334, %335 : vector<8x16xf32>
    %c32 = arith.constant 32 : index
    %c0_143 = arith.constant 0 : index
    %337 = vector.load %arg13[%c32, %c0_143] : memref<64x16xf32, #tpu.memory_space<vmem>>, vector<8x16xf32>
    tpu.vector_store %arg13[%c32, %c0_143], %336 {strides = array<i32>} : memref<64x16xf32, #tpu.memory_space<vmem>>, vector<8x16xf32>,
    %cst_144 = arith.constant 0.000000e+00 : f32
    %338 = vector.broadcast %cst_144 : f32 to vector<15x16xf32>
    %c10_145 = arith.constant 10 : index
    %c0_146 = arith.constant 0 : index
    %c0_147 = arith.constant 0 : index
    %339 = vector.load %arg12[%c10_145, %c0_146, %c0_147] : memref<18x18x16xf32, #tpu.memory_space<vmem>>, vector<1x18x16xf32>
    %340 = vector.shape_cast %339 : vector<1x18x16xf32> to vector<18x16xf32>
    %341 = vector.extract_strided_slice %340 {offsets = [0, 0], sizes = [15, 16], strides = [1, 1]} : vector<18x16xf32> to vector<15x16xf32>
    %342 = vector.broadcast %70 : vector<1x16xf32> to vector<15x16xf32>
    %343 = arith.mulf %342, %341 : vector<15x16xf32>
    %344 = arith.addf %338, %343 : vector<15x16xf32>
    %345 = vector.extract_strided_slice %340 {offsets = [1, 0], sizes = [15, 16], strides = [1, 1]} : vector<18x16xf32> to vector<15x16xf32>
    %346 = vector.broadcast %72 : vector<1x16xf32> to vector<15x16xf32>
    %347 = arith.mulf %346, %345 : vector<15x16xf32>
    %348 = arith.addf %344, %347 : vector<15x16xf32>
    %349 = vector.extract_strided_slice %340 {offsets = [2, 0], sizes = [15, 16], strides = [1, 1]} : vector<18x16xf32> to vector<15x16xf32>
    %350 = vector.broadcast %74 : vector<1x16xf32> to vector<15x16xf32>
    %351 = arith.mulf %350, %349 : vector<15x16xf32>
    %352 = arith.addf %348, %351 : vector<15x16xf32>
    %c11_148 = arith.constant 11 : index
    %c0_149 = arith.constant 0 : index
    %c0_150 = arith.constant 0 : index
    %353 = vector.load %arg12[%c11_148, %c0_149, %c0_150] : memref<18x18x16xf32, #tpu.memory_space<vmem>>, vector<1x18x16xf32>
    %354 = vector.shape_cast %353 : vector<1x18x16xf32> to vector<18x16xf32>
    %355 = vector.extract_strided_slice %354 {offsets = [0, 0], sizes = [15, 16], strides = [1, 1]} : vector<18x16xf32> to vector<15x16xf32>
    %356 = vector.broadcast %76 : vector<1x16xf32> to vector<15x16xf32>
    %357 = arith.mulf %356, %355 : vector<15x16xf32>
    %358 = arith.addf %352, %357 : vector<15x16xf32>
    %359 = vector.extract_strided_slice %354 {offsets = [1, 0], sizes = [15, 16], strides = [1, 1]} : vector<18x16xf32> to vector<15x16xf32>
    %360 = vector.broadcast %78 : vector<1x16xf32> to vector<15x16xf32>
    %361 = arith.mulf %360, %359 : vector<15x16xf32>
    %362 = arith.addf %358, %361 : vector<15x16xf32>
    %363 = vector.extract_strided_slice %354 {offsets = [2, 0], sizes = [15, 16], strides = [1, 1]} : vector<18x16xf32> to vector<15x16xf32>
    %364 = vector.broadcast %80 : vector<1x16xf32> to vector<15x16xf32>
    %365 = arith.mulf %364, %363 : vector<15x16xf32>
    %366 = arith.addf %362, %365 : vector<15x16xf32>
    %c12_151 = arith.constant 12 : index
    %c0_152 = arith.constant 0 : index
    %c0_153 = arith.constant 0 : index
    %367 = vector.load %arg12[%c12_151, %c0_152, %c0_153] : memref<18x18x16xf32, #tpu.memory_space<vmem>>, vector<1x18x16xf32>
    %368 = vector.shape_cast %367 : vector<1x18x16xf32> to vector<18x16xf32>
    %369 = vector.extract_strided_slice %368 {offsets = [0, 0], sizes = [15, 16], strides = [1, 1]} : vector<18x16xf32> to vector<15x16xf32>
    %370 = vector.broadcast %82 : vector<1x16xf32> to vector<15x16xf32>
    %371 = arith.mulf %370, %369 : vector<15x16xf32>
    %372 = arith.addf %366, %371 : vector<15x16xf32>
    %373 = vector.extract_strided_slice %368 {offsets = [1, 0], sizes = [15, 16], strides = [1, 1]} : vector<18x16xf32> to vector<15x16xf32>
    %374 = vector.broadcast %84 : vector<1x16xf32> to vector<15x16xf32>
    %375 = arith.mulf %374, %373 : vector<15x16xf32>
    %376 = arith.addf %372, %375 : vector<15x16xf32>
    %377 = vector.extract_strided_slice %368 {offsets = [2, 0], sizes = [15, 16], strides = [1, 1]} : vector<18x16xf32> to vector<15x16xf32>
    %378 = vector.broadcast %86 : vector<1x16xf32> to vector<15x16xf32>
    %379 = arith.mulf %378, %377 : vector<15x16xf32>
    %380 = arith.addf %376, %379 : vector<15x16xf32>
    %c0_154 = arith.constant 0 : index
    %c0_155 = arith.constant 0 : index
    %381 = vector.load %arg8[%c0_154, %c0_155] : memref<8x15xf32, #tpu.memory_space<vmem>>, vector<8x15xf32>
    %cst_156 = arith.constant dense<0.000000e+00> : vector<8x16xf32>
    %382 = tpu.matmul %381, %380, %cst_156 {dimension_numbers = #tpu.dot_dimension_numbers<[1], [0], [0], [1], [0, 0, 1, 1], [], []>} : vector<8x15xf32>, vector<15x16xf32>, vector<8x16xf32> -> vector<8x16xf32>
    %383 = vector.broadcast %87 : vector<1x16xf32> to vector<8x16xf32>
    %384 = arith.addf %382, %383 : vector<8x16xf32>
    %cst_157 = arith.constant 0.000000e+00 : f32
    %385 = vector.broadcast %cst_157 : f32 to vector<8x16xf32>
    %386 = arith.maximumf %384, %385 : vector<8x16xf32>
    %c40 = arith.constant 40 : index
    %c0_158 = arith.constant 0 : index
    %387 = vector.load %arg13[%c40, %c0_158] : memref<64x16xf32, #tpu.memory_space<vmem>>, vector<8x16xf32>
    tpu.vector_store %arg13[%c40, %c0_158], %386 {strides = array<i32>} : memref<64x16xf32, #tpu.memory_space<vmem>>, vector<8x16xf32>,
    %cst_159 = arith.constant 0.000000e+00 : f32
    %388 = vector.broadcast %cst_159 : f32 to vector<15x16xf32>
    %c12_160 = arith.constant 12 : index
    %c0_161 = arith.constant 0 : index
    %c0_162 = arith.constant 0 : index
    %389 = vector.load %arg12[%c12_160, %c0_161, %c0_162] : memref<18x18x16xf32, #tpu.memory_space<vmem>>, vector<1x18x16xf32>
    %390 = vector.shape_cast %389 : vector<1x18x16xf32> to vector<18x16xf32>
    %391 = vector.extract_strided_slice %390 {offsets = [0, 0], sizes = [15, 16], strides = [1, 1]} : vector<18x16xf32> to vector<15x16xf32>
    %392 = vector.broadcast %70 : vector<1x16xf32> to vector<15x16xf32>
    %393 = arith.mulf %392, %391 : vector<15x16xf32>
    %394 = arith.addf %388, %393 : vector<15x16xf32>
    %395 = vector.extract_strided_slice %390 {offsets = [1, 0], sizes = [15, 16], strides = [1, 1]} : vector<18x16xf32> to vector<15x16xf32>
    %396 = vector.broadcast %72 : vector<1x16xf32> to vector<15x16xf32>
    %397 = arith.mulf %396, %395 : vector<15x16xf32>
    %398 = arith.addf %394, %397 : vector<15x16xf32>
    %399 = vector.extract_strided_slice %390 {offsets = [2, 0], sizes = [15, 16], strides = [1, 1]} : vector<18x16xf32> to vector<15x16xf32>
    %400 = vector.broadcast %74 : vector<1x16xf32> to vector<15x16xf32>
    %401 = arith.mulf %400, %399 : vector<15x16xf32>
    %402 = arith.addf %398, %401 : vector<15x16xf32>
    %c13_163 = arith.constant 13 : index
    %c0_164 = arith.constant 0 : index
    %c0_165 = arith.constant 0 : index
    %403 = vector.load %arg12[%c13_163, %c0_164, %c0_165] : memref<18x18x16xf32, #tpu.memory_space<vmem>>, vector<1x18x16xf32>
    %404 = vector.shape_cast %403 : vector<1x18x16xf32> to vector<18x16xf32>
    %405 = vector.extract_strided_slice %404 {offsets = [0, 0], sizes = [15, 16], strides = [1, 1]} : vector<18x16xf32> to vector<15x16xf32>
    %406 = vector.broadcast %76 : vector<1x16xf32> to vector<15x16xf32>
    %407 = arith.mulf %406, %405 : vector<15x16xf32>
    %408 = arith.addf %402, %407 : vector<15x16xf32>
    %409 = vector.extract_strided_slice %404 {offsets = [1, 0], sizes = [15, 16], strides = [1, 1]} : vector<18x16xf32> to vector<15x16xf32>
    %410 = vector.broadcast %78 : vector<1x16xf32> to vector<15x16xf32>
    %411 = arith.mulf %410, %409 : vector<15x16xf32>
    %412 = arith.addf %408, %411 : vector<15x16xf32>
    %413 = vector.extract_strided_slice %404 {offsets = [2, 0], sizes = [15, 16], strides = [1, 1]} : vector<18x16xf32> to vector<15x16xf32>
    %414 = vector.broadcast %80 : vector<1x16xf32> to vector<15x16xf32>
    %415 = arith.mulf %414, %413 : vector<15x16xf32>
    %416 = arith.addf %412, %415 : vector<15x16xf32>
    %c14_166 = arith.constant 14 : index
    %c0_167 = arith.constant 0 : index
    %c0_168 = arith.constant 0 : index
    %417 = vector.load %arg12[%c14_166, %c0_167, %c0_168] : memref<18x18x16xf32, #tpu.memory_space<vmem>>, vector<1x18x16xf32>
    %418 = vector.shape_cast %417 : vector<1x18x16xf32> to vector<18x16xf32>
    %419 = vector.extract_strided_slice %418 {offsets = [0, 0], sizes = [15, 16], strides = [1, 1]} : vector<18x16xf32> to vector<15x16xf32>
    %420 = vector.broadcast %82 : vector<1x16xf32> to vector<15x16xf32>
    %421 = arith.mulf %420, %419 : vector<15x16xf32>
    %422 = arith.addf %416, %421 : vector<15x16xf32>
    %423 = vector.extract_strided_slice %418 {offsets = [1, 0], sizes = [15, 16], strides = [1, 1]} : vector<18x16xf32> to vector<15x16xf32>
    %424 = vector.broadcast %84 : vector<1x16xf32> to vector<15x16xf32>
    %425 = arith.mulf %424, %423 : vector<15x16xf32>
    %426 = arith.addf %422, %425 : vector<15x16xf32>
    %427 = vector.extract_strided_slice %418 {offsets = [2, 0], sizes = [15, 16], strides = [1, 1]} : vector<18x16xf32> to vector<15x16xf32>
    %428 = vector.broadcast %86 : vector<1x16xf32> to vector<15x16xf32>
    %429 = arith.mulf %428, %427 : vector<15x16xf32>
    %430 = arith.addf %426, %429 : vector<15x16xf32>
    %c0_169 = arith.constant 0 : index
    %c0_170 = arith.constant 0 : index
    %431 = vector.load %arg8[%c0_169, %c0_170] : memref<8x15xf32, #tpu.memory_space<vmem>>, vector<8x15xf32>
    %cst_171 = arith.constant dense<0.000000e+00> : vector<8x16xf32>
    %432 = tpu.matmul %431, %430, %cst_171 {dimension_numbers = #tpu.dot_dimension_numbers<[1], [0], [0], [1], [0, 0, 1, 1], [], []>} : vector<8x15xf32>, vector<15x16xf32>, vector<8x16xf32> -> vector<8x16xf32>
    %433 = vector.broadcast %87 : vector<1x16xf32> to vector<8x16xf32>
    %434 = arith.addf %432, %433 : vector<8x16xf32>
    %cst_172 = arith.constant 0.000000e+00 : f32
    %435 = vector.broadcast %cst_172 : f32 to vector<8x16xf32>
    %436 = arith.maximumf %434, %435 : vector<8x16xf32>
    %c48 = arith.constant 48 : index
    %c0_173 = arith.constant 0 : index
    %437 = vector.load %arg13[%c48, %c0_173] : memref<64x16xf32, #tpu.memory_space<vmem>>, vector<8x16xf32>
    tpu.vector_store %arg13[%c48, %c0_173], %436 {strides = array<i32>} : memref<64x16xf32, #tpu.memory_space<vmem>>, vector<8x16xf32>,
    %cst_174 = arith.constant 0.000000e+00 : f32
    %438 = vector.broadcast %cst_174 : f32 to vector<15x16xf32>
    %c14_175 = arith.constant 14 : index
    %c0_176 = arith.constant 0 : index
    %c0_177 = arith.constant 0 : index
    %439 = vector.load %arg12[%c14_175, %c0_176, %c0_177] : memref<18x18x16xf32, #tpu.memory_space<vmem>>, vector<1x18x16xf32>
    %440 = vector.shape_cast %439 : vector<1x18x16xf32> to vector<18x16xf32>
    %441 = vector.extract_strided_slice %440 {offsets = [0, 0], sizes = [15, 16], strides = [1, 1]} : vector<18x16xf32> to vector<15x16xf32>
    %442 = vector.broadcast %70 : vector<1x16xf32> to vector<15x16xf32>
    %443 = arith.mulf %442, %441 : vector<15x16xf32>
    %444 = arith.addf %438, %443 : vector<15x16xf32>
    %445 = vector.extract_strided_slice %440 {offsets = [1, 0], sizes = [15, 16], strides = [1, 1]} : vector<18x16xf32> to vector<15x16xf32>
    %446 = vector.broadcast %72 : vector<1x16xf32> to vector<15x16xf32>
    %447 = arith.mulf %446, %445 : vector<15x16xf32>
    %448 = arith.addf %444, %447 : vector<15x16xf32>
    %449 = vector.extract_strided_slice %440 {offsets = [2, 0], sizes = [15, 16], strides = [1, 1]} : vector<18x16xf32> to vector<15x16xf32>
    %450 = vector.broadcast %74 : vector<1x16xf32> to vector<15x16xf32>
    %451 = arith.mulf %450, %449 : vector<15x16xf32>
    %452 = arith.addf %448, %451 : vector<15x16xf32>
    %c15_178 = arith.constant 15 : index
    %c0_179 = arith.constant 0 : index
    %c0_180 = arith.constant 0 : index
    %453 = vector.load %arg12[%c15_178, %c0_179, %c0_180] : memref<18x18x16xf32, #tpu.memory_space<vmem>>, vector<1x18x16xf32>
    %454 = vector.shape_cast %453 : vector<1x18x16xf32> to vector<18x16xf32>
    %455 = vector.extract_strided_slice %454 {offsets = [0, 0], sizes = [15, 16], strides = [1, 1]} : vector<18x16xf32> to vector<15x16xf32>
    %456 = vector.broadcast %76 : vector<1x16xf32> to vector<15x16xf32>
    %457 = arith.mulf %456, %455 : vector<15x16xf32>
    %458 = arith.addf %452, %457 : vector<15x16xf32>
    %459 = vector.extract_strided_slice %454 {offsets = [1, 0], sizes = [15, 16], strides = [1, 1]} : vector<18x16xf32> to vector<15x16xf32>
    %460 = vector.broadcast %78 : vector<1x16xf32> to vector<15x16xf32>
    %461 = arith.mulf %460, %459 : vector<15x16xf32>
    %462 = arith.addf %458, %461 : vector<15x16xf32>
    %463 = vector.extract_strided_slice %454 {offsets = [2, 0], sizes = [15, 16], strides = [1, 1]} : vector<18x16xf32> to vector<15x16xf32>
    %464 = vector.broadcast %80 : vector<1x16xf32> to vector<15x16xf32>
    %465 = arith.mulf %464, %463 : vector<15x16xf32>
    %466 = arith.addf %462, %465 : vector<15x16xf32>
    %c16_181 = arith.constant 16 : index
    %c0_182 = arith.constant 0 : index
    %c0_183 = arith.constant 0 : index
    %467 = vector.load %arg12[%c16_181, %c0_182, %c0_183] : memref<18x18x16xf32, #tpu.memory_space<vmem>>, vector<1x18x16xf32>
    %468 = vector.shape_cast %467 : vector<1x18x16xf32> to vector<18x16xf32>
    %469 = vector.extract_strided_slice %468 {offsets = [0, 0], sizes = [15, 16], strides = [1, 1]} : vector<18x16xf32> to vector<15x16xf32>
    %470 = vector.broadcast %82 : vector<1x16xf32> to vector<15x16xf32>
    %471 = arith.mulf %470, %469 : vector<15x16xf32>
    %472 = arith.addf %466, %471 : vector<15x16xf32>
    %473 = vector.extract_strided_slice %468 {offsets = [1, 0], sizes = [15, 16], strides = [1, 1]} : vector<18x16xf32> to vector<15x16xf32>
    %474 = vector.broadcast %84 : vector<1x16xf32> to vector<15x16xf32>
    %475 = arith.mulf %474, %473 : vector<15x16xf32>
    %476 = arith.addf %472, %475 : vector<15x16xf32>
    %477 = vector.extract_strided_slice %468 {offsets = [2, 0], sizes = [15, 16], strides = [1, 1]} : vector<18x16xf32> to vector<15x16xf32>
    %478 = vector.broadcast %86 : vector<1x16xf32> to vector<15x16xf32>
    %479 = arith.mulf %478, %477 : vector<15x16xf32>
    %480 = arith.addf %476, %479 : vector<15x16xf32>
    %c0_184 = arith.constant 0 : index
    %c0_185 = arith.constant 0 : index
    %481 = vector.load %arg8[%c0_184, %c0_185] : memref<8x15xf32, #tpu.memory_space<vmem>>, vector<8x15xf32>
    %cst_186 = arith.constant dense<0.000000e+00> : vector<8x16xf32>
    %482 = tpu.matmul %481, %480, %cst_186 {dimension_numbers = #tpu.dot_dimension_numbers<[1], [0], [0], [1], [0, 0, 1, 1], [], []>} : vector<8x15xf32>, vector<15x16xf32>, vector<8x16xf32> -> vector<8x16xf32>
    %483 = vector.broadcast %87 : vector<1x16xf32> to vector<8x16xf32>
    %484 = arith.addf %482, %483 : vector<8x16xf32>
    %cst_187 = arith.constant 0.000000e+00 : f32
    %485 = vector.broadcast %cst_187 : f32 to vector<8x16xf32>
    %486 = arith.maximumf %484, %485 : vector<8x16xf32>
    %c56 = arith.constant 56 : index
    %c0_188 = arith.constant 0 : index
    %487 = vector.load %arg13[%c56, %c0_188] : memref<64x16xf32, #tpu.memory_space<vmem>>, vector<8x16xf32>
    tpu.vector_store %arg13[%c56, %c0_188], %486 {strides = array<i32>} : memref<64x16xf32, #tpu.memory_space<vmem>>, vector<8x16xf32>,
    %c0_189 = arith.constant 0 : index
    %c0_190 = arith.constant 0 : index
    %488 = vector.load %arg13[%c0_189, %c0_190] : memref<64x16xf32, #tpu.memory_space<vmem>>, vector<64x16xf32>
    %cst_191 = arith.constant dense<0.000000e+00> : vector<16xf32>
    %489 = vector.multi_reduction <add>, %488, %cst_191 [0] : vector<64x16xf32> to vector<16xf32>
    %490 = vector.shape_cast %489 : vector<16xf32> to vector<1x16xf32>
    %cst_192 = arith.constant 1.562500e-02 : f32
    %491 = vector.broadcast %cst_192 : f32 to vector<1x16xf32>
    %492 = arith.mulf %490, %491 : vector<1x16xf32>
    %c0_193 = arith.constant 0 : index
    %c0_194 = arith.constant 0 : index
    %493 = vector.load %arg4[%c0_193, %c0_194] : memref<16x8xf32, #tpu.memory_space<vmem>>, vector<16x8xf32>
    %cst_195 = arith.constant dense<0.000000e+00> : vector<1x8xf32>
    %494 = tpu.matmul %492, %493, %cst_195 {dimension_numbers = #tpu.dot_dimension_numbers<[1], [0], [0], [1], [0, 0, 1, 1], [], []>} : vector<1x16xf32>, vector<16x8xf32>, vector<1x8xf32> -> vector<1x8xf32>
    %c0_196 = arith.constant 0 : index
    %c0_197 = arith.constant 0 : index
    %495 = vector.load %arg5[%c0_196, %c0_197] : memref<1x8xf32, #tpu.memory_space<vmem>>, vector<1x8xf32>
    %496 = arith.addf %494, %495 : vector<1x8xf32>
    %cst_198 = arith.constant 0.000000e+00 : f32
    %497 = vector.broadcast %cst_198 : f32 to vector<1x8xf32>
    %498 = arith.maximumf %496, %497 : vector<1x8xf32>
    %c0_199 = arith.constant 0 : index
    %c0_200 = arith.constant 0 : index
    %499 = vector.load %arg6[%c0_199, %c0_200] : memref<8x16xf32, #tpu.memory_space<vmem>>, vector<8x16xf32>
    %cst_201 = arith.constant dense<0.000000e+00> : vector<1x16xf32>
    %500 = tpu.matmul %498, %499, %cst_201 {dimension_numbers = #tpu.dot_dimension_numbers<[1], [0], [0], [1], [0, 0, 1, 1], [], []>} : vector<1x8xf32>, vector<8x16xf32>, vector<1x16xf32> -> vector<1x16xf32>
    %c0_202 = arith.constant 0 : index
    %c0_203 = arith.constant 0 : index
    %501 = vector.load %arg7[%c0_202, %c0_203] : memref<1x16xf32, #tpu.memory_space<vmem>>, vector<1x16xf32>
    %502 = arith.addf %500, %501 : vector<1x16xf32>
    %cst_204 = arith.constant 3.000000e+00 : f32
    %503 = vector.broadcast %cst_204 : f32 to vector<1x16xf32>
    %504 = arith.addf %502, %503 : vector<1x16xf32>
    %cst_205 = arith.constant 0.000000e+00 : f32
    %cst_206 = arith.constant 6.000000e+00 : f32
    %505 = vector.broadcast %cst_205 : f32 to vector<1x16xf32>
    %506 = arith.maximumf %505, %504 : vector<1x16xf32>
    %507 = vector.broadcast %cst_206 : f32 to vector<1x16xf32>
    %508 = arith.minimumf %507, %506 : vector<1x16xf32>
    %cst_207 = arith.constant 0.166666672 : f32
    %509 = vector.broadcast %cst_207 : f32 to vector<1x16xf32>
    %510 = arith.mulf %508, %509 : vector<1x16xf32>
    %511 = vector.broadcast %510 : vector<1x16xf32> to vector<64x16xf32>
    %512 = arith.mulf %488, %511 : vector<64x16xf32>
    %513 = arith.truncf %512 : vector<64x16xf32> to vector<64x16xbf16>
    %c0_208 = arith.constant 0 : index
    %c0_209 = arith.constant 0 : index
    %514 = vector.load %arg9[%c0_208, %c0_209] : memref<16x16xbf16, #tpu.memory_space<vmem>>, vector<16x16xbf16>
    %cst_210 = arith.constant dense<0.000000e+00> : vector<64x16xf32>
    %515 = tpu.matmul %513, %514, %cst_210 {dimension_numbers = #tpu.dot_dimension_numbers<[1], [0], [0], [1], [0, 0, 1, 1], [], []>} : vector<64x16xbf16>, vector<16x16xbf16>, vector<64x16xf32> -> vector<64x16xf32>
    %c0_211 = arith.constant 0 : index
    %c0_212 = arith.constant 0 : index
    %516 = vector.load %arg10[%c0_211, %c0_212] : memref<1x16xf32, #tpu.memory_space<vmem>>, vector<1x16xf32>
    %517 = vector.broadcast %516 : vector<1x16xf32> to vector<64x16xf32>
    %518 = arith.addf %515, %517 : vector<64x16xf32>
    %519 = arith.truncf %518 : vector<64x16xf32> to vector<64x16xbf16>
    %c0_213 = arith.constant 0 : index
    %c0_214 = arith.constant 0 : index
    %c0_215 = arith.constant 0 : index
    %520 = vector.load %arg11[%c0_213, %c0_214, %c0_215] : memref<1x64x16xbf16, #tpu.memory_space<vmem>>, vector<1x64x16xbf16>
    %521 = vector.shape_cast %520 : vector<1x64x16xbf16> to vector<64x16xbf16>
    %522 = vector.shape_cast %519 : vector<64x16xbf16> to vector<1x64x16xbf16>
    tpu.vector_store %arg11[%c0_213, %c0_214, %c0_215], %522 {strides = array<i32>} : memref<1x64x16xbf16, #tpu.memory_space<vmem>>, vector<1x64x16xbf16>,
    return
  }
  func.func @transform_0(%arg0: i32) -> (i32, i32, i32) {
    %c0_i32 = arith.constant 0 : i32
    %c0_i32_0 = arith.constant 0 : i32
    %c0_i32_1 = arith.constant 0 : i32
    return %arg0, %c0_i32, %c0_i32_0 : i32, i32, i32
  }
  func.func @transform_1(%arg0: i32) -> (i32, i32, i32) {
    %c0_i32 = arith.constant 0 : i32
    %c0_i32_0 = arith.constant 0 : i32
    %c0_i32_1 = arith.constant 0 : i32
    %c0_i32_2 = arith.constant 0 : i32
    return %c0_i32, %c0_i32_0, %c0_i32_1 : i32, i32, i32
  }
  func.func @transform_2(%arg0: i32) -> (i32, i32) {
    %c0_i32 = arith.constant 0 : i32
    %c0_i32_0 = arith.constant 0 : i32
    %c0_i32_1 = arith.constant 0 : i32
    return %c0_i32, %c0_i32_0 : i32, i32
  }
  func.func @transform_3(%arg0: i32) -> (i32, i32) {
    %c0_i32 = arith.constant 0 : i32
    %c0_i32_0 = arith.constant 0 : i32
    %c0_i32_1 = arith.constant 0 : i32
    return %c0_i32, %c0_i32_0 : i32, i32
  }
  func.func @transform_4(%arg0: i32) -> (i32, i32) {
    %c0_i32 = arith.constant 0 : i32
    %c0_i32_0 = arith.constant 0 : i32
    %c0_i32_1 = arith.constant 0 : i32
    return %c0_i32, %c0_i32_0 : i32, i32
  }
  func.func @transform_5(%arg0: i32) -> (i32, i32) {
    %c0_i32 = arith.constant 0 : i32
    %c0_i32_0 = arith.constant 0 : i32
    %c0_i32_1 = arith.constant 0 : i32
    return %c0_i32, %c0_i32_0 : i32, i32
  }
  func.func @transform_6(%arg0: i32) -> (i32, i32) {
    %c0_i32 = arith.constant 0 : i32
    %c0_i32_0 = arith.constant 0 : i32
    %c0_i32_1 = arith.constant 0 : i32
    return %c0_i32, %c0_i32_0 : i32, i32
  }
  func.func @transform_7(%arg0: i32) -> (i32, i32) {
    %c0_i32 = arith.constant 0 : i32
    %c0_i32_0 = arith.constant 0 : i32
    %c0_i32_1 = arith.constant 0 : i32
    return %c0_i32, %c0_i32_0 : i32, i32
  }
  func.func @transform_8(%arg0: i32) -> (i32, i32) {
    %c0_i32 = arith.constant 0 : i32
    %c0_i32_0 = arith.constant 0 : i32
    %c0_i32_1 = arith.constant 0 : i32
    return %c0_i32, %c0_i32_0 : i32, i32
  }
  func.func @transform_9(%arg0: i32) -> (i32, i32) {
    %c0_i32 = arith.constant 0 : i32
    %c0_i32_0 = arith.constant 0 : i32
    %c0_i32_1 = arith.constant 0 : i32
    return %c0_i32, %c0_i32_0 : i32, i32
  }
  func.func @transform_10(%arg0: i32) -> (i32, i32, i32) {
    %c0_i32 = arith.constant 0 : i32
    %c0_i32_0 = arith.constant 0 : i32
    %c0_i32_1 = arith.constant 0 : i32
    return %arg0, %c0_i32, %c0_i32_0 : i32, i32, i32
  }
}

module attributes {stable_mosaic.version = 11 : i64} {
  func.func @_block_kernel(%arg0: i32, %arg1: memref<1x64x16xbf16, #tpu.memory_space<vmem>>, %arg2: memref<16x72xbf16, #tpu.memory_space<vmem>>, %arg3: memref<1x72xf32, #tpu.memory_space<vmem>>, %arg4: memref<9x1x72xf32, #tpu.memory_space<vmem>>, %arg5: memref<1x72xf32, #tpu.memory_space<vmem>>, %arg6: memref<4x7xf32, #tpu.memory_space<vmem>>, %arg7: memref<72x24xbf16, #tpu.memory_space<vmem>>, %arg8: memref<1x24xf32, #tpu.memory_space<vmem>>, %arg9: memref<1x16x24xbf16, #tpu.memory_space<vmem>>, %arg10: memref<10x10x72xf32, #tpu.memory_space<vmem>>, %arg11: memref<16x72xf32, #tpu.memory_space<vmem>>) attributes {dimension_semantics = [#tpu.dimension_semantics<parallel>], iteration_bounds = array<i64: 2>, scalar_prefetch = 0 : i64, scratch_operands = 2 : i64, tpu.core_type = #tpu.core_type<tc>, window_params = [{transform_indices = @transform_0, window_bounds = array<i64: 1, 64, 16>}, {pipeline_mode = #tpu.pipeline_mode<synchronous>, transform_indices = @transform_1, window_bounds = array<i64: 16, 72>}, {pipeline_mode = #tpu.pipeline_mode<synchronous>, transform_indices = @transform_2, window_bounds = array<i64: 1, 72>}, {pipeline_mode = #tpu.pipeline_mode<synchronous>, transform_indices = @transform_3, window_bounds = array<i64: 9, 1, 72>}, {pipeline_mode = #tpu.pipeline_mode<synchronous>, transform_indices = @transform_4, window_bounds = array<i64: 1, 72>}, {pipeline_mode = #tpu.pipeline_mode<synchronous>, transform_indices = @transform_5, window_bounds = array<i64: 4, 7>}, {pipeline_mode = #tpu.pipeline_mode<synchronous>, transform_indices = @transform_6, window_bounds = array<i64: 72, 24>}, {pipeline_mode = #tpu.pipeline_mode<synchronous>, transform_indices = @transform_7, window_bounds = array<i64: 1, 24>}, {transform_indices = @transform_8, window_bounds = array<i64: 1, 16, 24>}]} {
    %c0 = arith.constant 0 : index
    %c0_0 = arith.constant 0 : index
    %c0_1 = arith.constant 0 : index
    %0 = vector.load %arg1[%c0, %c0_0, %c0_1] : memref<1x64x16xbf16, #tpu.memory_space<vmem>>, vector<1x64x16xbf16>
    %1 = vector.shape_cast %0 : vector<1x64x16xbf16> to vector<64x16xbf16>
    %c0_2 = arith.constant 0 : index
    %c0_3 = arith.constant 0 : index
    %2 = vector.load %arg2[%c0_2, %c0_3] : memref<16x72xbf16, #tpu.memory_space<vmem>>, vector<16x72xbf16>
    %cst = arith.constant dense<0.000000e+00> : vector<64x72xf32>
    %3 = tpu.matmul %1, %2, %cst {dimension_numbers = #tpu.dot_dimension_numbers<[1], [0], [0], [1], [0, 0, 1, 1], [], []>} : vector<64x16xbf16>, vector<16x72xbf16>, vector<64x72xf32> -> vector<64x72xf32>
    %c0_4 = arith.constant 0 : index
    %c0_5 = arith.constant 0 : index
    %4 = vector.load %arg3[%c0_4, %c0_5] : memref<1x72xf32, #tpu.memory_space<vmem>>, vector<1x72xf32>
    %5 = vector.broadcast %4 : vector<1x72xf32> to vector<64x72xf32>
    %6 = arith.addf %3, %5 : vector<64x72xf32>
    %cst_6 = arith.constant 0.000000e+00 : f32
    %7 = vector.broadcast %cst_6 : f32 to vector<64x72xf32>
    %8 = arith.maximumf %6, %7 : vector<64x72xf32>
    %cst_7 = arith.constant 0.000000e+00 : f32
    %9 = vector.broadcast %cst_7 : f32 to vector<10x10x72xf32>
    %c0_8 = arith.constant 0 : index
    %c0_9 = arith.constant 0 : index
    %c0_10 = arith.constant 0 : index
    %10 = vector.load %arg10[%c0_8, %c0_9, %c0_10] : memref<10x10x72xf32, #tpu.memory_space<vmem>>, vector<10x10x72xf32>
    tpu.vector_store %arg10[%c0_8, %c0_9, %c0_10], %9 {strides = array<i32>} : memref<10x10x72xf32, #tpu.memory_space<vmem>>, vector<10x10x72xf32>,
    %11 = vector.extract_strided_slice %8 {offsets = [0, 0], sizes = [8, 72], strides = [1, 1]} : vector<64x72xf32> to vector<8x72xf32>
    %c1 = arith.constant 1 : index
    %c1_11 = arith.constant 1 : index
    %c0_12 = arith.constant 0 : index
    %12 = vector.load %arg10[%c1, %c1_11, %c0_12] : memref<10x10x72xf32, #tpu.memory_space<vmem>>, vector<1x8x72xf32>
    %13 = vector.shape_cast %12 : vector<1x8x72xf32> to vector<8x72xf32>
    %14 = vector.shape_cast %11 : vector<8x72xf32> to vector<1x8x72xf32>
    tpu.vector_store %arg10[%c1, %c1_11, %c0_12], %14 {strides = array<i32>} : memref<10x10x72xf32, #tpu.memory_space<vmem>>, vector<1x8x72xf32>,
    %15 = vector.extract_strided_slice %8 {offsets = [8, 0], sizes = [8, 72], strides = [1, 1]} : vector<64x72xf32> to vector<8x72xf32>
    %c2 = arith.constant 2 : index
    %c1_13 = arith.constant 1 : index
    %c0_14 = arith.constant 0 : index
    %16 = vector.load %arg10[%c2, %c1_13, %c0_14] : memref<10x10x72xf32, #tpu.memory_space<vmem>>, vector<1x8x72xf32>
    %17 = vector.shape_cast %16 : vector<1x8x72xf32> to vector<8x72xf32>
    %18 = vector.shape_cast %15 : vector<8x72xf32> to vector<1x8x72xf32>
    tpu.vector_store %arg10[%c2, %c1_13, %c0_14], %18 {strides = array<i32>} : memref<10x10x72xf32, #tpu.memory_space<vmem>>, vector<1x8x72xf32>,
    %19 = vector.extract_strided_slice %8 {offsets = [16, 0], sizes = [8, 72], strides = [1, 1]} : vector<64x72xf32> to vector<8x72xf32>
    %c3 = arith.constant 3 : index
    %c1_15 = arith.constant 1 : index
    %c0_16 = arith.constant 0 : index
    %20 = vector.load %arg10[%c3, %c1_15, %c0_16] : memref<10x10x72xf32, #tpu.memory_space<vmem>>, vector<1x8x72xf32>
    %21 = vector.shape_cast %20 : vector<1x8x72xf32> to vector<8x72xf32>
    %22 = vector.shape_cast %19 : vector<8x72xf32> to vector<1x8x72xf32>
    tpu.vector_store %arg10[%c3, %c1_15, %c0_16], %22 {strides = array<i32>} : memref<10x10x72xf32, #tpu.memory_space<vmem>>, vector<1x8x72xf32>,
    %23 = vector.extract_strided_slice %8 {offsets = [24, 0], sizes = [8, 72], strides = [1, 1]} : vector<64x72xf32> to vector<8x72xf32>
    %c4 = arith.constant 4 : index
    %c1_17 = arith.constant 1 : index
    %c0_18 = arith.constant 0 : index
    %24 = vector.load %arg10[%c4, %c1_17, %c0_18] : memref<10x10x72xf32, #tpu.memory_space<vmem>>, vector<1x8x72xf32>
    %25 = vector.shape_cast %24 : vector<1x8x72xf32> to vector<8x72xf32>
    %26 = vector.shape_cast %23 : vector<8x72xf32> to vector<1x8x72xf32>
    tpu.vector_store %arg10[%c4, %c1_17, %c0_18], %26 {strides = array<i32>} : memref<10x10x72xf32, #tpu.memory_space<vmem>>, vector<1x8x72xf32>,
    %27 = vector.extract_strided_slice %8 {offsets = [32, 0], sizes = [8, 72], strides = [1, 1]} : vector<64x72xf32> to vector<8x72xf32>
    %c5 = arith.constant 5 : index
    %c1_19 = arith.constant 1 : index
    %c0_20 = arith.constant 0 : index
    %28 = vector.load %arg10[%c5, %c1_19, %c0_20] : memref<10x10x72xf32, #tpu.memory_space<vmem>>, vector<1x8x72xf32>
    %29 = vector.shape_cast %28 : vector<1x8x72xf32> to vector<8x72xf32>
    %30 = vector.shape_cast %27 : vector<8x72xf32> to vector<1x8x72xf32>
    tpu.vector_store %arg10[%c5, %c1_19, %c0_20], %30 {strides = array<i32>} : memref<10x10x72xf32, #tpu.memory_space<vmem>>, vector<1x8x72xf32>,
    %31 = vector.extract_strided_slice %8 {offsets = [40, 0], sizes = [8, 72], strides = [1, 1]} : vector<64x72xf32> to vector<8x72xf32>
    %c6 = arith.constant 6 : index
    %c1_21 = arith.constant 1 : index
    %c0_22 = arith.constant 0 : index
    %32 = vector.load %arg10[%c6, %c1_21, %c0_22] : memref<10x10x72xf32, #tpu.memory_space<vmem>>, vector<1x8x72xf32>
    %33 = vector.shape_cast %32 : vector<1x8x72xf32> to vector<8x72xf32>
    %34 = vector.shape_cast %31 : vector<8x72xf32> to vector<1x8x72xf32>
    tpu.vector_store %arg10[%c6, %c1_21, %c0_22], %34 {strides = array<i32>} : memref<10x10x72xf32, #tpu.memory_space<vmem>>, vector<1x8x72xf32>,
    %35 = vector.extract_strided_slice %8 {offsets = [48, 0], sizes = [8, 72], strides = [1, 1]} : vector<64x72xf32> to vector<8x72xf32>
    %c7 = arith.constant 7 : index
    %c1_23 = arith.constant 1 : index
    %c0_24 = arith.constant 0 : index
    %36 = vector.load %arg10[%c7, %c1_23, %c0_24] : memref<10x10x72xf32, #tpu.memory_space<vmem>>, vector<1x8x72xf32>
    %37 = vector.shape_cast %36 : vector<1x8x72xf32> to vector<8x72xf32>
    %38 = vector.shape_cast %35 : vector<8x72xf32> to vector<1x8x72xf32>
    tpu.vector_store %arg10[%c7, %c1_23, %c0_24], %38 {strides = array<i32>} : memref<10x10x72xf32, #tpu.memory_space<vmem>>, vector<1x8x72xf32>,
    %39 = vector.extract_strided_slice %8 {offsets = [56, 0], sizes = [8, 72], strides = [1, 1]} : vector<64x72xf32> to vector<8x72xf32>
    %c8 = arith.constant 8 : index
    %c1_25 = arith.constant 1 : index
    %c0_26 = arith.constant 0 : index
    %40 = vector.load %arg10[%c8, %c1_25, %c0_26] : memref<10x10x72xf32, #tpu.memory_space<vmem>>, vector<1x8x72xf32>
    %41 = vector.shape_cast %40 : vector<1x8x72xf32> to vector<8x72xf32>
    %42 = vector.shape_cast %39 : vector<8x72xf32> to vector<1x8x72xf32>
    tpu.vector_store %arg10[%c8, %c1_25, %c0_26], %42 {strides = array<i32>} : memref<10x10x72xf32, #tpu.memory_space<vmem>>, vector<1x8x72xf32>,
    %c0_27 = arith.constant 0 : index
    %c0_28 = arith.constant 0 : index
    %c0_29 = arith.constant 0 : index
    %43 = vector.load %arg4[%c0_27, %c0_28, %c0_29] : memref<9x1x72xf32, #tpu.memory_space<vmem>>, vector<1x1x72xf32>
    %44 = vector.shape_cast %43 : vector<1x1x72xf32> to vector<1x72xf32>
    %c1_30 = arith.constant 1 : index
    %c0_31 = arith.constant 0 : index
    %c0_32 = arith.constant 0 : index
    %45 = vector.load %arg4[%c1_30, %c0_31, %c0_32] : memref<9x1x72xf32, #tpu.memory_space<vmem>>, vector<1x1x72xf32>
    %46 = vector.shape_cast %45 : vector<1x1x72xf32> to vector<1x72xf32>
    %c2_33 = arith.constant 2 : index
    %c0_34 = arith.constant 0 : index
    %c0_35 = arith.constant 0 : index
    %47 = vector.load %arg4[%c2_33, %c0_34, %c0_35] : memref<9x1x72xf32, #tpu.memory_space<vmem>>, vector<1x1x72xf32>
    %48 = vector.shape_cast %47 : vector<1x1x72xf32> to vector<1x72xf32>
    %c3_36 = arith.constant 3 : index
    %c0_37 = arith.constant 0 : index
    %c0_38 = arith.constant 0 : index
    %49 = vector.load %arg4[%c3_36, %c0_37, %c0_38] : memref<9x1x72xf32, #tpu.memory_space<vmem>>, vector<1x1x72xf32>
    %50 = vector.shape_cast %49 : vector<1x1x72xf32> to vector<1x72xf32>
    %c4_39 = arith.constant 4 : index
    %c0_40 = arith.constant 0 : index
    %c0_41 = arith.constant 0 : index
    %51 = vector.load %arg4[%c4_39, %c0_40, %c0_41] : memref<9x1x72xf32, #tpu.memory_space<vmem>>, vector<1x1x72xf32>
    %52 = vector.shape_cast %51 : vector<1x1x72xf32> to vector<1x72xf32>
    %c5_42 = arith.constant 5 : index
    %c0_43 = arith.constant 0 : index
    %c0_44 = arith.constant 0 : index
    %53 = vector.load %arg4[%c5_42, %c0_43, %c0_44] : memref<9x1x72xf32, #tpu.memory_space<vmem>>, vector<1x1x72xf32>
    %54 = vector.shape_cast %53 : vector<1x1x72xf32> to vector<1x72xf32>
    %c6_45 = arith.constant 6 : index
    %c0_46 = arith.constant 0 : index
    %c0_47 = arith.constant 0 : index
    %55 = vector.load %arg4[%c6_45, %c0_46, %c0_47] : memref<9x1x72xf32, #tpu.memory_space<vmem>>, vector<1x1x72xf32>
    %56 = vector.shape_cast %55 : vector<1x1x72xf32> to vector<1x72xf32>
    %c7_48 = arith.constant 7 : index
    %c0_49 = arith.constant 0 : index
    %c0_50 = arith.constant 0 : index
    %57 = vector.load %arg4[%c7_48, %c0_49, %c0_50] : memref<9x1x72xf32, #tpu.memory_space<vmem>>, vector<1x1x72xf32>
    %58 = vector.shape_cast %57 : vector<1x1x72xf32> to vector<1x72xf32>
    %c8_51 = arith.constant 8 : index
    %c0_52 = arith.constant 0 : index
    %c0_53 = arith.constant 0 : index
    %59 = vector.load %arg4[%c8_51, %c0_52, %c0_53] : memref<9x1x72xf32, #tpu.memory_space<vmem>>, vector<1x1x72xf32>
    %60 = vector.shape_cast %59 : vector<1x1x72xf32> to vector<1x72xf32>
    %c0_54 = arith.constant 0 : index
    %c0_55 = arith.constant 0 : index
    %61 = vector.load %arg5[%c0_54, %c0_55] : memref<1x72xf32, #tpu.memory_space<vmem>>, vector<1x72xf32>
    %cst_56 = arith.constant 0.000000e+00 : f32
    %62 = vector.broadcast %cst_56 : f32 to vector<7x72xf32>
    %c0_57 = arith.constant 0 : index
    %c0_58 = arith.constant 0 : index
    %c0_59 = arith.constant 0 : index
    %63 = vector.load %arg10[%c0_57, %c0_58, %c0_59] : memref<10x10x72xf32, #tpu.memory_space<vmem>>, vector<1x10x72xf32>
    %64 = vector.shape_cast %63 : vector<1x10x72xf32> to vector<10x72xf32>
    %65 = vector.extract_strided_slice %64 {offsets = [0, 0], sizes = [7, 72], strides = [1, 1]} : vector<10x72xf32> to vector<7x72xf32>
    %66 = vector.broadcast %44 : vector<1x72xf32> to vector<7x72xf32>
    %67 = arith.mulf %66, %65 : vector<7x72xf32>
    %68 = arith.addf %62, %67 : vector<7x72xf32>
    %69 = vector.extract_strided_slice %64 {offsets = [1, 0], sizes = [7, 72], strides = [1, 1]} : vector<10x72xf32> to vector<7x72xf32>
    %70 = vector.broadcast %46 : vector<1x72xf32> to vector<7x72xf32>
    %71 = arith.mulf %70, %69 : vector<7x72xf32>
    %72 = arith.addf %68, %71 : vector<7x72xf32>
    %73 = vector.extract_strided_slice %64 {offsets = [2, 0], sizes = [7, 72], strides = [1, 1]} : vector<10x72xf32> to vector<7x72xf32>
    %74 = vector.broadcast %48 : vector<1x72xf32> to vector<7x72xf32>
    %75 = arith.mulf %74, %73 : vector<7x72xf32>
    %76 = arith.addf %72, %75 : vector<7x72xf32>
    %c1_60 = arith.constant 1 : index
    %c0_61 = arith.constant 0 : index
    %c0_62 = arith.constant 0 : index
    %77 = vector.load %arg10[%c1_60, %c0_61, %c0_62] : memref<10x10x72xf32, #tpu.memory_space<vmem>>, vector<1x10x72xf32>
    %78 = vector.shape_cast %77 : vector<1x10x72xf32> to vector<10x72xf32>
    %79 = vector.extract_strided_slice %78 {offsets = [0, 0], sizes = [7, 72], strides = [1, 1]} : vector<10x72xf32> to vector<7x72xf32>
    %80 = vector.broadcast %50 : vector<1x72xf32> to vector<7x72xf32>
    %81 = arith.mulf %80, %79 : vector<7x72xf32>
    %82 = arith.addf %76, %81 : vector<7x72xf32>
    %83 = vector.extract_strided_slice %78 {offsets = [1, 0], sizes = [7, 72], strides = [1, 1]} : vector<10x72xf32> to vector<7x72xf32>
    %84 = vector.broadcast %52 : vector<1x72xf32> to vector<7x72xf32>
    %85 = arith.mulf %84, %83 : vector<7x72xf32>
    %86 = arith.addf %82, %85 : vector<7x72xf32>
    %87 = vector.extract_strided_slice %78 {offsets = [2, 0], sizes = [7, 72], strides = [1, 1]} : vector<10x72xf32> to vector<7x72xf32>
    %88 = vector.broadcast %54 : vector<1x72xf32> to vector<7x72xf32>
    %89 = arith.mulf %88, %87 : vector<7x72xf32>
    %90 = arith.addf %86, %89 : vector<7x72xf32>
    %c2_63 = arith.constant 2 : index
    %c0_64 = arith.constant 0 : index
    %c0_65 = arith.constant 0 : index
    %91 = vector.load %arg10[%c2_63, %c0_64, %c0_65] : memref<10x10x72xf32, #tpu.memory_space<vmem>>, vector<1x10x72xf32>
    %92 = vector.shape_cast %91 : vector<1x10x72xf32> to vector<10x72xf32>
    %93 = vector.extract_strided_slice %92 {offsets = [0, 0], sizes = [7, 72], strides = [1, 1]} : vector<10x72xf32> to vector<7x72xf32>
    %94 = vector.broadcast %56 : vector<1x72xf32> to vector<7x72xf32>
    %95 = arith.mulf %94, %93 : vector<7x72xf32>
    %96 = arith.addf %90, %95 : vector<7x72xf32>
    %97 = vector.extract_strided_slice %92 {offsets = [1, 0], sizes = [7, 72], strides = [1, 1]} : vector<10x72xf32> to vector<7x72xf32>
    %98 = vector.broadcast %58 : vector<1x72xf32> to vector<7x72xf32>
    %99 = arith.mulf %98, %97 : vector<7x72xf32>
    %100 = arith.addf %96, %99 : vector<7x72xf32>
    %101 = vector.extract_strided_slice %92 {offsets = [2, 0], sizes = [7, 72], strides = [1, 1]} : vector<10x72xf32> to vector<7x72xf32>
    %102 = vector.broadcast %60 : vector<1x72xf32> to vector<7x72xf32>
    %103 = arith.mulf %102, %101 : vector<7x72xf32>
    %104 = arith.addf %100, %103 : vector<7x72xf32>
    %c0_66 = arith.constant 0 : index
    %c0_67 = arith.constant 0 : index
    %105 = vector.load %arg6[%c0_66, %c0_67] : memref<4x7xf32, #tpu.memory_space<vmem>>, vector<4x7xf32>
    %cst_68 = arith.constant dense<0.000000e+00> : vector<4x72xf32>
    %106 = tpu.matmul %105, %104, %cst_68 {dimension_numbers = #tpu.dot_dimension_numbers<[1], [0], [0], [1], [0, 0, 1, 1], [], []>} : vector<4x7xf32>, vector<7x72xf32>, vector<4x72xf32> -> vector<4x72xf32>
    %107 = vector.broadcast %61 : vector<1x72xf32> to vector<4x72xf32>
    %108 = arith.addf %106, %107 : vector<4x72xf32>
    %cst_69 = arith.constant 0.000000e+00 : f32
    %109 = vector.broadcast %cst_69 : f32 to vector<4x72xf32>
    %110 = arith.maximumf %108, %109 : vector<4x72xf32>
    %c0_70 = arith.constant 0 : index
    %c0_71 = arith.constant 0 : index
    %111 = vector.load %arg11[%c0_70, %c0_71] : memref<16x72xf32, #tpu.memory_space<vmem>>, vector<4x72xf32>
    tpu.vector_store %arg11[%c0_70, %c0_71], %110 {strides = array<i32>} : memref<16x72xf32, #tpu.memory_space<vmem>>, vector<4x72xf32>,
    %cst_72 = arith.constant 0.000000e+00 : f32
    %112 = vector.broadcast %cst_72 : f32 to vector<7x72xf32>
    %c2_73 = arith.constant 2 : index
    %c0_74 = arith.constant 0 : index
    %c0_75 = arith.constant 0 : index
    %113 = vector.load %arg10[%c2_73, %c0_74, %c0_75] : memref<10x10x72xf32, #tpu.memory_space<vmem>>, vector<1x10x72xf32>
    %114 = vector.shape_cast %113 : vector<1x10x72xf32> to vector<10x72xf32>
    %115 = vector.extract_strided_slice %114 {offsets = [0, 0], sizes = [7, 72], strides = [1, 1]} : vector<10x72xf32> to vector<7x72xf32>
    %116 = vector.broadcast %44 : vector<1x72xf32> to vector<7x72xf32>
    %117 = arith.mulf %116, %115 : vector<7x72xf32>
    %118 = arith.addf %112, %117 : vector<7x72xf32>
    %119 = vector.extract_strided_slice %114 {offsets = [1, 0], sizes = [7, 72], strides = [1, 1]} : vector<10x72xf32> to vector<7x72xf32>
    %120 = vector.broadcast %46 : vector<1x72xf32> to vector<7x72xf32>
    %121 = arith.mulf %120, %119 : vector<7x72xf32>
    %122 = arith.addf %118, %121 : vector<7x72xf32>
    %123 = vector.extract_strided_slice %114 {offsets = [2, 0], sizes = [7, 72], strides = [1, 1]} : vector<10x72xf32> to vector<7x72xf32>
    %124 = vector.broadcast %48 : vector<1x72xf32> to vector<7x72xf32>
    %125 = arith.mulf %124, %123 : vector<7x72xf32>
    %126 = arith.addf %122, %125 : vector<7x72xf32>
    %c3_76 = arith.constant 3 : index
    %c0_77 = arith.constant 0 : index
    %c0_78 = arith.constant 0 : index
    %127 = vector.load %arg10[%c3_76, %c0_77, %c0_78] : memref<10x10x72xf32, #tpu.memory_space<vmem>>, vector<1x10x72xf32>
    %128 = vector.shape_cast %127 : vector<1x10x72xf32> to vector<10x72xf32>
    %129 = vector.extract_strided_slice %128 {offsets = [0, 0], sizes = [7, 72], strides = [1, 1]} : vector<10x72xf32> to vector<7x72xf32>
    %130 = vector.broadcast %50 : vector<1x72xf32> to vector<7x72xf32>
    %131 = arith.mulf %130, %129 : vector<7x72xf32>
    %132 = arith.addf %126, %131 : vector<7x72xf32>
    %133 = vector.extract_strided_slice %128 {offsets = [1, 0], sizes = [7, 72], strides = [1, 1]} : vector<10x72xf32> to vector<7x72xf32>
    %134 = vector.broadcast %52 : vector<1x72xf32> to vector<7x72xf32>
    %135 = arith.mulf %134, %133 : vector<7x72xf32>
    %136 = arith.addf %132, %135 : vector<7x72xf32>
    %137 = vector.extract_strided_slice %128 {offsets = [2, 0], sizes = [7, 72], strides = [1, 1]} : vector<10x72xf32> to vector<7x72xf32>
    %138 = vector.broadcast %54 : vector<1x72xf32> to vector<7x72xf32>
    %139 = arith.mulf %138, %137 : vector<7x72xf32>
    %140 = arith.addf %136, %139 : vector<7x72xf32>
    %c4_79 = arith.constant 4 : index
    %c0_80 = arith.constant 0 : index
    %c0_81 = arith.constant 0 : index
    %141 = vector.load %arg10[%c4_79, %c0_80, %c0_81] : memref<10x10x72xf32, #tpu.memory_space<vmem>>, vector<1x10x72xf32>
    %142 = vector.shape_cast %141 : vector<1x10x72xf32> to vector<10x72xf32>
    %143 = vector.extract_strided_slice %142 {offsets = [0, 0], sizes = [7, 72], strides = [1, 1]} : vector<10x72xf32> to vector<7x72xf32>
    %144 = vector.broadcast %56 : vector<1x72xf32> to vector<7x72xf32>
    %145 = arith.mulf %144, %143 : vector<7x72xf32>
    %146 = arith.addf %140, %145 : vector<7x72xf32>
    %147 = vector.extract_strided_slice %142 {offsets = [1, 0], sizes = [7, 72], strides = [1, 1]} : vector<10x72xf32> to vector<7x72xf32>
    %148 = vector.broadcast %58 : vector<1x72xf32> to vector<7x72xf32>
    %149 = arith.mulf %148, %147 : vector<7x72xf32>
    %150 = arith.addf %146, %149 : vector<7x72xf32>
    %151 = vector.extract_strided_slice %142 {offsets = [2, 0], sizes = [7, 72], strides = [1, 1]} : vector<10x72xf32> to vector<7x72xf32>
    %152 = vector.broadcast %60 : vector<1x72xf32> to vector<7x72xf32>
    %153 = arith.mulf %152, %151 : vector<7x72xf32>
    %154 = arith.addf %150, %153 : vector<7x72xf32>
    %c0_82 = arith.constant 0 : index
    %c0_83 = arith.constant 0 : index
    %155 = vector.load %arg6[%c0_82, %c0_83] : memref<4x7xf32, #tpu.memory_space<vmem>>, vector<4x7xf32>
    %cst_84 = arith.constant dense<0.000000e+00> : vector<4x72xf32>
    %156 = tpu.matmul %155, %154, %cst_84 {dimension_numbers = #tpu.dot_dimension_numbers<[1], [0], [0], [1], [0, 0, 1, 1], [], []>} : vector<4x7xf32>, vector<7x72xf32>, vector<4x72xf32> -> vector<4x72xf32>
    %157 = vector.broadcast %61 : vector<1x72xf32> to vector<4x72xf32>
    %158 = arith.addf %156, %157 : vector<4x72xf32>
    %cst_85 = arith.constant 0.000000e+00 : f32
    %159 = vector.broadcast %cst_85 : f32 to vector<4x72xf32>
    %160 = arith.maximumf %158, %159 : vector<4x72xf32>
    %c4_86 = arith.constant 4 : index
    %c0_87 = arith.constant 0 : index
    %161 = vector.load %arg11[%c4_86, %c0_87] : memref<16x72xf32, #tpu.memory_space<vmem>>, vector<4x72xf32>
    tpu.vector_store %arg11[%c4_86, %c0_87], %160 {strides = array<i32>} : memref<16x72xf32, #tpu.memory_space<vmem>>, vector<4x72xf32>,
    %cst_88 = arith.constant 0.000000e+00 : f32
    %162 = vector.broadcast %cst_88 : f32 to vector<7x72xf32>
    %c4_89 = arith.constant 4 : index
    %c0_90 = arith.constant 0 : index
    %c0_91 = arith.constant 0 : index
    %163 = vector.load %arg10[%c4_89, %c0_90, %c0_91] : memref<10x10x72xf32, #tpu.memory_space<vmem>>, vector<1x10x72xf32>
    %164 = vector.shape_cast %163 : vector<1x10x72xf32> to vector<10x72xf32>
    %165 = vector.extract_strided_slice %164 {offsets = [0, 0], sizes = [7, 72], strides = [1, 1]} : vector<10x72xf32> to vector<7x72xf32>
    %166 = vector.broadcast %44 : vector<1x72xf32> to vector<7x72xf32>
    %167 = arith.mulf %166, %165 : vector<7x72xf32>
    %168 = arith.addf %162, %167 : vector<7x72xf32>
    %169 = vector.extract_strided_slice %164 {offsets = [1, 0], sizes = [7, 72], strides = [1, 1]} : vector<10x72xf32> to vector<7x72xf32>
    %170 = vector.broadcast %46 : vector<1x72xf32> to vector<7x72xf32>
    %171 = arith.mulf %170, %169 : vector<7x72xf32>
    %172 = arith.addf %168, %171 : vector<7x72xf32>
    %173 = vector.extract_strided_slice %164 {offsets = [2, 0], sizes = [7, 72], strides = [1, 1]} : vector<10x72xf32> to vector<7x72xf32>
    %174 = vector.broadcast %48 : vector<1x72xf32> to vector<7x72xf32>
    %175 = arith.mulf %174, %173 : vector<7x72xf32>
    %176 = arith.addf %172, %175 : vector<7x72xf32>
    %c5_92 = arith.constant 5 : index
    %c0_93 = arith.constant 0 : index
    %c0_94 = arith.constant 0 : index
    %177 = vector.load %arg10[%c5_92, %c0_93, %c0_94] : memref<10x10x72xf32, #tpu.memory_space<vmem>>, vector<1x10x72xf32>
    %178 = vector.shape_cast %177 : vector<1x10x72xf32> to vector<10x72xf32>
    %179 = vector.extract_strided_slice %178 {offsets = [0, 0], sizes = [7, 72], strides = [1, 1]} : vector<10x72xf32> to vector<7x72xf32>
    %180 = vector.broadcast %50 : vector<1x72xf32> to vector<7x72xf32>
    %181 = arith.mulf %180, %179 : vector<7x72xf32>
    %182 = arith.addf %176, %181 : vector<7x72xf32>
    %183 = vector.extract_strided_slice %178 {offsets = [1, 0], sizes = [7, 72], strides = [1, 1]} : vector<10x72xf32> to vector<7x72xf32>
    %184 = vector.broadcast %52 : vector<1x72xf32> to vector<7x72xf32>
    %185 = arith.mulf %184, %183 : vector<7x72xf32>
    %186 = arith.addf %182, %185 : vector<7x72xf32>
    %187 = vector.extract_strided_slice %178 {offsets = [2, 0], sizes = [7, 72], strides = [1, 1]} : vector<10x72xf32> to vector<7x72xf32>
    %188 = vector.broadcast %54 : vector<1x72xf32> to vector<7x72xf32>
    %189 = arith.mulf %188, %187 : vector<7x72xf32>
    %190 = arith.addf %186, %189 : vector<7x72xf32>
    %c6_95 = arith.constant 6 : index
    %c0_96 = arith.constant 0 : index
    %c0_97 = arith.constant 0 : index
    %191 = vector.load %arg10[%c6_95, %c0_96, %c0_97] : memref<10x10x72xf32, #tpu.memory_space<vmem>>, vector<1x10x72xf32>
    %192 = vector.shape_cast %191 : vector<1x10x72xf32> to vector<10x72xf32>
    %193 = vector.extract_strided_slice %192 {offsets = [0, 0], sizes = [7, 72], strides = [1, 1]} : vector<10x72xf32> to vector<7x72xf32>
    %194 = vector.broadcast %56 : vector<1x72xf32> to vector<7x72xf32>
    %195 = arith.mulf %194, %193 : vector<7x72xf32>
    %196 = arith.addf %190, %195 : vector<7x72xf32>
    %197 = vector.extract_strided_slice %192 {offsets = [1, 0], sizes = [7, 72], strides = [1, 1]} : vector<10x72xf32> to vector<7x72xf32>
    %198 = vector.broadcast %58 : vector<1x72xf32> to vector<7x72xf32>
    %199 = arith.mulf %198, %197 : vector<7x72xf32>
    %200 = arith.addf %196, %199 : vector<7x72xf32>
    %201 = vector.extract_strided_slice %192 {offsets = [2, 0], sizes = [7, 72], strides = [1, 1]} : vector<10x72xf32> to vector<7x72xf32>
    %202 = vector.broadcast %60 : vector<1x72xf32> to vector<7x72xf32>
    %203 = arith.mulf %202, %201 : vector<7x72xf32>
    %204 = arith.addf %200, %203 : vector<7x72xf32>
    %c0_98 = arith.constant 0 : index
    %c0_99 = arith.constant 0 : index
    %205 = vector.load %arg6[%c0_98, %c0_99] : memref<4x7xf32, #tpu.memory_space<vmem>>, vector<4x7xf32>
    %cst_100 = arith.constant dense<0.000000e+00> : vector<4x72xf32>
    %206 = tpu.matmul %205, %204, %cst_100 {dimension_numbers = #tpu.dot_dimension_numbers<[1], [0], [0], [1], [0, 0, 1, 1], [], []>} : vector<4x7xf32>, vector<7x72xf32>, vector<4x72xf32> -> vector<4x72xf32>
    %207 = vector.broadcast %61 : vector<1x72xf32> to vector<4x72xf32>
    %208 = arith.addf %206, %207 : vector<4x72xf32>
    %cst_101 = arith.constant 0.000000e+00 : f32
    %209 = vector.broadcast %cst_101 : f32 to vector<4x72xf32>
    %210 = arith.maximumf %208, %209 : vector<4x72xf32>
    %c8_102 = arith.constant 8 : index
    %c0_103 = arith.constant 0 : index
    %211 = vector.load %arg11[%c8_102, %c0_103] : memref<16x72xf32, #tpu.memory_space<vmem>>, vector<4x72xf32>
    tpu.vector_store %arg11[%c8_102, %c0_103], %210 {strides = array<i32>} : memref<16x72xf32, #tpu.memory_space<vmem>>, vector<4x72xf32>,
    %cst_104 = arith.constant 0.000000e+00 : f32
    %212 = vector.broadcast %cst_104 : f32 to vector<7x72xf32>
    %c6_105 = arith.constant 6 : index
    %c0_106 = arith.constant 0 : index
    %c0_107 = arith.constant 0 : index
    %213 = vector.load %arg10[%c6_105, %c0_106, %c0_107] : memref<10x10x72xf32, #tpu.memory_space<vmem>>, vector<1x10x72xf32>
    %214 = vector.shape_cast %213 : vector<1x10x72xf32> to vector<10x72xf32>
    %215 = vector.extract_strided_slice %214 {offsets = [0, 0], sizes = [7, 72], strides = [1, 1]} : vector<10x72xf32> to vector<7x72xf32>
    %216 = vector.broadcast %44 : vector<1x72xf32> to vector<7x72xf32>
    %217 = arith.mulf %216, %215 : vector<7x72xf32>
    %218 = arith.addf %212, %217 : vector<7x72xf32>
    %219 = vector.extract_strided_slice %214 {offsets = [1, 0], sizes = [7, 72], strides = [1, 1]} : vector<10x72xf32> to vector<7x72xf32>
    %220 = vector.broadcast %46 : vector<1x72xf32> to vector<7x72xf32>
    %221 = arith.mulf %220, %219 : vector<7x72xf32>
    %222 = arith.addf %218, %221 : vector<7x72xf32>
    %223 = vector.extract_strided_slice %214 {offsets = [2, 0], sizes = [7, 72], strides = [1, 1]} : vector<10x72xf32> to vector<7x72xf32>
    %224 = vector.broadcast %48 : vector<1x72xf32> to vector<7x72xf32>
    %225 = arith.mulf %224, %223 : vector<7x72xf32>
    %226 = arith.addf %222, %225 : vector<7x72xf32>
    %c7_108 = arith.constant 7 : index
    %c0_109 = arith.constant 0 : index
    %c0_110 = arith.constant 0 : index
    %227 = vector.load %arg10[%c7_108, %c0_109, %c0_110] : memref<10x10x72xf32, #tpu.memory_space<vmem>>, vector<1x10x72xf32>
    %228 = vector.shape_cast %227 : vector<1x10x72xf32> to vector<10x72xf32>
    %229 = vector.extract_strided_slice %228 {offsets = [0, 0], sizes = [7, 72], strides = [1, 1]} : vector<10x72xf32> to vector<7x72xf32>
    %230 = vector.broadcast %50 : vector<1x72xf32> to vector<7x72xf32>
    %231 = arith.mulf %230, %229 : vector<7x72xf32>
    %232 = arith.addf %226, %231 : vector<7x72xf32>
    %233 = vector.extract_strided_slice %228 {offsets = [1, 0], sizes = [7, 72], strides = [1, 1]} : vector<10x72xf32> to vector<7x72xf32>
    %234 = vector.broadcast %52 : vector<1x72xf32> to vector<7x72xf32>
    %235 = arith.mulf %234, %233 : vector<7x72xf32>
    %236 = arith.addf %232, %235 : vector<7x72xf32>
    %237 = vector.extract_strided_slice %228 {offsets = [2, 0], sizes = [7, 72], strides = [1, 1]} : vector<10x72xf32> to vector<7x72xf32>
    %238 = vector.broadcast %54 : vector<1x72xf32> to vector<7x72xf32>
    %239 = arith.mulf %238, %237 : vector<7x72xf32>
    %240 = arith.addf %236, %239 : vector<7x72xf32>
    %c8_111 = arith.constant 8 : index
    %c0_112 = arith.constant 0 : index
    %c0_113 = arith.constant 0 : index
    %241 = vector.load %arg10[%c8_111, %c0_112, %c0_113] : memref<10x10x72xf32, #tpu.memory_space<vmem>>, vector<1x10x72xf32>
    %242 = vector.shape_cast %241 : vector<1x10x72xf32> to vector<10x72xf32>
    %243 = vector.extract_strided_slice %242 {offsets = [0, 0], sizes = [7, 72], strides = [1, 1]} : vector<10x72xf32> to vector<7x72xf32>
    %244 = vector.broadcast %56 : vector<1x72xf32> to vector<7x72xf32>
    %245 = arith.mulf %244, %243 : vector<7x72xf32>
    %246 = arith.addf %240, %245 : vector<7x72xf32>
    %247 = vector.extract_strided_slice %242 {offsets = [1, 0], sizes = [7, 72], strides = [1, 1]} : vector<10x72xf32> to vector<7x72xf32>
    %248 = vector.broadcast %58 : vector<1x72xf32> to vector<7x72xf32>
    %249 = arith.mulf %248, %247 : vector<7x72xf32>
    %250 = arith.addf %246, %249 : vector<7x72xf32>
    %251 = vector.extract_strided_slice %242 {offsets = [2, 0], sizes = [7, 72], strides = [1, 1]} : vector<10x72xf32> to vector<7x72xf32>
    %252 = vector.broadcast %60 : vector<1x72xf32> to vector<7x72xf32>
    %253 = arith.mulf %252, %251 : vector<7x72xf32>
    %254 = arith.addf %250, %253 : vector<7x72xf32>
    %c0_114 = arith.constant 0 : index
    %c0_115 = arith.constant 0 : index
    %255 = vector.load %arg6[%c0_114, %c0_115] : memref<4x7xf32, #tpu.memory_space<vmem>>, vector<4x7xf32>
    %cst_116 = arith.constant dense<0.000000e+00> : vector<4x72xf32>
    %256 = tpu.matmul %255, %254, %cst_116 {dimension_numbers = #tpu.dot_dimension_numbers<[1], [0], [0], [1], [0, 0, 1, 1], [], []>} : vector<4x7xf32>, vector<7x72xf32>, vector<4x72xf32> -> vector<4x72xf32>
    %257 = vector.broadcast %61 : vector<1x72xf32> to vector<4x72xf32>
    %258 = arith.addf %256, %257 : vector<4x72xf32>
    %cst_117 = arith.constant 0.000000e+00 : f32
    %259 = vector.broadcast %cst_117 : f32 to vector<4x72xf32>
    %260 = arith.maximumf %258, %259 : vector<4x72xf32>
    %c12 = arith.constant 12 : index
    %c0_118 = arith.constant 0 : index
    %261 = vector.load %arg11[%c12, %c0_118] : memref<16x72xf32, #tpu.memory_space<vmem>>, vector<4x72xf32>
    tpu.vector_store %arg11[%c12, %c0_118], %260 {strides = array<i32>} : memref<16x72xf32, #tpu.memory_space<vmem>>, vector<4x72xf32>,
    %c0_119 = arith.constant 0 : index
    %c0_120 = arith.constant 0 : index
    %262 = vector.load %arg11[%c0_119, %c0_120] : memref<16x72xf32, #tpu.memory_space<vmem>>, vector<16x72xf32>
    %263 = arith.truncf %262 : vector<16x72xf32> to vector<16x72xbf16>
    %c0_121 = arith.constant 0 : index
    %c0_122 = arith.constant 0 : index
    %264 = vector.load %arg7[%c0_121, %c0_122] : memref<72x24xbf16, #tpu.memory_space<vmem>>, vector<72x24xbf16>
    %cst_123 = arith.constant dense<0.000000e+00> : vector<16x24xf32>
    %265 = tpu.matmul %263, %264, %cst_123 {dimension_numbers = #tpu.dot_dimension_numbers<[1], [0], [0], [1], [0, 0, 1, 1], [], []>} : vector<16x72xbf16>, vector<72x24xbf16>, vector<16x24xf32> -> vector<16x24xf32>
    %c0_124 = arith.constant 0 : index
    %c0_125 = arith.constant 0 : index
    %266 = vector.load %arg8[%c0_124, %c0_125] : memref<1x24xf32, #tpu.memory_space<vmem>>, vector<1x24xf32>
    %267 = vector.broadcast %266 : vector<1x24xf32> to vector<16x24xf32>
    %268 = arith.addf %265, %267 : vector<16x24xf32>
    %269 = arith.truncf %268 : vector<16x24xf32> to vector<16x24xbf16>
    %c0_126 = arith.constant 0 : index
    %c0_127 = arith.constant 0 : index
    %c0_128 = arith.constant 0 : index
    %270 = vector.load %arg9[%c0_126, %c0_127, %c0_128] : memref<1x16x24xbf16, #tpu.memory_space<vmem>>, vector<1x16x24xbf16>
    %271 = vector.shape_cast %270 : vector<1x16x24xbf16> to vector<16x24xbf16>
    %272 = vector.shape_cast %269 : vector<16x24xbf16> to vector<1x16x24xbf16>
    tpu.vector_store %arg9[%c0_126, %c0_127, %c0_128], %272 {strides = array<i32>} : memref<1x16x24xbf16, #tpu.memory_space<vmem>>, vector<1x16x24xbf16>,
    return
  }
  func.func @transform_0(%arg0: i32) -> (i32, i32, i32) {
    %c0_i32 = arith.constant 0 : i32
    %c0_i32_0 = arith.constant 0 : i32
    %c0_i32_1 = arith.constant 0 : i32
    return %arg0, %c0_i32, %c0_i32_0 : i32, i32, i32
  }
  func.func @transform_1(%arg0: i32) -> (i32, i32) {
    %c0_i32 = arith.constant 0 : i32
    %c0_i32_0 = arith.constant 0 : i32
    %c0_i32_1 = arith.constant 0 : i32
    return %c0_i32, %c0_i32_0 : i32, i32
  }
  func.func @transform_2(%arg0: i32) -> (i32, i32) {
    %c0_i32 = arith.constant 0 : i32
    %c0_i32_0 = arith.constant 0 : i32
    %c0_i32_1 = arith.constant 0 : i32
    return %c0_i32, %c0_i32_0 : i32, i32
  }
  func.func @transform_3(%arg0: i32) -> (i32, i32, i32) {
    %c0_i32 = arith.constant 0 : i32
    %c0_i32_0 = arith.constant 0 : i32
    %c0_i32_1 = arith.constant 0 : i32
    %c0_i32_2 = arith.constant 0 : i32
    return %c0_i32, %c0_i32_0, %c0_i32_1 : i32, i32, i32
  }
  func.func @transform_4(%arg0: i32) -> (i32, i32) {
    %c0_i32 = arith.constant 0 : i32
    %c0_i32_0 = arith.constant 0 : i32
    %c0_i32_1 = arith.constant 0 : i32
    return %c0_i32, %c0_i32_0 : i32, i32
  }
  func.func @transform_5(%arg0: i32) -> (i32, i32) {
    %c0_i32 = arith.constant 0 : i32
    %c0_i32_0 = arith.constant 0 : i32
    %c0_i32_1 = arith.constant 0 : i32
    return %c0_i32, %c0_i32_0 : i32, i32
  }
  func.func @transform_6(%arg0: i32) -> (i32, i32) {
    %c0_i32 = arith.constant 0 : i32
    %c0_i32_0 = arith.constant 0 : i32
    %c0_i32_1 = arith.constant 0 : i32
    return %c0_i32, %c0_i32_0 : i32, i32
  }
  func.func @transform_7(%arg0: i32) -> (i32, i32) {
    %c0_i32 = arith.constant 0 : i32
    %c0_i32_0 = arith.constant 0 : i32
    %c0_i32_1 = arith.constant 0 : i32
    return %c0_i32, %c0_i32_0 : i32, i32
  }
  func.func @transform_8(%arg0: i32) -> (i32, i32, i32) {
    %c0_i32 = arith.constant 0 : i32
    %c0_i32_0 = arith.constant 0 : i32
    %c0_i32_1 = arith.constant 0 : i32
    return %arg0, %c0_i32, %c0_i32_0 : i32, i32, i32
  }
}

module attributes {stable_mosaic.version = 11 : i64} {
  func.func @_block_kernel(%arg0: i32, %arg1: memref<1x16x24xbf16, #tpu.memory_space<vmem>>, %arg2: memref<24x88xbf16, #tpu.memory_space<vmem>>, %arg3: memref<1x88xf32, #tpu.memory_space<vmem>>, %arg4: memref<9x1x88xf32, #tpu.memory_space<vmem>>, %arg5: memref<1x88xf32, #tpu.memory_space<vmem>>, %arg6: memref<88x24xbf16, #tpu.memory_space<vmem>>, %arg7: memref<1x24xf32, #tpu.memory_space<vmem>>, %arg8: memref<1x16x24xbf16, #tpu.memory_space<vmem>>, %arg9: memref<6x6x88xf32, #tpu.memory_space<vmem>>, %arg10: memref<16x88xf32, #tpu.memory_space<vmem>>) attributes {dimension_semantics = [#tpu.dimension_semantics<parallel>], iteration_bounds = array<i64: 2>, scalar_prefetch = 0 : i64, scratch_operands = 2 : i64, tpu.core_type = #tpu.core_type<tc>, window_params = [{transform_indices = @transform_0, window_bounds = array<i64: 1, 16, 24>}, {pipeline_mode = #tpu.pipeline_mode<synchronous>, transform_indices = @transform_1, window_bounds = array<i64: 24, 88>}, {pipeline_mode = #tpu.pipeline_mode<synchronous>, transform_indices = @transform_2, window_bounds = array<i64: 1, 88>}, {pipeline_mode = #tpu.pipeline_mode<synchronous>, transform_indices = @transform_3, window_bounds = array<i64: 9, 1, 88>}, {pipeline_mode = #tpu.pipeline_mode<synchronous>, transform_indices = @transform_4, window_bounds = array<i64: 1, 88>}, {pipeline_mode = #tpu.pipeline_mode<synchronous>, transform_indices = @transform_5, window_bounds = array<i64: 88, 24>}, {pipeline_mode = #tpu.pipeline_mode<synchronous>, transform_indices = @transform_6, window_bounds = array<i64: 1, 24>}, {transform_indices = @transform_7, window_bounds = array<i64: 1, 16, 24>}]} {
    %c0 = arith.constant 0 : index
    %c0_0 = arith.constant 0 : index
    %c0_1 = arith.constant 0 : index
    %0 = vector.load %arg1[%c0, %c0_0, %c0_1] : memref<1x16x24xbf16, #tpu.memory_space<vmem>>, vector<1x16x24xbf16>
    %1 = vector.shape_cast %0 : vector<1x16x24xbf16> to vector<16x24xbf16>
    %c0_2 = arith.constant 0 : index
    %c0_3 = arith.constant 0 : index
    %2 = vector.load %arg2[%c0_2, %c0_3] : memref<24x88xbf16, #tpu.memory_space<vmem>>, vector<24x88xbf16>
    %cst = arith.constant dense<0.000000e+00> : vector<16x88xf32>
    %3 = tpu.matmul %1, %2, %cst {dimension_numbers = #tpu.dot_dimension_numbers<[1], [0], [0], [1], [0, 0, 1, 1], [], []>} : vector<16x24xbf16>, vector<24x88xbf16>, vector<16x88xf32> -> vector<16x88xf32>
    %c0_4 = arith.constant 0 : index
    %c0_5 = arith.constant 0 : index
    %4 = vector.load %arg3[%c0_4, %c0_5] : memref<1x88xf32, #tpu.memory_space<vmem>>, vector<1x88xf32>
    %5 = vector.broadcast %4 : vector<1x88xf32> to vector<16x88xf32>
    %6 = arith.addf %3, %5 : vector<16x88xf32>
    %cst_6 = arith.constant 0.000000e+00 : f32
    %7 = vector.broadcast %cst_6 : f32 to vector<16x88xf32>
    %8 = arith.maximumf %6, %7 : vector<16x88xf32>
    %cst_7 = arith.constant 0.000000e+00 : f32
    %9 = vector.broadcast %cst_7 : f32 to vector<6x6x88xf32>
    %c0_8 = arith.constant 0 : index
    %c0_9 = arith.constant 0 : index
    %c0_10 = arith.constant 0 : index
    %10 = vector.load %arg9[%c0_8, %c0_9, %c0_10] : memref<6x6x88xf32, #tpu.memory_space<vmem>>, vector<6x6x88xf32>
    tpu.vector_store %arg9[%c0_8, %c0_9, %c0_10], %9 {strides = array<i32>} : memref<6x6x88xf32, #tpu.memory_space<vmem>>, vector<6x6x88xf32>,
    %11 = vector.extract_strided_slice %8 {offsets = [0, 0], sizes = [4, 88], strides = [1, 1]} : vector<16x88xf32> to vector<4x88xf32>
    %c1 = arith.constant 1 : index
    %c1_11 = arith.constant 1 : index
    %c0_12 = arith.constant 0 : index
    %12 = vector.load %arg9[%c1, %c1_11, %c0_12] : memref<6x6x88xf32, #tpu.memory_space<vmem>>, vector<1x4x88xf32>
    %13 = vector.shape_cast %12 : vector<1x4x88xf32> to vector<4x88xf32>
    %14 = vector.shape_cast %11 : vector<4x88xf32> to vector<1x4x88xf32>
    tpu.vector_store %arg9[%c1, %c1_11, %c0_12], %14 {strides = array<i32>} : memref<6x6x88xf32, #tpu.memory_space<vmem>>, vector<1x4x88xf32>,
    %15 = vector.extract_strided_slice %8 {offsets = [4, 0], sizes = [4, 88], strides = [1, 1]} : vector<16x88xf32> to vector<4x88xf32>
    %c2 = arith.constant 2 : index
    %c1_13 = arith.constant 1 : index
    %c0_14 = arith.constant 0 : index
    %16 = vector.load %arg9[%c2, %c1_13, %c0_14] : memref<6x6x88xf32, #tpu.memory_space<vmem>>, vector<1x4x88xf32>
    %17 = vector.shape_cast %16 : vector<1x4x88xf32> to vector<4x88xf32>
    %18 = vector.shape_cast %15 : vector<4x88xf32> to vector<1x4x88xf32>
    tpu.vector_store %arg9[%c2, %c1_13, %c0_14], %18 {strides = array<i32>} : memref<6x6x88xf32, #tpu.memory_space<vmem>>, vector<1x4x88xf32>,
    %19 = vector.extract_strided_slice %8 {offsets = [8, 0], sizes = [4, 88], strides = [1, 1]} : vector<16x88xf32> to vector<4x88xf32>
    %c3 = arith.constant 3 : index
    %c1_15 = arith.constant 1 : index
    %c0_16 = arith.constant 0 : index
    %20 = vector.load %arg9[%c3, %c1_15, %c0_16] : memref<6x6x88xf32, #tpu.memory_space<vmem>>, vector<1x4x88xf32>
    %21 = vector.shape_cast %20 : vector<1x4x88xf32> to vector<4x88xf32>
    %22 = vector.shape_cast %19 : vector<4x88xf32> to vector<1x4x88xf32>
    tpu.vector_store %arg9[%c3, %c1_15, %c0_16], %22 {strides = array<i32>} : memref<6x6x88xf32, #tpu.memory_space<vmem>>, vector<1x4x88xf32>,
    %23 = vector.extract_strided_slice %8 {offsets = [12, 0], sizes = [4, 88], strides = [1, 1]} : vector<16x88xf32> to vector<4x88xf32>
    %c4 = arith.constant 4 : index
    %c1_17 = arith.constant 1 : index
    %c0_18 = arith.constant 0 : index
    %24 = vector.load %arg9[%c4, %c1_17, %c0_18] : memref<6x6x88xf32, #tpu.memory_space<vmem>>, vector<1x4x88xf32>
    %25 = vector.shape_cast %24 : vector<1x4x88xf32> to vector<4x88xf32>
    %26 = vector.shape_cast %23 : vector<4x88xf32> to vector<1x4x88xf32>
    tpu.vector_store %arg9[%c4, %c1_17, %c0_18], %26 {strides = array<i32>} : memref<6x6x88xf32, #tpu.memory_space<vmem>>, vector<1x4x88xf32>,
    %c0_19 = arith.constant 0 : index
    %c0_20 = arith.constant 0 : index
    %c0_21 = arith.constant 0 : index
    %27 = vector.load %arg4[%c0_19, %c0_20, %c0_21] : memref<9x1x88xf32, #tpu.memory_space<vmem>>, vector<1x1x88xf32>
    %28 = vector.shape_cast %27 : vector<1x1x88xf32> to vector<1x88xf32>
    %c1_22 = arith.constant 1 : index
    %c0_23 = arith.constant 0 : index
    %c0_24 = arith.constant 0 : index
    %29 = vector.load %arg4[%c1_22, %c0_23, %c0_24] : memref<9x1x88xf32, #tpu.memory_space<vmem>>, vector<1x1x88xf32>
    %30 = vector.shape_cast %29 : vector<1x1x88xf32> to vector<1x88xf32>
    %c2_25 = arith.constant 2 : index
    %c0_26 = arith.constant 0 : index
    %c0_27 = arith.constant 0 : index
    %31 = vector.load %arg4[%c2_25, %c0_26, %c0_27] : memref<9x1x88xf32, #tpu.memory_space<vmem>>, vector<1x1x88xf32>
    %32 = vector.shape_cast %31 : vector<1x1x88xf32> to vector<1x88xf32>
    %c3_28 = arith.constant 3 : index
    %c0_29 = arith.constant 0 : index
    %c0_30 = arith.constant 0 : index
    %33 = vector.load %arg4[%c3_28, %c0_29, %c0_30] : memref<9x1x88xf32, #tpu.memory_space<vmem>>, vector<1x1x88xf32>
    %34 = vector.shape_cast %33 : vector<1x1x88xf32> to vector<1x88xf32>
    %c4_31 = arith.constant 4 : index
    %c0_32 = arith.constant 0 : index
    %c0_33 = arith.constant 0 : index
    %35 = vector.load %arg4[%c4_31, %c0_32, %c0_33] : memref<9x1x88xf32, #tpu.memory_space<vmem>>, vector<1x1x88xf32>
    %36 = vector.shape_cast %35 : vector<1x1x88xf32> to vector<1x88xf32>
    %c5 = arith.constant 5 : index
    %c0_34 = arith.constant 0 : index
    %c0_35 = arith.constant 0 : index
    %37 = vector.load %arg4[%c5, %c0_34, %c0_35] : memref<9x1x88xf32, #tpu.memory_space<vmem>>, vector<1x1x88xf32>
    %38 = vector.shape_cast %37 : vector<1x1x88xf32> to vector<1x88xf32>
    %c6 = arith.constant 6 : index
    %c0_36 = arith.constant 0 : index
    %c0_37 = arith.constant 0 : index
    %39 = vector.load %arg4[%c6, %c0_36, %c0_37] : memref<9x1x88xf32, #tpu.memory_space<vmem>>, vector<1x1x88xf32>
    %40 = vector.shape_cast %39 : vector<1x1x88xf32> to vector<1x88xf32>
    %c7 = arith.constant 7 : index
    %c0_38 = arith.constant 0 : index
    %c0_39 = arith.constant 0 : index
    %41 = vector.load %arg4[%c7, %c0_38, %c0_39] : memref<9x1x88xf32, #tpu.memory_space<vmem>>, vector<1x1x88xf32>
    %42 = vector.shape_cast %41 : vector<1x1x88xf32> to vector<1x88xf32>
    %c8 = arith.constant 8 : index
    %c0_40 = arith.constant 0 : index
    %c0_41 = arith.constant 0 : index
    %43 = vector.load %arg4[%c8, %c0_40, %c0_41] : memref<9x1x88xf32, #tpu.memory_space<vmem>>, vector<1x1x88xf32>
    %44 = vector.shape_cast %43 : vector<1x1x88xf32> to vector<1x88xf32>
    %c0_42 = arith.constant 0 : index
    %c0_43 = arith.constant 0 : index
    %45 = vector.load %arg5[%c0_42, %c0_43] : memref<1x88xf32, #tpu.memory_space<vmem>>, vector<1x88xf32>
    %cst_44 = arith.constant 0.000000e+00 : f32
    %46 = vector.broadcast %cst_44 : f32 to vector<4x88xf32>
    %c0_45 = arith.constant 0 : index
    %c0_46 = arith.constant 0 : index
    %c0_47 = arith.constant 0 : index
    %47 = vector.load %arg9[%c0_45, %c0_46, %c0_47] : memref<6x6x88xf32, #tpu.memory_space<vmem>>, vector<1x6x88xf32>
    %48 = vector.shape_cast %47 : vector<1x6x88xf32> to vector<6x88xf32>
    %49 = vector.extract_strided_slice %48 {offsets = [0, 0], sizes = [4, 88], strides = [1, 1]} : vector<6x88xf32> to vector<4x88xf32>
    %50 = vector.broadcast %28 : vector<1x88xf32> to vector<4x88xf32>
    %51 = arith.mulf %50, %49 : vector<4x88xf32>
    %52 = arith.addf %46, %51 : vector<4x88xf32>
    %53 = vector.extract_strided_slice %48 {offsets = [1, 0], sizes = [4, 88], strides = [1, 1]} : vector<6x88xf32> to vector<4x88xf32>
    %54 = vector.broadcast %30 : vector<1x88xf32> to vector<4x88xf32>
    %55 = arith.mulf %54, %53 : vector<4x88xf32>
    %56 = arith.addf %52, %55 : vector<4x88xf32>
    %57 = vector.extract_strided_slice %48 {offsets = [2, 0], sizes = [4, 88], strides = [1, 1]} : vector<6x88xf32> to vector<4x88xf32>
    %58 = vector.broadcast %32 : vector<1x88xf32> to vector<4x88xf32>
    %59 = arith.mulf %58, %57 : vector<4x88xf32>
    %60 = arith.addf %56, %59 : vector<4x88xf32>
    %c1_48 = arith.constant 1 : index
    %c0_49 = arith.constant 0 : index
    %c0_50 = arith.constant 0 : index
    %61 = vector.load %arg9[%c1_48, %c0_49, %c0_50] : memref<6x6x88xf32, #tpu.memory_space<vmem>>, vector<1x6x88xf32>
    %62 = vector.shape_cast %61 : vector<1x6x88xf32> to vector<6x88xf32>
    %63 = vector.extract_strided_slice %62 {offsets = [0, 0], sizes = [4, 88], strides = [1, 1]} : vector<6x88xf32> to vector<4x88xf32>
    %64 = vector.broadcast %34 : vector<1x88xf32> to vector<4x88xf32>
    %65 = arith.mulf %64, %63 : vector<4x88xf32>
    %66 = arith.addf %60, %65 : vector<4x88xf32>
    %67 = vector.extract_strided_slice %62 {offsets = [1, 0], sizes = [4, 88], strides = [1, 1]} : vector<6x88xf32> to vector<4x88xf32>
    %68 = vector.broadcast %36 : vector<1x88xf32> to vector<4x88xf32>
    %69 = arith.mulf %68, %67 : vector<4x88xf32>
    %70 = arith.addf %66, %69 : vector<4x88xf32>
    %71 = vector.extract_strided_slice %62 {offsets = [2, 0], sizes = [4, 88], strides = [1, 1]} : vector<6x88xf32> to vector<4x88xf32>
    %72 = vector.broadcast %38 : vector<1x88xf32> to vector<4x88xf32>
    %73 = arith.mulf %72, %71 : vector<4x88xf32>
    %74 = arith.addf %70, %73 : vector<4x88xf32>
    %c2_51 = arith.constant 2 : index
    %c0_52 = arith.constant 0 : index
    %c0_53 = arith.constant 0 : index
    %75 = vector.load %arg9[%c2_51, %c0_52, %c0_53] : memref<6x6x88xf32, #tpu.memory_space<vmem>>, vector<1x6x88xf32>
    %76 = vector.shape_cast %75 : vector<1x6x88xf32> to vector<6x88xf32>
    %77 = vector.extract_strided_slice %76 {offsets = [0, 0], sizes = [4, 88], strides = [1, 1]} : vector<6x88xf32> to vector<4x88xf32>
    %78 = vector.broadcast %40 : vector<1x88xf32> to vector<4x88xf32>
    %79 = arith.mulf %78, %77 : vector<4x88xf32>
    %80 = arith.addf %74, %79 : vector<4x88xf32>
    %81 = vector.extract_strided_slice %76 {offsets = [1, 0], sizes = [4, 88], strides = [1, 1]} : vector<6x88xf32> to vector<4x88xf32>
    %82 = vector.broadcast %42 : vector<1x88xf32> to vector<4x88xf32>
    %83 = arith.mulf %82, %81 : vector<4x88xf32>
    %84 = arith.addf %80, %83 : vector<4x88xf32>
    %85 = vector.extract_strided_slice %76 {offsets = [2, 0], sizes = [4, 88], strides = [1, 1]} : vector<6x88xf32> to vector<4x88xf32>
    %86 = vector.broadcast %44 : vector<1x88xf32> to vector<4x88xf32>
    %87 = arith.mulf %86, %85 : vector<4x88xf32>
    %88 = arith.addf %84, %87 : vector<4x88xf32>
    %89 = vector.broadcast %45 : vector<1x88xf32> to vector<4x88xf32>
    %90 = arith.addf %88, %89 : vector<4x88xf32>
    %cst_54 = arith.constant 0.000000e+00 : f32
    %91 = vector.broadcast %cst_54 : f32 to vector<4x88xf32>
    %92 = arith.maximumf %90, %91 : vector<4x88xf32>
    %c0_55 = arith.constant 0 : index
    %c0_56 = arith.constant 0 : index
    %93 = vector.load %arg10[%c0_55, %c0_56] : memref<16x88xf32, #tpu.memory_space<vmem>>, vector<4x88xf32>
    tpu.vector_store %arg10[%c0_55, %c0_56], %92 {strides = array<i32>} : memref<16x88xf32, #tpu.memory_space<vmem>>, vector<4x88xf32>,
    %cst_57 = arith.constant 0.000000e+00 : f32
    %94 = vector.broadcast %cst_57 : f32 to vector<4x88xf32>
    %c1_58 = arith.constant 1 : index
    %c0_59 = arith.constant 0 : index
    %c0_60 = arith.constant 0 : index
    %95 = vector.load %arg9[%c1_58, %c0_59, %c0_60] : memref<6x6x88xf32, #tpu.memory_space<vmem>>, vector<1x6x88xf32>
    %96 = vector.shape_cast %95 : vector<1x6x88xf32> to vector<6x88xf32>
    %97 = vector.extract_strided_slice %96 {offsets = [0, 0], sizes = [4, 88], strides = [1, 1]} : vector<6x88xf32> to vector<4x88xf32>
    %98 = vector.broadcast %28 : vector<1x88xf32> to vector<4x88xf32>
    %99 = arith.mulf %98, %97 : vector<4x88xf32>
    %100 = arith.addf %94, %99 : vector<4x88xf32>
    %101 = vector.extract_strided_slice %96 {offsets = [1, 0], sizes = [4, 88], strides = [1, 1]} : vector<6x88xf32> to vector<4x88xf32>
    %102 = vector.broadcast %30 : vector<1x88xf32> to vector<4x88xf32>
    %103 = arith.mulf %102, %101 : vector<4x88xf32>
    %104 = arith.addf %100, %103 : vector<4x88xf32>
    %105 = vector.extract_strided_slice %96 {offsets = [2, 0], sizes = [4, 88], strides = [1, 1]} : vector<6x88xf32> to vector<4x88xf32>
    %106 = vector.broadcast %32 : vector<1x88xf32> to vector<4x88xf32>
    %107 = arith.mulf %106, %105 : vector<4x88xf32>
    %108 = arith.addf %104, %107 : vector<4x88xf32>
    %c2_61 = arith.constant 2 : index
    %c0_62 = arith.constant 0 : index
    %c0_63 = arith.constant 0 : index
    %109 = vector.load %arg9[%c2_61, %c0_62, %c0_63] : memref<6x6x88xf32, #tpu.memory_space<vmem>>, vector<1x6x88xf32>
    %110 = vector.shape_cast %109 : vector<1x6x88xf32> to vector<6x88xf32>
    %111 = vector.extract_strided_slice %110 {offsets = [0, 0], sizes = [4, 88], strides = [1, 1]} : vector<6x88xf32> to vector<4x88xf32>
    %112 = vector.broadcast %34 : vector<1x88xf32> to vector<4x88xf32>
    %113 = arith.mulf %112, %111 : vector<4x88xf32>
    %114 = arith.addf %108, %113 : vector<4x88xf32>
    %115 = vector.extract_strided_slice %110 {offsets = [1, 0], sizes = [4, 88], strides = [1, 1]} : vector<6x88xf32> to vector<4x88xf32>
    %116 = vector.broadcast %36 : vector<1x88xf32> to vector<4x88xf32>
    %117 = arith.mulf %116, %115 : vector<4x88xf32>
    %118 = arith.addf %114, %117 : vector<4x88xf32>
    %119 = vector.extract_strided_slice %110 {offsets = [2, 0], sizes = [4, 88], strides = [1, 1]} : vector<6x88xf32> to vector<4x88xf32>
    %120 = vector.broadcast %38 : vector<1x88xf32> to vector<4x88xf32>
    %121 = arith.mulf %120, %119 : vector<4x88xf32>
    %122 = arith.addf %118, %121 : vector<4x88xf32>
    %c3_64 = arith.constant 3 : index
    %c0_65 = arith.constant 0 : index
    %c0_66 = arith.constant 0 : index
    %123 = vector.load %arg9[%c3_64, %c0_65, %c0_66] : memref<6x6x88xf32, #tpu.memory_space<vmem>>, vector<1x6x88xf32>
    %124 = vector.shape_cast %123 : vector<1x6x88xf32> to vector<6x88xf32>
    %125 = vector.extract_strided_slice %124 {offsets = [0, 0], sizes = [4, 88], strides = [1, 1]} : vector<6x88xf32> to vector<4x88xf32>
    %126 = vector.broadcast %40 : vector<1x88xf32> to vector<4x88xf32>
    %127 = arith.mulf %126, %125 : vector<4x88xf32>
    %128 = arith.addf %122, %127 : vector<4x88xf32>
    %129 = vector.extract_strided_slice %124 {offsets = [1, 0], sizes = [4, 88], strides = [1, 1]} : vector<6x88xf32> to vector<4x88xf32>
    %130 = vector.broadcast %42 : vector<1x88xf32> to vector<4x88xf32>
    %131 = arith.mulf %130, %129 : vector<4x88xf32>
    %132 = arith.addf %128, %131 : vector<4x88xf32>
    %133 = vector.extract_strided_slice %124 {offsets = [2, 0], sizes = [4, 88], strides = [1, 1]} : vector<6x88xf32> to vector<4x88xf32>
    %134 = vector.broadcast %44 : vector<1x88xf32> to vector<4x88xf32>
    %135 = arith.mulf %134, %133 : vector<4x88xf32>
    %136 = arith.addf %132, %135 : vector<4x88xf32>
    %137 = vector.broadcast %45 : vector<1x88xf32> to vector<4x88xf32>
    %138 = arith.addf %136, %137 : vector<4x88xf32>
    %cst_67 = arith.constant 0.000000e+00 : f32
    %139 = vector.broadcast %cst_67 : f32 to vector<4x88xf32>
    %140 = arith.maximumf %138, %139 : vector<4x88xf32>
    %c4_68 = arith.constant 4 : index
    %c0_69 = arith.constant 0 : index
    %141 = vector.load %arg10[%c4_68, %c0_69] : memref<16x88xf32, #tpu.memory_space<vmem>>, vector<4x88xf32>
    tpu.vector_store %arg10[%c4_68, %c0_69], %140 {strides = array<i32>} : memref<16x88xf32, #tpu.memory_space<vmem>>, vector<4x88xf32>,
    %cst_70 = arith.constant 0.000000e+00 : f32
    %142 = vector.broadcast %cst_70 : f32 to vector<4x88xf32>
    %c2_71 = arith.constant 2 : index
    %c0_72 = arith.constant 0 : index
    %c0_73 = arith.constant 0 : index
    %143 = vector.load %arg9[%c2_71, %c0_72, %c0_73] : memref<6x6x88xf32, #tpu.memory_space<vmem>>, vector<1x6x88xf32>
    %144 = vector.shape_cast %143 : vector<1x6x88xf32> to vector<6x88xf32>
    %145 = vector.extract_strided_slice %144 {offsets = [0, 0], sizes = [4, 88], strides = [1, 1]} : vector<6x88xf32> to vector<4x88xf32>
    %146 = vector.broadcast %28 : vector<1x88xf32> to vector<4x88xf32>
    %147 = arith.mulf %146, %145 : vector<4x88xf32>
    %148 = arith.addf %142, %147 : vector<4x88xf32>
    %149 = vector.extract_strided_slice %144 {offsets = [1, 0], sizes = [4, 88], strides = [1, 1]} : vector<6x88xf32> to vector<4x88xf32>
    %150 = vector.broadcast %30 : vector<1x88xf32> to vector<4x88xf32>
    %151 = arith.mulf %150, %149 : vector<4x88xf32>
    %152 = arith.addf %148, %151 : vector<4x88xf32>
    %153 = vector.extract_strided_slice %144 {offsets = [2, 0], sizes = [4, 88], strides = [1, 1]} : vector<6x88xf32> to vector<4x88xf32>
    %154 = vector.broadcast %32 : vector<1x88xf32> to vector<4x88xf32>
    %155 = arith.mulf %154, %153 : vector<4x88xf32>
    %156 = arith.addf %152, %155 : vector<4x88xf32>
    %c3_74 = arith.constant 3 : index
    %c0_75 = arith.constant 0 : index
    %c0_76 = arith.constant 0 : index
    %157 = vector.load %arg9[%c3_74, %c0_75, %c0_76] : memref<6x6x88xf32, #tpu.memory_space<vmem>>, vector<1x6x88xf32>
    %158 = vector.shape_cast %157 : vector<1x6x88xf32> to vector<6x88xf32>
    %159 = vector.extract_strided_slice %158 {offsets = [0, 0], sizes = [4, 88], strides = [1, 1]} : vector<6x88xf32> to vector<4x88xf32>
    %160 = vector.broadcast %34 : vector<1x88xf32> to vector<4x88xf32>
    %161 = arith.mulf %160, %159 : vector<4x88xf32>
    %162 = arith.addf %156, %161 : vector<4x88xf32>
    %163 = vector.extract_strided_slice %158 {offsets = [1, 0], sizes = [4, 88], strides = [1, 1]} : vector<6x88xf32> to vector<4x88xf32>
    %164 = vector.broadcast %36 : vector<1x88xf32> to vector<4x88xf32>
    %165 = arith.mulf %164, %163 : vector<4x88xf32>
    %166 = arith.addf %162, %165 : vector<4x88xf32>
    %167 = vector.extract_strided_slice %158 {offsets = [2, 0], sizes = [4, 88], strides = [1, 1]} : vector<6x88xf32> to vector<4x88xf32>
    %168 = vector.broadcast %38 : vector<1x88xf32> to vector<4x88xf32>
    %169 = arith.mulf %168, %167 : vector<4x88xf32>
    %170 = arith.addf %166, %169 : vector<4x88xf32>
    %c4_77 = arith.constant 4 : index
    %c0_78 = arith.constant 0 : index
    %c0_79 = arith.constant 0 : index
    %171 = vector.load %arg9[%c4_77, %c0_78, %c0_79] : memref<6x6x88xf32, #tpu.memory_space<vmem>>, vector<1x6x88xf32>
    %172 = vector.shape_cast %171 : vector<1x6x88xf32> to vector<6x88xf32>
    %173 = vector.extract_strided_slice %172 {offsets = [0, 0], sizes = [4, 88], strides = [1, 1]} : vector<6x88xf32> to vector<4x88xf32>
    %174 = vector.broadcast %40 : vector<1x88xf32> to vector<4x88xf32>
    %175 = arith.mulf %174, %173 : vector<4x88xf32>
    %176 = arith.addf %170, %175 : vector<4x88xf32>
    %177 = vector.extract_strided_slice %172 {offsets = [1, 0], sizes = [4, 88], strides = [1, 1]} : vector<6x88xf32> to vector<4x88xf32>
    %178 = vector.broadcast %42 : vector<1x88xf32> to vector<4x88xf32>
    %179 = arith.mulf %178, %177 : vector<4x88xf32>
    %180 = arith.addf %176, %179 : vector<4x88xf32>
    %181 = vector.extract_strided_slice %172 {offsets = [2, 0], sizes = [4, 88], strides = [1, 1]} : vector<6x88xf32> to vector<4x88xf32>
    %182 = vector.broadcast %44 : vector<1x88xf32> to vector<4x88xf32>
    %183 = arith.mulf %182, %181 : vector<4x88xf32>
    %184 = arith.addf %180, %183 : vector<4x88xf32>
    %185 = vector.broadcast %45 : vector<1x88xf32> to vector<4x88xf32>
    %186 = arith.addf %184, %185 : vector<4x88xf32>
    %cst_80 = arith.constant 0.000000e+00 : f32
    %187 = vector.broadcast %cst_80 : f32 to vector<4x88xf32>
    %188 = arith.maximumf %186, %187 : vector<4x88xf32>
    %c8_81 = arith.constant 8 : index
    %c0_82 = arith.constant 0 : index
    %189 = vector.load %arg10[%c8_81, %c0_82] : memref<16x88xf32, #tpu.memory_space<vmem>>, vector<4x88xf32>
    tpu.vector_store %arg10[%c8_81, %c0_82], %188 {strides = array<i32>} : memref<16x88xf32, #tpu.memory_space<vmem>>, vector<4x88xf32>,
    %cst_83 = arith.constant 0.000000e+00 : f32
    %190 = vector.broadcast %cst_83 : f32 to vector<4x88xf32>
    %c3_84 = arith.constant 3 : index
    %c0_85 = arith.constant 0 : index
    %c0_86 = arith.constant 0 : index
    %191 = vector.load %arg9[%c3_84, %c0_85, %c0_86] : memref<6x6x88xf32, #tpu.memory_space<vmem>>, vector<1x6x88xf32>
    %192 = vector.shape_cast %191 : vector<1x6x88xf32> to vector<6x88xf32>
    %193 = vector.extract_strided_slice %192 {offsets = [0, 0], sizes = [4, 88], strides = [1, 1]} : vector<6x88xf32> to vector<4x88xf32>
    %194 = vector.broadcast %28 : vector<1x88xf32> to vector<4x88xf32>
    %195 = arith.mulf %194, %193 : vector<4x88xf32>
    %196 = arith.addf %190, %195 : vector<4x88xf32>
    %197 = vector.extract_strided_slice %192 {offsets = [1, 0], sizes = [4, 88], strides = [1, 1]} : vector<6x88xf32> to vector<4x88xf32>
    %198 = vector.broadcast %30 : vector<1x88xf32> to vector<4x88xf32>
    %199 = arith.mulf %198, %197 : vector<4x88xf32>
    %200 = arith.addf %196, %199 : vector<4x88xf32>
    %201 = vector.extract_strided_slice %192 {offsets = [2, 0], sizes = [4, 88], strides = [1, 1]} : vector<6x88xf32> to vector<4x88xf32>
    %202 = vector.broadcast %32 : vector<1x88xf32> to vector<4x88xf32>
    %203 = arith.mulf %202, %201 : vector<4x88xf32>
    %204 = arith.addf %200, %203 : vector<4x88xf32>
    %c4_87 = arith.constant 4 : index
    %c0_88 = arith.constant 0 : index
    %c0_89 = arith.constant 0 : index
    %205 = vector.load %arg9[%c4_87, %c0_88, %c0_89] : memref<6x6x88xf32, #tpu.memory_space<vmem>>, vector<1x6x88xf32>
    %206 = vector.shape_cast %205 : vector<1x6x88xf32> to vector<6x88xf32>
    %207 = vector.extract_strided_slice %206 {offsets = [0, 0], sizes = [4, 88], strides = [1, 1]} : vector<6x88xf32> to vector<4x88xf32>
    %208 = vector.broadcast %34 : vector<1x88xf32> to vector<4x88xf32>
    %209 = arith.mulf %208, %207 : vector<4x88xf32>
    %210 = arith.addf %204, %209 : vector<4x88xf32>
    %211 = vector.extract_strided_slice %206 {offsets = [1, 0], sizes = [4, 88], strides = [1, 1]} : vector<6x88xf32> to vector<4x88xf32>
    %212 = vector.broadcast %36 : vector<1x88xf32> to vector<4x88xf32>
    %213 = arith.mulf %212, %211 : vector<4x88xf32>
    %214 = arith.addf %210, %213 : vector<4x88xf32>
    %215 = vector.extract_strided_slice %206 {offsets = [2, 0], sizes = [4, 88], strides = [1, 1]} : vector<6x88xf32> to vector<4x88xf32>
    %216 = vector.broadcast %38 : vector<1x88xf32> to vector<4x88xf32>
    %217 = arith.mulf %216, %215 : vector<4x88xf32>
    %218 = arith.addf %214, %217 : vector<4x88xf32>
    %c5_90 = arith.constant 5 : index
    %c0_91 = arith.constant 0 : index
    %c0_92 = arith.constant 0 : index
    %219 = vector.load %arg9[%c5_90, %c0_91, %c0_92] : memref<6x6x88xf32, #tpu.memory_space<vmem>>, vector<1x6x88xf32>
    %220 = vector.shape_cast %219 : vector<1x6x88xf32> to vector<6x88xf32>
    %221 = vector.extract_strided_slice %220 {offsets = [0, 0], sizes = [4, 88], strides = [1, 1]} : vector<6x88xf32> to vector<4x88xf32>
    %222 = vector.broadcast %40 : vector<1x88xf32> to vector<4x88xf32>
    %223 = arith.mulf %222, %221 : vector<4x88xf32>
    %224 = arith.addf %218, %223 : vector<4x88xf32>
    %225 = vector.extract_strided_slice %220 {offsets = [1, 0], sizes = [4, 88], strides = [1, 1]} : vector<6x88xf32> to vector<4x88xf32>
    %226 = vector.broadcast %42 : vector<1x88xf32> to vector<4x88xf32>
    %227 = arith.mulf %226, %225 : vector<4x88xf32>
    %228 = arith.addf %224, %227 : vector<4x88xf32>
    %229 = vector.extract_strided_slice %220 {offsets = [2, 0], sizes = [4, 88], strides = [1, 1]} : vector<6x88xf32> to vector<4x88xf32>
    %230 = vector.broadcast %44 : vector<1x88xf32> to vector<4x88xf32>
    %231 = arith.mulf %230, %229 : vector<4x88xf32>
    %232 = arith.addf %228, %231 : vector<4x88xf32>
    %233 = vector.broadcast %45 : vector<1x88xf32> to vector<4x88xf32>
    %234 = arith.addf %232, %233 : vector<4x88xf32>
    %cst_93 = arith.constant 0.000000e+00 : f32
    %235 = vector.broadcast %cst_93 : f32 to vector<4x88xf32>
    %236 = arith.maximumf %234, %235 : vector<4x88xf32>
    %c12 = arith.constant 12 : index
    %c0_94 = arith.constant 0 : index
    %237 = vector.load %arg10[%c12, %c0_94] : memref<16x88xf32, #tpu.memory_space<vmem>>, vector<4x88xf32>
    tpu.vector_store %arg10[%c12, %c0_94], %236 {strides = array<i32>} : memref<16x88xf32, #tpu.memory_space<vmem>>, vector<4x88xf32>,
    %c0_95 = arith.constant 0 : index
    %c0_96 = arith.constant 0 : index
    %238 = vector.load %arg10[%c0_95, %c0_96] : memref<16x88xf32, #tpu.memory_space<vmem>>, vector<16x88xf32>
    %239 = arith.truncf %238 : vector<16x88xf32> to vector<16x88xbf16>
    %c0_97 = arith.constant 0 : index
    %c0_98 = arith.constant 0 : index
    %240 = vector.load %arg6[%c0_97, %c0_98] : memref<88x24xbf16, #tpu.memory_space<vmem>>, vector<88x24xbf16>
    %cst_99 = arith.constant dense<0.000000e+00> : vector<16x24xf32>
    %241 = tpu.matmul %239, %240, %cst_99 {dimension_numbers = #tpu.dot_dimension_numbers<[1], [0], [0], [1], [0, 0, 1, 1], [], []>} : vector<16x88xbf16>, vector<88x24xbf16>, vector<16x24xf32> -> vector<16x24xf32>
    %c0_100 = arith.constant 0 : index
    %c0_101 = arith.constant 0 : index
    %242 = vector.load %arg7[%c0_100, %c0_101] : memref<1x24xf32, #tpu.memory_space<vmem>>, vector<1x24xf32>
    %243 = vector.broadcast %242 : vector<1x24xf32> to vector<16x24xf32>
    %244 = arith.addf %241, %243 : vector<16x24xf32>
    %245 = arith.extf %1 : vector<16x24xbf16> to vector<16x24xf32>
    %246 = arith.addf %244, %245 : vector<16x24xf32>
    %247 = arith.truncf %246 : vector<16x24xf32> to vector<16x24xbf16>
    %c0_102 = arith.constant 0 : index
    %c0_103 = arith.constant 0 : index
    %c0_104 = arith.constant 0 : index
    %248 = vector.load %arg8[%c0_102, %c0_103, %c0_104] : memref<1x16x24xbf16, #tpu.memory_space<vmem>>, vector<1x16x24xbf16>
    %249 = vector.shape_cast %248 : vector<1x16x24xbf16> to vector<16x24xbf16>
    %250 = vector.shape_cast %247 : vector<16x24xbf16> to vector<1x16x24xbf16>
    tpu.vector_store %arg8[%c0_102, %c0_103, %c0_104], %250 {strides = array<i32>} : memref<1x16x24xbf16, #tpu.memory_space<vmem>>, vector<1x16x24xbf16>,
    return
  }
  func.func @transform_0(%arg0: i32) -> (i32, i32, i32) {
    %c0_i32 = arith.constant 0 : i32
    %c0_i32_0 = arith.constant 0 : i32
    %c0_i32_1 = arith.constant 0 : i32
    return %arg0, %c0_i32, %c0_i32_0 : i32, i32, i32
  }
  func.func @transform_1(%arg0: i32) -> (i32, i32) {
    %c0_i32 = arith.constant 0 : i32
    %c0_i32_0 = arith.constant 0 : i32
    %c0_i32_1 = arith.constant 0 : i32
    return %c0_i32, %c0_i32_0 : i32, i32
  }
  func.func @transform_2(%arg0: i32) -> (i32, i32) {
    %c0_i32 = arith.constant 0 : i32
    %c0_i32_0 = arith.constant 0 : i32
    %c0_i32_1 = arith.constant 0 : i32
    return %c0_i32, %c0_i32_0 : i32, i32
  }
  func.func @transform_3(%arg0: i32) -> (i32, i32, i32) {
    %c0_i32 = arith.constant 0 : i32
    %c0_i32_0 = arith.constant 0 : i32
    %c0_i32_1 = arith.constant 0 : i32
    %c0_i32_2 = arith.constant 0 : i32
    return %c0_i32, %c0_i32_0, %c0_i32_1 : i32, i32, i32
  }
  func.func @transform_4(%arg0: i32) -> (i32, i32) {
    %c0_i32 = arith.constant 0 : i32
    %c0_i32_0 = arith.constant 0 : i32
    %c0_i32_1 = arith.constant 0 : i32
    return %c0_i32, %c0_i32_0 : i32, i32
  }
  func.func @transform_5(%arg0: i32) -> (i32, i32) {
    %c0_i32 = arith.constant 0 : i32
    %c0_i32_0 = arith.constant 0 : i32
    %c0_i32_1 = arith.constant 0 : i32
    return %c0_i32, %c0_i32_0 : i32, i32
  }
  func.func @transform_6(%arg0: i32) -> (i32, i32) {
    %c0_i32 = arith.constant 0 : i32
    %c0_i32_0 = arith.constant 0 : i32
    %c0_i32_1 = arith.constant 0 : i32
    return %c0_i32, %c0_i32_0 : i32, i32
  }
  func.func @transform_7(%arg0: i32) -> (i32, i32, i32) {
    %c0_i32 = arith.constant 0 : i32
    %c0_i32_0 = arith.constant 0 : i32
    %c0_i32_1 = arith.constant 0 : i32
    return %arg0, %c0_i32, %c0_i32_0 : i32, i32, i32
  }
}

module attributes {stable_mosaic.version = 11 : i64} {
  func.func @_mm_kernel(%arg0: i32, %arg1: memref<8x40xbf16, #tpu.memory_space<vmem>>, %arg2: memref<40x240xbf16, #tpu.memory_space<vmem>>, %arg3: memref<1x240xf32, #tpu.memory_space<vmem>>, %arg4: memref<8x240xbf16, #tpu.memory_space<vmem>>) attributes {dimension_semantics = [#tpu.dimension_semantics<parallel>], iteration_bounds = array<i64: 1>, scalar_prefetch = 0 : i64, scratch_operands = 0 : i64, tpu.core_type = #tpu.core_type<tc>, window_params = [{transform_indices = @transform_0, window_bounds = array<i64: 8, 40>}, {pipeline_mode = #tpu.pipeline_mode<synchronous>, transform_indices = @transform_1, window_bounds = array<i64: 40, 240>}, {pipeline_mode = #tpu.pipeline_mode<synchronous>, transform_indices = @transform_2, window_bounds = array<i64: 1, 240>}, {transform_indices = @transform_3, window_bounds = array<i64: 8, 240>}]} {
    %c0 = arith.constant 0 : index
    %c0_0 = arith.constant 0 : index
    %0 = vector.load %arg1[%c0, %c0_0] : memref<8x40xbf16, #tpu.memory_space<vmem>>, vector<8x40xbf16>
    %c0_1 = arith.constant 0 : index
    %c0_2 = arith.constant 0 : index
    %1 = vector.load %arg2[%c0_1, %c0_2] : memref<40x240xbf16, #tpu.memory_space<vmem>>, vector<40x240xbf16>
    %cst = arith.constant dense<0.000000e+00> : vector<8x240xf32>
    %2 = tpu.matmul %0, %1, %cst {dimension_numbers = #tpu.dot_dimension_numbers<[1], [0], [0], [1], [0, 0, 1, 1], [], []>} : vector<8x40xbf16>, vector<40x240xbf16>, vector<8x240xf32> -> vector<8x240xf32>
    %c0_3 = arith.constant 0 : index
    %c0_4 = arith.constant 0 : index
    %3 = vector.load %arg3[%c0_3, %c0_4] : memref<1x240xf32, #tpu.memory_space<vmem>>, vector<1x240xf32>
    %4 = vector.broadcast %3 : vector<1x240xf32> to vector<8x240xf32>
    %5 = arith.addf %2, %4 : vector<8x240xf32>
    %cst_5 = arith.constant 3.000000e+00 : f32
    %6 = vector.broadcast %cst_5 : f32 to vector<8x240xf32>
    %7 = arith.addf %5, %6 : vector<8x240xf32>
    %cst_6 = arith.constant 0.000000e+00 : f32
    %cst_7 = arith.constant 6.000000e+00 : f32
    %8 = vector.broadcast %cst_6 : f32 to vector<8x240xf32>
    %9 = arith.maximumf %8, %7 : vector<8x240xf32>
    %10 = vector.broadcast %cst_7 : f32 to vector<8x240xf32>
    %11 = arith.minimumf %10, %9 : vector<8x240xf32>
    %12 = arith.mulf %5, %11 : vector<8x240xf32>
    %cst_8 = arith.constant 0.166666672 : f32
    %13 = vector.broadcast %cst_8 : f32 to vector<8x240xf32>
    %14 = arith.mulf %12, %13 : vector<8x240xf32>
    %15 = arith.truncf %14 : vector<8x240xf32> to vector<8x240xbf16>
    %c0_9 = arith.constant 0 : index
    %c0_10 = arith.constant 0 : index
    %16 = vector.load %arg4[%c0_9, %c0_10] : memref<8x240xbf16, #tpu.memory_space<vmem>>, vector<8x240xbf16>
    tpu.vector_store %arg4[%c0_9, %c0_10], %15 {strides = array<i32>} : memref<8x240xbf16, #tpu.memory_space<vmem>>, vector<8x240xbf16>,
    return
  }
  func.func @transform_0(%arg0: i32) -> (i32, i32) {
    %c0_i32 = arith.constant 0 : i32
    %c0_i32_0 = arith.constant 0 : i32
    return %arg0, %c0_i32 : i32, i32
  }
  func.func @transform_1(%arg0: i32) -> (i32, i32) {
    %c0_i32 = arith.constant 0 : i32
    %c0_i32_0 = arith.constant 0 : i32
    %c0_i32_1 = arith.constant 0 : i32
    return %c0_i32, %c0_i32_0 : i32, i32
  }
  func.func @transform_2(%arg0: i32) -> (i32, i32) {
    %c0_i32 = arith.constant 0 : i32
    %c0_i32_0 = arith.constant 0 : i32
    %c0_i32_1 = arith.constant 0 : i32
    return %c0_i32, %c0_i32_0 : i32, i32
  }
  func.func @transform_3(%arg0: i32) -> (i32, i32) {
    %c0_i32 = arith.constant 0 : i32
    %c0_i32_0 = arith.constant 0 : i32
    return %arg0, %c0_i32 : i32, i32
  }
}

module attributes {stable_mosaic.version = 11 : i64} {
  func.func @_block_kernel(%arg0: i32, %arg1: memref<1x16x24xbf16, #tpu.memory_space<vmem>>, %arg2: memref<24x96xbf16, #tpu.memory_space<vmem>>, %arg3: memref<1x96xf32, #tpu.memory_space<vmem>>, %arg4: memref<25x1x96xf32, #tpu.memory_space<vmem>>, %arg5: memref<1x96xf32, #tpu.memory_space<vmem>>, %arg6: memref<96x24xf32, #tpu.memory_space<vmem>>, %arg7: memref<1x24xf32, #tpu.memory_space<vmem>>, %arg8: memref<24x96xf32, #tpu.memory_space<vmem>>, %arg9: memref<1x96xf32, #tpu.memory_space<vmem>>, %arg10: memref<2x3xf32, #tpu.memory_space<vmem>>, %arg11: memref<96x40xbf16, #tpu.memory_space<vmem>>, %arg12: memref<1x40xf32, #tpu.memory_space<vmem>>, %arg13: memref<1x4x40xbf16, #tpu.memory_space<vmem>>, %arg14: memref<8x8x96xf32, #tpu.memory_space<vmem>>, %arg15: memref<4x96xf32, #tpu.memory_space<vmem>>) attributes {dimension_semantics = [#tpu.dimension_semantics<parallel>], iteration_bounds = array<i64: 2>, scalar_prefetch = 0 : i64, scratch_operands = 2 : i64, tpu.core_type = #tpu.core_type<tc>, window_params = [{transform_indices = @transform_0, window_bounds = array<i64: 1, 16, 24>}, {pipeline_mode = #tpu.pipeline_mode<synchronous>, transform_indices = @transform_1, window_bounds = array<i64: 24, 96>}, {pipeline_mode = #tpu.pipeline_mode<synchronous>, transform_indices = @transform_2, window_bounds = array<i64: 1, 96>}, {pipeline_mode = #tpu.pipeline_mode<synchronous>, transform_indices = @transform_3, window_bounds = array<i64: 25, 1, 96>}, {pipeline_mode = #tpu.pipeline_mode<synchronous>, transform_indices = @transform_4, window_bounds = array<i64: 1, 96>}, {pipeline_mode = #tpu.pipeline_mode<synchronous>, transform_indices = @transform_5, window_bounds = array<i64: 96, 24>}, {pipeline_mode = #tpu.pipeline_mode<synchronous>, transform_indices = @transform_6, window_bounds = array<i64: 1, 24>}, {pipeline_mode = #tpu.pipeline_mode<synchronous>, transform_indices = @transform_7, window_bounds = array<i64: 24, 96>}, {pipeline_mode = #tpu.pipeline_mode<synchronous>, transform_indices = @transform_8, window_bounds = array<i64: 1, 96>}, {pipeline_mode = #tpu.pipeline_mode<synchronous>, transform_indices = @transform_9, window_bounds = array<i64: 2, 3>}, {pipeline_mode = #tpu.pipeline_mode<synchronous>, transform_indices = @transform_10, window_bounds = array<i64: 96, 40>}, {pipeline_mode = #tpu.pipeline_mode<synchronous>, transform_indices = @transform_11, window_bounds = array<i64: 1, 40>}, {transform_indices = @transform_12, window_bounds = array<i64: 1, 4, 40>}]} {
    %c0 = arith.constant 0 : index
    %c0_0 = arith.constant 0 : index
    %c0_1 = arith.constant 0 : index
    %0 = vector.load %arg1[%c0, %c0_0, %c0_1] : memref<1x16x24xbf16, #tpu.memory_space<vmem>>, vector<1x16x24xbf16>
    %1 = vector.shape_cast %0 : vector<1x16x24xbf16> to vector<16x24xbf16>
    %c0_2 = arith.constant 0 : index
    %c0_3 = arith.constant 0 : index
    %2 = vector.load %arg2[%c0_2, %c0_3] : memref<24x96xbf16, #tpu.memory_space<vmem>>, vector<24x96xbf16>
    %cst = arith.constant dense<0.000000e+00> : vector<16x96xf32>
    %3 = tpu.matmul %1, %2, %cst {dimension_numbers = #tpu.dot_dimension_numbers<[1], [0], [0], [1], [0, 0, 1, 1], [], []>} : vector<16x24xbf16>, vector<24x96xbf16>, vector<16x96xf32> -> vector<16x96xf32>
    %c0_4 = arith.constant 0 : index
    %c0_5 = arith.constant 0 : index
    %4 = vector.load %arg3[%c0_4, %c0_5] : memref<1x96xf32, #tpu.memory_space<vmem>>, vector<1x96xf32>
    %5 = vector.broadcast %4 : vector<1x96xf32> to vector<16x96xf32>
    %6 = arith.addf %3, %5 : vector<16x96xf32>
    %cst_6 = arith.constant 3.000000e+00 : f32
    %7 = vector.broadcast %cst_6 : f32 to vector<16x96xf32>
    %8 = arith.addf %6, %7 : vector<16x96xf32>
    %cst_7 = arith.constant 0.000000e+00 : f32
    %cst_8 = arith.constant 6.000000e+00 : f32
    %9 = vector.broadcast %cst_7 : f32 to vector<16x96xf32>
    %10 = arith.maximumf %9, %8 : vector<16x96xf32>
    %11 = vector.broadcast %cst_8 : f32 to vector<16x96xf32>
    %12 = arith.minimumf %11, %10 : vector<16x96xf32>
    %13 = arith.mulf %6, %12 : vector<16x96xf32>
    %cst_9 = arith.constant 0.166666672 : f32
    %14 = vector.broadcast %cst_9 : f32 to vector<16x96xf32>
    %15 = arith.mulf %13, %14 : vector<16x96xf32>
    %cst_10 = arith.constant 0.000000e+00 : f32
    %16 = vector.broadcast %cst_10 : f32 to vector<8x8x96xf32>
    %c0_11 = arith.constant 0 : index
    %c0_12 = arith.constant 0 : index
    %c0_13 = arith.constant 0 : index
    %17 = vector.load %arg14[%c0_11, %c0_12, %c0_13] : memref<8x8x96xf32, #tpu.memory_space<vmem>>, vector<8x8x96xf32>
    tpu.vector_store %arg14[%c0_11, %c0_12, %c0_13], %16 {strides = array<i32>} : memref<8x8x96xf32, #tpu.memory_space<vmem>>, vector<8x8x96xf32>,
    %18 = vector.extract_strided_slice %15 {offsets = [0, 0], sizes = [4, 96], strides = [1, 1]} : vector<16x96xf32> to vector<4x96xf32>
    %c2 = arith.constant 2 : index
    %c2_14 = arith.constant 2 : index
    %c0_15 = arith.constant 0 : index
    %19 = vector.load %arg14[%c2, %c2_14, %c0_15] : memref<8x8x96xf32, #tpu.memory_space<vmem>>, vector<1x4x96xf32>
    %20 = vector.shape_cast %19 : vector<1x4x96xf32> to vector<4x96xf32>
    %21 = vector.shape_cast %18 : vector<4x96xf32> to vector<1x4x96xf32>
    tpu.vector_store %arg14[%c2, %c2_14, %c0_15], %21 {strides = array<i32>} : memref<8x8x96xf32, #tpu.memory_space<vmem>>, vector<1x4x96xf32>,
    %22 = vector.extract_strided_slice %15 {offsets = [4, 0], sizes = [4, 96], strides = [1, 1]} : vector<16x96xf32> to vector<4x96xf32>
    %c3 = arith.constant 3 : index
    %c2_16 = arith.constant 2 : index
    %c0_17 = arith.constant 0 : index
    %23 = vector.load %arg14[%c3, %c2_16, %c0_17] : memref<8x8x96xf32, #tpu.memory_space<vmem>>, vector<1x4x96xf32>
    %24 = vector.shape_cast %23 : vector<1x4x96xf32> to vector<4x96xf32>
    %25 = vector.shape_cast %22 : vector<4x96xf32> to vector<1x4x96xf32>
    tpu.vector_store %arg14[%c3, %c2_16, %c0_17], %25 {strides = array<i32>} : memref<8x8x96xf32, #tpu.memory_space<vmem>>, vector<1x4x96xf32>,
    %26 = vector.extract_strided_slice %15 {offsets = [8, 0], sizes = [4, 96], strides = [1, 1]} : vector<16x96xf32> to vector<4x96xf32>
    %c4 = arith.constant 4 : index
    %c2_18 = arith.constant 2 : index
    %c0_19 = arith.constant 0 : index
    %27 = vector.load %arg14[%c4, %c2_18, %c0_19] : memref<8x8x96xf32, #tpu.memory_space<vmem>>, vector<1x4x96xf32>
    %28 = vector.shape_cast %27 : vector<1x4x96xf32> to vector<4x96xf32>
    %29 = vector.shape_cast %26 : vector<4x96xf32> to vector<1x4x96xf32>
    tpu.vector_store %arg14[%c4, %c2_18, %c0_19], %29 {strides = array<i32>} : memref<8x8x96xf32, #tpu.memory_space<vmem>>, vector<1x4x96xf32>,
    %30 = vector.extract_strided_slice %15 {offsets = [12, 0], sizes = [4, 96], strides = [1, 1]} : vector<16x96xf32> to vector<4x96xf32>
    %c5 = arith.constant 5 : index
    %c2_20 = arith.constant 2 : index
    %c0_21 = arith.constant 0 : index
    %31 = vector.load %arg14[%c5, %c2_20, %c0_21] : memref<8x8x96xf32, #tpu.memory_space<vmem>>, vector<1x4x96xf32>
    %32 = vector.shape_cast %31 : vector<1x4x96xf32> to vector<4x96xf32>
    %33 = vector.shape_cast %30 : vector<4x96xf32> to vector<1x4x96xf32>
    tpu.vector_store %arg14[%c5, %c2_20, %c0_21], %33 {strides = array<i32>} : memref<8x8x96xf32, #tpu.memory_space<vmem>>, vector<1x4x96xf32>,
    %c0_22 = arith.constant 0 : index
    %c0_23 = arith.constant 0 : index
    %c0_24 = arith.constant 0 : index
    %34 = vector.load %arg4[%c0_22, %c0_23, %c0_24] : memref<25x1x96xf32, #tpu.memory_space<vmem>>, vector<1x1x96xf32>
    %35 = vector.shape_cast %34 : vector<1x1x96xf32> to vector<1x96xf32>
    %c1 = arith.constant 1 : index
    %c0_25 = arith.constant 0 : index
    %c0_26 = arith.constant 0 : index
    %36 = vector.load %arg4[%c1, %c0_25, %c0_26] : memref<25x1x96xf32, #tpu.memory_space<vmem>>, vector<1x1x96xf32>
    %37 = vector.shape_cast %36 : vector<1x1x96xf32> to vector<1x96xf32>
    %c2_27 = arith.constant 2 : index
    %c0_28 = arith.constant 0 : index
    %c0_29 = arith.constant 0 : index
    %38 = vector.load %arg4[%c2_27, %c0_28, %c0_29] : memref<25x1x96xf32, #tpu.memory_space<vmem>>, vector<1x1x96xf32>
    %39 = vector.shape_cast %38 : vector<1x1x96xf32> to vector<1x96xf32>
    %c3_30 = arith.constant 3 : index
    %c0_31 = arith.constant 0 : index
    %c0_32 = arith.constant 0 : index
    %40 = vector.load %arg4[%c3_30, %c0_31, %c0_32] : memref<25x1x96xf32, #tpu.memory_space<vmem>>, vector<1x1x96xf32>
    %41 = vector.shape_cast %40 : vector<1x1x96xf32> to vector<1x96xf32>
    %c4_33 = arith.constant 4 : index
    %c0_34 = arith.constant 0 : index
    %c0_35 = arith.constant 0 : index
    %42 = vector.load %arg4[%c4_33, %c0_34, %c0_35] : memref<25x1x96xf32, #tpu.memory_space<vmem>>, vector<1x1x96xf32>
    %43 = vector.shape_cast %42 : vector<1x1x96xf32> to vector<1x96xf32>
    %c5_36 = arith.constant 5 : index
    %c0_37 = arith.constant 0 : index
    %c0_38 = arith.constant 0 : index
    %44 = vector.load %arg4[%c5_36, %c0_37, %c0_38] : memref<25x1x96xf32, #tpu.memory_space<vmem>>, vector<1x1x96xf32>
    %45 = vector.shape_cast %44 : vector<1x1x96xf32> to vector<1x96xf32>
    %c6 = arith.constant 6 : index
    %c0_39 = arith.constant 0 : index
    %c0_40 = arith.constant 0 : index
    %46 = vector.load %arg4[%c6, %c0_39, %c0_40] : memref<25x1x96xf32, #tpu.memory_space<vmem>>, vector<1x1x96xf32>
    %47 = vector.shape_cast %46 : vector<1x1x96xf32> to vector<1x96xf32>
    %c7 = arith.constant 7 : index
    %c0_41 = arith.constant 0 : index
    %c0_42 = arith.constant 0 : index
    %48 = vector.load %arg4[%c7, %c0_41, %c0_42] : memref<25x1x96xf32, #tpu.memory_space<vmem>>, vector<1x1x96xf32>
    %49 = vector.shape_cast %48 : vector<1x1x96xf32> to vector<1x96xf32>
    %c8 = arith.constant 8 : index
    %c0_43 = arith.constant 0 : index
    %c0_44 = arith.constant 0 : index
    %50 = vector.load %arg4[%c8, %c0_43, %c0_44] : memref<25x1x96xf32, #tpu.memory_space<vmem>>, vector<1x1x96xf32>
    %51 = vector.shape_cast %50 : vector<1x1x96xf32> to vector<1x96xf32>
    %c9 = arith.constant 9 : index
    %c0_45 = arith.constant 0 : index
    %c0_46 = arith.constant 0 : index
    %52 = vector.load %arg4[%c9, %c0_45, %c0_46] : memref<25x1x96xf32, #tpu.memory_space<vmem>>, vector<1x1x96xf32>
    %53 = vector.shape_cast %52 : vector<1x1x96xf32> to vector<1x96xf32>
    %c10 = arith.constant 10 : index
    %c0_47 = arith.constant 0 : index
    %c0_48 = arith.constant 0 : index
    %54 = vector.load %arg4[%c10, %c0_47, %c0_48] : memref<25x1x96xf32, #tpu.memory_space<vmem>>, vector<1x1x96xf32>
    %55 = vector.shape_cast %54 : vector<1x1x96xf32> to vector<1x96xf32>
    %c11 = arith.constant 11 : index
    %c0_49 = arith.constant 0 : index
    %c0_50 = arith.constant 0 : index
    %56 = vector.load %arg4[%c11, %c0_49, %c0_50] : memref<25x1x96xf32, #tpu.memory_space<vmem>>, vector<1x1x96xf32>
    %57 = vector.shape_cast %56 : vector<1x1x96xf32> to vector<1x96xf32>
    %c12 = arith.constant 12 : index
    %c0_51 = arith.constant 0 : index
    %c0_52 = arith.constant 0 : index
    %58 = vector.load %arg4[%c12, %c0_51, %c0_52] : memref<25x1x96xf32, #tpu.memory_space<vmem>>, vector<1x1x96xf32>
    %59 = vector.shape_cast %58 : vector<1x1x96xf32> to vector<1x96xf32>
    %c13 = arith.constant 13 : index
    %c0_53 = arith.constant 0 : index
    %c0_54 = arith.constant 0 : index
    %60 = vector.load %arg4[%c13, %c0_53, %c0_54] : memref<25x1x96xf32, #tpu.memory_space<vmem>>, vector<1x1x96xf32>
    %61 = vector.shape_cast %60 : vector<1x1x96xf32> to vector<1x96xf32>
    %c14 = arith.constant 14 : index
    %c0_55 = arith.constant 0 : index
    %c0_56 = arith.constant 0 : index
    %62 = vector.load %arg4[%c14, %c0_55, %c0_56] : memref<25x1x96xf32, #tpu.memory_space<vmem>>, vector<1x1x96xf32>
    %63 = vector.shape_cast %62 : vector<1x1x96xf32> to vector<1x96xf32>
    %c15 = arith.constant 15 : index
    %c0_57 = arith.constant 0 : index
    %c0_58 = arith.constant 0 : index
    %64 = vector.load %arg4[%c15, %c0_57, %c0_58] : memref<25x1x96xf32, #tpu.memory_space<vmem>>, vector<1x1x96xf32>
    %65 = vector.shape_cast %64 : vector<1x1x96xf32> to vector<1x96xf32>
    %c16 = arith.constant 16 : index
    %c0_59 = arith.constant 0 : index
    %c0_60 = arith.constant 0 : index
    %66 = vector.load %arg4[%c16, %c0_59, %c0_60] : memref<25x1x96xf32, #tpu.memory_space<vmem>>, vector<1x1x96xf32>
    %67 = vector.shape_cast %66 : vector<1x1x96xf32> to vector<1x96xf32>
    %c17 = arith.constant 17 : index
    %c0_61 = arith.constant 0 : index
    %c0_62 = arith.constant 0 : index
    %68 = vector.load %arg4[%c17, %c0_61, %c0_62] : memref<25x1x96xf32, #tpu.memory_space<vmem>>, vector<1x1x96xf32>
    %69 = vector.shape_cast %68 : vector<1x1x96xf32> to vector<1x96xf32>
    %c18 = arith.constant 18 : index
    %c0_63 = arith.constant 0 : index
    %c0_64 = arith.constant 0 : index
    %70 = vector.load %arg4[%c18, %c0_63, %c0_64] : memref<25x1x96xf32, #tpu.memory_space<vmem>>, vector<1x1x96xf32>
    %71 = vector.shape_cast %70 : vector<1x1x96xf32> to vector<1x96xf32>
    %c19 = arith.constant 19 : index
    %c0_65 = arith.constant 0 : index
    %c0_66 = arith.constant 0 : index
    %72 = vector.load %arg4[%c19, %c0_65, %c0_66] : memref<25x1x96xf32, #tpu.memory_space<vmem>>, vector<1x1x96xf32>
    %73 = vector.shape_cast %72 : vector<1x1x96xf32> to vector<1x96xf32>
    %c20 = arith.constant 20 : index
    %c0_67 = arith.constant 0 : index
    %c0_68 = arith.constant 0 : index
    %74 = vector.load %arg4[%c20, %c0_67, %c0_68] : memref<25x1x96xf32, #tpu.memory_space<vmem>>, vector<1x1x96xf32>
    %75 = vector.shape_cast %74 : vector<1x1x96xf32> to vector<1x96xf32>
    %c21 = arith.constant 21 : index
    %c0_69 = arith.constant 0 : index
    %c0_70 = arith.constant 0 : index
    %76 = vector.load %arg4[%c21, %c0_69, %c0_70] : memref<25x1x96xf32, #tpu.memory_space<vmem>>, vector<1x1x96xf32>
    %77 = vector.shape_cast %76 : vector<1x1x96xf32> to vector<1x96xf32>
    %c22 = arith.constant 22 : index
    %c0_71 = arith.constant 0 : index
    %c0_72 = arith.constant 0 : index
    %78 = vector.load %arg4[%c22, %c0_71, %c0_72] : memref<25x1x96xf32, #tpu.memory_space<vmem>>, vector<1x1x96xf32>
    %79 = vector.shape_cast %78 : vector<1x1x96xf32> to vector<1x96xf32>
    %c23 = arith.constant 23 : index
    %c0_73 = arith.constant 0 : index
    %c0_74 = arith.constant 0 : index
    %80 = vector.load %arg4[%c23, %c0_73, %c0_74] : memref<25x1x96xf32, #tpu.memory_space<vmem>>, vector<1x1x96xf32>
    %81 = vector.shape_cast %80 : vector<1x1x96xf32> to vector<1x96xf32>
    %c24 = arith.constant 24 : index
    %c0_75 = arith.constant 0 : index
    %c0_76 = arith.constant 0 : index
    %82 = vector.load %arg4[%c24, %c0_75, %c0_76] : memref<25x1x96xf32, #tpu.memory_space<vmem>>, vector<1x1x96xf32>
    %83 = vector.shape_cast %82 : vector<1x1x96xf32> to vector<1x96xf32>
    %c0_77 = arith.constant 0 : index
    %c0_78 = arith.constant 0 : index
    %84 = vector.load %arg5[%c0_77, %c0_78] : memref<1x96xf32, #tpu.memory_space<vmem>>, vector<1x96xf32>
    %cst_79 = arith.constant 0.000000e+00 : f32
    %85 = vector.broadcast %cst_79 : f32 to vector<3x96xf32>
    %c0_80 = arith.constant 0 : index
    %c0_81 = arith.constant 0 : index
    %c0_82 = arith.constant 0 : index
    %86 = vector.load %arg14[%c0_80, %c0_81, %c0_82] : memref<8x8x96xf32, #tpu.memory_space<vmem>>, vector<1x8x96xf32>
    %87 = vector.shape_cast %86 : vector<1x8x96xf32> to vector<8x96xf32>
    %88 = vector.extract_strided_slice %87 {offsets = [0, 0], sizes = [3, 96], strides = [1, 1]} : vector<8x96xf32> to vector<3x96xf32>
    %89 = vector.broadcast %35 : vector<1x96xf32> to vector<3x96xf32>
    %90 = arith.mulf %89, %88 : vector<3x96xf32>
    %91 = arith.addf %85, %90 : vector<3x96xf32>
    %92 = vector.extract_strided_slice %87 {offsets = [1, 0], sizes = [3, 96], strides = [1, 1]} : vector<8x96xf32> to vector<3x96xf32>
    %93 = vector.broadcast %37 : vector<1x96xf32> to vector<3x96xf32>
    %94 = arith.mulf %93, %92 : vector<3x96xf32>
    %95 = arith.addf %91, %94 : vector<3x96xf32>
    %96 = vector.extract_strided_slice %87 {offsets = [2, 0], sizes = [3, 96], strides = [1, 1]} : vector<8x96xf32> to vector<3x96xf32>
    %97 = vector.broadcast %39 : vector<1x96xf32> to vector<3x96xf32>
    %98 = arith.mulf %97, %96 : vector<3x96xf32>
    %99 = arith.addf %95, %98 : vector<3x96xf32>
    %100 = vector.extract_strided_slice %87 {offsets = [3, 0], sizes = [3, 96], strides = [1, 1]} : vector<8x96xf32> to vector<3x96xf32>
    %101 = vector.broadcast %41 : vector<1x96xf32> to vector<3x96xf32>
    %102 = arith.mulf %101, %100 : vector<3x96xf32>
    %103 = arith.addf %99, %102 : vector<3x96xf32>
    %104 = vector.extract_strided_slice %87 {offsets = [4, 0], sizes = [3, 96], strides = [1, 1]} : vector<8x96xf32> to vector<3x96xf32>
    %105 = vector.broadcast %43 : vector<1x96xf32> to vector<3x96xf32>
    %106 = arith.mulf %105, %104 : vector<3x96xf32>
    %107 = arith.addf %103, %106 : vector<3x96xf32>
    %c1_83 = arith.constant 1 : index
    %c0_84 = arith.constant 0 : index
    %c0_85 = arith.constant 0 : index
    %108 = vector.load %arg14[%c1_83, %c0_84, %c0_85] : memref<8x8x96xf32, #tpu.memory_space<vmem>>, vector<1x8x96xf32>
    %109 = vector.shape_cast %108 : vector<1x8x96xf32> to vector<8x96xf32>
    %110 = vector.extract_strided_slice %109 {offsets = [0, 0], sizes = [3, 96], strides = [1, 1]} : vector<8x96xf32> to vector<3x96xf32>
    %111 = vector.broadcast %45 : vector<1x96xf32> to vector<3x96xf32>
    %112 = arith.mulf %111, %110 : vector<3x96xf32>
    %113 = arith.addf %107, %112 : vector<3x96xf32>
    %114 = vector.extract_strided_slice %109 {offsets = [1, 0], sizes = [3, 96], strides = [1, 1]} : vector<8x96xf32> to vector<3x96xf32>
    %115 = vector.broadcast %47 : vector<1x96xf32> to vector<3x96xf32>
    %116 = arith.mulf %115, %114 : vector<3x96xf32>
    %117 = arith.addf %113, %116 : vector<3x96xf32>
    %118 = vector.extract_strided_slice %109 {offsets = [2, 0], sizes = [3, 96], strides = [1, 1]} : vector<8x96xf32> to vector<3x96xf32>
    %119 = vector.broadcast %49 : vector<1x96xf32> to vector<3x96xf32>
    %120 = arith.mulf %119, %118 : vector<3x96xf32>
    %121 = arith.addf %117, %120 : vector<3x96xf32>
    %122 = vector.extract_strided_slice %109 {offsets = [3, 0], sizes = [3, 96], strides = [1, 1]} : vector<8x96xf32> to vector<3x96xf32>
    %123 = vector.broadcast %51 : vector<1x96xf32> to vector<3x96xf32>
    %124 = arith.mulf %123, %122 : vector<3x96xf32>
    %125 = arith.addf %121, %124 : vector<3x96xf32>
    %126 = vector.extract_strided_slice %109 {offsets = [4, 0], sizes = [3, 96], strides = [1, 1]} : vector<8x96xf32> to vector<3x96xf32>
    %127 = vector.broadcast %53 : vector<1x96xf32> to vector<3x96xf32>
    %128 = arith.mulf %127, %126 : vector<3x96xf32>
    %129 = arith.addf %125, %128 : vector<3x96xf32>
    %c2_86 = arith.constant 2 : index
    %c0_87 = arith.constant 0 : index
    %c0_88 = arith.constant 0 : index
    %130 = vector.load %arg14[%c2_86, %c0_87, %c0_88] : memref<8x8x96xf32, #tpu.memory_space<vmem>>, vector<1x8x96xf32>
    %131 = vector.shape_cast %130 : vector<1x8x96xf32> to vector<8x96xf32>
    %132 = vector.extract_strided_slice %131 {offsets = [0, 0], sizes = [3, 96], strides = [1, 1]} : vector<8x96xf32> to vector<3x96xf32>
    %133 = vector.broadcast %55 : vector<1x96xf32> to vector<3x96xf32>
    %134 = arith.mulf %133, %132 : vector<3x96xf32>
    %135 = arith.addf %129, %134 : vector<3x96xf32>
    %136 = vector.extract_strided_slice %131 {offsets = [1, 0], sizes = [3, 96], strides = [1, 1]} : vector<8x96xf32> to vector<3x96xf32>
    %137 = vector.broadcast %57 : vector<1x96xf32> to vector<3x96xf32>
    %138 = arith.mulf %137, %136 : vector<3x96xf32>
    %139 = arith.addf %135, %138 : vector<3x96xf32>
    %140 = vector.extract_strided_slice %131 {offsets = [2, 0], sizes = [3, 96], strides = [1, 1]} : vector<8x96xf32> to vector<3x96xf32>
    %141 = vector.broadcast %59 : vector<1x96xf32> to vector<3x96xf32>
    %142 = arith.mulf %141, %140 : vector<3x96xf32>
    %143 = arith.addf %139, %142 : vector<3x96xf32>
    %144 = vector.extract_strided_slice %131 {offsets = [3, 0], sizes = [3, 96], strides = [1, 1]} : vector<8x96xf32> to vector<3x96xf32>
    %145 = vector.broadcast %61 : vector<1x96xf32> to vector<3x96xf32>
    %146 = arith.mulf %145, %144 : vector<3x96xf32>
    %147 = arith.addf %143, %146 : vector<3x96xf32>
    %148 = vector.extract_strided_slice %131 {offsets = [4, 0], sizes = [3, 96], strides = [1, 1]} : vector<8x96xf32> to vector<3x96xf32>
    %149 = vector.broadcast %63 : vector<1x96xf32> to vector<3x96xf32>
    %150 = arith.mulf %149, %148 : vector<3x96xf32>
    %151 = arith.addf %147, %150 : vector<3x96xf32>
    %c3_89 = arith.constant 3 : index
    %c0_90 = arith.constant 0 : index
    %c0_91 = arith.constant 0 : index
    %152 = vector.load %arg14[%c3_89, %c0_90, %c0_91] : memref<8x8x96xf32, #tpu.memory_space<vmem>>, vector<1x8x96xf32>
    %153 = vector.shape_cast %152 : vector<1x8x96xf32> to vector<8x96xf32>
    %154 = vector.extract_strided_slice %153 {offsets = [0, 0], sizes = [3, 96], strides = [1, 1]} : vector<8x96xf32> to vector<3x96xf32>
    %155 = vector.broadcast %65 : vector<1x96xf32> to vector<3x96xf32>
    %156 = arith.mulf %155, %154 : vector<3x96xf32>
    %157 = arith.addf %151, %156 : vector<3x96xf32>
    %158 = vector.extract_strided_slice %153 {offsets = [1, 0], sizes = [3, 96], strides = [1, 1]} : vector<8x96xf32> to vector<3x96xf32>
    %159 = vector.broadcast %67 : vector<1x96xf32> to vector<3x96xf32>
    %160 = arith.mulf %159, %158 : vector<3x96xf32>
    %161 = arith.addf %157, %160 : vector<3x96xf32>
    %162 = vector.extract_strided_slice %153 {offsets = [2, 0], sizes = [3, 96], strides = [1, 1]} : vector<8x96xf32> to vector<3x96xf32>
    %163 = vector.broadcast %69 : vector<1x96xf32> to vector<3x96xf32>
    %164 = arith.mulf %163, %162 : vector<3x96xf32>
    %165 = arith.addf %161, %164 : vector<3x96xf32>
    %166 = vector.extract_strided_slice %153 {offsets = [3, 0], sizes = [3, 96], strides = [1, 1]} : vector<8x96xf32> to vector<3x96xf32>
    %167 = vector.broadcast %71 : vector<1x96xf32> to vector<3x96xf32>
    %168 = arith.mulf %167, %166 : vector<3x96xf32>
    %169 = arith.addf %165, %168 : vector<3x96xf32>
    %170 = vector.extract_strided_slice %153 {offsets = [4, 0], sizes = [3, 96], strides = [1, 1]} : vector<8x96xf32> to vector<3x96xf32>
    %171 = vector.broadcast %73 : vector<1x96xf32> to vector<3x96xf32>
    %172 = arith.mulf %171, %170 : vector<3x96xf32>
    %173 = arith.addf %169, %172 : vector<3x96xf32>
    %c4_92 = arith.constant 4 : index
    %c0_93 = arith.constant 0 : index
    %c0_94 = arith.constant 0 : index
    %174 = vector.load %arg14[%c4_92, %c0_93, %c0_94] : memref<8x8x96xf32, #tpu.memory_space<vmem>>, vector<1x8x96xf32>
    %175 = vector.shape_cast %174 : vector<1x8x96xf32> to vector<8x96xf32>
    %176 = vector.extract_strided_slice %175 {offsets = [0, 0], sizes = [3, 96], strides = [1, 1]} : vector<8x96xf32> to vector<3x96xf32>
    %177 = vector.broadcast %75 : vector<1x96xf32> to vector<3x96xf32>
    %178 = arith.mulf %177, %176 : vector<3x96xf32>
    %179 = arith.addf %173, %178 : vector<3x96xf32>
    %180 = vector.extract_strided_slice %175 {offsets = [1, 0], sizes = [3, 96], strides = [1, 1]} : vector<8x96xf32> to vector<3x96xf32>
    %181 = vector.broadcast %77 : vector<1x96xf32> to vector<3x96xf32>
    %182 = arith.mulf %181, %180 : vector<3x96xf32>
    %183 = arith.addf %179, %182 : vector<3x96xf32>
    %184 = vector.extract_strided_slice %175 {offsets = [2, 0], sizes = [3, 96], strides = [1, 1]} : vector<8x96xf32> to vector<3x96xf32>
    %185 = vector.broadcast %79 : vector<1x96xf32> to vector<3x96xf32>
    %186 = arith.mulf %185, %184 : vector<3x96xf32>
    %187 = arith.addf %183, %186 : vector<3x96xf32>
    %188 = vector.extract_strided_slice %175 {offsets = [3, 0], sizes = [3, 96], strides = [1, 1]} : vector<8x96xf32> to vector<3x96xf32>
    %189 = vector.broadcast %81 : vector<1x96xf32> to vector<3x96xf32>
    %190 = arith.mulf %189, %188 : vector<3x96xf32>
    %191 = arith.addf %187, %190 : vector<3x96xf32>
    %192 = vector.extract_strided_slice %175 {offsets = [4, 0], sizes = [3, 96], strides = [1, 1]} : vector<8x96xf32> to vector<3x96xf32>
    %193 = vector.broadcast %83 : vector<1x96xf32> to vector<3x96xf32>
    %194 = arith.mulf %193, %192 : vector<3x96xf32>
    %195 = arith.addf %191, %194 : vector<3x96xf32>
    %c0_95 = arith.constant 0 : index
    %c0_96 = arith.constant 0 : index
    %196 = vector.load %arg10[%c0_95, %c0_96] : memref<2x3xf32, #tpu.memory_space<vmem>>, vector<2x3xf32>
    %cst_97 = arith.constant dense<0.000000e+00> : vector<2x96xf32>
    %197 = tpu.matmul %196, %195, %cst_97 {dimension_numbers = #tpu.dot_dimension_numbers<[1], [0], [0], [1], [0, 0, 1, 1], [], []>} : vector<2x3xf32>, vector<3x96xf32>, vector<2x96xf32> -> vector<2x96xf32>
    %198 = vector.broadcast %84 : vector<1x96xf32> to vector<2x96xf32>
    %199 = arith.addf %197, %198 : vector<2x96xf32>
    %cst_98 = arith.constant 3.000000e+00 : f32
    %200 = vector.broadcast %cst_98 : f32 to vector<2x96xf32>
    %201 = arith.addf %199, %200 : vector<2x96xf32>
    %cst_99 = arith.constant 0.000000e+00 : f32
    %cst_100 = arith.constant 6.000000e+00 : f32
    %202 = vector.broadcast %cst_99 : f32 to vector<2x96xf32>
    %203 = arith.maximumf %202, %201 : vector<2x96xf32>
    %204 = vector.broadcast %cst_100 : f32 to vector<2x96xf32>
    %205 = arith.minimumf %204, %203 : vector<2x96xf32>
    %206 = arith.mulf %199, %205 : vector<2x96xf32>
    %cst_101 = arith.constant 0.166666672 : f32
    %207 = vector.broadcast %cst_101 : f32 to vector<2x96xf32>
    %208 = arith.mulf %206, %207 : vector<2x96xf32>
    %c0_102 = arith.constant 0 : index
    %c0_103 = arith.constant 0 : index
    %209 = vector.load %arg15[%c0_102, %c0_103] : memref<4x96xf32, #tpu.memory_space<vmem>>, vector<2x96xf32>
    tpu.vector_store %arg15[%c0_102, %c0_103], %208 {strides = array<i32>} : memref<4x96xf32, #tpu.memory_space<vmem>>, vector<2x96xf32>,
    %cst_104 = arith.constant 0.000000e+00 : f32
    %210 = vector.broadcast %cst_104 : f32 to vector<3x96xf32>
    %c2_105 = arith.constant 2 : index
    %c0_106 = arith.constant 0 : index
    %c0_107 = arith.constant 0 : index
    %211 = vector.load %arg14[%c2_105, %c0_106, %c0_107] : memref<8x8x96xf32, #tpu.memory_space<vmem>>, vector<1x8x96xf32>
    %212 = vector.shape_cast %211 : vector<1x8x96xf32> to vector<8x96xf32>
    %213 = vector.extract_strided_slice %212 {offsets = [0, 0], sizes = [3, 96], strides = [1, 1]} : vector<8x96xf32> to vector<3x96xf32>
    %214 = vector.broadcast %35 : vector<1x96xf32> to vector<3x96xf32>
    %215 = arith.mulf %214, %213 : vector<3x96xf32>
    %216 = arith.addf %210, %215 : vector<3x96xf32>
    %217 = vector.extract_strided_slice %212 {offsets = [1, 0], sizes = [3, 96], strides = [1, 1]} : vector<8x96xf32> to vector<3x96xf32>
    %218 = vector.broadcast %37 : vector<1x96xf32> to vector<3x96xf32>
    %219 = arith.mulf %218, %217 : vector<3x96xf32>
    %220 = arith.addf %216, %219 : vector<3x96xf32>
    %221 = vector.extract_strided_slice %212 {offsets = [2, 0], sizes = [3, 96], strides = [1, 1]} : vector<8x96xf32> to vector<3x96xf32>
    %222 = vector.broadcast %39 : vector<1x96xf32> to vector<3x96xf32>
    %223 = arith.mulf %222, %221 : vector<3x96xf32>
    %224 = arith.addf %220, %223 : vector<3x96xf32>
    %225 = vector.extract_strided_slice %212 {offsets = [3, 0], sizes = [3, 96], strides = [1, 1]} : vector<8x96xf32> to vector<3x96xf32>
    %226 = vector.broadcast %41 : vector<1x96xf32> to vector<3x96xf32>
    %227 = arith.mulf %226, %225 : vector<3x96xf32>
    %228 = arith.addf %224, %227 : vector<3x96xf32>
    %229 = vector.extract_strided_slice %212 {offsets = [4, 0], sizes = [3, 96], strides = [1, 1]} : vector<8x96xf32> to vector<3x96xf32>
    %230 = vector.broadcast %43 : vector<1x96xf32> to vector<3x96xf32>
    %231 = arith.mulf %230, %229 : vector<3x96xf32>
    %232 = arith.addf %228, %231 : vector<3x96xf32>
    %c3_108 = arith.constant 3 : index
    %c0_109 = arith.constant 0 : index
    %c0_110 = arith.constant 0 : index
    %233 = vector.load %arg14[%c3_108, %c0_109, %c0_110] : memref<8x8x96xf32, #tpu.memory_space<vmem>>, vector<1x8x96xf32>
    %234 = vector.shape_cast %233 : vector<1x8x96xf32> to vector<8x96xf32>
    %235 = vector.extract_strided_slice %234 {offsets = [0, 0], sizes = [3, 96], strides = [1, 1]} : vector<8x96xf32> to vector<3x96xf32>
    %236 = vector.broadcast %45 : vector<1x96xf32> to vector<3x96xf32>
    %237 = arith.mulf %236, %235 : vector<3x96xf32>
    %238 = arith.addf %232, %237 : vector<3x96xf32>
    %239 = vector.extract_strided_slice %234 {offsets = [1, 0], sizes = [3, 96], strides = [1, 1]} : vector<8x96xf32> to vector<3x96xf32>
    %240 = vector.broadcast %47 : vector<1x96xf32> to vector<3x96xf32>
    %241 = arith.mulf %240, %239 : vector<3x96xf32>
    %242 = arith.addf %238, %241 : vector<3x96xf32>
    %243 = vector.extract_strided_slice %234 {offsets = [2, 0], sizes = [3, 96], strides = [1, 1]} : vector<8x96xf32> to vector<3x96xf32>
    %244 = vector.broadcast %49 : vector<1x96xf32> to vector<3x96xf32>
    %245 = arith.mulf %244, %243 : vector<3x96xf32>
    %246 = arith.addf %242, %245 : vector<3x96xf32>
    %247 = vector.extract_strided_slice %234 {offsets = [3, 0], sizes = [3, 96], strides = [1, 1]} : vector<8x96xf32> to vector<3x96xf32>
    %248 = vector.broadcast %51 : vector<1x96xf32> to vector<3x96xf32>
    %249 = arith.mulf %248, %247 : vector<3x96xf32>
    %250 = arith.addf %246, %249 : vector<3x96xf32>
    %251 = vector.extract_strided_slice %234 {offsets = [4, 0], sizes = [3, 96], strides = [1, 1]} : vector<8x96xf32> to vector<3x96xf32>
    %252 = vector.broadcast %53 : vector<1x96xf32> to vector<3x96xf32>
    %253 = arith.mulf %252, %251 : vector<3x96xf32>
    %254 = arith.addf %250, %253 : vector<3x96xf32>
    %c4_111 = arith.constant 4 : index
    %c0_112 = arith.constant 0 : index
    %c0_113 = arith.constant 0 : index
    %255 = vector.load %arg14[%c4_111, %c0_112, %c0_113] : memref<8x8x96xf32, #tpu.memory_space<vmem>>, vector<1x8x96xf32>
    %256 = vector.shape_cast %255 : vector<1x8x96xf32> to vector<8x96xf32>
    %257 = vector.extract_strided_slice %256 {offsets = [0, 0], sizes = [3, 96], strides = [1, 1]} : vector<8x96xf32> to vector<3x96xf32>
    %258 = vector.broadcast %55 : vector<1x96xf32> to vector<3x96xf32>
    %259 = arith.mulf %258, %257 : vector<3x96xf32>
    %260 = arith.addf %254, %259 : vector<3x96xf32>
    %261 = vector.extract_strided_slice %256 {offsets = [1, 0], sizes = [3, 96], strides = [1, 1]} : vector<8x96xf32> to vector<3x96xf32>
    %262 = vector.broadcast %57 : vector<1x96xf32> to vector<3x96xf32>
    %263 = arith.mulf %262, %261 : vector<3x96xf32>
    %264 = arith.addf %260, %263 : vector<3x96xf32>
    %265 = vector.extract_strided_slice %256 {offsets = [2, 0], sizes = [3, 96], strides = [1, 1]} : vector<8x96xf32> to vector<3x96xf32>
    %266 = vector.broadcast %59 : vector<1x96xf32> to vector<3x96xf32>
    %267 = arith.mulf %266, %265 : vector<3x96xf32>
    %268 = arith.addf %264, %267 : vector<3x96xf32>
    %269 = vector.extract_strided_slice %256 {offsets = [3, 0], sizes = [3, 96], strides = [1, 1]} : vector<8x96xf32> to vector<3x96xf32>
    %270 = vector.broadcast %61 : vector<1x96xf32> to vector<3x96xf32>
    %271 = arith.mulf %270, %269 : vector<3x96xf32>
    %272 = arith.addf %268, %271 : vector<3x96xf32>
    %273 = vector.extract_strided_slice %256 {offsets = [4, 0], sizes = [3, 96], strides = [1, 1]} : vector<8x96xf32> to vector<3x96xf32>
    %274 = vector.broadcast %63 : vector<1x96xf32> to vector<3x96xf32>
    %275 = arith.mulf %274, %273 : vector<3x96xf32>
    %276 = arith.addf %272, %275 : vector<3x96xf32>
    %c5_114 = arith.constant 5 : index
    %c0_115 = arith.constant 0 : index
    %c0_116 = arith.constant 0 : index
    %277 = vector.load %arg14[%c5_114, %c0_115, %c0_116] : memref<8x8x96xf32, #tpu.memory_space<vmem>>, vector<1x8x96xf32>
    %278 = vector.shape_cast %277 : vector<1x8x96xf32> to vector<8x96xf32>
    %279 = vector.extract_strided_slice %278 {offsets = [0, 0], sizes = [3, 96], strides = [1, 1]} : vector<8x96xf32> to vector<3x96xf32>
    %280 = vector.broadcast %65 : vector<1x96xf32> to vector<3x96xf32>
    %281 = arith.mulf %280, %279 : vector<3x96xf32>
    %282 = arith.addf %276, %281 : vector<3x96xf32>
    %283 = vector.extract_strided_slice %278 {offsets = [1, 0], sizes = [3, 96], strides = [1, 1]} : vector<8x96xf32> to vector<3x96xf32>
    %284 = vector.broadcast %67 : vector<1x96xf32> to vector<3x96xf32>
    %285 = arith.mulf %284, %283 : vector<3x96xf32>
    %286 = arith.addf %282, %285 : vector<3x96xf32>
    %287 = vector.extract_strided_slice %278 {offsets = [2, 0], sizes = [3, 96], strides = [1, 1]} : vector<8x96xf32> to vector<3x96xf32>
    %288 = vector.broadcast %69 : vector<1x96xf32> to vector<3x96xf32>
    %289 = arith.mulf %288, %287 : vector<3x96xf32>
    %290 = arith.addf %286, %289 : vector<3x96xf32>
    %291 = vector.extract_strided_slice %278 {offsets = [3, 0], sizes = [3, 96], strides = [1, 1]} : vector<8x96xf32> to vector<3x96xf32>
    %292 = vector.broadcast %71 : vector<1x96xf32> to vector<3x96xf32>
    %293 = arith.mulf %292, %291 : vector<3x96xf32>
    %294 = arith.addf %290, %293 : vector<3x96xf32>
    %295 = vector.extract_strided_slice %278 {offsets = [4, 0], sizes = [3, 96], strides = [1, 1]} : vector<8x96xf32> to vector<3x96xf32>
    %296 = vector.broadcast %73 : vector<1x96xf32> to vector<3x96xf32>
    %297 = arith.mulf %296, %295 : vector<3x96xf32>
    %298 = arith.addf %294, %297 : vector<3x96xf32>
    %c6_117 = arith.constant 6 : index
    %c0_118 = arith.constant 0 : index
    %c0_119 = arith.constant 0 : index
    %299 = vector.load %arg14[%c6_117, %c0_118, %c0_119] : memref<8x8x96xf32, #tpu.memory_space<vmem>>, vector<1x8x96xf32>
    %300 = vector.shape_cast %299 : vector<1x8x96xf32> to vector<8x96xf32>
    %301 = vector.extract_strided_slice %300 {offsets = [0, 0], sizes = [3, 96], strides = [1, 1]} : vector<8x96xf32> to vector<3x96xf32>
    %302 = vector.broadcast %75 : vector<1x96xf32> to vector<3x96xf32>
    %303 = arith.mulf %302, %301 : vector<3x96xf32>
    %304 = arith.addf %298, %303 : vector<3x96xf32>
    %305 = vector.extract_strided_slice %300 {offsets = [1, 0], sizes = [3, 96], strides = [1, 1]} : vector<8x96xf32> to vector<3x96xf32>
    %306 = vector.broadcast %77 : vector<1x96xf32> to vector<3x96xf32>
    %307 = arith.mulf %306, %305 : vector<3x96xf32>
    %308 = arith.addf %304, %307 : vector<3x96xf32>
    %309 = vector.extract_strided_slice %300 {offsets = [2, 0], sizes = [3, 96], strides = [1, 1]} : vector<8x96xf32> to vector<3x96xf32>
    %310 = vector.broadcast %79 : vector<1x96xf32> to vector<3x96xf32>
    %311 = arith.mulf %310, %309 : vector<3x96xf32>
    %312 = arith.addf %308, %311 : vector<3x96xf32>
    %313 = vector.extract_strided_slice %300 {offsets = [3, 0], sizes = [3, 96], strides = [1, 1]} : vector<8x96xf32> to vector<3x96xf32>
    %314 = vector.broadcast %81 : vector<1x96xf32> to vector<3x96xf32>
    %315 = arith.mulf %314, %313 : vector<3x96xf32>
    %316 = arith.addf %312, %315 : vector<3x96xf32>
    %317 = vector.extract_strided_slice %300 {offsets = [4, 0], sizes = [3, 96], strides = [1, 1]} : vector<8x96xf32> to vector<3x96xf32>
    %318 = vector.broadcast %83 : vector<1x96xf32> to vector<3x96xf32>
    %319 = arith.mulf %318, %317 : vector<3x96xf32>
    %320 = arith.addf %316, %319 : vector<3x96xf32>
    %c0_120 = arith.constant 0 : index
    %c0_121 = arith.constant 0 : index
    %321 = vector.load %arg10[%c0_120, %c0_121] : memref<2x3xf32, #tpu.memory_space<vmem>>, vector<2x3xf32>
    %cst_122 = arith.constant dense<0.000000e+00> : vector<2x96xf32>
    %322 = tpu.matmul %321, %320, %cst_122 {dimension_numbers = #tpu.dot_dimension_numbers<[1], [0], [0], [1], [0, 0, 1, 1], [], []>} : vector<2x3xf32>, vector<3x96xf32>, vector<2x96xf32> -> vector<2x96xf32>
    %323 = vector.broadcast %84 : vector<1x96xf32> to vector<2x96xf32>
    %324 = arith.addf %322, %323 : vector<2x96xf32>
    %cst_123 = arith.constant 3.000000e+00 : f32
    %325 = vector.broadcast %cst_123 : f32 to vector<2x96xf32>
    %326 = arith.addf %324, %325 : vector<2x96xf32>
    %cst_124 = arith.constant 0.000000e+00 : f32
    %cst_125 = arith.constant 6.000000e+00 : f32
    %327 = vector.broadcast %cst_124 : f32 to vector<2x96xf32>
    %328 = arith.maximumf %327, %326 : vector<2x96xf32>
    %329 = vector.broadcast %cst_125 : f32 to vector<2x96xf32>
    %330 = arith.minimumf %329, %328 : vector<2x96xf32>
    %331 = arith.mulf %324, %330 : vector<2x96xf32>
    %cst_126 = arith.constant 0.166666672 : f32
    %332 = vector.broadcast %cst_126 : f32 to vector<2x96xf32>
    %333 = arith.mulf %331, %332 : vector<2x96xf32>
    %c2_127 = arith.constant 2 : index
    %c0_128 = arith.constant 0 : index
    %334 = vector.load %arg15[%c2_127, %c0_128] : memref<4x96xf32, #tpu.memory_space<vmem>>, vector<2x96xf32>
    tpu.vector_store %arg15[%c2_127, %c0_128], %333 {strides = array<i32>} : memref<4x96xf32, #tpu.memory_space<vmem>>, vector<2x96xf32>,
    %c0_129 = arith.constant 0 : index
    %c0_130 = arith.constant 0 : index
    %335 = vector.load %arg15[%c0_129, %c0_130] : memref<4x96xf32, #tpu.memory_space<vmem>>, vector<4x96xf32>
    %cst_131 = arith.constant dense<0.000000e+00> : vector<96xf32>
    %336 = vector.multi_reduction <add>, %335, %cst_131 [0] : vector<4x96xf32> to vector<96xf32>
    %337 = vector.shape_cast %336 : vector<96xf32> to vector<1x96xf32>
    %cst_132 = arith.constant 2.500000e-01 : f32
    %338 = vector.broadcast %cst_132 : f32 to vector<1x96xf32>
    %339 = arith.mulf %337, %338 : vector<1x96xf32>
    %c0_133 = arith.constant 0 : index
    %c0_134 = arith.constant 0 : index
    %340 = vector.load %arg6[%c0_133, %c0_134] : memref<96x24xf32, #tpu.memory_space<vmem>>, vector<96x24xf32>
    %cst_135 = arith.constant dense<0.000000e+00> : vector<1x24xf32>
    %341 = tpu.matmul %339, %340, %cst_135 {dimension_numbers = #tpu.dot_dimension_numbers<[1], [0], [0], [1], [0, 0, 1, 1], [], []>} : vector<1x96xf32>, vector<96x24xf32>, vector<1x24xf32> -> vector<1x24xf32>
    %c0_136 = arith.constant 0 : index
    %c0_137 = arith.constant 0 : index
    %342 = vector.load %arg7[%c0_136, %c0_137] : memref<1x24xf32, #tpu.memory_space<vmem>>, vector<1x24xf32>
    %343 = arith.addf %341, %342 : vector<1x24xf32>
    %cst_138 = arith.constant 0.000000e+00 : f32
    %344 = vector.broadcast %cst_138 : f32 to vector<1x24xf32>
    %345 = arith.maximumf %343, %344 : vector<1x24xf32>
    %c0_139 = arith.constant 0 : index
    %c0_140 = arith.constant 0 : index
    %346 = vector.load %arg8[%c0_139, %c0_140] : memref<24x96xf32, #tpu.memory_space<vmem>>, vector<24x96xf32>
    %cst_141 = arith.constant dense<0.000000e+00> : vector<1x96xf32>
    %347 = tpu.matmul %345, %346, %cst_141 {dimension_numbers = #tpu.dot_dimension_numbers<[1], [0], [0], [1], [0, 0, 1, 1], [], []>} : vector<1x24xf32>, vector<24x96xf32>, vector<1x96xf32> -> vector<1x96xf32>
    %c0_142 = arith.constant 0 : index
    %c0_143 = arith.constant 0 : index
    %348 = vector.load %arg9[%c0_142, %c0_143] : memref<1x96xf32, #tpu.memory_space<vmem>>, vector<1x96xf32>
    %349 = arith.addf %347, %348 : vector<1x96xf32>
    %cst_144 = arith.constant 3.000000e+00 : f32
    %350 = vector.broadcast %cst_144 : f32 to vector<1x96xf32>
    %351 = arith.addf %349, %350 : vector<1x96xf32>
    %cst_145 = arith.constant 0.000000e+00 : f32
    %cst_146 = arith.constant 6.000000e+00 : f32
    %352 = vector.broadcast %cst_145 : f32 to vector<1x96xf32>
    %353 = arith.maximumf %352, %351 : vector<1x96xf32>
    %354 = vector.broadcast %cst_146 : f32 to vector<1x96xf32>
    %355 = arith.minimumf %354, %353 : vector<1x96xf32>
    %cst_147 = arith.constant 0.166666672 : f32
    %356 = vector.broadcast %cst_147 : f32 to vector<1x96xf32>
    %357 = arith.mulf %355, %356 : vector<1x96xf32>
    %358 = vector.broadcast %357 : vector<1x96xf32> to vector<4x96xf32>
    %359 = arith.mulf %335, %358 : vector<4x96xf32>
    %360 = arith.truncf %359 : vector<4x96xf32> to vector<4x96xbf16>
    %c0_148 = arith.constant 0 : index
    %c0_149 = arith.constant 0 : index
    %361 = vector.load %arg11[%c0_148, %c0_149] : memref<96x40xbf16, #tpu.memory_space<vmem>>, vector<96x40xbf16>
    %cst_150 = arith.constant dense<0.000000e+00> : vector<4x40xf32>
    %362 = tpu.matmul %360, %361, %cst_150 {dimension_numbers = #tpu.dot_dimension_numbers<[1], [0], [0], [1], [0, 0, 1, 1], [], []>} : vector<4x96xbf16>, vector<96x40xbf16>, vector<4x40xf32> -> vector<4x40xf32>
    %c0_151 = arith.constant 0 : index
    %c0_152 = arith.constant 0 : index
    %363 = vector.load %arg12[%c0_151, %c0_152] : memref<1x40xf32, #tpu.memory_space<vmem>>, vector<1x40xf32>
    %364 = vector.broadcast %363 : vector<1x40xf32> to vector<4x40xf32>
    %365 = arith.addf %362, %364 : vector<4x40xf32>
    %366 = arith.truncf %365 : vector<4x40xf32> to vector<4x40xbf16>
    %c0_153 = arith.constant 0 : index
    %c0_154 = arith.constant 0 : index
    %c0_155 = arith.constant 0 : index
    %367 = vector.load %arg13[%c0_153, %c0_154, %c0_155] : memref<1x4x40xbf16, #tpu.memory_space<vmem>>, vector<1x4x40xbf16>
    %368 = vector.shape_cast %367 : vector<1x4x40xbf16> to vector<4x40xbf16>
    %369 = vector.shape_cast %366 : vector<4x40xbf16> to vector<1x4x40xbf16>
    tpu.vector_store %arg13[%c0_153, %c0_154, %c0_155], %369 {strides = array<i32>} : memref<1x4x40xbf16, #tpu.memory_space<vmem>>, vector<1x4x40xbf16>,
    return
  }
  func.func @transform_0(%arg0: i32) -> (i32, i32, i32) {
    %c0_i32 = arith.constant 0 : i32
    %c0_i32_0 = arith.constant 0 : i32
    %c0_i32_1 = arith.constant 0 : i32
    return %arg0, %c0_i32, %c0_i32_0 : i32, i32, i32
  }
  func.func @transform_1(%arg0: i32) -> (i32, i32) {
    %c0_i32 = arith.constant 0 : i32
    %c0_i32_0 = arith.constant 0 : i32
    %c0_i32_1 = arith.constant 0 : i32
    return %c0_i32, %c0_i32_0 : i32, i32
  }
  func.func @transform_2(%arg0: i32) -> (i32, i32) {
    %c0_i32 = arith.constant 0 : i32
    %c0_i32_0 = arith.constant 0 : i32
    %c0_i32_1 = arith.constant 0 : i32
    return %c0_i32, %c0_i32_0 : i32, i32
  }
  func.func @transform_3(%arg0: i32) -> (i32, i32, i32) {
    %c0_i32 = arith.constant 0 : i32
    %c0_i32_0 = arith.constant 0 : i32
    %c0_i32_1 = arith.constant 0 : i32
    %c0_i32_2 = arith.constant 0 : i32
    return %c0_i32, %c0_i32_0, %c0_i32_1 : i32, i32, i32
  }
  func.func @transform_4(%arg0: i32) -> (i32, i32) {
    %c0_i32 = arith.constant 0 : i32
    %c0_i32_0 = arith.constant 0 : i32
    %c0_i32_1 = arith.constant 0 : i32
    return %c0_i32, %c0_i32_0 : i32, i32
  }
  func.func @transform_5(%arg0: i32) -> (i32, i32) {
    %c0_i32 = arith.constant 0 : i32
    %c0_i32_0 = arith.constant 0 : i32
    %c0_i32_1 = arith.constant 0 : i32
    return %c0_i32, %c0_i32_0 : i32, i32
  }
  func.func @transform_6(%arg0: i32) -> (i32, i32) {
    %c0_i32 = arith.constant 0 : i32
    %c0_i32_0 = arith.constant 0 : i32
    %c0_i32_1 = arith.constant 0 : i32
    return %c0_i32, %c0_i32_0 : i32, i32
  }
  func.func @transform_7(%arg0: i32) -> (i32, i32) {
    %c0_i32 = arith.constant 0 : i32
    %c0_i32_0 = arith.constant 0 : i32
    %c0_i32_1 = arith.constant 0 : i32
    return %c0_i32, %c0_i32_0 : i32, i32
  }
  func.func @transform_8(%arg0: i32) -> (i32, i32) {
    %c0_i32 = arith.constant 0 : i32
    %c0_i32_0 = arith.constant 0 : i32
    %c0_i32_1 = arith.constant 0 : i32
    return %c0_i32, %c0_i32_0 : i32, i32
  }
  func.func @transform_9(%arg0: i32) -> (i32, i32) {
    %c0_i32 = arith.constant 0 : i32
    %c0_i32_0 = arith.constant 0 : i32
    %c0_i32_1 = arith.constant 0 : i32
    return %c0_i32, %c0_i32_0 : i32, i32
  }
  func.func @transform_10(%arg0: i32) -> (i32, i32) {
    %c0_i32 = arith.constant 0 : i32
    %c0_i32_0 = arith.constant 0 : i32
    %c0_i32_1 = arith.constant 0 : i32
    return %c0_i32, %c0_i32_0 : i32, i32
  }
  func.func @transform_11(%arg0: i32) -> (i32, i32) {
    %c0_i32 = arith.constant 0 : i32
    %c0_i32_0 = arith.constant 0 : i32
    %c0_i32_1 = arith.constant 0 : i32
    return %c0_i32, %c0_i32_0 : i32, i32
  }
  func.func @transform_12(%arg0: i32) -> (i32, i32, i32) {
    %c0_i32 = arith.constant 0 : i32
    %c0_i32_0 = arith.constant 0 : i32
    %c0_i32_1 = arith.constant 0 : i32
    return %arg0, %c0_i32, %c0_i32_0 : i32, i32, i32
  }
}

</mosaic_0001>

<bundles_post_ra>
// kernel: _lambda_.6
= control target key start
LH: loop header
LB: loop body
LE: loop exit
PB: predicated region body
PF: predicated region fallthrough
CT: control target
= control target key end

     0   :  { %s1119_s12 = smov 0   ;;  %s1334_s0 = inlined_call_operand.vmem [shape: bf16[512,32], index: 0, kind: input, shape index: {}]   ;;  %s1335_s1 = inlined_call_operand.vmem [shape: bf16[32,16], index: 1, kind: input, shape index: {}]   ;;  %s1336_s2 = inlined_call_operand.vmem [shape: f32[1,16], index: 2, kind: input, shape index: {}]   ;;  %s1337_s3 = inlined_call_operand.vmem [shape: bf16[512,16], index: 3, kind: output, shape index: {}]  }
   0x1 LB: > { %s897_s13 = sadd.s32 4294967295, %s1097_s12   ;;  %p901_p0 = scmp.ge.s32.totalorder %s1097_s12, 1  ;;  %s1097_s12 = sphi %s1119_s12, %s13_s12  }
   0x2   : > { %p138_p1 = scmp.lt.s32.totalorder %s1097_s12, 3 }
   0x4   : > { %p139_p2 = pnand %p901_p0, %p138_p1 }
   0x5   : > { %v1073_v0 = vld [vmem:[%s1335_s1] sm:$0xff] (!%p139_p2)   ;;  %s902_s16 = sshll.u32 (!%p139_p2), %s897_s13, 5  ;;  %v1074_v1 = vld [vmem:[%s1335_s1 + $0x8] sm:$0xff] (!%p139_p2)   ;;  %vm310_vm0 = vcmask (!%p139_p2), 261120   ;;  %vm808_vm1 = vcmask (!%p139_p2), 125952  }
   0x6   : > { %142 = sbr.rel (%p139_p2) target bundleno = 292 (0x124), region = 32  ;;  %p163_p3 = scmp.lt.s32.totalorder (!%p139_p2), %s902_s16, 63  ;;  %1025 = vmatprep.subr.bf16.mxu0 (!%p139_p2), %v1073_v0  ;;  %1061 = vmatprep.subr.bf16.mxu1 (!%p139_p2), %v1073_v0  ;;  %v1178_v18 = vld [vmem:[%s1336_s2] ss:$0 sm:$0xff] (!%p139_p2) }
   0x7   : > { %1026 = vmatpush3.bf16.msra.mxu0 (!%p139_p2), %v1073_v0  ;;  %1063 = vmatpush3.bf16.msra.mxu1 (!%p139_p2), %v1073_v0 }
   0x8   : > { %1027 = vmatprep.subr.bf16.mxu0 (!%p139_p2), %v1074_v1  ;;  %1062 = vmatprep.subr.bf16.mxu1 (!%p139_p2), %v1074_v1 }
   0xb   : > { %1028 = vmatpush3.bf16.msra.mxu0 (!%p139_p2), %v1074_v1  ;;  %1064 = vmatpush3.bf16.msra.mxu1 (!%p139_p2), %v1074_v1 }
   0xd   : > { %s1339_s16 = smov (!%p163_p3, %s902_s16), 63 }
   0xe   : > { %s903_s19 = sshll.u32 %s1339_s16, 2 }
   0xf   : > { %s1141_s22 = scalar_lea.vmem %s1334_s0, %s903_s19  ;;  %s1193_s27 = scalar_lea.vmem %s1337_s3, %s903_s19 }
  0x10   : > { %v1075_v2 = vld [vmem:[%s1141_s22] sm:$0xff]   ;;  %v1077_v4 = vld [vmem:[%s1141_s22 + $0x8] sm:$0xff]   ;;  %v1079_v6 = vld [vmem:[%s1141_s22 + $0x10] sm:$0xff]  }
  0x11   : > { %v1076_v3 = vld [vmem:[%s1141_s22 + $0x40] sm:$0xff]   ;;  %1029 = vmatprep.mubr.msk.bf16.mxu0 %vm310_vm0, %v1075_v2  ;;  %v1078_v5 = vld [vmem:[%s1141_s22 + $0x48] sm:$0xff]   ;;  %v1080_v7 = vld [vmem:[%s1141_s22 + $0x50] sm:$0xff]  }
  0x12   : > { %1045 = vmatprep.mubr.msk.bf16.mxu1 %vm310_vm0, %v1076_v3  ;;  %1030 = vmatmul.mubr.msk.bf16.vlgmr.msra.gmra.mrb[0].mxu0 %vm310_vm0, %v1077_v4  ;;  %v1081_v8 = vld [vmem:[%s1141_s22 + $0x18] sm:$0xff]   ;;  %v1083_v10 = vld [vmem:[%s1141_s22 + $0x20] sm:$0xff]   ;;  %v1085_v12 = vld [vmem:[%s1141_s22 + $0x28] sm:$0xff]  }
  0x13   : > { %1046 = vmatmul.mubr.msk.bf16.vlgmr.msra.gmra.mrb[0].mxu1 %vm310_vm0, %v1078_v5  ;;  %1033 = vmatprep.mubr.msk.bf16.mxu0 %vm310_vm0, %v1079_v6  ;;  %v1082_v9 = vld [vmem:[%s1141_s22 + $0x58] sm:$0xff]   ;;  %v1084_v11 = vld [vmem:[%s1141_s22 + $0x60] sm:$0xff]   ;;  %v1086_v13 = vld [vmem:[%s1141_s22 + $0x68] sm:$0xff]  }
  0x14   : > { %1049 = vmatprep.mubr.msk.bf16.mxu1 %vm310_vm0, %v1080_v7  ;;  %v1087_v14 = vld [vmem:[%s1141_s22 + $0x30] sm:$0xff]   ;;  %v1089_v16 = vld [vmem:[%s1141_s22 + $0x38] sm:$0xff]  }
  0x15   : > { %v1088_v15 = vld [vmem:[%s1141_s22 + $0x70] sm:$0xff]   ;;  %v1090_v17 = vld [vmem:[%s1141_s22 + $0x78] sm:$0xff]  }
  0x1a   : > { %1034 = vmatmul.mubr.msk.bf16.gmra.mrb[4].mxu0 %vm310_vm0, %v1081_v8 }
  0x1b   : > { %1050 = vmatmul.mubr.msk.bf16.gmra.mrb[4].mxu1 %vm310_vm0, %v1082_v9  ;;  %1037 = vmatprep.mubr.msk.bf16.mxu0 %vm310_vm0, %v1083_v10 }
  0x1c   : > { %1053 = vmatprep.mubr.msk.bf16.mxu1 %vm310_vm0, %v1084_v11 }
  0x22   : > { %1038 = vmatmul.mubr.msk.bf16.gmra.mrb[8].mxu0 %vm310_vm0, %v1085_v12 }
  0x23   : > { %1054 = vmatmul.mubr.msk.bf16.gmra.mrb[8].mxu1 %vm310_vm0, %v1086_v13  ;;  %1041 = vmatprep.mubr.msk.bf16.mxu0 %vm310_vm0, %v1087_v14 }
  0x24   : > { %1057 = vmatprep.mubr.msk.bf16.mxu1 %vm310_vm0, %v1088_v15 }
  0x2a   : > { %1042 = vmatmul.mubr.msk.bf16.gmra.mrb[12].mxu0 %vm310_vm0, %v1089_v16 }
  0x2b   : > { %1058 = vmatmul.mubr.msk.bf16.gmra.mrb[12].mxu1 %vm310_vm0, %v1090_v17 }
  0xe5   : > { %v1031_v19 = vpop.f32.mrb[0].mxu0 }
  0xe6   : > { %v402_v20 = vadd.f32 %v1031_v19, %v1178_v18  ;;  %v1047_v21 = vpop.f32.mrb[0].mxu1  ;;  %v393_v22 = vpop.f32.mrb[1].mxu0 }
  0xe7   : > { %v466_v23 = vadd.f32 %v1047_v21, %v1178_v18  ;;  %v394_v24 = vadd.f32 %v1178_v18, %v393_v22  ;;  %v457_v25 = vpop.f32.mrb[1].mxu1  ;;  %v1032_v26 = vpop.f32.mrb[2].mxu0 }
  0xe8   : > { %v522_v27 = vadd.f32 3.0, %v402_v20  ;;  %v458_v28 = vadd.f32 %v1178_v18, %v457_v25  ;;  %v405_v29 = vadd.f32 %v1032_v26, %v1178_v18  ;;  %v1048_v30 = vpop.f32.mrb[2].mxu1  ;;  %v396_v31 = vpop.f32.mrb[3].mxu0 }
  0xe9   : > { %v538_v32 = vadd.f32 3.0, %v466_v23  ;;  %v520_v33 = vadd.f32 3.0, %v394_v24  ;;  %v469_v34 = vadd.f32 %v1048_v30, %v1178_v18  ;;  %v397_v35 = vadd.f32 %v1178_v18, %v396_v31  ;;  %v460_v36 = vpop.f32.mrb[3].mxu1 }
  0xea   : > { %v554_v37 = vmax.f32 %v522_v27, 0.0  ;;  %v536_v38 = vadd.f32 3.0, %v458_v28  ;;  %v523_v39 = vadd.f32 3.0, %v405_v29  ;;  %v461_v40 = vadd.f32 %v1178_v18, %v460_v36 }
  0xeb   : > { %v570_v41 = vmax.f32 %v538_v32, 0.0  ;;  %v552_v42 = vmax.f32 %v520_v33, 0.0  ;;  %v539_v43 = vadd.f32 3.0, %v469_v34  ;;  %v521_v44 = vadd.f32 3.0, %v397_v35 }
  0xec   : > { %v586_v45 = vmin.f32 %v554_v37, 6.0  ;;  %v568_v46 = vmax.f32 %v536_v38, 0.0  ;;  %v555_v47 = vmax.f32 %v523_v39, 0.0  ;;  %v537_v48 = vadd.f32 3.0, %v461_v40 }
  0xed   : > { %v602_v49 = vmin.f32 %v570_v41, 6.0  ;;  %v584_v50 = vmin.f32 %v552_v42, 6.0  ;;  %v571_v51 = vmax.f32 %v539_v43, 0.0  ;;  %v553_v52 = vmax.f32 %v521_v44, 0.0  ;;  %v1035_v53 = vpop.f32.mrb[4].mxu0 }
  0xee   : > { %v618_v54 = vmul.f32 %v586_v45, %v402_v20  ;;  %v600_v55 = vmin.f32 %v568_v46, 6.0  ;;  %v587_v56 = vmin.f32 %v555_v47, 6.0  ;;  %v569_v57 = vmax.f32 %v537_v48, 0.0  ;;  %v1051_v58 = vpop.f32.mrb[4].mxu1  ;;  %v409_v59 = vpop.f32.mrb[5].mxu0 }
  0xef   : > { %v634_v60 = vmul.f32 %v602_v49, %v466_v23  ;;  %v616_v61 = vmul.f32 %v584_v50, %v394_v24  ;;  %v603_v62 = vmin.f32 %v571_v51, 6.0  ;;  %v585_v63 = vmin.f32 %v553_v52, 6.0  ;;  %v473_v0 = vpop.f32.mrb[5].mxu1  ;;  %v1036_v1 = vpop.f32.mrb[6].mxu0 }
  0xf0   : > { %v650_v2 = vmul.f32 0.16666667, %v618_v54  ;;  %v632_v3 = vmul.f32 %v600_v55, %v458_v28  ;;  %v619_v4 = vmul.f32 %v587_v56, %v405_v29  ;;  %v601_v5 = vmin.f32 %v569_v57, 6.0  ;;  %v1052_v6 = vpop.f32.mrb[6].mxu1  ;;  %v412_v7 = vpop.f32.mrb[7].mxu0 }
  0xf1   : > { %v666_v8 = vmul.f32 0.16666667, %v634_v60  ;;  %v648_v9 = vmul.f32 0.16666667, %v616_v61  ;;  %v635_v10 = vmul.f32 %v603_v62, %v469_v34  ;;  %v617_v11 = vmul.f32 %v585_v63, %v397_v35  ;;  %v476_v12 = vpop.f32.mrb[7].mxu1 }
  0xf2   : > { %v977_v13 = vpack.c.bf16 %v650_v2, %v650_v2  ;;  %v664_v14 = vmul.f32 0.16666667, %v632_v3  ;;  %v651_v15 = vmul.f32 0.16666667, %v619_v4  ;;  %v633_v16 = vmul.f32 %v601_v5, %v461_v40 }
  0xf3   : > { %v993_v17 = vpack.c.bf16 %v666_v8, %v666_v8  ;;  %v975_v19 = vpack.c.bf16 %v648_v9, %v648_v9  ;;  %v667_v20 = vmul.f32 0.16666667, %v635_v10  ;;  %v649_v21 = vmul.f32 0.16666667, %v617_v11 }
  0xf4   : > { %811 = vst.msk [vmem:[%s1193_s27 + $0x8] sm:$0xf] %vm808_vm1, %v977_v13  ;;  %v991_v22 = vpack.c.bf16 %v664_v14, %v664_v14  ;;  %v978_v23 = vpack.c.bf16 %v651_v15, %v651_v15  ;;  %v665_v24 = vmul.f32 0.16666667, %v633_v16  ;;  %v418_v25 = vadd.f32 %v1035_v53, %v1178_v18 }
  0xf5   : > { %827 = vst.msk [vmem:[%s1193_s27 + $0x48] sm:$0xf] %vm808_vm1, %v993_v17  ;;  %809 = vst.msk [vmem:[%s1193_s27] sm:$0xf] %vm808_vm1, %v975_v19  ;;  %v994_v26 = vpack.c.bf16 %v667_v20, %v667_v20  ;;  %v976_v27 = vpack.c.bf16 %v649_v21, %v649_v21  ;;  %v482_v28 = vadd.f32 %v1051_v58, %v1178_v18  ;;  %v1204_v30 = vpop.f32.mrb[8].mxu0 }
  0xf6   : > { %v410_v29 = vadd.f32 %v1178_v18, %v409_v59  ;;  %825 = vst.msk [vmem:[%s1193_s27 + $0x40] sm:$0xf] %vm808_vm1, %v991_v22  ;;  %812 = vst.msk [vmem:[%s1193_s27 + $0xc] sm:$0xf] %vm808_vm1, %v978_v23  ;;  %v992_v31 = vpack.c.bf16 %v665_v24, %v665_v24  ;;  %v526_v32 = vadd.f32 3.0, %v418_v25  ;;  %v474_v33 = vadd.f32 %v1178_v18, %v473_v0  ;;  %v1212_v35 = vpop.f32.mrb[8].mxu1 }
  0xf7   : > { %v421_v34 = vadd.f32 %v1036_v1, %v1178_v18  ;;  %v1214_v36 = vpop.f32.mrb[9].mxu0  ;;  %828 = vst.msk [vmem:[%s1193_s27 + $0x4c] sm:$0xf] %vm808_vm1, %v994_v26  ;;  %810 = vst.msk [vmem:[%s1193_s27 + $0x4] sm:$0xf] %vm808_vm1, %v976_v27  ;;  %v542_v37 = vadd.f32 3.0, %v482_v28  ;;  %v485_v39 = vadd.f32 %v1052_v6, %v1178_v18  ;;  %v413_v40 = vadd.f32 %v1178_v18, %v412_v7 }
  0xf8   : > { %v524_v38 = vadd.f32 3.0, %v410_v29  ;;  %v1222_v41 = vpop.f32.mrb[9].mxu1  ;;  %v1224_v42 = vpop.f32.mrb[10].mxu0  ;;  %826 = vst.msk [vmem:[%s1193_s27 + $0x44] sm:$0xf] %vm808_vm1, %v992_v31  ;;  %v558_v43 = vmax.f32 %v526_v32, 0.0  ;;  %v477_v46 = vadd.f32 %v1178_v18, %v476_v12 }
  0xf9   : > { %v540_v44 = vadd.f32 3.0, %v474_v33  ;;  %v527_v45 = vadd.f32 3.0, %v421_v34  ;;  %v1229_v47 = vpop.f32.mrb[10].mxu1  ;;  %v1231_v48 = vpop.f32.mrb[11].mxu0  ;;  %v574_v49 = vmax.f32 %v542_v37, 0.0  ;;  %v543_v51 = vadd.f32 3.0, %v485_v39 }
  0xfa   : > { %v556_v50 = vmax.f32 %v524_v38, 0.0  ;;  %v525_v52 = vadd.f32 3.0, %v413_v40  ;;  %v1233_v53 = vpop.f32.mrb[11].mxu1  ;;  %v590_v54 = vmin.f32 %v558_v43, 6.0  ;;  %v541_v57 = vadd.f32 3.0, %v477_v46 }
  0xfb   : > { %v572_v55 = vmax.f32 %v540_v44, 0.0  ;;  %v559_v56 = vmax.f32 %v527_v45, 0.0  ;;  %v606_v58 = vmin.f32 %v574_v49, 6.0  ;;  %v575_v60 = vmax.f32 %v543_v51, 0.0 }
  0xfc   : > { %v588_v59 = vmin.f32 %v556_v50, 6.0  ;;  %v557_v61 = vmax.f32 %v525_v52, 0.0  ;;  %v622_v62 = vmul.f32 %v590_v54, %v418_v25  ;;  %v573_v1 = vmax.f32 %v541_v57, 0.0 }
  0xfd   : > { %v604_v63 = vmin.f32 %v572_v55, 6.0  ;;  %v591_v0 = vmin.f32 %v559_v56, 6.0  ;;  %v638_v2 = vmul.f32 %v606_v58, %v482_v28  ;;  %v607_v4 = vmin.f32 %v575_v60, 6.0  ;;  %v1235_v6 = vpop.f32.mrb[12].mxu0 }
  0xfe   : > { %v620_v3 = vmul.f32 %v588_v59, %v410_v29  ;;  %v589_v5 = vmin.f32 %v557_v61, 6.0  ;;  %v654_v7 = vmul.f32 0.16666667, %v622_v62  ;;  %v605_v10 = vmin.f32 %v573_v1, 6.0  ;;  %v1237_v11 = vpop.f32.mrb[12].mxu1  ;;  %v1239_v12 = vpop.f32.mrb[13].mxu0 }
  0xff   : > { %v636_v8 = vmul.f32 %v604_v63, %v474_v33  ;;  %v623_v9 = vmul.f32 %v591_v0, %v421_v34  ;;  %v670_v13 = vmul.f32 0.16666667, %v638_v2  ;;  %v639_v15 = vmul.f32 %v607_v4, %v485_v39  ;;  %v1241_v17 = vpop.f32.mrb[13].mxu1  ;;  %v1243_v19 = vpop.f32.mrb[14].mxu0 }
 0x100   : > { %v652_v14 = vmul.f32 0.16666667, %v620_v3  ;;  %v621_v16 = vmul.f32 %v589_v5, %v413_v40  ;;  %v981_v20 = vpack.c.bf16 %v654_v7, %v654_v7  ;;  %v637_v23 = vmul.f32 %v605_v10, %v477_v46  ;;  %v1245_v24 = vpop.f32.mrb[14].mxu1  ;;  %v1247_v25 = vpop.f32.mrb[15].mxu0 }
 0x101   : > { %v668_v21 = vmul.f32 0.16666667, %v636_v8  ;;  %v655_v22 = vmul.f32 0.16666667, %v623_v9  ;;  %v997_v26 = vpack.c.bf16 %v670_v13, %v670_v13  ;;  %v671_v28 = vmul.f32 0.16666667, %v639_v15 }
 0x102   : > { %v979_v27 = vpack.c.bf16 %v652_v14, %v652_v14  ;;  %v653_v29 = vmul.f32 0.16666667, %v621_v16  ;;  %v1249_v31 = vpop.f32.mrb[15].mxu1  ;;  %815 = vst.msk [vmem:[%s1193_s27 + $0x18] sm:$0xf] %vm808_vm1, %v981_v20  ;;  %v434_v37 = vadd.f32 %v1204_v30, %v1178_v18  ;;  %v498_v40 = vadd.f32 %v1212_v35, %v1178_v18 }
 0x103   : > { %v995_v32 = vpack.c.bf16 %v668_v21, %v668_v21  ;;  %v982_v33 = vpack.c.bf16 %v655_v22, %v655_v22  ;;  %v669_v34 = vmul.f32 0.16666667, %v637_v23  ;;  %831 = vst.msk [vmem:[%s1193_s27 + $0x58] sm:$0xf] %vm808_vm1, %v997_v26  ;;  %v998_v38 = vpack.c.bf16 %v671_v28, %v671_v28 }
 0x104   : > { %813 = vst.msk [vmem:[%s1193_s27 + $0x10] sm:$0xf] %vm808_vm1, %v979_v27  ;;  %v980_v39 = vpack.c.bf16 %v653_v29, %v653_v29  ;;  %v426_v43 = vadd.f32 %v1178_v18, %v1214_v36  ;;  %v530_v45 = vadd.f32 3.0, %v434_v37  ;;  %v490_v30 = vadd.f32 %v1178_v18, %v1222_v41 }
 0x105   : > { %829 = vst.msk [vmem:[%s1193_s27 + $0x50] sm:$0xf] %vm808_vm1, %v995_v32  ;;  %816 = vst.msk [vmem:[%s1193_s27 + $0x1c] sm:$0xf] %vm808_vm1, %v982_v33  ;;  %v996_v44 = vpack.c.bf16 %v669_v34, %v669_v34  ;;  %v437_v46 = vadd.f32 %v1224_v42, %v1178_v18  ;;  %v546_v35 = vadd.f32 3.0, %v498_v40  ;;  %v501_v36 = vadd.f32 %v1229_v47, %v1178_v18 }
 0x106   : > { %832 = vst.msk [vmem:[%s1193_s27 + $0x5c] sm:$0xf] %vm808_vm1, %v998_v38  ;;  %814 = vst.msk [vmem:[%s1193_s27 + $0x14] sm:$0xf] %vm808_vm1, %v980_v39  ;;  %v528_v49 = vadd.f32 3.0, %v426_v43  ;;  %v429_v50 = vadd.f32 %v1178_v18, %v1231_v48  ;;  %v562_v51 = vmax.f32 %v530_v45, 0.0  ;;  %v493_v42 = vadd.f32 %v1178_v18, %v1233_v53 }
 0x107   : > { %830 = vst.msk [vmem:[%s1193_s27 + $0x54] sm:$0xf] %vm808_vm1, %v996_v44  ;;  %v544_v52 = vadd.f32 3.0, %v490_v30  ;;  %v531_v41 = vadd.f32 3.0, %v437_v46  ;;  %v578_v54 = vmax.f32 %v546_v35, 0.0  ;;  %v547_v56 = vadd.f32 3.0, %v501_v36 }
 0x108   : > { %v560_v55 = vmax.f32 %v528_v49, 0.0  ;;  %v529_v57 = vadd.f32 3.0, %v429_v50  ;;  %v594_v58 = vmin.f32 %v562_v51, 6.0  ;;  %v545_v61 = vadd.f32 3.0, %v493_v42 }
 0x109   : > { %v576_v59 = vmax.f32 %v544_v52, 0.0  ;;  %v563_v60 = vmax.f32 %v531_v41, 0.0  ;;  %v610_v47 = vmin.f32 %v578_v54, 6.0  ;;  %v579_v63 = vmax.f32 %v547_v56, 0.0 }
 0x10a   : > { %v592_v62 = vmin.f32 %v560_v55, 6.0  ;;  %v561_v48 = vmax.f32 %v529_v57, 0.0  ;;  %v626_v0 = vmul.f32 %v594_v58, %v434_v37  ;;  %v577_v3 = vmax.f32 %v545_v61, 0.0 }
 0x10b   : > { %v608_v1 = vmin.f32 %v576_v59, 6.0  ;;  %v595_v2 = vmin.f32 %v563_v60, 6.0  ;;  %v642_v4 = vmul.f32 %v610_v47, %v498_v40  ;;  %v611_v7 = vmin.f32 %v579_v63, 6.0 }
 0x10c   : > { %v624_v5 = vmul.f32 %v592_v62, %v426_v43  ;;  %v593_v53 = vmin.f32 %v561_v48, 6.0  ;;  %v658_v8 = vmul.f32 0.16666667, %v626_v0  ;;  %v609_v13 = vmin.f32 %v577_v3, 6.0 }
 0x10d   : > { %v640_v9 = vmul.f32 %v608_v1, %v490_v30  ;;  %v627_v10 = vmul.f32 %v595_v2, %v437_v46  ;;  %v674_v14 = vmul.f32 0.16666667, %v642_v4  ;;  %v643_v16 = vmul.f32 %v611_v7, %v501_v36 }
 0x10e   : > { %v656_v15 = vmul.f32 0.16666667, %v624_v5  ;;  %v625_v20 = vmul.f32 %v593_v53, %v429_v50  ;;  %v985_v21 = vpack.c.bf16 %v658_v8, %v658_v8  ;;  %v641_v26 = vmul.f32 %v609_v13, %v493_v42 }
 0x10f   : > { %v672_v22 = vmul.f32 0.16666667, %v640_v9  ;;  %v659_v23 = vmul.f32 0.16666667, %v627_v10  ;;  %v1001_v27 = vpack.c.bf16 %v674_v14, %v674_v14  ;;  %v675_v29 = vmul.f32 0.16666667, %v643_v16 }
 0x110   : > { %v983_v28 = vpack.c.bf16 %v656_v15, %v656_v15  ;;  %v657_v32 = vmul.f32 0.16666667, %v625_v20  ;;  %819 = vst.msk [vmem:[%s1193_s27 + $0x28] sm:$0xf] %vm808_vm1, %v985_v21  ;;  %v673_v37 = vmul.f32 0.16666667, %v641_v26  ;;  %v450_v38 = vadd.f32 %v1235_v6, %v1178_v18 }
 0x111   : > { %v999_v33 = vpack.c.bf16 %v672_v22, %v672_v22  ;;  %v986_v34 = vpack.c.bf16 %v659_v23, %v659_v23  ;;  %835 = vst.msk [vmem:[%s1193_s27 + $0x68] sm:$0xf] %vm808_vm1, %v1001_v27  ;;  %v1002_v39 = vpack.c.bf16 %v675_v29, %v675_v29  ;;  %v514_v43 = vadd.f32 %v1237_v11, %v1178_v18 }
 0x112   : > { %817 = vst.msk [vmem:[%s1193_s27 + $0x20] sm:$0xf] %vm808_vm1, %v983_v28  ;;  %v984_v40 = vpack.c.bf16 %v657_v32, %v657_v32  ;;  %v442_v44 = vadd.f32 %v1178_v18, %v1239_v12  ;;  %v1000_v45 = vpack.c.bf16 %v673_v37, %v673_v37  ;;  %v534_v30 = vadd.f32 3.0, %v450_v38 }
 0x113   : > { %833 = vst.msk [vmem:[%s1193_s27 + $0x60] sm:$0xf] %vm808_vm1, %v999_v33  ;;  %820 = vst.msk [vmem:[%s1193_s27 + $0x2c] sm:$0xf] %vm808_vm1, %v986_v34  ;;  %v506_v6 = vadd.f32 %v1178_v18, %v1241_v17  ;;  %v453_v46 = vadd.f32 %v1243_v19, %v1178_v18  ;;  %v550_v11 = vadd.f32 3.0, %v514_v43  ;;  %v517_v12 = vadd.f32 %v1245_v24, %v1178_v18 }
 0x114   : > { %836 = vst.msk [vmem:[%s1193_s27 + $0x6c] sm:$0xf] %vm808_vm1, %v1002_v39  ;;  %818 = vst.msk [vmem:[%s1193_s27 + $0x24] sm:$0xf] %vm808_vm1, %v984_v40  ;;  %v532_v35 = vadd.f32 3.0, %v442_v44  ;;  %v445_v49 = vadd.f32 %v1178_v18, %v1247_v25  ;;  %v566_v36 = vmax.f32 %v534_v30, 0.0  ;;  %v509_v19 = vadd.f32 %v1178_v18, %v1249_v31 }
 0x115   : > { %834 = vst.msk [vmem:[%s1193_s27 + $0x64] sm:$0xf] %vm808_vm1, %v1000_v45  ;;  %v548_v50 = vadd.f32 3.0, %v506_v6  ;;  %v535_v17 = vadd.f32 3.0, %v453_v46  ;;  %v582_v51 = vmax.f32 %v550_v11, 0.0  ;;  %v551_v41 = vadd.f32 3.0, %v517_v12 }
 0x116   : > { %v564_v52 = vmax.f32 %v532_v35, 0.0  ;;  %v533_v42 = vadd.f32 3.0, %v445_v49  ;;  %v598_v54 = vmin.f32 %v566_v36, 6.0  ;;  %v549_v57 = vadd.f32 3.0, %v509_v19 }
 0x117   : > { %v580_v55 = vmax.f32 %v548_v50, 0.0  ;;  %v567_v56 = vmax.f32 %v535_v17, 0.0  ;;  %v614_v24 = vmin.f32 %v582_v51, 6.0  ;;  %v583_v59 = vmax.f32 %v551_v41, 0.0 }
 0x118   : > { %v596_v58 = vmin.f32 %v564_v52, 6.0  ;;  %v565_v25 = vmax.f32 %v533_v42, 0.0  ;;  %v630_v60 = vmul.f32 %v598_v54, %v450_v38  ;;  %v581_v62 = vmax.f32 %v549_v57, 0.0 }
 0x119   : > { %v612_v61 = vmin.f32 %v580_v55, 6.0  ;;  %v599_v47 = vmin.f32 %v567_v56, 6.0  ;;  %v646_v63 = vmul.f32 %v614_v24, %v514_v43  ;;  %v615_v0 = vmin.f32 %v583_v59, 6.0 }
 0x11a   : > { %v628_v48 = vmul.f32 %v596_v58, %v442_v44  ;;  %v597_v18 = vmin.f32 %v565_v25, 6.0  ;;  %v662_v31 = vmul.f32 0.16666667, %v630_v60  ;;  %v613_v3 = vmin.f32 %v581_v62, 6.0 }
 0x11b   : > { %v644_v1 = vmul.f32 %v612_v61, %v506_v6  ;;  %v631_v2 = vmul.f32 %v599_v47, %v453_v46  ;;  %v678_v4 = vmul.f32 0.16666667, %v646_v63  ;;  %v647_v7 = vmul.f32 %v615_v0, %v517_v12 }
 0x11c   : > { %v660_v5 = vmul.f32 0.16666667, %v628_v48  ;;  %v629_v53 = vmul.f32 %v597_v18, %v445_v49  ;;  %v989_v8 = vpack.c.bf16 %v662_v31, %v662_v31  ;;  %v645_v13 = vmul.f32 %v613_v3, %v509_v19 }
 0x11d   : > { %v676_v9 = vmul.f32 0.16666667, %v644_v1  ;;  %v663_v10 = vmul.f32 0.16666667, %v631_v2  ;;  %v1005_v14 = vpack.c.bf16 %v678_v4, %v678_v4  ;;  %v679_v16 = vmul.f32 0.16666667, %v647_v7 }
 0x11e   : > { %v987_v15 = vpack.c.bf16 %v660_v5, %v660_v5  ;;  %v661_v20 = vmul.f32 0.16666667, %v629_v53  ;;  %823 = vst.msk [vmem:[%s1193_s27 + $0x38] sm:$0xf] %vm808_vm1, %v989_v8  ;;  %v677_v23 = vmul.f32 0.16666667, %v645_v13 }
 0x11f   : > { %v1003_v21 = vpack.c.bf16 %v676_v9, %v676_v9  ;;  %v990_v22 = vpack.c.bf16 %v663_v10, %v663_v10  ;;  %839 = vst.msk [vmem:[%s1193_s27 + $0x78] sm:$0xf] %vm808_vm1, %v1005_v14  ;;  %v1006_v26 = vpack.c.bf16 %v679_v16, %v679_v16 }
 0x120   : > { %821 = vst.msk [vmem:[%s1193_s27 + $0x30] sm:$0xf] %vm808_vm1, %v987_v15  ;;  %v988_v27 = vpack.c.bf16 %v661_v20, %v661_v20  ;;  %v1004_v28 = vpack.c.bf16 %v677_v23, %v677_v23 }
 0x121   : > { %837 = vst.msk [vmem:[%s1193_s27 + $0x70] sm:$0xf] %vm808_vm1, %v1003_v21  ;;  %824 = vst.msk [vmem:[%s1193_s27 + $0x3c] sm:$0xf] %vm808_vm1, %v990_v22 }
 0x122   : > { %840 = vst.msk [vmem:[%s1193_s27 + $0x7c] sm:$0xf] %vm808_vm1, %v1006_v26  ;;  %822 = vst.msk [vmem:[%s1193_s27 + $0x34] sm:$0xf] %vm808_vm1, %v988_v27 }
 0x123   : > { %838 = vst.msk [vmem:[%s1193_s27 + $0x74] sm:$0xf] %vm808_vm1, %v1004_v28 }
 0x124 PF: > { %s13_s12 = sadd.s32 1, %s1097_s12  }
 0x125   : > { %p10_p4 = scmp.ge.s32.totalorder %s13_s12, 4  }
 0x127   :  { %12 = sbr.rel (!%p10_p4) target bundleno = 1 (0x1), region = 62 }

// kernel: _lambda_.8
= control target key start
LH: loop header
LB: loop body
LE: loop exit
PB: predicated region body
PF: predicated region fallthrough
CT: control target
= control target key end

     0   :  { %s1446_s27 = smov 0   ;;  %s1696_s0 = inlined_call_operand.vmem [shape: bf16[2,64,16], index: 0, kind: input, shape index: {}]   ;;  %s1697_s1 = inlined_call_operand.vmem [shape: bf16[16,72], index: 1, kind: input, shape index: {}]   ;;  %s1698_s2 = inlined_call_operand.vmem [shape: f32[1,72], index: 2, kind: input, shape index: {}]   ;;  %s1699_s3 = inlined_call_operand.vmem [shape: f32[9,1,72], index: 3, kind: input, shape index: {}]   ;;  %s1700_s4 = inlined_call_operand.vmem [shape: f32[1,72], index: 4, kind: input, shape index: {}]   ;;  %s1701_s5 = inlined_call_operand.vmem [shape: f32[4,7], index: 5, kind: input, shape index: {}]   ;;  %s1702_s6 = inlined_call_operand.vmem [shape: bf16[72,24], index: 6, kind: input, shape index: {}]   ;;  %s1703_s7 = inlined_call_operand.vmem [shape: f32[1,24], index: 7, kind: input, shape index: {}]   ;;  %s1704_s8 = inlined_call_operand.vmem [shape: bf16[2,16,24], index: 8, kind: output, shape index: {}]  }
   0x1 LB: > { %s1248_s28 = sadd.s32 4294967295, %s1397_s27   ;;  %p1252_p0 = scmp.ge.s32.totalorder %s1397_s27, 1  ;;  %s1397_s27 = sphi %s1446_s27, %s18_s27  }
   0x2   : > { %p262_p1 = scmp.lt.s32.totalorder %s1397_s27, 3 }
   0x4   : > { %p263_p2 = pnand %p1252_p0, %p262_p1 }
   0x5   : > { %v1381_v0 = vld [vmem:[%s1697_s1] sm:$0xff] (!%p263_p2)   ;;  %p296_p3 = scmp.lt.s32.totalorder (!%p263_p2), %s1248_s28, 1  ;;  %vm350_vm0 = vcmask (!%p263_p2), 130048   ;;  %vm436_vm1 = vcmask (!%p263_p2), 588800   ;;  %vm438_vm2 = vcmask (!%p263_p2), 582656   ;;  %v1399_v5 = vmov (!%p263_p2), 0.0  }
   0x6   : > { %266 = sbr.rel (%p263_p2) target bundleno = 726 (0x2d6), region = 52  ;;  %1327 = vmatprep.subr.bf16.mxu0 (!%p263_p2), %v1381_v0  ;;  %444 = vst.msk [vmem:[#allocation2 + $0x30] sm:$0xff] (!%p263_p2), %vm436_vm1, %v1399_v5  ;;  %437 = vst.msk [vmem:[#allocation2] sm:$0xff] (!%p263_p2), %vm436_vm1, %v1399_v5  ;;  %1337 = vmatprep.subr.mxu1 (!%p263_p2), %v1399_v5  ;;  %vm1400_vm3 = vmmov (!%p263_p2), 0   ;;  %v1508_v6 = vld [vmem:[%s1699_s3 + $0x1] ss:$0 sm:$0xff] (!%p263_p2) }
   0x7   : > { %1328 = vmatpush3.bf16.msra.mxu0 (!%p263_p2), %v1381_v0  ;;  %440 = vst.msk [vmem:[#allocation2 + $0x10] sm:$0xff] (!%p263_p2), %vm436_vm1, %v1399_v5  ;;  %442 = vst.msk [vmem:[#allocation2 + $0x20] sm:$0xff] (!%p263_p2), %vm436_vm1, %v1399_v5  ;;  %1339 = vmatprep.mubr.msk.f32.mxu1 (!%p263_p2), %vm1400_vm3, %v1399_v5  ;;  %v1257_v8 = vld [vmem:[%s1698_s2] ss:$0 sm:$0xff] (!%p263_p2)  ;;  %v1516_v9 = vld [vmem:[%s1699_s3 + $0x2] ss:$0 sm:$0xff] (!%p263_p2) }
   0x8   : > { %446 = vst.msk [vmem:[#allocation2 + $0x40] sm:$0xff] (!%p263_p2), %vm436_vm1, %v1399_v5  ;;  %448 = vst.msk [vmem:[#allocation2 + $0x50] sm:$0xff] (!%p263_p2), %vm436_vm1, %v1399_v5  ;;  %1357 = vmatprep.subr.bf16.mxu0 (!%p263_p2), %v1399_v5  ;;  %v1522_v15 = vld [vmem:[%s1699_s3] ss:$0 sm:$0xff] (!%p263_p2)  ;;  %vm523_vm4 = vcmask (!%p263_p2), 1045504   ;;  %vm612_vm5 = vcmask (!%p263_p2), 1046528  }
   0x9   : > { %450 = vst.msk [vmem:[#allocation2 + $0x60] sm:$0xff] (!%p263_p2), %vm436_vm1, %v1399_v5  ;;  %452 = vst.msk [vmem:[#allocation2 + $0x70] sm:$0xff] (!%p263_p2), %vm436_vm1, %v1399_v5  ;;  %v1535_v38 = vld [vmem:[%s1699_s3 + $0x3] ss:$0 sm:$0xff] (!%p263_p2)  ;;  %v1540_v42 = vld [vmem:[%s1699_s3 + $0x4] ss:$0 sm:$0xff] (!%p263_p2) }
   0xa   : > { %454 = vst.msk [vmem:[#allocation2 + $0x80] sm:$0xff] (!%p263_p2), %vm436_vm1, %v1399_v5  ;;  %v1545_v43 = vld [vmem:[%s1699_s3 + $0x5] ss:$0 sm:$0xff] (!%p263_p2)  ;;  %v1552_v53 = vld [vmem:[%s1699_s3 + $0x7] ss:$0 sm:$0xff] (!%p263_p2)  ;;  %vm608_vm6 = vcmask (!%p263_p2), 56320  }
   0xb   : > { %445 = vst.msk [vmem:[#allocation2 + $0x38] sm:$0x3] (!%p263_p2), %vm438_vm2, %v1399_v5  ;;  %439 = vst.msk [vmem:[#allocation2 + $0x8] sm:$0x3] (!%p263_p2), %vm438_vm2, %v1399_v5  ;;  %v1557_v54 = vld [vmem:[%s1699_s3 + $0x8] ss:$0 sm:$0xff] (!%p263_p2) }
   0xc   : > { %441 = vst.msk [vmem:[#allocation2 + $0x18] sm:$0x3] (!%p263_p2), %vm438_vm2, %v1399_v5  ;;  %443 = vst.msk [vmem:[#allocation2 + $0x28] sm:$0x3] (!%p263_p2), %vm438_vm2, %v1399_v5  ;;  %v1566_v58 = vld [vmem:[%s1699_s3 + $0x6] ss:$0 sm:$0xff] (!%p263_p2) }
   0xd   : > { %s1706_s28 = smov (!%p296_p3, %s1248_s28), 1  ;;  %447 = vst.msk [vmem:[#allocation2 + $0x48] sm:$0x3] %vm438_vm2, %v1399_v5  ;;  %449 = vst.msk [vmem:[#allocation2 + $0x58] sm:$0x3] %vm438_vm2, %v1399_v5  ;;  %v492_v7 = vld [vmem:[#allocation2] sm:$0xff] }
   0xe   : > { %s1304_s9 = sshll.u32 %s1706_s28, 5  ;;  %451 = vst.msk [vmem:[#allocation2 + $0x68] sm:$0x3] %vm438_vm2, %v1399_v5  ;;  %453 = vst.msk [vmem:[#allocation2 + $0x78] sm:$0x3] %vm438_vm2, %v1399_v5  ;;  %v508_v12 = vmul.f32 %v1508_v6, %v492_v7  ;;  %v519_v16 = vmul.f32 %v1516_v9, %v492_v7  ;;  %v500_v25 = vmul.f32 %v1522_v15, %v492_v7  ;;  %vm1137_vm7 = vcmask 1043456  }
   0xf   : > { %s300_s12 = scalar_lea.vmem %s1696_s0, %s1304_s9  ;;  %455 = vst.msk [vmem:[#allocation2 + $0x88] sm:$0x3] %vm438_vm2, %v1399_v5  ;;  %vm687_vm8 = vcmask 584704   ;;  %s1305_s15 = sshll.u32 %s1706_s28, 3  ;;  %vm1190_vm9 = vcmask 191488  }
  0x10   : > { %v1382_v1 = vld [vmem:[%s300_s12] sm:$0xff]   ;;  %v1383_v2 = vld [vmem:[%s300_s12 + $0x8] sm:$0xff]   ;;  %v1384_v3 = vld [vmem:[%s300_s12 + $0x10] sm:$0xff]   ;;  %v510_v26 = vrot.slane %v508_v12, 1  ;;  %v524_v28 = vrot.slane %v519_v16, 2  ;;  %s305_s18 = scalar_lea.vmem %s1704_s8, %s1305_s15 }
  0x11   : > { %1329 = vmatprep.mubr.msk.bf16.mxu0 %vm350_vm0, %v1382_v1  ;;  %v1385_v4 = vld [vmem:[%s300_s12 + $0x18] sm:$0xff]  }
  0x12   : > { %1330 = vmatmul.mubr.msk.bf16.vlgmr.msra.gmra.mrb[0].mxu0 %vm350_vm0, %v1383_v2  ;;  %v493_v10 = vld [vmem:[#allocation2 + $0x8] sm:$0x3]  ;;  %v512_v32 = vadd.f32 %v510_v26, %v500_v25 }
  0x13   : > { %1333 = vmatprep.mubr.msk.bf16.mxu0 %vm350_vm0, %v1384_v3  ;;  %v520_v17 = vmul.f32 %v1516_v9, %v493_v10 }
  0x15   : > { %v525_v29 = vrot.slane %v520_v17, 2 }
  0x17   : > { %v526_v35 = vsel %vm523_vm4, %v524_v28, %v525_v29 }
  0x18   : > { %v528_v46 = vadd.f32 %v526_v35, %v512_v32 }
  0x1a   : > { %1334 = vmatmul.mubr.msk.bf16.gmra.mrb[4].mxu0 %vm350_vm0, %v1385_v4 }
  0x1b   : > { %1367 = vmatprep.mubr.msk.bf16.mxu0 %vm1400_vm3, %v1399_v5 }
  0xe5   : > { %v1331_v11 = vpop.f32.mrb[0].mxu0 }
  0xe6   : > { %v406_v13 = vadd.f32 %v1331_v11, %v1257_v8  ;;  %v397_v14 = vpop.f32.mrb[1].mxu0 }
  0xe7   : > { %v398_v18 = vadd.f32 %v1257_v8, %v397_v14  ;;  %v1332_v19 = vpop.f32.mrb[2].mxu0 }
  0xe8   : > { %v430_v20 = vmax.f32 %v406_v13, 0.0  ;;  %v409_v21 = vadd.f32 %v1332_v19, %v1257_v8  ;;  %v400_v22 = vpop.f32.mrb[3].mxu0 }
  0xe9   : > { %v428_v23 = vmax.f32 %v398_v18, 0.0  ;;  %v401_v24 = vadd.f32 %v1257_v8, %v400_v22 }
  0xea   : > { %463 = vst.msk [vmem:[#allocation2 + $0x31] sm:$0xff] %vm436_vm1, %v430_v20  ;;  %v431_v27 = vmax.f32 %v409_v21, 0.0 }
  0xeb   : > { %459 = vst.msk [vmem:[#allocation2 + $0x11] sm:$0xff] %vm436_vm1, %v428_v23  ;;  %v429_v30 = vmax.f32 %v401_v24, 0.0 }
  0xec   : > { %465 = vst.msk [vmem:[#allocation2 + $0x41] sm:$0xff] %vm436_vm1, %v431_v27 }
  0xed   : > { %461 = vst.msk [vmem:[#allocation2 + $0x21] sm:$0xff] %vm436_vm1, %v429_v30  ;;  %v1335_v31 = vpop.f32.mrb[4].mxu0 }
  0xee   : > { %v422_v33 = vadd.f32 %v1335_v31, %v1257_v8  ;;  %v413_v34 = vpop.f32.mrb[5].mxu0 }
  0xef   : > { %v414_v36 = vadd.f32 %v1257_v8, %v413_v34  ;;  %v1336_v37 = vpop.f32.mrb[6].mxu0 }
  0xf0   : > { %v434_v39 = vmax.f32 %v422_v33, 0.0  ;;  %v425_v40 = vadd.f32 %v1336_v37, %v1257_v8  ;;  %v416_v41 = vpop.f32.mrb[7].mxu0 }
  0xf1   : > { %v432_v44 = vmax.f32 %v414_v36, 0.0  ;;  %v417_v45 = vadd.f32 %v1257_v8, %v416_v41  ;;  %v707_v47 = vld [vmem:[#allocation2 + $0x30] sm:$0xff]  ;;  %v708_v51 = vld [vmem:[#allocation2 + $0x38] sm:$0x3] }
  0xf2   : > { %471 = vst.msk [vmem:[#allocation2 + $0x71] sm:$0xff] %vm436_vm1, %v434_v39  ;;  %v435_v48 = vmax.f32 %v425_v40, 0.0  ;;  %v529_v49 = vld [vmem:[#allocation2 + $0x10] sm:$0xff]  ;;  %v530_v50 = vld [vmem:[#allocation2 + $0x18] sm:$0x3]  ;;  %v1570_v62 = vmul.f32 %v1540_v42, %v707_v47  ;;  %v1573_v63 = vmul.f32 %v1545_v43, %v707_v47  ;;  %v1577_v3 = vmul.f32 %v1545_v43, %v708_v51 }
  0xf3   : > { %467 = vst.msk [vmem:[#allocation2 + $0x51] sm:$0xff] %vm436_vm1, %v432_v44  ;;  %v433_v52 = vmax.f32 %v417_v45, 0.0  ;;  %v537_v55 = vmul.f32 %v1535_v38, %v529_v49  ;;  %v545_v56 = vmul.f32 %v1540_v42, %v529_v49  ;;  %v556_v57 = vmul.f32 %v1545_v43, %v529_v49  ;;  %v725_v21 = vld [vmem:[#allocation2 + $0x40] sm:$0xff]  ;;  %v726_v26 = vld [vmem:[#allocation2 + $0x48] sm:$0x3] }
  0xf4   : > { %473 = vst.msk [vmem:[#allocation2 + $0x81] sm:$0xff] %vm436_vm1, %v435_v48  ;;  %v557_v59 = vmul.f32 %v1545_v43, %v530_v50  ;;  %v565_v60 = vld [vmem:[#allocation2 + $0x20] sm:$0xff]  ;;  %v566_v61 = vld [vmem:[#allocation2 + $0x28] sm:$0x3]  ;;  %v709_v28 = vmul.f32 %v1535_v38, %v707_v47  ;;  %v713_v29 = vrot.slane %v1570_v62, 1  ;;  %v734_v33 = vmul.f32 %v1557_v54, %v725_v21 }
  0xf5   : > { %469 = vst.msk [vmem:[#allocation2 + $0x61] sm:$0xff] %vm436_vm1, %v433_v52  ;;  %v538_v0 = vadd.f32 %v537_v55, %v528_v46  ;;  %v547_v1 = vrot.slane %v545_v56, 1  ;;  %v560_v2 = vrot.slane %v556_v57, 2  ;;  %v581_v7 = vmul.f32 %v1552_v53, %v565_v60  ;;  %v690_v11 = vld [vmem:[#allocation2 + $0x28] sm:$0x3] }
  0xf6   : > { %v561_v4 = vrot.slane %v557_v59, 2  ;;  %v592_v8 = vmul.f32 %v1557_v54, %v565_v60  ;;  %v593_v10 = vmul.f32 %v1557_v54, %v566_v61  ;;  %v573_v13 = vmul.f32 %v1566_v58, %v565_v60  ;;  %v823_v34 = vld [vmem:[#allocation2 + $0x48] sm:$0x3]  ;;  %v601_v55 = vld [vmem:[%s1701_s5] sm:$0xf] }
  0xf7   : > { %v549_v12 = vadd.f32 %v547_v1, %v538_v0  ;;  %v693_v14 = vmul.f32 %v1508_v6, %v565_v60  ;;  %v698_v16 = vmul.f32 %v1516_v9, %v565_v60  ;;  %v691_v20 = vmul.f32 %v1522_v15, %v565_v60 }
  0xf8   : > { %v562_v17 = vsel %vm523_vm4, %v560_v2, %v561_v4  ;;  %v596_v18 = vrot.slane %v592_v8, 2  ;;  %v597_v19 = vrot.slane %v593_v10, 2  ;;  %v699_v24 = vmul.f32 %v1516_v9, %v690_v11 }
  0xf9   : > { %v564_v22 = vadd.f32 %v562_v17, %v549_v12  ;;  %v695_v23 = vrot.slane %v693_v14, 1  ;;  %v702_v25 = vrot.slane %v698_v16, 2  ;;  %v583_v27 = vrot.slane %v581_v7, 1 }
  0xfa   : > { %v703_v32 = vrot.slane %v699_v24, 2  ;;  %v598_v35 = vsel %vm523_vm4, %v596_v18, %v597_v19  ;;  %v720_v36 = vrot.slane %v1573_v63, 2  ;;  %v721_v37 = vrot.slane %v1577_v3, 2  ;;  %v840_v40 = vld [vmem:[#allocation2 + $0x50] sm:$0xff]  ;;  %v841_v51 = vld [vmem:[#allocation2 + $0x58] sm:$0x3] }
  0xfb   : > { %v574_v30 = vadd.f32 %v573_v13, %v564_v22  ;;  %v697_v31 = vadd.f32 %v695_v23, %v691_v20  ;;  %v735_v39 = vmul.f32 %v1557_v54, %v726_v26  ;;  %v729_v45 = vmul.f32 %v1552_v53, %v725_v21 }
  0xfc   : > { %v704_v44 = vsel %vm523_vm4, %v702_v25, %v703_v32  ;;  %v826_v46 = vmul.f32 %v1508_v6, %v725_v21  ;;  %v824_v48 = vmul.f32 %v1522_v15, %v725_v21  ;;  %v831_v49 = vmul.f32 %v1516_v9, %v725_v21  ;;  %v858_v4 = vld [vmem:[#allocation2 + $0x60] sm:$0xff]  ;;  %v859_v16 = vld [vmem:[#allocation2 + $0x68] sm:$0x3] }
  0xfd   : > { %v585_v41 = vadd.f32 %v583_v27, %v574_v30  ;;  %v706_v47 = vadd.f32 %v704_v44, %v697_v31  ;;  %v832_v50 = vmul.f32 %v1516_v9, %v823_v34  ;;  %v738_v56 = vrot.slane %v734_v33, 2  ;;  %v956_v22 = vld [vmem:[#allocation2 + $0x68] sm:$0x3]  ;;  %v973_v31 = vld [vmem:[#allocation2 + $0x70] sm:$0xff] }
  0xfe   : > { %v828_v57 = vrot.slane %v826_v46, 1  ;;  %v844_v59 = vmul.f32 %v1540_v42, %v840_v40  ;;  %v739_v61 = vrot.slane %v735_v39, 2  ;;  %v835_v62 = vrot.slane %v831_v49, 2 }
  0xff   : > { %v600_v52 = vadd.f32 %v598_v35, %v585_v41  ;;  %v710_v60 = vadd.f32 %v709_v28, %v706_v47  ;;  %v836_v63 = vrot.slane %v832_v50, 2  ;;  %v842_v1 = vmul.f32 %v1535_v38, %v840_v40  ;;  %v974_v35 = vld [vmem:[#allocation2 + $0x78] sm:$0x3]  ;;  %v743_v47 = vld [vmem:[%s1701_s5] sm:$0xf] }
 0x100   : > { %v830_v0 = vadd.f32 %v828_v57, %v824_v48  ;;  %v849_v2 = vmul.f32 %v1545_v43, %v840_v40  ;;  %v850_v3 = vmul.f32 %v1545_v43, %v841_v51  ;;  %v722_v8 = vsel %vm523_vm4, %v720_v36, %v721_v37  ;;  %v992_v57 = vld [vmem:[#allocation2 + $0x88] sm:$0x3] }
 0x101   : > { %1338 = vmatpush3.msk.msra.mxu1 %vm612_vm5, %v600_v52  ;;  %v715_v7 = vadd.f32 %v713_v29, %v710_v60  ;;  %v837_v10 = vsel %vm523_vm4, %v835_v62, %v836_v63  ;;  %v846_v12 = vrot.slane %v844_v59, 1  ;;  %v727_v18 = vmul.f32 %v1566_v58, %v725_v21 }
 0x102   : > { %1340 = vmatmul.mubr.msk.f32.vlgmr.msra.gmra.mrb[0].mxu1 %vm608_vm6, %v601_v55  ;;  %1342 = vmatprep.subr.mxu1 %v1399_v5  ;;  %v839_v11 = vadd.f32 %v837_v10, %v830_v0  ;;  %v853_v13 = vrot.slane %v849_v2, 2  ;;  %v854_v14 = vrot.slane %v850_v3, 2  ;;  %v731_v19 = vrot.slane %v729_v45, 1 }
 0x103   : > { %1344 = vmatprep.mubr.msk.f32.mxu1 %vm1400_vm3, %v1399_v5  ;;  %v724_v17 = vadd.f32 %v722_v8, %v715_v7  ;;  %v867_v20 = vmul.f32 %v1557_v54, %v858_v4  ;;  %v740_v23 = vsel %vm523_vm4, %v738_v56, %v739_v61  ;;  %v862_v25 = vmul.f32 %v1552_v53, %v858_v4  ;;  %v991_v56 = vld [vmem:[#allocation2 + $0x80] sm:$0xff] }
 0x104   : > { %v843_v24 = vadd.f32 %v842_v1, %v839_v11  ;;  %v959_v26 = vmul.f32 %v1508_v6, %v858_v4  ;;  %v855_v28 = vsel %vm523_vm4, %v853_v13, %v854_v14  ;;  %v868_v29 = vmul.f32 %v1557_v54, %v859_v16  ;;  %v1009_v16 = vld [vmem:[%s1701_s5] sm:$0xf] }
 0x105   : > { %v728_v27 = vadd.f32 %v727_v18, %v724_v17  ;;  %v964_v30 = vmul.f32 %v1516_v9, %v858_v4  ;;  %v957_v32 = vmul.f32 %v1522_v15, %v858_v4  ;;  %v965_v34 = vmul.f32 %v1516_v9, %v956_v22  ;;  %v1387_v17 = vld [vmem:[%s1702_s6 + $0x8] sm:$0xff]   ;;  %v1388_v18 = vld [vmem:[%s1702_s6 + $0x10] sm:$0xff]  }
 0x106   : > { %v848_v21 = vadd.f32 %v846_v12, %v843_v24  ;;  %v961_v33 = vrot.slane %v959_v26, 1  ;;  %v860_v37 = vmul.f32 %v1566_v58, %v858_v4  ;;  %v871_v39 = vrot.slane %v867_v20, 2  ;;  %v1390_v20 = vld [vmem:[%s1702_s6 + $0x20] ss:$0 sps:$4 sm:$0xff]  }
 0x107   : > { %v733_v36 = vadd.f32 %v731_v19, %v728_v27  ;;  %v968_v6 = vrot.slane %v964_v30, 2  ;;  %v969_v44 = vrot.slane %v965_v34, 2  ;;  %v982_v45 = vmul.f32 %v1545_v43, %v973_v31  ;;  %v1389_v19 = vld [vmem:[%s1702_s6 + $0x18] sm:$0xff]  }
 0x108   : > { %v857_v40 = vadd.f32 %v855_v28, %v848_v21  ;;  %v963_v41 = vadd.f32 %v961_v33, %v957_v32  ;;  %v872_v15 = vrot.slane %v868_v29, 2  ;;  %v977_v48 = vmul.f32 %v1540_v42, %v973_v31 }
 0x109   : > { %v742_v46 = vadd.f32 %v740_v23, %v733_v36  ;;  %v983_v9 = vmul.f32 %v1545_v43, %v974_v35  ;;  %v864_v50 = vrot.slane %v862_v25, 1  ;;  %v970_v51 = vsel %vm523_vm4, %v968_v6, %v969_v44  ;;  %v1284_v23 = vld [vmem:[%s1700_s4] ss:$0 sm:$0xff] }
 0x10a   : > { %v861_v49 = vadd.f32 %v860_v37, %v857_v40  ;;  %v972_v52 = vadd.f32 %v970_v51, %v963_v41  ;;  %v975_v55 = vmul.f32 %v1535_v38, %v973_v31  ;;  %v986_v60 = vrot.slane %v982_v45, 2  ;;  %v876_v38 = vld [vmem:[%s1701_s5] sm:$0xf] }
 0x10b   : > { %1343 = vmatpush3.msk.msra.mxu1 %vm612_vm5, %v742_v46  ;;  %v987_v42 = vrot.slane %v983_v9, 2  ;;  %v873_v43 = vsel %vm523_vm4, %v871_v39, %v872_v15  ;;  %v979_v62 = vrot.slane %v977_v48, 1  ;;  %v1000_v0 = vmul.f32 %v1557_v54, %v991_v56  ;;  %v1293_v41 = vld [vmem:[%s1703_s7] ss:$0 sm:$0xff] }
 0x10c   : > { %1345 = vmatmul.mubr.msk.f32.vlgmr.msra.gmra.mrb[2].mxu1 %vm608_vm6, %v743_v47  ;;  %1347 = vmatprep.subr.mxu1 %v1399_v5  ;;  %v866_v59 = vadd.f32 %v864_v50, %v861_v49  ;;  %v976_v61 = vadd.f32 %v975_v55, %v972_v52  ;;  %v1001_v1 = vmul.f32 %v1557_v54, %v992_v57  ;;  %v1139_v22 = vsel %vm1137_vm7, %v1390_v20, 0 }
 0x10d   : > { %1349 = vmatprep.mubr.msk.f32.mxu1 %vm1400_vm3, %v1399_v5  ;;  %v995_v3 = vmul.f32 %v1552_v53, %v991_v56  ;;  %v988_v4 = vsel %vm523_vm4, %v986_v60, %v987_v42  ;;  %v993_v8 = vmul.f32 %v1566_v58, %v991_v56  ;;  %v1004_v10 = vrot.slane %v1000_v0, 2  ;;  %v1386_v58 = vld [vmem:[%s1702_s6] sm:$0xff]  }
 0x10e   : > { %v875_v63 = vadd.f32 %v873_v43, %v866_v59  ;;  %v981_v2 = vadd.f32 %v979_v62, %v976_v61  ;;  %v1005_v11 = vrot.slane %v1001_v1, 2  ;;  %1358 = vmatpush3.bf16.msra.mxu0 %v1386_v58 }
 0x10f   : > { %v997_v12 = vrot.slane %v995_v3, 1  ;;  %1359 = vmatprep.subr.bf16.mxu0 %v1399_v5 }
 0x110   : > { %1348 = vmatpush3.msk.msra.mxu1 %vm612_vm5, %v875_v63  ;;  %v990_v7 = vadd.f32 %v988_v4, %v981_v2  ;;  %v1006_v53 = vsel %vm523_vm4, %v1004_v10, %v1005_v11 }
 0x111   : > { %1350 = vmatmul.mubr.msk.f32.vlgmr.msra.gmra.mrb[4].mxu1 %vm608_vm6, %v876_v38  ;;  %1352 = vmatprep.subr.mxu1 %v1399_v5 }
 0x112   : > { %1354 = vmatprep.mubr.msk.f32.mxu1 %vm1400_vm3, %v1399_v5  ;;  %v994_v54 = vadd.f32 %v993_v8, %v990_v7  ;;  %1360 = vmatpush3.bf16.msra.mxu0 %v1387_v17 }
 0x113   : > { %1361 = vmatprep.subr.bf16.mxu0 %v1399_v5 }
 0x114   : > { %v999_v13 = vadd.f32 %v997_v12, %v994_v54 }
 0x116   : > { %v1008_v14 = vadd.f32 %v1006_v53, %v999_v13  ;;  %1362 = vmatpush3.bf16.msra.mxu0 %v1388_v18 }
 0x117   : > { %1363 = vmatprep.subr.bf16.mxu0 %v1399_v5 }
 0x118   : > { %1353 = vmatpush3.msk.msra.mxu1 %vm612_vm5, %v1008_v14 }
 0x119   : > { %1355 = vmatmul.mubr.msk.f32.vlgmr.msra.gmra.mrb[6].mxu1 %vm608_vm6, %v1009_v16 }
 0x11a   : > { %1364 = vmatpush3.bf16.msra.mxu0 %v1389_v19 }
 0x11b   : > { %1365 = vmatprep.subr.bf16.mxu0 %v1399_v5 }
 0x11e   : > { %1366 = vmatpush3.bf16.msra.mxu0 %v1139_v22 }
 0x1d5   : > { %v682_v24 = vpop.f32.mrb[0].mxu1 }
 0x1d6   : > { %v683_v25 = vadd.f32 %v1284_v23, %v682_v24  ;;  %v1341_v26 = vpop.f32.mrb[1].mxu1 }
 0x1d8   : > { %v686_v27 = vmax.f32 %v683_v25, 0.0 }
 0x1da   : > { %688 = vst.msk [vmem:[#allocation3] sm:$0xf] %vm687_vm8, %v686_v27 }
 0x1df   : > { %v816_v28 = vpop.f32.mrb[2].mxu1 }
 0x1e0   : > { %v817_v29 = vadd.f32 %v1284_v23, %v816_v28  ;;  %v1346_v30 = vpop.f32.mrb[3].mxu1 }
 0x1e2   : > { %v820_v31 = vmax.f32 %v817_v29, 0.0 }
 0x1e4   : > { %821 = vst.msk [vmem:[#allocation3 + $0x4] sm:$0xf] %vm687_vm8, %v820_v31  ;;  %v949_v5 = vpop.f32.mrb[4].mxu1 }
 0x1e5   : > { %v950_v21 = vadd.f32 %v1284_v23, %v949_v5  ;;  %v1351_v32 = vpop.f32.mrb[5].mxu1 }
 0x1e7   : > { %v953_v33 = vmax.f32 %v950_v21, 0.0 }
 0x1e9   : > { %954 = vst.msk [vmem:[#allocation3 + $0x8] sm:$0xf] %vm687_vm8, %v953_v33 }
 0x1eb   : > { %v1088_v39 = vld [vmem:[#allocation3] sm:$0xff] }
 0x1ec   : > { %v1082_v34 = vpop.f32.mrb[6].mxu1 }
 0x1ed   : > { %v1083_v35 = vadd.f32 %v1284_v23, %v1082_v34  ;;  %v1356_v36 = vpop.f32.mrb[7].mxu1 }
 0x1ef   : > { %v1086_v37 = vmax.f32 %v1083_v35, 0.0 }
 0x1f1   : > { %1087 = vst.msk [vmem:[#allocation3 + $0xc] sm:$0xf] %vm687_vm8, %v1086_v37 }
 0x1f8   : > { %v1089_v6 = vld [vmem:[#allocation3 + $0x8] sm:$0xff] }
 0x1f9   : > { %v1090_v40 = vpack.c.bf16 %v1089_v6, %v1088_v39 }
 0x1fb   : > { %1368 = vmatmul.mubr.msk.bf16.vlgmr.msra.gmra.mrb[8].mxu0 %vm436_vm1, %v1090_v40 }
 0x2ce   : > { %v1175_v44 = vpop.f32.mrb[8].mxu0 }
 0x2cf   : > { %v1176_v45 = vadd.f32 %v1293_v41, %v1175_v44  ;;  %v1369_v46 = vpop.f32.mrb[9].mxu0 }
 0x2d0   : > { %v1178_v47 = vpop.f32.mrb[10].mxu0 }
 0x2d1   : > { %v1306_v15 = vpack.c.bf16 %v1176_v45, %v1176_v45  ;;  %v1179_v48 = vadd.f32 %v1293_v41, %v1178_v47  ;;  %v1370_v9 = vpop.f32.mrb[11].mxu0 }
 0x2d3   : > { %1191 = vst.msk [vmem:[%s305_s18] sm:$0xf] %vm1190_vm9, %v1306_v15  ;;  %v1307_v49 = vpack.c.bf16 %v1179_v48, %v1179_v48 }
 0x2d5   : > { %1192 = vst.msk [vmem:[%s305_s18 + $0x4] sm:$0xf] %vm1190_vm9, %v1307_v49 }
 0x2d6 PF: > { %s18_s27 = sadd.s32 1, %s1397_s27  }
 0x2d7   : > { %p15_p4 = scmp.ge.s32.totalorder %s18_s27, 4  }
 0x2d9   :  { %17 = sbr.rel (!%p15_p4) target bundleno = 1 (0x1), region = 98 }

// kernel: _lambda_.7
= control target key start
LH: loop header
LB: loop body
LE: loop exit
PB: predicated region body
PF: predicated region fallthrough
CT: control target
= control target key end

     0   :  { %s2813_s13 = smov 0   ;;  %s3438_s0 = inlined_call_operand.vmem [shape: bf16[2,256,16], index: 0, kind: input, shape index: {}]   ;;  %s3439_s1 = inlined_call_operand.vmem [shape: f32[9,1,16], index: 1, kind: input, shape index: {}]   ;;  %s3440_s2 = inlined_call_operand.vmem [shape: f32[1,16], index: 2, kind: input, shape index: {}]   ;;  %s3441_s3 = inlined_call_operand.vmem [shape: f32[16,8], index: 3, kind: input, shape index: {}]   ;;  %s3442_s4 = inlined_call_operand.vmem [shape: f32[1,8], index: 4, kind: input, shape index: {}]   ;;  %s3443_s5 = inlined_call_operand.vmem [shape: f32[8,16], index: 5, kind: input, shape index: {}]   ;;  %s3444_s6 = inlined_call_operand.vmem [shape: f32[1,16], index: 6, kind: input, shape index: {}]   ;;  %s3445_s7 = inlined_call_operand.vmem [shape: f32[8,15], index: 7, kind: input, shape index: {}]   ;;  %s3446_s8 = inlined_call_operand.vmem [shape: bf16[16,16], index: 8, kind: input, shape index: {}]   ;;  %s3447_s9 = inlined_call_operand.vmem [shape: f32[1,16], index: 9, kind: input, shape index: {}]   ;;  %s3448_s10 = inlined_call_operand.vmem [shape: bf16[2,64,16], index: 10, kind: output, shape index: {}]  }
   0x1 LB: > { %s2425_s14 = sadd.s32 4294967295, %s2752_s13   ;;  %p2429_p0 = scmp.ge.s32.totalorder %s2752_s13, 1  ;;  %s2752_s13 = sphi %s2813_s13, %s20_s13  }
   0x2   : > { %p312_p1 = scmp.lt.s32.totalorder %s2752_s13, 3 }
   0x4   : > { %p313_p2 = pnand %p2429_p0, %p312_p1 }
   0x5   : > { %p2823_p3 = scmp.lt.s32.totalorder (!%p313_p2), %s2425_s14, 1  ;;  %vm425_vm0 = vcmask (!%p313_p2), 130048   ;;  %vm428_vm1 = vcmask (!%p313_p2), 123904   ;;  %v2754_v0 = vmov (!%p313_p2), 0.0|0.0   ;;  %v2755_v1 = vmov (!%p313_p2), 0.0  }
   0x6   : > { %316 = sbr.rel (%p313_p2) target bundleno = 1079 (0x437), region = 60  ;;  %2687 = vmatprep.subr.bf16.mxu0 (!%p313_p2), %v2754_v0  ;;  %426 = vst.msk [vmem:[#allocation2] sm:$0xff] (!%p313_p2), %vm425_vm0, %v2755_v1  ;;  %427 = vst.msk [vmem:[#allocation2 + $0x8] sm:$0xff] (!%p313_p2), %vm425_vm0, %v2755_v1  ;;  %2691 = vmatprep.subr.bf16.mxu1 (!%p313_p2), %v2754_v0  ;;  %v2941_v2 = vld [vmem:[%s3439_s1] ss:$0 sm:$0xff] (!%p313_p2)  ;;  %vm2756_vm2 = vmmov (!%p313_p2), 0  }
   0x7   : > { %429 = vst.msk [vmem:[#allocation2 + $0x10] sm:$0x3] (!%p313_p2), %vm428_vm1, %v2755_v1  ;;  %432 = vst.msk [vmem:[#allocation2 + $0x28] sm:$0x3] (!%p313_p2), %vm428_vm1, %v2755_v1  ;;  %v2946_v3 = vld [vmem:[%s3439_s1 + $0x1] ss:$0 sm:$0xff] (!%p313_p2)  ;;  %2613 = vmatprep.mubr.msk.f32.mxu0 (!%p313_p2), %vm2756_vm2, %v2755_v1  ;;  %2620 = vmatprep.mubr.msk.f32.mxu1 (!%p313_p2), %vm2756_vm2, %v2755_v1 }
   0x8   : > { %430 = vst.msk [vmem:[#allocation2 + $0x18] sm:$0xff] (!%p313_p2), %vm425_vm0, %v2755_v1  ;;  %431 = vst.msk [vmem:[#allocation2 + $0x20] sm:$0xff] (!%p313_p2), %vm425_vm0, %v2755_v1  ;;  %v2956_v4 = vld [vmem:[%s3439_s1 + $0x2] ss:$0 sm:$0xff] (!%p313_p2)  ;;  %vm570_vm3 = vcmask (!%p313_p2), 1046528   ;;  %vm590_vm4 = vcmask (!%p313_p2), 1045504  }
   0x9   : > { %433 = vst.msk [vmem:[#allocation2 + $0x30] sm:$0xff] (!%p313_p2), %vm425_vm0, %v2755_v1  ;;  %434 = vst.msk [vmem:[#allocation2 + $0x38] sm:$0xff] (!%p313_p2), %vm425_vm0, %v2755_v1  ;;  %v2997_v47 = vld [vmem:[%s3439_s1 + $0x3] ss:$0 sm:$0xff] (!%p313_p2)  ;;  %v3002_v48 = vld [vmem:[%s3439_s1 + $0x4] ss:$0 sm:$0xff] (!%p313_p2) }
   0xa   : > { %435 = vst.msk [vmem:[#allocation2 + $0x40] sm:$0x3] (!%p313_p2), %vm428_vm1, %v2755_v1  ;;  %438 = vst.msk [vmem:[#allocation2 + $0x58] sm:$0x3] (!%p313_p2), %vm428_vm1, %v2755_v1  ;;  %v3010_v53 = vld [vmem:[%s3439_s1 + $0x5] ss:$0 sm:$0xff] (!%p313_p2) }
   0xb   : > { %436 = vst.msk [vmem:[#allocation2 + $0x48] sm:$0xff] (!%p313_p2), %vm425_vm0, %v2755_v1  ;;  %437 = vst.msk [vmem:[#allocation2 + $0x50] sm:$0xff] (!%p313_p2), %vm425_vm0, %v2755_v1  ;;  %v3015_v54 = vld [vmem:[%s3439_s1 + $0x6] ss:$0 sm:$0xff] (!%p313_p2)  ;;  %vm709_vm5 = vcmask (!%p313_p2), 121856   ;;  %vm2757_vm6 = vmmov (!%p313_p2), 1  }
   0xc   : > { %439 = vst.msk [vmem:[#allocation2 + $0x60] sm:$0xff] (!%p313_p2), %vm425_vm0, %v2755_v1  ;;  %440 = vst.msk [vmem:[#allocation2 + $0x68] sm:$0xff] (!%p313_p2), %vm425_vm0, %v2755_v1  ;;  %vm2143_vm8 = vcmask (!%p313_p2), 64512   ;;  %vm2361_vm9 = vcmask (!%p313_p2), 125952  }
   0xd   : > { %441 = vst.msk [vmem:[#allocation2 + $0x70] sm:$0x3] %vm428_vm1, %v2755_v1  ;;  %444 = vst.msk [vmem:[#allocation2 + $0x88] sm:$0x3] %vm428_vm1, %v2755_v1  ;;  %s3453_s14 = smov (!%p2823_p3, %s2425_s14), 1  ;;  %v547_v15 = vld [vmem:[#allocation2] sm:$0xff] }
   0xe   : > { %442 = vst.msk [vmem:[#allocation2 + $0x78] sm:$0xff] %vm425_vm0, %v2755_v1  ;;  %443 = vst.msk [vmem:[#allocation2 + $0x80] sm:$0xff] %vm425_vm0, %v2755_v1  ;;  %s2486_s16 = sshll.u32 %s3453_s14, 7  ;;  %v548_v16 = vld [vmem:[#allocation2 + $0x8] sm:$0xff]  ;;  %v549_v17 = vld [vmem:[#allocation2 + $0x10] sm:$0x3]  ;;  %v556_v22 = vmul.f32 %v2941_v2, %v547_v15  ;;  %v566_v24 = vmul.f32 %v2946_v3, %v547_v15  ;;  %v584_v26 = vmul.f32 %v2956_v4, %v547_v15 }
   0xf   : > { %445 = vst.msk [vmem:[#allocation2 + $0x90] sm:$0xff] %vm425_vm0, %v2755_v1  ;;  %446 = vst.msk [vmem:[#allocation2 + $0x98] sm:$0xff] %vm425_vm0, %v2755_v1  ;;  %s2951_s23 = scalar_lea.vmem %s3438_s0, %s2486_s16  ;;  %v557_v23 = vmul.f32 %v2941_v2, %v548_v16  ;;  %v567_v25 = vmul.f32 %v2946_v3, %v548_v16  ;;  %v585_v27 = vmul.f32 %v2956_v4, %v548_v16  ;;  %s2487_s22 = sshll.u32 %s3453_s14, 5 }
  0x10   : > { %447 = vst.msk [vmem:[#allocation2 + $0xa0] sm:$0x3] %vm428_vm1, %v2755_v1  ;;  %450 = vst.msk [vmem:[#allocation2 + $0xb8] sm:$0x3] %vm428_vm1, %v2755_v1  ;;  %v2497_v5 = vld [vmem:[%s2951_s23] sm:$0xff]   ;;  %v2560_v6 = vld [vmem:[%s2951_s23 + $0x8] sm:$0xff]   ;;  %v586_v28 = vmul.f32 %v2956_v4, %v549_v17  ;;  %s359_s26 = scalar_lea.vmem %s3448_s10, %s2487_s22 }
  0x11   : > { %448 = vst.msk [vmem:[#allocation2 + $0xa8] sm:$0xff] %vm425_vm0, %v2755_v1  ;;  %449 = vst.msk [vmem:[#allocation2 + $0xb0] sm:$0xff] %vm425_vm0, %v2755_v1  ;;  %v2561_v7 = vld [vmem:[%s2951_s23 + $0x10] sm:$0xff]   ;;  %v2498_v8 = vunpack.c.l.bf16 %v2497_v5  ;;  %v2499_v9 = vunpack.c.h.bf16 %v2497_v5  ;;  %v2502_v10 = vunpack.c.l.bf16 %v2560_v6  ;;  %v2503_v11 = vunpack.c.h.bf16 %v2560_v6  ;;  %v2562_v12 = vld [vmem:[%s2951_s23 + $0x18] sm:$0xff]  }
  0x12   : > { %451 = vst.msk [vmem:[#allocation2 + $0xc0] sm:$0xff] %vm425_vm0, %v2755_v1  ;;  %452 = vst.msk [vmem:[#allocation2 + $0xc8] sm:$0xff] %vm425_vm0, %v2755_v1  ;;  %v2563_v13 = vld [vmem:[%s2951_s23 + $0x20] sm:$0xff]   ;;  %v2564_v14 = vld [vmem:[%s2951_s23 + $0x28] sm:$0xff]   ;;  %v2506_v18 = vunpack.c.l.bf16 %v2561_v7  ;;  %v2507_v19 = vunpack.c.h.bf16 %v2561_v7  ;;  %v2510_v20 = vunpack.c.l.bf16 %v2562_v12  ;;  %v2511_v21 = vunpack.c.h.bf16 %v2562_v12 }
  0x13   : > { %453 = vst.msk [vmem:[#allocation2 + $0xd0] sm:$0x3] %vm428_vm1, %v2755_v1  ;;  %456 = vst.msk [vmem:[#allocation2 + $0xe8] sm:$0x3] %vm428_vm1, %v2755_v1  ;;  %v2514_v29 = vunpack.c.l.bf16 %v2563_v13  ;;  %v2565_v30 = vld [vmem:[%s2951_s23 + $0x30] sm:$0xff]   ;;  %v571_v31 = vrot.slane %v566_v24, 1  ;;  %v2515_v33 = vunpack.c.h.bf16 %v2563_v13  ;;  %v2518_v34 = vunpack.c.l.bf16 %v2564_v14 }
  0x14   : > { %454 = vst.msk [vmem:[#allocation2 + $0xd8] sm:$0xff] %vm425_vm0, %v2755_v1  ;;  %455 = vst.msk [vmem:[#allocation2 + $0xe0] sm:$0xff] %vm425_vm0, %v2755_v1  ;;  %v572_v32 = vrot.slane %v567_v25, 1  ;;  %v2566_v35 = vld [vmem:[%s2951_s23 + $0x38] sm:$0xff]   ;;  %v591_v36 = vrot.slane %v584_v26, 2  ;;  %v592_v37 = vrot.slane %v585_v27, 2  ;;  %v2519_v39 = vunpack.c.h.bf16 %v2564_v14 }
  0x15   : > { %457 = vst.msk [vmem:[#allocation2 + $0xf0] sm:$0xff] %vm425_vm0, %v2755_v1  ;;  %458 = vst.msk [vmem:[#allocation2 + $0xf8] sm:$0xff] %vm425_vm0, %v2755_v1  ;;  %v594_v38 = vrot.slane %v586_v28, 2  ;;  %v2567_v40 = vld [vmem:[%s2951_s23 + $0x40] sm:$0xff]   ;;  %v2522_v43 = vunpack.c.l.bf16 %v2565_v30  ;;  %v2523_v44 = vunpack.c.h.bf16 %v2565_v30  ;;  %v2568_v45 = vld [vmem:[%s2951_s23 + $0x48] sm:$0xff]   ;;  %v2526_v52 = vunpack.c.l.bf16 %v2566_v35 }
  0x16   : > { %459 = vst.msk [vmem:[#allocation2 + $0x100] sm:$0x3] %vm428_vm1, %v2755_v1  ;;  %462 = vst.msk [vmem:[#allocation2 + $0x118] sm:$0x3] %vm428_vm1, %v2755_v1  ;;  %v573_v41 = vsel %vm570_vm3, %v571_v31, %v572_v32  ;;  %v577_v42 = vadd.f32 %v572_v32, %v557_v23  ;;  %v2992_v46 = vld [vmem:[%s2951_s23 + $0x50] sm:$0xff]   ;;  %v593_v50 = vsel %vm590_vm4, %v591_v36, %v592_v37  ;;  %v2527_v56 = vunpack.c.h.bf16 %v2566_v35 }
  0x17   : > { %460 = vst.msk [vmem:[#allocation2 + $0x108] sm:$0xff] %vm425_vm0, %v2755_v1  ;;  %461 = vst.msk [vmem:[#allocation2 + $0x110] sm:$0xff] %vm425_vm0, %v2755_v1  ;;  %v576_v49 = vadd.f32 %v573_v41, %v556_v22  ;;  %v595_v51 = vsel %vm590_vm4, %v592_v37, %v594_v38  ;;  %v2530_v57 = vunpack.c.l.bf16 %v2567_v40  ;;  %v2531_v58 = vunpack.c.h.bf16 %v2567_v40  ;;  %v3031_v12 = vld [vmem:[%s3439_s1 + $0x7] ss:$0 sm:$0xff]  ;;  %v3043_v17 = vld [vmem:[%s3439_s1 + $0x8] ss:$0 sm:$0xff] }
  0x18   : > { %463 = vst.msk [vmem:[#allocation2 + $0x120] sm:$0xff] %vm425_vm0, %v2755_v1  ;;  %464 = vst.msk [vmem:[#allocation2 + $0x128] sm:$0xff] %vm425_vm0, %v2755_v1  ;;  %v599_v55 = vadd.f32 %v595_v51, %v577_v42  ;;  %v2534_v63 = vunpack.c.l.bf16 %v2568_v45  ;;  %v2535_v5 = vunpack.c.h.bf16 %v2568_v45  ;;  %v2538_v6 = vunpack.c.l.bf16 %v2992_v46 }
  0x19   : > { %465 = vst.msk [vmem:[#allocation2 + $0x130] sm:$0x3] %vm428_vm1, %v2755_v1  ;;  %468 = vst.msk [vmem:[#allocation2 + $0x148] sm:$0x3] %vm428_vm1, %v2755_v1  ;;  %v598_v59 = vadd.f32 %v593_v50, %v576_v49 }
  0x1a   : > { %466 = vst.msk [vmem:[#allocation2 + $0x138] sm:$0xff] %vm425_vm0, %v2755_v1  ;;  %467 = vst.msk [vmem:[#allocation2 + $0x140] sm:$0xff] %vm425_vm0, %v2755_v1 }
  0x1b   : > { %469 = vst.msk [vmem:[#allocation2 + $0x150] sm:$0xff] %vm425_vm0, %v2755_v1  ;;  %470 = vst.msk [vmem:[#allocation2 + $0x158] sm:$0xff] %vm425_vm0, %v2755_v1 }
  0x1c   : > { %471 = vst.msk [vmem:[#allocation2 + $0x160] sm:$0x3] %vm428_vm1, %v2755_v1  ;;  %474 = vst.msk [vmem:[#allocation2 + $0x178] sm:$0x3] %vm428_vm1, %v2755_v1 }
  0x1d   : > { %472 = vst.msk [vmem:[#allocation2 + $0x168] sm:$0xff] %vm425_vm0, %v2755_v1  ;;  %473 = vst.msk [vmem:[#allocation2 + $0x170] sm:$0xff] %vm425_vm0, %v2755_v1 }
  0x1e   : > { %475 = vst.msk [vmem:[#allocation2 + $0x180] sm:$0xff] %vm425_vm0, %v2755_v1  ;;  %476 = vst.msk [vmem:[#allocation2 + $0x188] sm:$0xff] %vm425_vm0, %v2755_v1 }
  0x1f   : > { %477 = vst.msk [vmem:[#allocation2 + $0x190] sm:$0x3] %vm428_vm1, %v2755_v1  ;;  %vm3067_vm7 = vmpackc.low %vm570_vm3, %vm2757_vm6 }
  0x20   : > { %482 = vst.msk [vmem:[#allocation2 + $0x19] sm:$0xff] %vm425_vm0, %v2498_v8  ;;  %483 = vst.msk [vmem:[#allocation2 + $0x21] sm:$0xff] %vm425_vm0, %v2499_v9 }
  0x21   : > { %485 = vst.msk [vmem:[#allocation2 + $0x31] sm:$0xff] %vm425_vm0, %v2502_v10  ;;  %486 = vst.msk [vmem:[#allocation2 + $0x39] sm:$0xff] %vm425_vm0, %v2503_v11 }
  0x22   : > { %488 = vst.msk [vmem:[#allocation2 + $0x49] sm:$0xff] %vm425_vm0, %v2506_v18  ;;  %489 = vst.msk [vmem:[#allocation2 + $0x51] sm:$0xff] %vm425_vm0, %v2507_v19 }
  0x23   : > { %491 = vst.msk [vmem:[#allocation2 + $0x61] sm:$0xff] %vm425_vm0, %v2510_v20  ;;  %492 = vst.msk [vmem:[#allocation2 + $0x69] sm:$0xff] %vm425_vm0, %v2511_v21 }
  0x24   : > { %494 = vst.msk [vmem:[#allocation2 + $0x79] sm:$0xff] %vm425_vm0, %v2514_v29  ;;  %495 = vst.msk [vmem:[#allocation2 + $0x81] sm:$0xff] %vm425_vm0, %v2515_v33 }
  0x25   : > { %497 = vst.msk [vmem:[#allocation2 + $0x91] sm:$0xff] %vm425_vm0, %v2518_v34  ;;  %498 = vst.msk [vmem:[#allocation2 + $0x99] sm:$0xff] %vm425_vm0, %v2519_v39 }
  0x26   : > { %500 = vst.msk [vmem:[#allocation2 + $0xa9] sm:$0xff] %vm425_vm0, %v2522_v43  ;;  %501 = vst.msk [vmem:[#allocation2 + $0xb1] sm:$0xff] %vm425_vm0, %v2523_v44 }
  0x27   : > { %v600_v60 = vld [vmem:[#allocation2 + $0x18] sm:$0xff]  ;;  %v601_v61 = vld [vmem:[#allocation2 + $0x20] sm:$0xff]  ;;  %v602_v62 = vld [vmem:[#allocation2 + $0x28] sm:$0x3]  ;;  %503 = vst.msk [vmem:[#allocation2 + $0xc1] sm:$0xff] %vm425_vm0, %v2526_v52 }
  0x28   : > { %v609_v7 = vmul.f32 %v2997_v47, %v600_v60  ;;  %v610_v8 = vmul.f32 %v2997_v47, %v601_v61  ;;  %v619_v9 = vmul.f32 %v3002_v48, %v600_v60  ;;  %v620_v10 = vmul.f32 %v3002_v48, %v601_v61  ;;  %v651_v11 = vld [vmem:[#allocation2 + $0x30] sm:$0xff]  ;;  %504 = vst.msk [vmem:[#allocation2 + $0xc9] sm:$0xff] %vm425_vm0, %v2527_v56  ;;  %v652_v22 = vld [vmem:[#allocation2 + $0x38] sm:$0xff]  ;;  %v653_v29 = vld [vmem:[#allocation2 + $0x40] sm:$0x3] }
  0x29   : > { %506 = vst.msk [vmem:[#allocation2 + $0xd9] sm:$0xff] %vm425_vm0, %v2530_v57  ;;  %507 = vst.msk [vmem:[#allocation2 + $0xe1] sm:$0xff] %vm425_vm0, %v2531_v58  ;;  %v636_v13 = vmul.f32 %v3010_v53, %v600_v60  ;;  %v637_v14 = vmul.f32 %v3010_v53, %v601_v61  ;;  %v638_v15 = vmul.f32 %v3010_v53, %v602_v62  ;;  %v821_v62 = vld [vmem:[#allocation2 + $0x48] sm:$0xff] }
  0x2a   : > { %v660_v16 = vmul.f32 %v3015_v54, %v651_v11  ;;  %509 = vst.msk [vmem:[#allocation2 + $0xf1] sm:$0xff] %vm425_vm0, %v2534_v63  ;;  %510 = vst.msk [vmem:[#allocation2 + $0xf9] sm:$0xff] %vm425_vm0, %v2535_v5  ;;  %v611_v18 = vadd.f32 %v609_v7, %v598_v59  ;;  %v612_v19 = vadd.f32 %v610_v8, %v599_v55  ;;  %v623_v20 = vrot.slane %v619_v9, 1  ;;  %v790_v55 = vld [vmem:[#allocation2 + $0x40] sm:$0x3]  ;;  %v822_v8 = vld [vmem:[#allocation2 + $0x50] sm:$0xff] }
  0x2b   : > { %512 = vst.msk [vmem:[#allocation2 + $0x109] sm:$0xff] %vm425_vm0, %v2538_v6  ;;  %v624_v21 = vrot.slane %v620_v10, 1  ;;  %v642_v23 = vrot.slane %v636_v13, 2  ;;  %v643_v24 = vrot.slane %v637_v14, 2  ;;  %v645_v25 = vrot.slane %v638_v15, 2 }
  0x2c   : > { %v661_v26 = vmul.f32 %v3015_v54, %v652_v22  ;;  %v670_v30 = vmul.f32 %v3031_v12, %v651_v11  ;;  %v671_v31 = vmul.f32 %v3031_v12, %v652_v22  ;;  %v687_v35 = vmul.f32 %v3043_v17, %v651_v11 }
  0x2d   : > { %v625_v27 = vsel %vm570_vm3, %v623_v20, %v624_v21  ;;  %v629_v28 = vadd.f32 %v624_v21, %v612_v19  ;;  %v644_v33 = vsel %vm590_vm4, %v642_v23, %v643_v24  ;;  %v646_v34 = vsel %vm590_vm4, %v643_v24, %v645_v25  ;;  %v823_v19 = vld [vmem:[#allocation2 + $0x58] sm:$0x3]  ;;  %v2451_v20 = vld [vmem:[%s3440_s2] ss:$0 sm:$0xff] }
  0x2e   : > { %v628_v32 = vadd.f32 %v625_v27, %v611_v18  ;;  %v674_v37 = vrot.slane %v670_v30, 1  ;;  %v675_v38 = vrot.slane %v671_v31, 1  ;;  %v688_v39 = vmul.f32 %v3043_v17, %v652_v22 }
  0x2f   : > { %v650_v36 = vadd.f32 %v646_v34, %v629_v28  ;;  %v689_v41 = vmul.f32 %v3043_v17, %v653_v29  ;;  %v693_v42 = vrot.slane %v687_v35, 2  ;;  %v791_v43 = vmul.f32 %v2941_v2, %v651_v11 }
  0x30   : > { %v649_v40 = vadd.f32 %v644_v33, %v628_v32  ;;  %v676_v45 = vsel %vm570_vm3, %v674_v37, %v675_v38  ;;  %v694_v49 = vrot.slane %v688_v39, 2  ;;  %v792_v50 = vmul.f32 %v2941_v2, %v652_v22  ;;  %v854_v37 = vld [vmem:[#allocation2 + $0x60] sm:$0xff] }
  0x31   : > { %v663_v44 = vadd.f32 %v661_v26, %v650_v36  ;;  %v696_v52 = vrot.slane %v689_v41, 2  ;;  %v795_v56 = vmul.f32 %v2946_v3, %v651_v11  ;;  %v796_v57 = vmul.f32 %v2946_v3, %v652_v22 }
  0x32   : > { %v662_v51 = vadd.f32 %v660_v16, %v649_v40  ;;  %v695_v59 = vsel %vm590_vm4, %v693_v42, %v694_v49  ;;  %v806_v60 = vmul.f32 %v2956_v4, %v651_v11  ;;  %v807_v61 = vmul.f32 %v2956_v4, %v652_v22  ;;  %v855_v42 = vld [vmem:[#allocation2 + $0x68] sm:$0xff] }
  0x33   : > { %v680_v58 = vadd.f32 %v675_v38, %v663_v44  ;;  %v697_v5 = vsel %vm590_vm4, %v694_v49, %v696_v52  ;;  %v799_v6 = vrot.slane %v795_v56, 1  ;;  %v800_v7 = vrot.slane %v796_v57, 1  ;;  %v3084_v38 = vld [vmem:[%s3445_s7] sm:$0xff]  ;;  %v856_v49 = vld [vmem:[#allocation2 + $0x70] sm:$0x3] }
  0x34   : > { %v679_v63 = vadd.f32 %v676_v45, %v662_v51  ;;  %v808_v10 = vmul.f32 %v2956_v4, %v790_v55  ;;  %v812_v13 = vrot.slane %v806_v60, 2  ;;  %v813_v14 = vrot.slane %v807_v61, 2 }
  0x35   : > { %v701_v9 = vadd.f32 %v697_v5, %v680_v58  ;;  %v801_v16 = vsel %vm570_vm3, %v799_v6, %v800_v7  ;;  %v805_v18 = vadd.f32 %v800_v7, %v792_v50  ;;  %v824_v11 = vmul.f32 %v2997_v47, %v821_v62 }
  0x36   : > { %v700_v15 = vadd.f32 %v695_v59, %v679_v63  ;;  %v804_v21 = vadd.f32 %v801_v16, %v791_v43  ;;  %v814_v22 = vsel %vm590_vm4, %v812_v13, %v813_v14  ;;  %v815_v23 = vrot.slane %v808_v10, 2  ;;  %v968_v16 = vld [vmem:[#allocation2 + $0x70] sm:$0x3] }
  0x37   : > { %v825_v24 = vmul.f32 %v2997_v47, %v822_v8  ;;  %v828_v26 = vmul.f32 %v3002_v48, %v821_v62  ;;  %v829_v27 = vmul.f32 %v3002_v48, %v822_v8  ;;  %v839_v28 = vmul.f32 %v3010_v53, %v821_v62 }
  0x38   : > { %v2688_v25 = vpack.c.bf16 %v701_v9, %v700_v15  ;;  %v816_v29 = vsel %vm590_vm4, %v813_v14, %v815_v23  ;;  %v819_v30 = vadd.f32 %v814_v22, %v804_v21  ;;  %v840_v31 = vmul.f32 %v3010_v53, %v822_v8  ;;  %v999_v23 = vld [vmem:[#allocation2 + $0x78] sm:$0xff] }
  0x39   : > { %v841_v32 = vmul.f32 %v3010_v53, %v823_v19  ;;  %v820_v33 = vadd.f32 %v816_v29, %v805_v18  ;;  %v832_v34 = vrot.slane %v828_v26, 1  ;;  %v833_v35 = vrot.slane %v829_v27, 1 }
  0x3a   : > { %2690 = vmatpush3.bf16.msk.msra.mxu0 %vm3067_vm7, %v2688_v25  ;;  %v845_v36 = vrot.slane %v839_v28, 2  ;;  %v826_v39 = vadd.f32 %v824_v11, %v819_v30  ;;  %v846_v40 = vrot.slane %v840_v31, 2  ;;  %v857_v43 = vmul.f32 %v3015_v54, %v854_v37 }
  0x3b   : > { %v848_v41 = vrot.slane %v841_v32, 2  ;;  %2695 = vmatprep.subr.bf16.mxu0 %v2754_v0  ;;  %v827_v44 = vadd.f32 %v825_v24, %v820_v33  ;;  %v834_v45 = vsel %vm570_vm3, %v832_v34, %v833_v35  ;;  %v858_v50 = vmul.f32 %v3015_v54, %v855_v42  ;;  %v1000_v24 = vld [vmem:[#allocation2 + $0x80] sm:$0xff] }
  0x3c   : > { %v861_v51 = vmul.f32 %v3031_v12, %v854_v37  ;;  %v837_v52 = vadd.f32 %v834_v45, %v826_v39  ;;  %v847_v55 = vsel %vm590_vm4, %v845_v36, %v846_v40  ;;  %v862_v57 = vmul.f32 %v3031_v12, %v855_v42 }
  0x3d   : > { %v849_v56 = vsel %vm590_vm4, %v846_v40, %v848_v41  ;;  %2614 = vmatmul.mubr.msk.f32.vlgmr.msra.gmra.mrb[0].mxu0 %vm709_vm5, %v3084_v38  ;;  %v838_v58 = vadd.f32 %v833_v35, %v827_v44  ;;  %v872_v60 = vmul.f32 %v3043_v17, %v854_v37  ;;  %v873_v61 = vmul.f32 %v3043_v17, %v855_v42 }
  0x3e   : > { %v865_v59 = vrot.slane %v861_v51, 1  ;;  %2627 = vmatprep.mubr.msk.f32.mxu0 %vm2756_vm2, %v2755_v1  ;;  %v852_v62 = vadd.f32 %v847_v55, %v837_v52  ;;  %v866_v63 = vrot.slane %v862_v57, 1  ;;  %v874_v5 = vmul.f32 %v3043_v17, %v856_v49 }
  0x3f   : > { %v969_v6 = vmul.f32 %v2941_v2, %v854_v37  ;;  %v853_v7 = vadd.f32 %v849_v56, %v838_v58  ;;  %v878_v8 = vrot.slane %v872_v60, 2  ;;  %v879_v9 = vrot.slane %v873_v61, 2  ;;  %v1032_v60 = vld [vmem:[#allocation2 + $0x90] sm:$0xff] }
  0x40   : > { %v970_v10 = vmul.f32 %v2941_v2, %v855_v42  ;;  %v859_v13 = vadd.f32 %v857_v43, %v852_v62  ;;  %v867_v14 = vsel %vm570_vm3, %v865_v59, %v866_v63  ;;  %v881_v15 = vrot.slane %v874_v5, 2  ;;  %v1033_v5 = vld [vmem:[#allocation2 + $0x98] sm:$0xff] }
  0x41   : > { %v973_v18 = vmul.f32 %v2946_v3, %v854_v37  ;;  %v860_v19 = vadd.f32 %v858_v50, %v853_v7  ;;  %v880_v11 = vsel %vm590_vm4, %v878_v8, %v879_v9  ;;  %v974_v21 = vmul.f32 %v2946_v3, %v855_v42 }
  0x42   : > { %v984_v22 = vmul.f32 %v2956_v4, %v854_v37  ;;  %v870_v25 = vadd.f32 %v867_v14, %v859_v13  ;;  %v882_v26 = vsel %vm590_vm4, %v879_v9, %v881_v15  ;;  %v985_v28 = vmul.f32 %v2956_v4, %v855_v42  ;;  %v1001_v42 = vld [vmem:[#allocation2 + $0x88] sm:$0x3] }
  0x43   : > { %v977_v27 = vrot.slane %v973_v18, 1  ;;  %v871_v29 = vadd.f32 %v866_v63, %v860_v19  ;;  %v978_v30 = vrot.slane %v974_v21, 1  ;;  %v986_v31 = vmul.f32 %v2956_v4, %v968_v16 }
  0x44   : > { %v990_v32 = vrot.slane %v984_v22, 2  ;;  %v885_v33 = vadd.f32 %v880_v11, %v870_v25  ;;  %v991_v34 = vrot.slane %v985_v28, 2  ;;  %v1002_v35 = vmul.f32 %v2997_v47, %v999_v23 }
  0x45   : > { %v1003_v36 = vmul.f32 %v2997_v47, %v1000_v24  ;;  %v886_v37 = vadd.f32 %v882_v26, %v871_v29  ;;  %v979_v39 = vsel %vm570_vm3, %v977_v27, %v978_v30  ;;  %v983_v40 = vadd.f32 %v978_v30, %v970_v10  ;;  %v1034_v10 = vld [vmem:[#allocation2 + $0xa0] sm:$0x3] }
  0x46   : > { %v993_v41 = vrot.slane %v986_v31, 2  ;;  %v982_v43 = vadd.f32 %v979_v39, %v969_v6  ;;  %v992_v44 = vsel %vm590_vm4, %v990_v32, %v991_v34  ;;  %v1006_v45 = vmul.f32 %v3002_v48, %v999_v23 }
  0x47   : > { %v1007_v49 = vmul.f32 %v3002_v48, %v1000_v24  ;;  %v2692_v50 = vpack.c.bf16 %v886_v37, %v885_v33  ;;  %v1017_v52 = vmul.f32 %v3010_v53, %v999_v23  ;;  %v1018_v55 = vmul.f32 %v3010_v53, %v1000_v24  ;;  %v1146_v33 = vld [vmem:[#allocation2 + $0xa0] sm:$0x3] }
  0x48   : > { %v994_v51 = vsel %vm590_vm4, %v991_v34, %v993_v41  ;;  %v997_v56 = vadd.f32 %v992_v44, %v982_v43  ;;  %v1010_v58 = vrot.slane %v1006_v45, 1  ;;  %v1019_v61 = vmul.f32 %v3010_v53, %v1001_v42  ;;  %v1177_v41 = vld [vmem:[#allocation2 + $0xa8] sm:$0xff] }
  0x49   : > { %v998_v57 = vadd.f32 %v994_v51, %v983_v40  ;;  %v1011_v59 = vrot.slane %v1007_v49, 1  ;;  %2694 = vmatpush3.bf16.msk.msra.mxu1 %vm3067_vm7, %v2692_v50  ;;  %v1023_v62 = vrot.slane %v1017_v52, 2  ;;  %v1024_v63 = vrot.slane %v1018_v55, 2  ;;  %v1178_v49 = vld [vmem:[#allocation2 + $0xb0] sm:$0xff] }
  0x4a   : > { %v1035_v6 = vmul.f32 %v3015_v54, %v1032_v60  ;;  %v1004_v7 = vadd.f32 %v1002_v35, %v997_v56  ;;  %v1036_v13 = vmul.f32 %v3015_v54, %v1033_v5  ;;  %2699 = vmatprep.subr.bf16.mxu1 %v2754_v0  ;;  %v1026_v15 = vrot.slane %v1019_v61, 2 }
  0x4b   : > { %v1005_v8 = vadd.f32 %v1003_v36, %v998_v57  ;;  %v1012_v9 = vsel %vm570_vm3, %v1010_v58, %v1011_v59  ;;  %v1025_v14 = vsel %vm590_vm4, %v1023_v62, %v1024_v63  ;;  %v1039_v16 = vmul.f32 %v3031_v12, %v1032_v60 }
  0x4c   : > { %v1040_v18 = vmul.f32 %v3031_v12, %v1033_v5  ;;  %v1015_v19 = vadd.f32 %v1012_v9, %v1004_v7  ;;  %v1050_v21 = vmul.f32 %v3043_v17, %v1032_v60  ;;  %v1051_v22 = vmul.f32 %v3043_v17, %v1033_v5  ;;  %2621 = vmatmul.mubr.msk.f32.vlgmr.msra.gmra.mrb[0].mxu1 %vm709_vm5, %v3084_v38 }
  0x4d   : > { %v1016_v11 = vadd.f32 %v1011_v59, %v1005_v8  ;;  %v1027_v23 = vsel %vm590_vm4, %v1024_v63, %v1026_v15  ;;  %v1043_v24 = vrot.slane %v1039_v16, 1  ;;  %v1052_v26 = vmul.f32 %v3043_v17, %v1034_v10  ;;  %2634 = vmatprep.mubr.msk.f32.mxu1 %vm2756_vm2, %v2755_v1  ;;  %v1179_v8 = vld [vmem:[#allocation2 + $0xb8] sm:$0x3] }
  0x4e   : > { %v1044_v25 = vrot.slane %v1040_v18, 1  ;;  %v1030_v27 = vadd.f32 %v1025_v14, %v1015_v19  ;;  %v1056_v29 = vrot.slane %v1050_v21, 2  ;;  %v1057_v30 = vrot.slane %v1051_v22, 2  ;;  %v1210_v21 = vld [vmem:[#allocation2 + $0xc0] sm:$0xff] }
  0x4f   : > { %v1031_v28 = vadd.f32 %v1027_v23, %v1016_v11  ;;  %v1059_v32 = vrot.slane %v1052_v26, 2  ;;  %v1147_v34 = vmul.f32 %v2941_v2, %v1032_v60  ;;  %v1148_v35 = vmul.f32 %v2941_v2, %v1033_v5 }
  0x50   : > { %v1045_v31 = vsel %vm570_vm3, %v1043_v24, %v1044_v25  ;;  %v1037_v36 = vadd.f32 %v1035_v6, %v1030_v27  ;;  %v1058_v39 = vsel %vm590_vm4, %v1056_v29, %v1057_v30  ;;  %v1151_v40 = vmul.f32 %v2946_v3, %v1032_v60 }
  0x51   : > { %v1038_v37 = vadd.f32 %v1036_v13, %v1031_v28  ;;  %v1060_v43 = vsel %vm590_vm4, %v1057_v30, %v1059_v32  ;;  %v1152_v44 = vmul.f32 %v2946_v3, %v1033_v5  ;;  %v1162_v42 = vmul.f32 %v2956_v4, %v1032_v60 }
  0x52   : > { %v1163_v45 = vmul.f32 %v2956_v4, %v1033_v5  ;;  %v1048_v50 = vadd.f32 %v1045_v31, %v1037_v36  ;;  %v1155_v52 = vrot.slane %v1151_v40, 1  ;;  %v1164_v55 = vmul.f32 %v2956_v4, %v1146_v33 }
  0x53   : > { %v1049_v51 = vadd.f32 %v1044_v25, %v1038_v37  ;;  %v1156_v56 = vrot.slane %v1152_v44, 1  ;;  %v1168_v57 = vrot.slane %v1162_v42, 2  ;;  %v1180_v59 = vmul.f32 %v2997_v47, %v1177_v41  ;;  %v1211_v25 = vld [vmem:[#allocation2 + $0xc8] sm:$0xff] }
  0x54   : > { %v1169_v58 = vrot.slane %v1163_v45, 2  ;;  %v1063_v61 = vadd.f32 %v1058_v39, %v1048_v50  ;;  %v1171_v63 = vrot.slane %v1164_v55, 2  ;;  %v1181_v6 = vmul.f32 %v2997_v47, %v1178_v49 }
  0x55   : > { %v1064_v62 = vadd.f32 %v1060_v43, %v1049_v51  ;;  %v1157_v60 = vsel %vm570_vm3, %v1155_v52, %v1156_v56  ;;  %v1161_v7 = vadd.f32 %v1156_v56, %v1148_v35  ;;  %v1184_v9 = vmul.f32 %v3002_v48, %v1177_v41 }
  0x56   : > { %v1170_v5 = vsel %vm590_vm4, %v1168_v57, %v1169_v58  ;;  %v1160_v13 = vadd.f32 %v1157_v60, %v1147_v34  ;;  %v1172_v14 = vsel %vm590_vm4, %v1169_v58, %v1171_v63  ;;  %v1185_v15 = vmul.f32 %v3002_v48, %v1178_v49  ;;  %v1212_v34 = vld [vmem:[#allocation2 + $0xd0] sm:$0x3] }
  0x57   : > { %v2696_v10 = vpack.c.bf16 %v1064_v62, %v1063_v61  ;;  %v1176_v16 = vadd.f32 %v1172_v14, %v1161_v7  ;;  %v1188_v18 = vrot.slane %v1184_v9, 1  ;;  %v1195_v19 = vmul.f32 %v3010_v53, %v1177_v41  ;;  %v1324_v62 = vld [vmem:[#allocation2 + $0xd0] sm:$0x3]  ;;  %v1356_v9 = vld [vmem:[#allocation2 + $0xe0] sm:$0xff] }
  0x58   : > { %v1196_v11 = vmul.f32 %v3010_v53, %v1178_v49  ;;  %v1175_v22 = vadd.f32 %v1170_v5, %v1160_v13  ;;  %v1189_v23 = vrot.slane %v1185_v15, 1  ;;  %v1197_v24 = vmul.f32 %v3010_v53, %v1179_v8  ;;  %v1355_v8 = vld [vmem:[#allocation2 + $0xd8] sm:$0xff] }
  0x59   : > { %2698 = vmatpush3.bf16.msk.msra.mxu0 %vm3067_vm7, %v2696_v10  ;;  %v1213_v26 = vmul.f32 %v3015_v54, %v1210_v21  ;;  %v1183_v27 = vadd.f32 %v1181_v6, %v1176_v16  ;;  %v1201_v28 = vrot.slane %v1195_v19, 2  ;;  %v1214_v30 = vmul.f32 %v3015_v54, %v1211_v25 }
  0x5a   : > { %v1202_v29 = vrot.slane %v1196_v11, 2  ;;  %2703 = vmatprep.subr.bf16.mxu0 %v2754_v0  ;;  %v1182_v31 = vadd.f32 %v1180_v59, %v1175_v22  ;;  %v1190_v32 = vsel %vm570_vm3, %v1188_v18, %v1189_v23  ;;  %v1204_v33 = vrot.slane %v1197_v24, 2 }
  0x5b   : > { %v1217_v35 = vmul.f32 %v3031_v12, %v1210_v21  ;;  %v1194_v36 = vadd.f32 %v1189_v23, %v1183_v27  ;;  %v1218_v39 = vmul.f32 %v3031_v12, %v1211_v25  ;;  %v1228_v40 = vmul.f32 %v3043_v17, %v1210_v21 }
  0x5c   : > { %v1203_v37 = vsel %vm590_vm4, %v1201_v28, %v1202_v29  ;;  %2628 = vmatmul.mubr.msk.f32.vlgmr.msra.gmra.mrb[2].mxu0 %vm709_vm5, %v3084_v38  ;;  %v1193_v41 = vadd.f32 %v1190_v32, %v1182_v31  ;;  %v1205_v43 = vsel %vm590_vm4, %v1202_v29, %v1204_v33  ;;  %v1229_v42 = vmul.f32 %v3043_v17, %v1211_v25 }
  0x5d   : > { %v1221_v44 = vrot.slane %v1217_v35, 1  ;;  %2641 = vmatprep.mubr.msk.f32.mxu0 %vm2756_vm2, %v2755_v1  ;;  %v1209_v45 = vadd.f32 %v1205_v43, %v1194_v36  ;;  %v1222_v49 = vrot.slane %v1218_v39, 1  ;;  %v1230_v50 = vmul.f32 %v3043_v17, %v1212_v34 }
  0x5e   : > { %v1234_v51 = vrot.slane %v1228_v40, 2  ;;  %v1208_v52 = vadd.f32 %v1203_v37, %v1193_v41  ;;  %v1235_v55 = vrot.slane %v1229_v42, 2  ;;  %v1325_v56 = vmul.f32 %v2941_v2, %v1210_v21 }
  0x5f   : > { %v1326_v57 = vmul.f32 %v2941_v2, %v1211_v25  ;;  %v1216_v58 = vadd.f32 %v1214_v30, %v1209_v45  ;;  %v1223_v59 = vsel %vm570_vm3, %v1221_v44, %v1222_v49  ;;  %v1237_v61 = vrot.slane %v1230_v50, 2  ;;  %v1388_v44 = vld [vmem:[#allocation2 + $0xf0] sm:$0xff]  ;;  %v1389_v50 = vld [vmem:[#allocation2 + $0xf8] sm:$0xff] }
  0x60   : > { %v1329_v63 = vmul.f32 %v2946_v3, %v1210_v21  ;;  %v1215_v6 = vadd.f32 %v1213_v26, %v1208_v52  ;;  %v1236_v60 = vsel %vm590_vm4, %v1234_v51, %v1235_v55  ;;  %v1330_v7 = vmul.f32 %v2946_v3, %v1211_v25 }
  0x61   : > { %v1340_v5 = vmul.f32 %v2956_v4, %v1210_v21  ;;  %v1227_v10 = vadd.f32 %v1222_v49, %v1216_v58  ;;  %v1238_v13 = vsel %vm590_vm4, %v1235_v55, %v1237_v61  ;;  %v1341_v15 = vmul.f32 %v2956_v4, %v1211_v25  ;;  %v1357_v25 = vld [vmem:[#allocation2 + $0xe8] sm:$0x3] }
  0x62   : > { %v1333_v14 = vrot.slane %v1329_v63, 1  ;;  %v1226_v16 = vadd.f32 %v1223_v59, %v1215_v6  ;;  %v1334_v18 = vrot.slane %v1330_v7, 1  ;;  %v1342_v19 = vmul.f32 %v2956_v4, %v1324_v62 }
  0x63   : > { %v1346_v11 = vrot.slane %v1340_v5, 2  ;;  %v1242_v22 = vadd.f32 %v1238_v13, %v1227_v10  ;;  %v1347_v23 = vrot.slane %v1341_v15, 2  ;;  %v1358_v24 = vmul.f32 %v2997_v47, %v1355_v8 }
  0x64   : > { %v1359_v26 = vmul.f32 %v2997_v47, %v1356_v9  ;;  %v1241_v21 = vadd.f32 %v1236_v60, %v1226_v16  ;;  %v1335_v27 = vsel %vm570_vm3, %v1333_v14, %v1334_v18  ;;  %v1339_v28 = vadd.f32 %v1334_v18, %v1326_v57  ;;  %v1390_v57 = vld [vmem:[#allocation2 + $0x100] sm:$0x3] }
  0x65   : > { %v1349_v29 = vrot.slane %v1342_v19, 2  ;;  %v1338_v30 = vadd.f32 %v1335_v27, %v1325_v56  ;;  %v1348_v31 = vsel %vm590_vm4, %v1346_v11, %v1347_v23  ;;  %v1362_v32 = vmul.f32 %v3002_v48, %v1355_v8 }
  0x66   : > { %v1363_v33 = vmul.f32 %v3002_v48, %v1356_v9  ;;  %v2700_v34 = vpack.c.bf16 %v1242_v22, %v1241_v21  ;;  %v1373_v36 = vmul.f32 %v3010_v53, %v1355_v8  ;;  %v1374_v37 = vmul.f32 %v3010_v53, %v1356_v9  ;;  %v2570_v8 = vld [vmem:[%s2951_s23 + $0x58] sm:$0xff]  }
  0x67   : > { %v1350_v35 = vsel %vm590_vm4, %v1347_v23, %v1349_v29  ;;  %v1353_v39 = vadd.f32 %v1348_v31, %v1338_v30  ;;  %v1366_v41 = vrot.slane %v1362_v32, 1  ;;  %v1375_v42 = vmul.f32 %v3010_v53, %v1357_v25  ;;  %v1502_v29 = vld [vmem:[#allocation2 + $0x100] sm:$0x3]  ;;  %v1533_v30 = vld [vmem:[#allocation2 + $0x108] sm:$0xff] }
  0x68   : > { %v1354_v40 = vadd.f32 %v1350_v35, %v1339_v28  ;;  %v1367_v43 = vrot.slane %v1363_v33, 1  ;;  %2702 = vmatpush3.bf16.msk.msra.mxu1 %vm3067_vm7, %v2700_v34  ;;  %v1379_v45 = vrot.slane %v1373_v36, 2  ;;  %v1380_v49 = vrot.slane %v1374_v37, 2 }
  0x69   : > { %v1391_v51 = vmul.f32 %v3015_v54, %v1388_v44  ;;  %v1360_v52 = vadd.f32 %v1358_v24, %v1353_v39  ;;  %v1392_v58 = vmul.f32 %v3015_v54, %v1389_v50  ;;  %2707 = vmatprep.subr.bf16.mxu1 %v2754_v0  ;;  %v1382_v61 = vrot.slane %v1375_v42, 2 }
  0x6a   : > { %v1361_v55 = vadd.f32 %v1359_v26, %v1354_v40  ;;  %v1368_v56 = vsel %vm570_vm3, %v1366_v41, %v1367_v43  ;;  %v1381_v59 = vsel %vm590_vm4, %v1379_v45, %v1380_v49  ;;  %v1395_v62 = vmul.f32 %v3031_v12, %v1388_v44 }
  0x6b   : > { %v1396_v63 = vmul.f32 %v3031_v12, %v1389_v50  ;;  %v1371_v6 = vadd.f32 %v1368_v56, %v1360_v52  ;;  %v1406_v7 = vmul.f32 %v3043_v17, %v1388_v44  ;;  %v1407_v5 = vmul.f32 %v3043_v17, %v1389_v50  ;;  %2635 = vmatmul.mubr.msk.f32.vlgmr.msra.gmra.mrb[2].mxu1 %vm709_vm5, %v3084_v38  ;;  %v2572_v56 = vld [vmem:[%s2951_s23 + $0x68] sm:$0xff]  }
  0x6c   : > { %v1372_v60 = vadd.f32 %v1367_v43, %v1361_v55  ;;  %v1383_v9 = vsel %vm590_vm4, %v1380_v49, %v1382_v61  ;;  %v1399_v10 = vrot.slane %v1395_v62, 1  ;;  %v1408_v14 = vmul.f32 %v3043_v17, %v1390_v57  ;;  %2648 = vmatprep.mubr.msk.f32.mxu1 %vm2756_vm2, %v2755_v1  ;;  %v2571_v43 = vld [vmem:[%s2951_s23 + $0x60] sm:$0xff]  }
  0x6d   : > { %v1400_v13 = vrot.slane %v1396_v63, 1  ;;  %v1386_v15 = vadd.f32 %v1381_v59, %v1371_v6  ;;  %v1412_v18 = vrot.slane %v1406_v7, 2  ;;  %v1413_v19 = vrot.slane %v1407_v5, 2 }
  0x6e   : > { %v1387_v16 = vadd.f32 %v1383_v9, %v1372_v60  ;;  %v1415_v22 = vrot.slane %v1408_v14, 2  ;;  %v2539_v23 = vunpack.c.h.bf16 %v2992_v46  ;;  %v2542_v24 = vunpack.c.l.bf16 %v2570_v8 }
  0x6f   : > { %v1401_v11 = vsel %vm570_vm3, %v1399_v10, %v1400_v13  ;;  %v1393_v26 = vadd.f32 %v1391_v51, %v1386_v15  ;;  %v1414_v27 = vsel %vm590_vm4, %v1412_v18, %v1413_v19  ;;  %v2543_v28 = vunpack.c.h.bf16 %v2570_v8 }
  0x70   : > { %v1394_v21 = vadd.f32 %v1392_v58, %v1387_v16  ;;  %v1416_v31 = vsel %vm590_vm4, %v1413_v19, %v1415_v22  ;;  %513 = vst.msk [vmem:[#allocation2 + $0x111] sm:$0xff] %vm425_vm0, %v2539_v23  ;;  %515 = vst.msk [vmem:[#allocation2 + $0x121] sm:$0xff] %vm425_vm0, %v2542_v24  ;;  %v1503_v25 = vmul.f32 %v2941_v2, %v1388_v44  ;;  %v2546_v58 = vunpack.c.l.bf16 %v2571_v43 }
  0x71   : > { %v1504_v32 = vmul.f32 %v2941_v2, %v1389_v50  ;;  %v1507_v46 = vmul.f32 %v2946_v3, %v1388_v44  ;;  %v1404_v33 = vadd.f32 %v1401_v11, %v1393_v26  ;;  %516 = vst.msk [vmem:[#allocation2 + $0x129] sm:$0xff] %vm425_vm0, %v2543_v28  ;;  %v1508_v35 = vmul.f32 %v2946_v3, %v1389_v50 }
  0x72   : > { %v1405_v34 = vadd.f32 %v1400_v13, %v1394_v21  ;;  %v1518_v36 = vmul.f32 %v2956_v4, %v1388_v44  ;;  %v1519_v39 = vmul.f32 %v2956_v4, %v1389_v50  ;;  %v1520_v40 = vmul.f32 %v2956_v4, %v1502_v29  ;;  %518 = vst.msk [vmem:[#allocation2 + $0x139] sm:$0xff] %vm425_vm0, %v2546_v58 }
  0x73   : > { %v1511_v37 = vrot.slane %v1507_v46, 1  ;;  %v1536_v41 = vmul.f32 %v2997_v47, %v1533_v30  ;;  %v1419_v2 = vadd.f32 %v1414_v27, %v1404_v33  ;;  %v1512_v45 = vrot.slane %v1508_v35, 1 }
  0x74   : > { %v1420_v42 = vadd.f32 %v1416_v31, %v1405_v34  ;;  %v1524_v49 = vrot.slane %v1518_v36, 2  ;;  %v1525_v51 = vrot.slane %v1519_v39, 2  ;;  %v1527_v52 = vrot.slane %v1520_v40, 2 }
  0x75   : > { %v1540_v55 = vmul.f32 %v3002_v48, %v1533_v30  ;;  %v1551_v3 = vmul.f32 %v3010_v53, %v1533_v30  ;;  %v1513_v57 = vsel %vm570_vm3, %v1511_v37, %v1512_v45  ;;  %v1517_v50 = vadd.f32 %v1512_v45, %v1504_v32 }
  0x76   : > { %v2704_v44 = vpack.c.bf16 %v1420_v42, %v1419_v2  ;;  %v1516_v4 = vadd.f32 %v1513_v57, %v1503_v25  ;;  %v1526_v59 = vsel %vm590_vm4, %v1524_v49, %v1525_v51  ;;  %v1528_v61 = vsel %vm590_vm4, %v1525_v51, %v1527_v52  ;;  %v3263_v51 = vld [vmem:[%s3439_s1] ss:$0 sm:$0xff] }
  0x77   : > { %v1544_v62 = vrot.slane %v1540_v55, 1  ;;  %v1532_v63 = vadd.f32 %v1528_v61, %v1517_v50  ;;  %v1534_v6 = vld [vmem:[#allocation2 + $0x110] sm:$0xff]  ;;  %v1535_v60 = vld [vmem:[#allocation2 + $0x118] sm:$0x3]  ;;  %v1557_v7 = vrot.slane %v1551_v3, 2  ;;  %v2547_v5 = vunpack.c.h.bf16 %v2571_v43  ;;  %v1566_v15 = vld [vmem:[#allocation2 + $0x120] sm:$0xff] }
  0x78   : > { %2706 = vmatpush3.bf16.msk.msra.mxu0 %vm3067_vm7, %v2704_v44  ;;  %v2550_v8 = vunpack.c.l.bf16 %v2572_v56  ;;  %v1531_v9 = vadd.f32 %v1526_v59, %v1516_v4  ;;  %v1537_v10 = vmul.f32 %v2997_v47, %v1534_v6  ;;  %v1541_v13 = vmul.f32 %v3002_v48, %v1534_v6  ;;  %v1567_v16 = vld [vmem:[#allocation2 + $0x128] sm:$0xff]  ;;  %v1568_v27 = vld [vmem:[#allocation2 + $0x130] sm:$0x3]  ;;  %v3280_v61 = vld [vmem:[%s3439_s1 + $0x2] ss:$0 sm:$0xff] }
  0x79   : > { %v1552_v14 = vmul.f32 %v3010_v53, %v1534_v6  ;;  %2711 = vmatprep.subr.bf16.mxu0 %v2754_v0  ;;  %v1553_v18 = vmul.f32 %v3010_v53, %v1535_v60  ;;  %v1569_v19 = vmul.f32 %v3015_v54, %v1566_v15  ;;  %v1570_v11 = vmul.f32 %v3015_v54, %v1567_v16  ;;  %v1680_v49 = vld [vmem:[#allocation2 + $0x130] sm:$0x3]  ;;  %v1711_v50 = vld [vmem:[#allocation2 + $0x138] sm:$0xff] }
  0x7a   : > { %v1573_v22 = vmul.f32 %v3031_v12, %v1566_v15  ;;  %519 = vst.msk [vmem:[#allocation2 + $0x141] sm:$0xff] %vm425_vm0, %v2547_v5  ;;  %521 = vst.msk [vmem:[#allocation2 + $0x151] sm:$0xff] %vm425_vm0, %v2550_v8  ;;  %v1538_v23 = vadd.f32 %v1536_v41, %v1531_v9  ;;  %v1539_v24 = vadd.f32 %v1537_v10, %v1532_v63  ;;  %v1545_v26 = vrot.slane %v1541_v13, 1 }
  0x7b   : > { %v1558_v21 = vrot.slane %v1552_v14, 2  ;;  %2642 = vmatmul.mubr.msk.f32.vlgmr.msra.gmra.mrb[4].mxu0 %vm709_vm5, %v3084_v38  ;;  %v1560_v28 = vrot.slane %v1553_v18, 2  ;;  %v1574_v29 = vmul.f32 %v3031_v12, %v1567_v16  ;;  %v1584_v31 = vmul.f32 %v3043_v17, %v1566_v15 }
  0x7c   : > { %v1577_v30 = vrot.slane %v1573_v22, 1  ;;  %2655 = vmatprep.mubr.msk.f32.mxu0 %vm2756_vm2, %v2755_v1  ;;  %v1546_v25 = vsel %vm570_vm3, %v1544_v62, %v1545_v26  ;;  %v1550_v32 = vadd.f32 %v1545_v26, %v1539_v24  ;;  %v1585_v33 = vmul.f32 %v3043_v17, %v1567_v16 }
  0x7d   : > { %v1559_v46 = vsel %vm590_vm4, %v1557_v7, %v1558_v21  ;;  %v1549_v34 = vadd.f32 %v1546_v25, %v1538_v23  ;;  %v1561_v35 = vsel %vm590_vm4, %v1558_v21, %v1560_v28  ;;  %v1578_v36 = vrot.slane %v1574_v29, 1 }
  0x7e   : > { %v1586_v37 = vmul.f32 %v3043_v17, %v1568_v27  ;;  %v1565_v39 = vadd.f32 %v1561_v35, %v1550_v32  ;;  %v1590_v40 = vrot.slane %v1584_v31, 2  ;;  %v1591_v41 = vrot.slane %v1585_v33, 2 }
  0x7f   : > { %v2551_v43 = vunpack.c.h.bf16 %v2572_v56  ;;  %v1564_v2 = vadd.f32 %v1559_v46, %v1549_v34  ;;  %v1579_v42 = vsel %vm570_vm3, %v1577_v30, %v1578_v36  ;;  %v1681_v52 = vmul.f32 %v3263_v51, %v1566_v15  ;;  %v3272_v56 = vld [vmem:[%s3439_s1 + $0x1] ss:$0 sm:$0xff] }
  0x80   : > { %v1593_v45 = vrot.slane %v1586_v37, 2  ;;  %v1572_v55 = vadd.f32 %v1570_v11, %v1565_v39  ;;  %v1592_v3 = vsel %vm590_vm4, %v1590_v40, %v1591_v41  ;;  %v1682_v44 = vmul.f32 %v3263_v51, %v1567_v16 }
  0x81   : > { %522 = vst.msk [vmem:[#allocation2 + $0x159] sm:$0xff] %vm425_vm0, %v2551_v43  ;;  %v1685_v57 = vmul.f32 %v3272_v56, %v1566_v15  ;;  %v1571_v58 = vadd.f32 %v1569_v19, %v1564_v2  ;;  %v1686_v59 = vmul.f32 %v3272_v56, %v1567_v16  ;;  %v1696_v62 = vmul.f32 %v3280_v61, %v1566_v15  ;;  %v1712_v63 = vld [vmem:[#allocation2 + $0x140] sm:$0xff]  ;;  %v1713_v24 = vld [vmem:[#allocation2 + $0x148] sm:$0x3]  ;;  %v1744_v34 = vld [vmem:[#allocation2 + $0x150] sm:$0xff] }
  0x82   : > { %v1594_v4 = vsel %vm590_vm4, %v1591_v41, %v1593_v45  ;;  %v1583_v6 = vadd.f32 %v1578_v36, %v1572_v55  ;;  %v1697_v7 = vmul.f32 %v3280_v61, %v1567_v16  ;;  %v1698_v5 = vmul.f32 %v3280_v61, %v1680_v49  ;;  %v2573_v55 = vld [vmem:[%s2951_s23 + $0x70] sm:$0xff]  }
  0x83   : > { %v1689_v60 = vrot.slane %v1685_v57, 1  ;;  %v1582_v8 = vadd.f32 %v1579_v42, %v1571_v58  ;;  %v1690_v9 = vrot.slane %v1686_v59, 1  ;;  %v1702_v10 = vrot.slane %v1696_v62, 2  ;;  %v2574_v62 = vld [vmem:[%s2951_s23 + $0x78] sm:$0xff]  }
  0x84   : > { %v1714_v13 = vmul.f32 %v2997_v47, %v1711_v50  ;;  %v1598_v14 = vadd.f32 %v1594_v4, %v1583_v6  ;;  %v1703_v18 = vrot.slane %v1697_v7, 2  ;;  %v1705_v19 = vrot.slane %v1698_v5, 2 }
  0x85   : > { %v1715_v11 = vmul.f32 %v2997_v47, %v1712_v63  ;;  %v1597_v22 = vadd.f32 %v1592_v3, %v1582_v8  ;;  %v1691_v15 = vsel %vm570_vm3, %v1689_v60, %v1690_v9  ;;  %v1695_v23 = vadd.f32 %v1690_v9, %v1682_v44 }
  0x86   : > { %v1718_v26 = vmul.f32 %v3002_v48, %v1711_v50  ;;  %v1694_v16 = vadd.f32 %v1691_v15, %v1681_v52  ;;  %v1704_v21 = vsel %vm590_vm4, %v1702_v10, %v1703_v18  ;;  %v1706_v27 = vsel %vm590_vm4, %v1703_v18, %v1705_v19 }
  0x87   : > { %v1719_v28 = vmul.f32 %v3002_v48, %v1712_v63  ;;  %v2708_v29 = vpack.c.bf16 %v1598_v14, %v1597_v22  ;;  %v1710_v30 = vadd.f32 %v1706_v27, %v1695_v23  ;;  %v1729_v25 = vmul.f32 %v3010_v53, %v1711_v50 }
  0x88   : > { %v1722_v31 = vrot.slane %v1718_v26, 1  ;;  %v1709_v47 = vadd.f32 %v1704_v21, %v1694_v16  ;;  %v1730_v46 = vmul.f32 %v3010_v53, %v1712_v63  ;;  %v1731_v33 = vmul.f32 %v3010_v53, %v1713_v24  ;;  %v1745_v35 = vld [vmem:[#allocation2 + $0x158] sm:$0xff]  ;;  %v1746_v42 = vld [vmem:[#allocation2 + $0x160] sm:$0x3] }
  0x89   : > { %v1723_v32 = vrot.slane %v1719_v28, 1  ;;  %2710 = vmatpush3.bf16.msk.msra.mxu1 %vm3067_vm7, %v2708_v29  ;;  %v1717_v36 = vadd.f32 %v1715_v11, %v1710_v30  ;;  %v1735_v37 = vrot.slane %v1729_v25, 2  ;;  %v1747_v48 = vmul.f32 %v3015_v54, %v1744_v34  ;;  %v1858_v14 = vld [vmem:[#allocation2 + $0x160] sm:$0x3] }
  0x8a   : > { %v1748_v39 = vmul.f32 %v3015_v54, %v1745_v35  ;;  %v1716_v40 = vadd.f32 %v1714_v13, %v1709_v47  ;;  %v1736_v43 = vrot.slane %v1730_v46, 2  ;;  %v1738_v2 = vrot.slane %v1731_v33, 2  ;;  %2715 = vmatprep.subr.bf16.mxu1 %v2754_v0 }
  0x8b   : > { %v1724_v41 = vsel %vm570_vm3, %v1722_v31, %v1723_v32  ;;  %v1728_v53 = vadd.f32 %v1723_v32, %v1717_v36  ;;  %v1751_v45 = vmul.f32 %v3031_v12, %v1744_v34  ;;  %v1752_v49 = vmul.f32 %v3031_v12, %v1745_v35 }
  0x8c   : > { %v1762_v52 = vmul.f32 %v3043_v17, %v1744_v34  ;;  %v1727_v3 = vadd.f32 %v1724_v41, %v1716_v40  ;;  %v1737_v54 = vsel %vm590_vm4, %v1735_v37, %v1736_v43  ;;  %v1739_v44 = vsel %vm590_vm4, %v1736_v43, %v1738_v2  ;;  %2649 = vmatmul.mubr.msk.f32.vlgmr.msra.gmra.mrb[4].mxu1 %vm709_vm5, %v3084_v38  ;;  %v2741_v40 = vld [vmem:[%s3439_s1 + $0x4] ss:$0 sm:$0xff]  ;;  %v2742_v43 = vld [vmem:[%s3439_s1 + $0x5] ss:$0 sm:$0xff] }
  0x8d   : > { %v1763_v57 = vmul.f32 %v3043_v17, %v1745_v35  ;;  %v1743_v50 = vadd.f32 %v1739_v44, %v1728_v53  ;;  %v1755_v58 = vrot.slane %v1751_v45, 1  ;;  %v1756_v4 = vrot.slane %v1752_v49, 1  ;;  %2662 = vmatprep.mubr.msk.f32.mxu1 %vm2756_vm2, %v2755_v1 }
  0x8e   : > { %v1764_v59 = vmul.f32 %v3043_v17, %v1746_v42  ;;  %v1742_v12 = vadd.f32 %v1737_v54, %v1727_v3  ;;  %v1768_v63 = vrot.slane %v1762_v52, 2  ;;  %v2554_v60 = vunpack.c.l.bf16 %v2573_v55  ;;  %v1777_v42 = vld [vmem:[%s3445_s7] sm:$0xff] }
  0x8f   : > { %v1769_v6 = vrot.slane %v1763_v57, 2  ;;  %v1750_v7 = vadd.f32 %v1748_v39, %v1743_v50  ;;  %v1757_v5 = vsel %vm570_vm3, %v1755_v58, %v1756_v4  ;;  %v2555_v9 = vunpack.c.h.bf16 %v2573_v55  ;;  %v2743_v50 = vld [vmem:[%s3439_s1 + $0x6] ss:$0 sm:$0xff] }
  0x90   : > { %v1771_v8 = vrot.slane %v1764_v59, 2  ;;  %v1749_v10 = vadd.f32 %v1747_v48, %v1742_v12  ;;  %v2558_v38 = vunpack.c.l.bf16 %v2574_v62  ;;  %v2559_v13 = vunpack.c.h.bf16 %v2574_v62  ;;  %524 = vst.msk [vmem:[#allocation2 + $0x169] sm:$0xff] %vm425_vm0, %v2554_v60  ;;  %v2740_v48 = vld [vmem:[%s3439_s1 + $0x3] ss:$0 sm:$0xff] }
  0x91   : > { %v1761_v17 = vadd.f32 %v1756_v4, %v1750_v7  ;;  %v1770_v18 = vsel %vm590_vm4, %v1768_v63, %v1769_v6  ;;  %525 = vst.msk [vmem:[#allocation2 + $0x171] sm:$0xff] %vm425_vm0, %v2555_v9  ;;  %v1860_v11 = vmul.f32 %v3263_v51, %v1745_v35  ;;  %v1863_v15 = vmul.f32 %v3272_v56, %v1744_v34 }
  0x92   : > { %v1772_v19 = vsel %vm590_vm4, %v1769_v6, %v1771_v8  ;;  %v1760_v22 = vadd.f32 %v1757_v5, %v1749_v10  ;;  %527 = vst.msk [vmem:[#allocation2 + $0x181] sm:$0xff] %vm425_vm0, %v2558_v38  ;;  %528 = vst.msk [vmem:[#allocation2 + $0x189] sm:$0xff] %vm425_vm0, %v2559_v13  ;;  %v1864_v23 = vmul.f32 %v3272_v56, %v1745_v35  ;;  %v2745_v38 = vld [vmem:[%s3439_s1 + $0x8] ss:$0 sm:$0xff] }
  0x93   : > { %v1874_v24 = vmul.f32 %v3280_v61, %v1744_v34  ;;  %v1776_v26 = vadd.f32 %v1772_v19, %v1761_v17  ;;  %v1859_v16 = vmul.f32 %v3263_v51, %v1744_v34  ;;  %v1875_v21 = vmul.f32 %v3280_v61, %v1745_v35 }
  0x94   : > { %v1876_v27 = vmul.f32 %v3280_v61, %v1858_v14  ;;  %v1775_v28 = vadd.f32 %v1770_v18, %v1760_v22  ;;  %v1867_v29 = vrot.slane %v1863_v15, 1  ;;  %v1868_v30 = vrot.slane %v1864_v23, 1 }
  0x95   : > { %v1880_v31 = vrot.slane %v1874_v24, 2  ;;  %v1881_v25 = vrot.slane %v1875_v21, 2 }
  0x96   : > { %v1883_v47 = vrot.slane %v1876_v27, 2  ;;  %v2712_v32 = vpack.c.bf16 %v1776_v26, %v1775_v28  ;;  %v1869_v46 = vsel %vm570_vm3, %v1867_v29, %v1868_v30  ;;  %v1873_v33 = vadd.f32 %v1868_v30, %v1860_v11 }
  0x97   : > { %v1872_v56 = vadd.f32 %v1869_v46, %v1859_v16  ;;  %v1882_v36 = vsel %vm590_vm4, %v1880_v31, %v1881_v25  ;;  %v1889_v51 = vld [vmem:[#allocation2 + $0x168] sm:$0xff] }
  0x98   : > { %v1884_v37 = vsel %vm590_vm4, %v1881_v25, %v1883_v47  ;;  %2714 = vmatpush3.bf16.msk.msra.mxu0 %vm3067_vm7, %v2712_v32  ;;  %v1890_v34 = vld [vmem:[#allocation2 + $0x170] sm:$0xff]  ;;  %v1891_v35 = vld [vmem:[#allocation2 + $0x178] sm:$0x3]  ;;  %v1892_v39 = vmul.f32 %v2740_v48, %v1889_v51  ;;  %v1896_v41 = vmul.f32 %v2741_v40, %v1889_v51  ;;  %v1907_v2 = vmul.f32 %v2742_v43, %v1889_v51 }
  0x99   : > { %v1888_v61 = vadd.f32 %v1884_v37, %v1873_v33  ;;  %v1887_v53 = vadd.f32 %v1882_v36, %v1872_v56  ;;  %v1893_v45 = vmul.f32 %v2740_v48, %v1890_v34  ;;  %v1897_v49 = vmul.f32 %v2741_v40, %v1890_v34  ;;  %v1922_v55 = vld [vmem:[#allocation2 + $0x180] sm:$0xff]  ;;  %v1923_v3 = vld [vmem:[#allocation2 + $0x188] sm:$0xff]  ;;  %2719 = vmatprep.subr.bf16.mxu0 %v2754_v0  ;;  %v1924_v6 = vld [vmem:[#allocation2 + $0x190] sm:$0x3] }
  0x9a   : > { %v1908_v52 = vmul.f32 %v2742_v43, %v1890_v34  ;;  %v1900_v54 = vrot.slane %v1896_v41, 1  ;;  %v1909_v44 = vmul.f32 %v2742_v43, %v1891_v35  ;;  %v1913_v57 = vrot.slane %v1907_v2, 2  ;;  %v2744_v0 = vld [vmem:[%s3439_s1 + $0x7] ss:$0 sm:$0xff]  ;;  %v2065_v56 = vld [vmem:[%s3441_s3 + $0x8] sm:$0xff] }
  0x9b   : > { %v1925_v58 = vmul.f32 %v2743_v50, %v1922_v55  ;;  %v1894_v4 = vadd.f32 %v1892_v39, %v1887_v53  ;;  %v1895_v59 = vadd.f32 %v1893_v45, %v1888_v61  ;;  %v1901_v62 = vrot.slane %v1897_v49, 1  ;;  %2656 = vmatmul.mubr.msk.f32.vlgmr.msra.gmra.mrb[6].mxu0 %vm709_vm5, %v1777_v42  ;;  %v2064_v33 = vld [vmem:[%s3441_s3] sm:$0xff] }
  0x9c   : > { %v1914_v12 = vrot.slane %v1908_v52, 2  ;;  %v1916_v63 = vrot.slane %v1909_v44, 2  ;;  %v1926_v60 = vmul.f32 %v2743_v50, %v1923_v3  ;;  %v1929_v7 = vmul.f32 %v2744_v0, %v1922_v55  ;;  %2669 = vmatprep.mubr.msk.f32.mxu0 %vm2756_vm2, %v2755_v1 }
  0x9d   : > { %v1930_v5 = vmul.f32 %v2744_v0, %v1923_v3  ;;  %v1902_v8 = vsel %vm570_vm3, %v1900_v54, %v1901_v62  ;;  %v1906_v9 = vadd.f32 %v1901_v62, %v1895_v59  ;;  %v1940_v13 = vmul.f32 %v2745_v38, %v1922_v55 }
  0x9e   : > { %v1915_v10 = vsel %vm590_vm4, %v1913_v57, %v1914_v12  ;;  %v1905_v14 = vadd.f32 %v1902_v8, %v1894_v4  ;;  %v1917_v17 = vsel %vm590_vm4, %v1914_v12, %v1916_v63  ;;  %v1933_v18 = vrot.slane %v1929_v7, 1 }
  0x9f   : > { %v1934_v19 = vrot.slane %v1930_v5, 1  ;;  %v1921_v11 = vadd.f32 %v1917_v17, %v1906_v9  ;;  %v1941_v22 = vmul.f32 %v2745_v38, %v1923_v3  ;;  %v1942_v15 = vmul.f32 %v2745_v38, %v1924_v6 }
  0xa0   : > { %v1946_v23 = vrot.slane %v1940_v13, 2  ;;  %v1920_v24 = vadd.f32 %v1915_v10, %v1905_v14  ;;  %v2720_v36 = vpack.c.bf16 %v2065_v56, %v2064_v33 }
  0xa1   : > { %v1928_v26 = vadd.f32 %v1926_v60, %v1921_v11  ;;  %v1935_v16 = vsel %vm570_vm3, %v1933_v18, %v1934_v19  ;;  %v1947_v21 = vrot.slane %v1941_v22, 2  ;;  %v1949_v27 = vrot.slane %v1942_v15, 2 }
  0xa2   : > { %v1927_v28 = vadd.f32 %v1925_v58, %v1920_v24  ;;  %2721 = vmatpush3.bf16.msra.mxu0 %v2720_v36  ;;  %v2141_v36 = vld [vmem:[%s3443_s5] sm:$0xff] }
  0xa3   : > { %v1939_v29 = vadd.f32 %v1934_v19, %v1928_v26  ;;  %v1948_v30 = vsel %vm590_vm4, %v1946_v23, %v1947_v21  ;;  %v1950_v31 = vsel %vm590_vm4, %v1947_v21, %v1949_v27 }
  0xa4   : > { %v1938_v25 = vadd.f32 %v1935_v16, %v1927_v28 }
  0xa5   : > { %v1954_v47 = vadd.f32 %v1950_v31, %v1939_v29 }
  0xa6   : > { %v1953_v32 = vadd.f32 %v1948_v30, %v1938_v25 }
  0xa8   : > { %v2716_v46 = vpack.c.bf16 %v1954_v47, %v1953_v32 }
  0xaa   : > { %2718 = vmatpush3.bf16.msk.msra.mxu1 %vm3067_vm7, %v2716_v46 }
  0xab   : > { %2672 = vmatprep.subr.mxu1 %v2755_v1 }
  0xad   : > { %2663 = vmatmul.mubr.msk.f32.vlgmr.msra.gmra.mrb[6].mxu1 %vm709_vm5, %v1777_v42 }
  0xae   : > { %2674 = vmatprep.mubr.msk.f32.mxu1 %vm2756_vm2, %v2755_v1  ;;  %2673 = vmatpush3.msra.mxu1 %v2141_v36 }
 0x110   : > { %v782_v37 = vpop.f32.mrb[0].mxu0 }
 0x111   : > { %v783_v51 = vadd.f32 %v2451_v20, %v782_v37  ;;  %v2615_v61 = vpop.f32.mrb[1].mxu0 }
 0x113   : > { %v786_v34 = vmax.f32 %v783_v51, 0.0 }
 0x115   : > { %787 = vst.msk [vmem:[#allocation3] sm:$0xff] %vm425_vm0, %v786_v34 }
 0x11c   : > { %v2034_v6 = vld [vmem:[#allocation3] sm:$0xff] }
 0x11d   : > { %v2042_v7 = vsel %vm425_vm0, %v2034_v6, 0.0 }
 0x11f   : > { %v960_v1 = vpop.f32.mrb[0].mxu1 }
 0x120   : > { %v961_v35 = vadd.f32 %v2451_v20, %v960_v1  ;;  %v2622_v48 = vpop.f32.mrb[1].mxu1  ;;  %v2736_v1 = vld [vmem:[%s3446_s8] sm:$0xff]  }
 0x121   : > { %2677 = vmatprep.subr.bf16.mxu0 %v2736_v1  ;;  %2722 = vmatprep.subr.bf16.mxu1 %v2736_v1  ;;  %v2221_v48 = vlaneseq }
 0x122   : > { %v964_v39 = vmax.f32 %v961_v35, 0.0  ;;  %v2142_v35 = vld [vmem:[%s3444_s6] sm:$0x1] }
 0x124   : > { %965 = vst.msk [vmem:[#allocation3 + $0x8] sm:$0xff] %vm425_vm0, %v964_v39 }
 0x12b   : > { %v3385_v12 = vld [vmem:[#allocation3 + $0x8] sm:$0xff] }
 0x12c   : > { %v2043_v60 = vsel %vm425_vm0, %v3385_v12, 0.0 }
 0x12d   : > { %v2044_v5 = vadd.f32 %v2043_v60, %v2042_v7 }
 0x12f   : > { %v1138_v40 = vpop.f32.mrb[2].mxu0 }
 0x130   : > { %v1139_v41 = vadd.f32 %v2451_v20, %v1138_v40  ;;  %v2629_v43 = vpop.f32.mrb[3].mxu0 }
 0x132   : > { %v1142_v2 = vmax.f32 %v1139_v41, 0.0 }
 0x134   : > { %1143 = vst.msk [vmem:[#allocation3 + $0x10] sm:$0xff] %vm425_vm0, %v1142_v2  ;;  %v2222_v2 = vshrl.u32 %v2221_v48, 7 }
 0x13b   : > { %v3390_v0 = vld [vmem:[#allocation3 + $0x10] sm:$0xff] }
 0x13c   : > { %v2045_v8 = vsel %vm425_vm0, %v3390_v0, 0.0 }
 0x13d   : > { %v2046_v10 = vadd.f32 %v2045_v8, %v2044_v5 }
 0x13e   : > { %v1316_v42 = vpop.f32.mrb[2].mxu1 }
 0x13f   : > { %v1317_v53 = vadd.f32 %v2451_v20, %v1316_v42  ;;  %v2636_v45 = vpop.f32.mrb[3].mxu1 }
 0x140   : > { %v2223_v45 = vsub.s32 0, %v2222_v2 }
 0x141   : > { %v1320_v49 = vmax.f32 %v1317_v53, 0.0 }
 0x143   : > { %1321 = vst.msk [vmem:[#allocation3 + $0x18] sm:$0xff] %vm425_vm0, %v1320_v49 }
 0x14a   : > { %v2037_v9 = vld [vmem:[#allocation3 + $0x18] sm:$0xff] }
 0x14b   : > { %v2047_v38 = vsel %vm425_vm0, %v2037_v9, 0.0 }
 0x14c   : > { %v2048_v14 = vadd.f32 %v2047_v38, %v2046_v10 }
 0x14e   : > { %v1494_v52 = vpop.f32.mrb[4].mxu0 }
 0x14f   : > { %v1495_v55 = vadd.f32 %v2451_v20, %v1494_v52  ;;  %v2643_v3 = vpop.f32.mrb[5].mxu0 }
 0x151   : > { %v1498_v54 = vmax.f32 %v1495_v55, 0.0 }
 0x153   : > { %1499 = vst.msk [vmem:[#allocation3 + $0x20] sm:$0xff] %vm425_vm0, %v1498_v54 }
 0x15a   : > { %v2038_v13 = vld [vmem:[#allocation3 + $0x20] sm:$0xff] }
 0x15b   : > { %v2049_v17 = vsel %vm425_vm0, %v2038_v13, 0.0 }
 0x15c   : > { %v2050_v15 = vadd.f32 %v2049_v17, %v2048_v14 }
 0x15f   : > { %v1672_v44 = vpop.f32.mrb[4].mxu1 }
 0x160   : > { %v1673_v57 = vadd.f32 %v2451_v20, %v1672_v44  ;;  %v2650_v50 = vpop.f32.mrb[5].mxu1 }
 0x162   : > { %v1676_v58 = vmax.f32 %v1673_v57, 0.0 }
 0x164   : > { %1677 = vst.msk [vmem:[#allocation3 + $0x28] sm:$0xff] %vm425_vm0, %v1676_v58 }
 0x16b   : > { %v2039_v19 = vld [vmem:[#allocation3 + $0x28] sm:$0xff] }
 0x16c   : > { %v2051_v24 = vsel %vm425_vm0, %v2039_v19, 0.0 }
 0x16d   : > { %v2052_v16 = vadd.f32 %v2051_v24, %v2050_v15 }
 0x16e   : > { %v1850_v4 = vpop.f32.mrb[6].mxu0 }
 0x16f   : > { %v1851_v59 = vadd.f32 %v2451_v20, %v1850_v4  ;;  %v2657_v62 = vpop.f32.mrb[7].mxu0 }
 0x171   : > { %v1854_v63 = vmax.f32 %v1851_v59, 0.0 }
 0x173   : > { %1855 = vst.msk [vmem:[#allocation3 + $0x30] sm:$0xff] %vm425_vm0, %v1854_v63 }
 0x17a   : > { %v2040_v26 = vld [vmem:[#allocation3 + $0x30] sm:$0xff] }
 0x17b   : > { %v2053_v21 = vsel %vm425_vm0, %v2040_v26, 0.0 }
 0x17c   : > { %v2054_v27 = vadd.f32 %v2053_v21, %v2052_v16 }
 0x180   : > { %v2028_v18 = vpop.f32.mrb[6].mxu1 }
 0x181   : > { %v2029_v11 = vadd.f32 %v2451_v20, %v2028_v18  ;;  %v2664_v22 = vpop.f32.mrb[7].mxu1  ;;  %v2066_v20 = vld [vmem:[%s3442_s4] sm:$0x1] }
 0x183   : > { %v2032_v23 = vmax.f32 %v2029_v11, 0.0 }
 0x185   : > { %2033 = vst.msk [vmem:[#allocation3 + $0x38] sm:$0xff] %vm425_vm0, %v2032_v23 }
 0x18c   : > { %v2041_v28 = vld [vmem:[#allocation3 + $0x38] sm:$0xff] }
 0x18d   : > { %v2055_v29 = vsel %vm425_vm0, %v2041_v28, 0.0 }
 0x18e   : > { %v2056_v30 = vadd.f32 %v2055_v29, %v2054_v27 }
 0x190   : > { %v2057_v31 = vrot.slane %v2056_v30, 4 }
 0x192   : > { %v2058_v25 = vadd.f32 %v2057_v31, %v2056_v30 }
 0x194   : > { %v2059_v47 = vrot.slane %v2058_v25, 2 }
 0x196   : > { %v2060_v32 = vadd.f32 %v2059_v47, %v2058_v25 }
 0x198   : > { %v2061_v46 = vrot.slane %v2060_v32, 1 }
 0x19a   : > { %v2062_v33 = vadd.f32 %v2061_v46, %v2060_v32 }
 0x19c   : > { %v2063_v56 = vmul.f32 0.015625, %v2062_v33 }
 0x19e   : > { %2670 = vmatmul.mubr.msk.f32.vlgmr.msra.gmra.mrb[8].mxu0 %vm425_vm0, %v2063_v56 }
 0x19f   : > { %2678 = vmatpush3.bf16.msra.mxu0 %v2736_v1 }
 0x271   : > { %v2136_v37 = vpop.f32.mrb[8].mxu0 }
 0x272   : > { %v2137_v51 = vadd.f32 %v2136_v37, %v2066_v20  ;;  %v2671_v61 = vpop.f32.mrb[9].mxu0 }
 0x274   : > { %v2140_v34 = vmax.f32 %v2137_v51, 0.0 }
 0x276   : > { %2675 = vmatmul.mubr.msk.f32.vlgmr.msra.gmra.mrb[8].mxu1 %vm2143_vm8, %v2140_v34 }
 0x277   : > { %2723 = vmatpush3.bf16.msra.mxu1 %v2736_v1 }
 0x349   : > { %v2213_v39 = vpop.f32.mrb[8].mxu1 }
 0x34a   : > { %v2214_v40 = vadd.f32 %v2213_v39, %v2142_v35  ;;  %v2676_v41 = vpop.f32.mrb[9].mxu1 }
 0x34c   : > { %v2217_v43 = vadd.f32 3.0, %v2214_v40 }
 0x34e   : > { %v2218_v42 = vmax.f32 %v2217_v43, 0.0 }
 0x350   : > { %v2219_v53 = vmin.f32 %v2218_v42, 6.0 }
 0x352   : > { %v2220_v49 = vmul.f32 0.16666667, %v2219_v53 }
 0x354   : > { %v2224_v52 = vrot.slane %v2220_v49, %v2223_v45 }
 0x356   : > { %v2225_v55 = vmul.f32 %v2224_v52, %v2034_v6  ;;  %v2226_v3 = vmul.f32 %v2224_v52, %v3385_v12  ;;  %v2229_v54 = vmul.f32 %v2224_v52, %v2038_v13  ;;  %v2230_v44 = vmul.f32 %v2224_v52, %v2039_v19  ;;  %v2470_v12 = vld [vmem:[%s3447_s9] ss:$0 sm:$0xff] }
 0x357   : > { %v2227_v57 = vmul.f32 %v2224_v52, %v3390_v0  ;;  %v2228_v50 = vmul.f32 %v2224_v52, %v2037_v9  ;;  %v2231_v58 = vmul.f32 %v2224_v52, %v2040_v26  ;;  %v2232_v4 = vmul.f32 %v2224_v52, %v2041_v28 }
 0x358   : > { %v2233_v59 = vpack.c.bf16 %v2226_v3, %v2225_v55  ;;  %v2235_v62 = vpack.c.bf16 %v2230_v44, %v2229_v54 }
 0x359   : > { %v2234_v63 = vpack.c.bf16 %v2228_v50, %v2227_v57  ;;  %v2236_v60 = vpack.c.bf16 %v2232_v4, %v2231_v58 }
 0x35a   : > { %2679 = vmatprep.mubr.msk.bf16.mxu0 %vm425_vm0, %v2233_v59  ;;  %2683 = vmatprep.mubr.msk.bf16.mxu1 %vm425_vm0, %v2235_v62 }
 0x35b   : > { %2680 = vmatmul.mubr.msk.bf16.vlgmr.msra.gmra.mrb[12].mxu0 %vm425_vm0, %v2234_v63  ;;  %2684 = vmatmul.mubr.msk.bf16.vlgmr.msra.gmra.mrb[12].mxu1 %vm425_vm0, %v2236_v60 }
 0x42e   : > { %v2681_v6 = vpop.f32.mrb[12].mxu0  ;;  %v2685_v0 = vpop.f32.mrb[12].mxu1 }
 0x42f   : > { %v2307_v7 = vadd.f32 %v2681_v6, %v2470_v12  ;;  %v2323_v5 = vadd.f32 %v2685_v0, %v2470_v12  ;;  %v2298_v8 = vpop.f32.mrb[13].mxu0  ;;  %v2314_v9 = vpop.f32.mrb[13].mxu1 }
 0x430   : > { %v2299_v10 = vadd.f32 %v2470_v12, %v2298_v8  ;;  %v2315_v38 = vadd.f32 %v2470_v12, %v2314_v9  ;;  %v2682_v13 = vpop.f32.mrb[14].mxu0  ;;  %v2686_v14 = vpop.f32.mrb[14].mxu1 }
 0x431   : > { %v2490_v17 = vpack.c.bf16 %v2307_v7, %v2307_v7  ;;  %v2494_v18 = vpack.c.bf16 %v2323_v5, %v2323_v5  ;;  %v2310_v19 = vadd.f32 %v2682_v13, %v2470_v12  ;;  %v2326_v11 = vadd.f32 %v2686_v14, %v2470_v12  ;;  %v2301_v22 = vpop.f32.mrb[15].mxu0  ;;  %v2317_v15 = vpop.f32.mrb[15].mxu1 }
 0x432   : > { %v2488_v23 = vpack.c.bf16 %v2299_v10, %v2299_v10  ;;  %v2492_v24 = vpack.c.bf16 %v2315_v38, %v2315_v38  ;;  %v2302_v26 = vadd.f32 %v2470_v12, %v2301_v22  ;;  %v2318_v16 = vadd.f32 %v2470_v12, %v2317_v15 }
 0x433   : > { %2364 = vst.msk [vmem:[%s359_s26 + $0x8] sm:$0xf] %vm2361_vm9, %v2490_v17  ;;  %2368 = vst.msk [vmem:[%s359_s26 + $0x18] sm:$0xf] %vm2361_vm9, %v2494_v18  ;;  %v2491_v21 = vpack.c.bf16 %v2310_v19, %v2310_v19  ;;  %v2495_v27 = vpack.c.bf16 %v2326_v11, %v2326_v11 }
 0x434   : > { %2362 = vst.msk [vmem:[%s359_s26] sm:$0xf] %vm2361_vm9, %v2488_v23  ;;  %2366 = vst.msk [vmem:[%s359_s26 + $0x10] sm:$0xf] %vm2361_vm9, %v2492_v24  ;;  %v2489_v28 = vpack.c.bf16 %v2302_v26, %v2302_v26  ;;  %v2493_v29 = vpack.c.bf16 %v2318_v16, %v2318_v16 }
 0x435   : > { %2365 = vst.msk [vmem:[%s359_s26 + $0xc] sm:$0xf] %vm2361_vm9, %v2491_v21  ;;  %2369 = vst.msk [vmem:[%s359_s26 + $0x1c] sm:$0xf] %vm2361_vm9, %v2495_v27 }
 0x436   : > { %2363 = vst.msk [vmem:[%s359_s26 + $0x4] sm:$0xf] %vm2361_vm9, %v2489_v28  ;;  %2367 = vst.msk [vmem:[%s359_s26 + $0x14] sm:$0xf] %vm2361_vm9, %v2493_v29 }
 0x437 PF: > { %s20_s13 = sadd.s32 1, %s2752_s13  }
 0x438   : > { %p17_p4 = scmp.ge.s32.totalorder %s20_s13, 4  }
 0x43a   :  { %19 = sbr.rel (!%p17_p4) target bundleno = 1 (0x1), region = 114 }

// kernel: _lambda_.9
= control target key start
LH: loop header
LB: loop body
LE: loop exit
PB: predicated region body
PF: predicated region fallthrough
CT: control target
= control target key end

     0   :  { %s945_s24 = smov 0   ;;  %s1096_s0 = inlined_call_operand.vmem [shape: bf16[2,16,24], index: 0, kind: input, shape index: {}]   ;;  %s1097_s1 = inlined_call_operand.vmem [shape: bf16[24,88], index: 1, kind: input, shape index: {}]   ;;  %s1098_s2 = inlined_call_operand.vmem [shape: f32[1,88], index: 2, kind: input, shape index: {}]   ;;  %s1099_s3 = inlined_call_operand.vmem [shape: f32[9,1,88], index: 3, kind: input, shape index: {}]   ;;  %s1100_s4 = inlined_call_operand.vmem [shape: f32[1,88], index: 4, kind: input, shape index: {}]   ;;  %s1101_s5 = inlined_call_operand.vmem [shape: bf16[88,24], index: 5, kind: input, shape index: {}]   ;;  %s1102_s6 = inlined_call_operand.vmem [shape: f32[1,24], index: 6, kind: input, shape index: {}]   ;;  %s1103_s7 = inlined_call_operand.vmem [shape: bf16[2,16,24], index: 7, kind: output, shape index: {}]  }
   0x1 LB: > { %s793_s25 = sadd.s32 4294967295, %s901_s24   ;;  %p797_p0 = scmp.ge.s32.totalorder %s901_s24, 1  ;;  %s901_s24 = sphi %s945_s24, %s17_s24  }
   0x2   : > { %p237_p1 = scmp.lt.s32.totalorder %s901_s24, 3 }
   0x4   : > { %p238_p2 = pnand %p797_p0, %p237_p1 }
   0x5   : > { %v885_v0 = vld [vmem:[%s1097_s1] sm:$0xff] (!%p238_p2)   ;;  %v903_v1 = vmov (!%p238_p2), 0.0   ;;  %v886_v2 = vld [vmem:[%s1097_s1 + $0x8] ss:$0 sps:$4 sm:$0xff] (!%p238_p2)   ;;  %vm310_vm0 = vcmask (!%p238_p2), 1043456   ;;  %vm904_vm1 = vmmov (!%p238_p2), 0  }
   0x6   : > { %241 = sbr.rel (%p238_p2) target bundleno = 506 (0x1fa), region = 48  ;;  %851 = vmatprep.subr.bf16.mxu0 (!%p238_p2), %v903_v1  ;;  %859 = vmatprep.subr.bf16.mxu1 (!%p238_p2), %v903_v1  ;;  %p269_p3 = scmp.lt.s32.totalorder (!%p238_p2), %s793_s25, 1  ;;  %v312_v3 = vsel (!%p238_p2), %vm310_vm0, %v886_v2, 0  ;;  %vm306_vm2 = vcmask (!%p238_p2), 195584   ;;  %vm357_vm3 = vcmask (!%p238_p2), 717824   ;;  %v888_v5 = vld [vmem:[%s1101_s5] sm:$0xff] (!%p238_p2)  }
   0x7   : > { %852 = vmatpush3.bf16.msra.mxu0 (!%p238_p2), %v885_v0  ;;  %855 = vmatprep.mubr.msk.bf16.mxu0 (!%p238_p2), %vm904_vm1, %v903_v1  ;;  %358 = vst.msk [vmem:[#allocation2] sm:$0x3f] (!%p238_p2), %vm357_vm3, %v903_v1  ;;  %359 = vst.msk [vmem:[#allocation2 + $0x8] sm:$0x3f] (!%p238_p2), %vm357_vm3, %v903_v1  ;;  %v889_v6 = vld [vmem:[%s1101_s5 + $0x8] sm:$0xff] (!%p238_p2)   ;;  %v890_v7 = vld [vmem:[%s1101_s5 + $0x10] sm:$0xff] (!%p238_p2)  }
   0x8   : > { %853 = vmatprep.subr.bf16.mxu0 (!%p238_p2), %v903_v1  ;;  %871 = vmatprep.mubr.msk.bf16.mxu1 (!%p238_p2), %vm904_vm1, %v903_v1  ;;  %360 = vst.msk [vmem:[#allocation2 + $0x10] sm:$0x3f] (!%p238_p2), %vm357_vm3, %v903_v1  ;;  %363 = vst.msk [vmem:[#allocation2 + $0x28] sm:$0x3f] (!%p238_p2), %vm357_vm3, %v903_v1  ;;  %v891_v8 = vld [vmem:[%s1101_s5 + $0x18] sm:$0xff] (!%p238_p2)   ;;  %v892_v9 = vld [vmem:[%s1101_s5 + $0x20] sm:$0xff] (!%p238_p2)  }
   0x9   : > { %361 = vst.msk [vmem:[#allocation2 + $0x18] sm:$0x3f] (!%p238_p2), %vm357_vm3, %v903_v1  ;;  %362 = vst.msk [vmem:[#allocation2 + $0x20] sm:$0x3f] (!%p238_p2), %vm357_vm3, %v903_v1  ;;  %860 = vmatpush3.bf16.msra.mxu1 (!%p238_p2), %v888_v5  ;;  %v893_v10 = vld [vmem:[%s1101_s5 + $0x28] ss:$0 sps:$4 sm:$0xff] (!%p238_p2)  }
   0xa   : > { %861 = vmatprep.subr.bf16.mxu1 (!%p238_p2), %v903_v1  ;;  %v680_v11 = vsel (!%p238_p2), %vm310_vm0, %v893_v10, 0  ;;  %v993_v12 = vld [vmem:[%s1099_s3 + $0x1] ss:$0 sm:$0xff] (!%p238_p2)  ;;  %v802_v14 = vld [vmem:[%s1098_s2] ss:$0 sm:$0xff] (!%p238_p2)  ;;  %vm365_vm4 = vcmask (!%p238_p2), 715776  }
   0xb   : > { %854 = vmatpush3.bf16.msra.mxu0 (!%p238_p2), %v312_v3  ;;  %v1001_v15 = vld [vmem:[%s1099_s3] ss:$0 sm:$0xff] (!%p238_p2)  ;;  %v1007_v18 = vld [vmem:[%s1099_s3 + $0x2] ss:$0 sm:$0xff] (!%p238_p2)  ;;  %vm368_vm5 = vcmask (!%p238_p2), 719876   ;;  %vm675_vm6 = vcmask (!%p238_p2), 719872  }
   0xc   : > { %v1016_v31 = vld [vmem:[%s1099_s3 + $0x3] ss:$0 sm:$0xff] (!%p238_p2)  ;;  %v1021_v32 = vld [vmem:[%s1099_s3 + $0x4] ss:$0 sm:$0xff] (!%p238_p2)  ;;  %v1026_v33 = vld [vmem:[%s1099_s3 + $0x5] ss:$0 sm:$0xff] (!%p238_p2) }
   0xd   : > { %s1105_s25 = smov (!%p269_p3, %s793_s25), 1  ;;  %862 = vmatpush3.bf16.msra.mxu1 %v889_v6  ;;  %v1034_v40 = vld [vmem:[%s1099_s3 + $0x7] ss:$0 sm:$0xff]  ;;  %v1041_v48 = vld [vmem:[%s1099_s3 + $0x6] ss:$0 sm:$0xff]  ;;  %vm735_vm7 = vcmask 191488  }
   0xe   : > { %s837_s30 = sshll.u32 %s1105_s25, 3  ;;  %863 = vmatprep.subr.bf16.mxu1 %v903_v1  ;;  %v392_v13 = vld [vmem:[#allocation2] sm:$0x3f]  ;;  %v1046_v49 = vld [vmem:[%s1099_s3 + $0x8] ss:$0 sm:$0xff] }
   0xf   : > { %s273_s10 = scalar_lea.vmem %s1096_s0, %s837_s30  ;;  %v407_v16 = vmul.f32 %v993_v12, %v392_v13  ;;  %v399_v21 = vmul.f32 %v1001_v15, %v392_v13  ;;  %v418_v25 = vmul.f32 %v1007_v18, %v392_v13  ;;  %s278_s9 = scalar_lea.vmem %s1103_s7, %s837_s30 }
  0x10   : > { %v968_v4 = vld [vmem:[%s273_s10] sm:$0xff]  }
  0x11   : > { %856 = vmatmul.mubr.msk.bf16.vlgmr.msra.gmra.mrb[0].mxu0 %vm306_vm2, %v968_v4  ;;  %864 = vmatpush3.bf16.msra.mxu1 %v890_v7  ;;  %v409_v24 = vrot.slane %v407_v16, 1  ;;  %v420_v30 = vrot.slane %v418_v25, 2 }
  0x12   : > { %865 = vmatprep.subr.bf16.mxu1 %v903_v1 }
  0x13   : > { %v411_v29 = vadd.f32 %v409_v24, %v399_v21 }
  0x15   : > { %866 = vmatpush3.bf16.msra.mxu1 %v891_v8  ;;  %v422_v34 = vadd.f32 %v420_v30, %v411_v29 }
  0x16   : > { %867 = vmatprep.subr.bf16.mxu1 %v903_v1 }
  0x19   : > { %868 = vmatpush3.bf16.msra.mxu1 %v892_v9 }
  0x1a   : > { %869 = vmatprep.subr.bf16.mxu1 %v903_v1 }
  0x1d   : > { %870 = vmatpush3.bf16.msra.mxu1 %v680_v11 }
  0xe4   : > { %v348_v17 = vpop.f32.mrb[0].mxu0 }
  0xe5   : > { %v349_v19 = vadd.f32 %v802_v14, %v348_v17  ;;  %v857_v20 = vpop.f32.mrb[1].mxu0 }
  0xe6   : > { %v351_v22 = vpop.f32.mrb[2].mxu0 }
  0xe7   : > { %v355_v23 = vmax.f32 %v349_v19, 0.0  ;;  %v352_v26 = vadd.f32 %v802_v14, %v351_v22  ;;  %v858_v27 = vpop.f32.mrb[3].mxu0 }
  0xe9   : > { %366 = vst.msk [vmem:[#allocation2 + $0x9] sm:$0xf] %vm365_vm4, %v355_v23  ;;  %v356_v28 = vmax.f32 %v352_v26, 0.0 }
  0xea   : > { %369 = vst.msk [vmem:[#allocation2 + $0xd] sm:$0xf0] %vm368_vm5, %v355_v23  ;;  %v824_v23 = vld [vmem:[%s1100_s4] ss:$0 sm:$0xff] }
  0xeb   : > { %371 = vst.msk [vmem:[#allocation2 + $0x19] sm:$0xf] %vm365_vm4, %v356_v28 }
  0xec   : > { %373 = vst.msk [vmem:[#allocation2 + $0x1d] sm:$0xf0] %vm368_vm5, %v356_v28 }
  0xf0   : > { %v423_v35 = vld [vmem:[#allocation2 + $0x8] sm:$0x3f] }
  0xf1   : > { %v494_v36 = vld [vmem:[#allocation2 + $0x8] sm:$0x3f]  ;;  %v430_v37 = vmul.f32 %v1016_v31, %v423_v35  ;;  %v438_v38 = vmul.f32 %v1021_v32, %v423_v35  ;;  %v449_v39 = vmul.f32 %v1026_v33, %v423_v35  ;;  %v454_v41 = vld [vmem:[#allocation2 + $0x10] sm:$0x3f] }
  0xf2   : > { %v497_v42 = vmul.f32 %v993_v12, %v494_v36  ;;  %v507_v43 = vld [vmem:[#allocation2 + $0x10] sm:$0x3f]  ;;  %v502_v46 = vmul.f32 %v1007_v18, %v494_v36  ;;  %v495_v50 = vmul.f32 %v1001_v15, %v494_v36  ;;  %v469_v54 = vmul.f32 %v1034_v40, %v454_v41  ;;  %v520_v60 = vld [vmem:[#allocation2 + $0x18] sm:$0x3f] }
  0xf3   : > { %v431_v44 = vadd.f32 %v430_v37, %v422_v34  ;;  %v440_v45 = vrot.slane %v438_v38, 1  ;;  %v536_v47 = vld [vmem:[#allocation2 + $0x10] sm:$0x3f]  ;;  %v451_v53 = vrot.slane %v449_v39, 2  ;;  %v510_v55 = vmul.f32 %v1021_v32, %v507_v43  ;;  %v549_v1 = vld [vmem:[#allocation2 + $0x18] sm:$0x3f] }
  0xf4   : > { %v499_v51 = vrot.slane %v497_v42, 1  ;;  %v504_v57 = vrot.slane %v502_v46, 2  ;;  %v539_v58 = vmul.f32 %v993_v12, %v536_v47  ;;  %v544_v59 = vmul.f32 %v1007_v18, %v536_v47  ;;  %v578_v17 = vld [vmem:[#allocation2 + $0x18] sm:$0x3f]  ;;  %v562_v34 = vld [vmem:[#allocation2 + $0x20] sm:$0x3f] }
  0xf5   : > { %v442_v52 = vadd.f32 %v440_v45, %v431_v44  ;;  %v461_v62 = vmul.f32 %v1041_v48, %v454_v41  ;;  %v480_v63 = vmul.f32 %v1046_v49, %v454_v41  ;;  %v515_v0 = vmul.f32 %v1026_v33, %v507_v43  ;;  %v591_v41 = vld [vmem:[#allocation2 + $0x20] sm:$0x3f] }
  0xf6   : > { %v501_v56 = vadd.f32 %v499_v51, %v495_v50  ;;  %v508_v3 = vmul.f32 %v1016_v31, %v507_v43  ;;  %v537_v5 = vmul.f32 %v1001_v15, %v536_v47  ;;  %v541_v6 = vrot.slane %v539_v58, 1 }
  0xf7   : > { %v453_v61 = vadd.f32 %v451_v53, %v442_v52  ;;  %v471_v8 = vrot.slane %v469_v54, 1  ;;  %v512_v9 = vrot.slane %v510_v55, 1  ;;  %v523_v10 = vmul.f32 %v1034_v40, %v520_v60  ;;  %v605_v55 = vld [vmem:[#allocation2 + $0x28] sm:$0x3f] }
  0xf8   : > { %v506_v2 = vadd.f32 %v504_v57, %v501_v56  ;;  %v543_v13 = vadd.f32 %v541_v6, %v537_v5  ;;  %v546_v14 = vrot.slane %v544_v59, 2  ;;  %v552_v16 = vmul.f32 %v1021_v32, %v549_v1 }
  0xf9   : > { %v462_v7 = vadd.f32 %v461_v62, %v453_v61  ;;  %v482_v20 = vrot.slane %v480_v63, 2  ;;  %v517_v21 = vrot.slane %v515_v0, 2  ;;  %v528_v22 = vmul.f32 %v1046_v49, %v520_v60 }
  0xfa   : > { %v509_v11 = vadd.f32 %v508_v3, %v506_v2  ;;  %v548_v25 = vadd.f32 %v546_v14, %v543_v13  ;;  %v550_v26 = vmul.f32 %v1016_v31, %v549_v1  ;;  %v557_v27 = vmul.f32 %v1026_v33, %v549_v1 }
  0xfb   : > { %v473_v19 = vadd.f32 %v471_v8, %v462_v7  ;;  %v521_v29 = vmul.f32 %v1041_v48, %v520_v60  ;;  %v525_v30 = vrot.slane %v523_v10, 1  ;;  %v581_v35 = vmul.f32 %v993_v12, %v578_v17 }
  0xfc   : > { %v514_v24 = vadd.f32 %v512_v9, %v509_v11  ;;  %v551_v37 = vadd.f32 %v550_v26, %v548_v25  ;;  %v554_v38 = vrot.slane %v552_v16, 1  ;;  %v586_v39 = vmul.f32 %v1007_v18, %v578_v17 }
  0xfd   : > { %v484_v28 = vadd.f32 %v482_v20, %v473_v19  ;;  %v530_v43 = vrot.slane %v528_v22, 2  ;;  %v579_v44 = vmul.f32 %v1001_v15, %v578_v17  ;;  %v583_v45 = vrot.slane %v581_v35, 1 }
  0xfe   : > { %v519_v36 = vadd.f32 %v517_v21, %v514_v24  ;;  %v556_v47 = vadd.f32 %v554_v38, %v551_v37  ;;  %v559_v50 = vrot.slane %v557_v27, 2  ;;  %v565_v51 = vmul.f32 %v1034_v40, %v562_v34  ;;  %v825_v24 = vld [vmem:[%s1102_s6] ss:$0 sm:$0xff] }
  0xff   : > { %v491_v42 = vadd.f32 %v824_v23, %v484_v28  ;;  %v585_v53 = vadd.f32 %v583_v45, %v579_v44  ;;  %v588_v54 = vrot.slane %v586_v39, 2  ;;  %v594_v12 = vmul.f32 %v1021_v32, %v591_v41 }
 0x100   : > { %v522_v46 = vadd.f32 %v521_v29, %v519_v36  ;;  %v561_v57 = vadd.f32 %v559_v50, %v556_v47  ;;  %v563_v18 = vmul.f32 %v1041_v48, %v562_v34  ;;  %v570_v58 = vmul.f32 %v1046_v49, %v562_v34 }
 0x101   : > { %v492_v52 = vmax.f32 %v491_v42, 0.0  ;;  %v590_v15 = vadd.f32 %v588_v54, %v585_v53  ;;  %v592_v59 = vmul.f32 %v1016_v31, %v591_v41  ;;  %v599_v60 = vmul.f32 %v1026_v33, %v591_v41 }
 0x102   : > { %v527_v56 = vadd.f32 %v525_v30, %v522_v46  ;;  %v564_v62 = vadd.f32 %v563_v18, %v561_v57  ;;  %v567_v63 = vrot.slane %v565_v51, 1  ;;  %v608_v0 = vmul.f32 %v1034_v40, %v605_v55 }
 0x103   : > { %493 = vst.msk [vmem:[#allocation3] sm:$0xf] %vm365_vm4, %v492_v52  ;;  %v593_v32 = vadd.f32 %v592_v59, %v590_v15  ;;  %v596_v1 = vrot.slane %v594_v12, 1  ;;  %v572_v3 = vrot.slane %v570_v58, 2  ;;  %v606_v6 = vmul.f32 %v1041_v48, %v605_v55 }
 0x104   : > { %v532_v61 = vadd.f32 %v530_v43, %v527_v56  ;;  %v569_v2 = vadd.f32 %v567_v63, %v564_v62  ;;  %v613_v7 = vmul.f32 %v1046_v49, %v605_v55  ;;  %v601_v9 = vrot.slane %v599_v60, 2 }
 0x105   : > { %v598_v8 = vadd.f32 %v596_v1, %v593_v32  ;;  %v610_v11 = vrot.slane %v608_v0, 1  ;;  %v723_v25 = vunpack.c.l.bf16 %v968_v4 }
 0x106   : > { %v533_v5 = vadd.f32 %v824_v23, %v532_v61  ;;  %v574_v10 = vadd.f32 %v572_v3, %v569_v2  ;;  %v615_v14 = vrot.slane %v613_v7, 2 }
 0x107   : > { %v603_v33 = vadd.f32 %v601_v9, %v598_v8 }
 0x108   : > { %v534_v31 = vmax.f32 %v533_v5, 0.0  ;;  %v575_v13 = vadd.f32 %v824_v23, %v574_v10 }
 0x109   : > { %v607_v40 = vadd.f32 %v606_v6, %v603_v33 }
 0x10a   : > { %535 = vst.msk [vmem:[#allocation3 + $0x4] sm:$0xf] %vm365_vm4, %v534_v31  ;;  %v576_v16 = vmax.f32 %v575_v13, 0.0 }
 0x10b   : > { %v612_v17 = vadd.f32 %v610_v11, %v607_v40 }
 0x10c   : > { %577 = vst.msk [vmem:[#allocation3 + $0x8] sm:$0xf] %vm365_vm4, %v576_v16 }
 0x10d   : > { %v617_v19 = vadd.f32 %v615_v14, %v612_v17 }
 0x10f   : > { %v618_v20 = vadd.f32 %v824_v23, %v617_v19  ;;  %v724_v23 = vunpack.c.h.bf16 %v968_v4 }
 0x111   : > { %v619_v48 = vmax.f32 %v618_v20, 0.0  ;;  %v621_v49 = vld [vmem:[#allocation3] sm:$0xff] }
 0x113   : > { %620 = vst.msk [vmem:[#allocation3 + $0xc] sm:$0xf] %vm365_vm4, %v619_v48 }
 0x11a   : > { %v622_v21 = vld [vmem:[#allocation3 + $0x8] sm:$0xff] }
 0x11b   : > { %v623_v22 = vpack.c.bf16 %v622_v21, %v621_v49 }
 0x11d   : > { %872 = vmatmul.mubr.msk.bf16.vlgmr.msra.gmra.mrb[0].mxu1 %vm675_vm6, %v623_v22 }
 0x1f0   : > { %v716_v26 = vpop.f32.mrb[0].mxu1 }
 0x1f1   : > { %v717_v27 = vadd.f32 %v825_v24, %v716_v26  ;;  %v873_v28 = vpop.f32.mrb[1].mxu1 }
 0x1f2   : > { %v719_v29 = vpop.f32.mrb[2].mxu1 }
 0x1f3   : > { %v725_v30 = vadd.f32 %v723_v25, %v717_v27  ;;  %v720_v34 = vadd.f32 %v825_v24, %v719_v29  ;;  %v874_v35 = vpop.f32.mrb[3].mxu1 }
 0x1f5   : > { %v839_v36 = vpack.c.bf16 %v725_v30, %v725_v30  ;;  %v726_v37 = vadd.f32 %v724_v23, %v720_v34 }
 0x1f7   : > { %736 = vst.msk [vmem:[%s278_s9] sm:$0xf] %vm735_vm7, %v839_v36  ;;  %v840_v38 = vpack.c.bf16 %v726_v37, %v726_v37 }
 0x1f9   : > { %737 = vst.msk [vmem:[%s278_s9 + $0x4] sm:$0xf] %vm735_vm7, %v840_v38 }
 0x1fa PF: > { %s17_s24 = sadd.s32 1, %s901_s24  }
 0x1fb   : > { %p14_p4 = scmp.ge.s32.totalorder %s17_s24, 4  }
 0x1fd   :  { %16 = sbr.rel (!%p14_p4) target bundleno = 1 (0x1), region = 91 }

// kernel: _lambda_.11
= control target key start
LH: loop header
LB: loop body
LE: loop exit
PB: predicated region body
PF: predicated region fallthrough
CT: control target
= control target key end

     0   :  { %v154_v1 = vmov 0   ;;  %vm62_vm0 = vcmask 1043456   ;;  %vm58_vm1 = vcmask 326656   ;;  %v23_v10 = vlaneseq  ;;  %s202_s1 = inlined_call_operand.vmem [shape: bf16[40,240], index: 1, kind: input, shape index: {}]   ;;  %s203_s0 = inlined_call_operand.vmem [shape: bf16[8,40], index: 0, kind: input, shape index: {}]   ;;  %s204_s2 = inlined_call_operand.vmem [shape: f32[1,240], index: 2, kind: input, shape index: {}]   ;;  %s205_s3 = inlined_call_operand.vmem [shape: bf16[8,240], index: 3, kind: output, shape index: {}]  }
   0x1   :  { %v146_v0 = vld [vmem:[%s202_s1 + $0x4] ss:$8 sps:$4 sm:$0xff]   ;;  %101 = vmatprep.mubr.bf16.mxu0 %v154_v1  ;;  %v148_v2 = vld [vmem:[%s202_s1] ss:$8 sps:$4 sm:$0xff]   ;;  %v149_v3 = vld [vmem:[%s202_s1 + $0x14] ss:$8 sps:$4 sm:$0xff]  }
   0x2   :  { %69 = vmatprep.subr.bf16.mxu0 %v146_v0  ;;  %v20_v4 = vld [vmem:[%s202_s1 + $0x20] sm:$0xff]  ;;  %v151_v5 = vld [vmem:[%s202_s1 + $0x10] ss:$8 sps:$4 sm:$0xff]   ;;  %v24_v11 = vshrl.u32 %v23_v10, 7  ;;  %vm128_vm2 = vcmask 916484  }
   0x3   :  { %70 = vmatpush1.bf16.msra.mxu0 %v148_v2  ;;  %v140_v6 = vcombine.high %v20_v4, %v20_v4  ;;  %v139_v7 = vcombine.low %v20_v4, %v20_v4  ;;  %v15_v9 = vld [vmem:[%s203_s0] sm:$0xf]  ;;  %vm129_vm3 = vmor %vm128_vm2, %vm62_vm0 }
   0x4   :  { %71 = vmatprep.subr.bf16.mxu0 %v149_v3  ;;  %v25_v12 = vsub.s32 0, %v24_v11  ;;  %v21_v13 = vld [vmem:[%s204_s2] sm:$0x3]  ;;  %v29_v14 = vsub.s32 1, %v24_v11 }
   0x5   :  { %v64_v8 = vsel %vm62_vm0, %v139_v7, 0 }
   0x6   :  { %v26_v15 = vrot.slane %v21_v13, %v25_v12  ;;  %v30_v16 = vrot.slane %v21_v13, %v29_v14 }
   0x7   :  { %72 = vmatpush1.bf16.msra.mxu0 %v151_v5 }
   0x8   :  { %141 = vmatprep.subr.msk.bf16.mxu0 %vm62_vm0, %v140_v6 }
   0xb   :  { %74 = vmatpush1.bf16.msra.mxu0 %v64_v8 }
   0xe   :  { %142 = vmatmul.mubr.msk.bf16.vlgmr.msra.gmra.mrb[0].mxu0 %vm58_vm1, %v15_v9 }
  0xe1   :  { %v103_v17 = vpop.f32.mrb[0].mxu0 }
  0xe2   :  { %v104_v18 = vadd.f32 %v103_v17, %v26_v15  ;;  %v105_v19 = vpop.f32.mrb[1].mxu0 }
  0xe3   :  { %v106_v20 = vadd.f32 %v105_v19, %v30_v16  ;;  %v107_v21 = vpop.f32.mrb[2].mxu0 }
  0xe4   :  { %v110_v22 = vadd.f32 3.0, %v104_v18  ;;  %v108_v23 = vpop.f32.mrb[3].mxu0 }
  0xe5   :  { %v111_v24 = vadd.f32 3.0, %v106_v20 }
  0xe6   :  { %v112_v25 = vmax.f32 %v110_v22, 0.0 }
  0xe7   :  { %v113_v26 = vmax.f32 %v111_v24, 0.0 }
  0xe8   :  { %v114_v27 = vmin.f32 %v112_v25, 6.0 }
  0xe9   :  { %v115_v28 = vmin.f32 %v113_v26, 6.0 }
  0xea   :  { %v116_v29 = vmul.f32 %v114_v27, %v104_v18 }
  0xeb   :  { %v117_v30 = vmul.f32 %v115_v28, %v106_v20 }
  0xec   :  { %v118_v31 = vmul.f32 0.16666667, %v116_v29 }
  0xed   :  { %v119_v32 = vmul.f32 0.16666667, %v117_v30 }
  0xef   :  { %v144_v33 = vpack.c.bf16 %v119_v32, %v118_v31 }
  0xf1   :  { %130 = vst.msk [vmem:[%s205_s3] sm:$0xff] %vm129_vm3, %v144_v33 }

// kernel: _lambda_.10
= control target key start
LH: loop header
LB: loop body
LE: loop exit
PB: predicated region body
PF: predicated region fallthrough
CT: control target
= control target key end

     0   :  { %s1759_s21 = smov 0   ;;  %s2077_s0 = inlined_call_operand.vmem [shape: bf16[2,16,24], index: 0, kind: input, shape index: {}]   ;;  %s2078_s1 = inlined_call_operand.vmem [shape: bf16[24,96], index: 1, kind: input, shape index: {}]   ;;  %s2079_s2 = inlined_call_operand.vmem [shape: f32[1,96], index: 2, kind: input, shape index: {}]   ;;  %s2080_s3 = inlined_call_operand.vmem [shape: f32[25,1,96], index: 3, kind: input, shape index: {}]   ;;  %s2081_s4 = inlined_call_operand.vmem [shape: f32[1,96], index: 4, kind: input, shape index: {}]   ;;  %s2082_s5 = inlined_call_operand.vmem [shape: f32[96,24], index: 5, kind: input, shape index: {}]   ;;  %s2083_s6 = inlined_call_operand.vmem [shape: f32[1,24], index: 6, kind: input, shape index: {}]   ;;  %s2084_s7 = inlined_call_operand.vmem [shape: f32[24,96], index: 7, kind: input, shape index: {}]   ;;  %s2085_s8 = inlined_call_operand.vmem [shape: f32[1,96], index: 8, kind: input, shape index: {}]   ;;  %s2086_s9 = inlined_call_operand.vmem [shape: f32[2,3], index: 9, kind: input, shape index: {}]   ;;  %s2087_s10 = inlined_call_operand.vmem [shape: bf16[96,40], index: 10, kind: input, shape index: {}]   ;;  %s2088_s11 = inlined_call_operand.vmem [shape: f32[1,40], index: 11, kind: input, shape index: {}]   ;;  %s2089_s12 = inlined_call_operand.vmem [shape: bf16[2,4,40], index: 12, kind: output, shape index: {}]  }
   0x1 LB: > { %s1461_s22 = sadd.s32 4294967295, %s1689_s21   ;;  %p1465_p0 = scmp.ge.s32.totalorder %s1689_s21, 1  ;;  %s1689_s21 = sphi %s1759_s21, %s22_s21  }
   0x2   : > { %p362_p1 = scmp.lt.s32.totalorder %s1689_s21, 3 }
   0x4   : > { %p363_p2 = pnand %p1465_p0, %p362_p1 }
   0x5   : > { %v1674_v0 = vld [vmem:[%s2078_s1] sm:$0xff] (!%p363_p2)   ;;  %v1691_v1 = vmov (!%p363_p2), 0.0   ;;  %v1675_v2 = vld [vmem:[%s2078_s1 + $0x8] ss:$0 sps:$4 sm:$0xff] (!%p363_p2)   ;;  %vm443_vm0 = vcmask (!%p363_p2), 1043456   ;;  %vm1692_vm1 = vmmov (!%p363_p2), 0  }
   0x6   : > { %366 = sbr.rel (%p363_p2) target bundleno = 1210 (0x4ba), region = 68  ;;  %1572 = vmatprep.subr.bf16.mxu0 (!%p363_p2), %v1691_v1  ;;  %1580 = vmatprep.subr.mxu1 (!%p363_p2), %v1691_v1  ;;  %p403_p3 = scmp.lt.s32.totalorder (!%p363_p2), %s1461_s22, 1  ;;  %v445_v3 = vsel (!%p363_p2), %vm443_vm0, %v1675_v2, 0  ;;  %vm439_vm2 = vcmask (!%p363_p2), 195584   ;;  %vm498_vm3 = vcmask (!%p363_p2), 785408   ;;  %vm508_vm4 = vcmask (!%p363_p2), 781312  }
   0x7   : > { %1573 = vmatpush3.bf16.msra.mxu0 (!%p363_p2), %v1674_v0  ;;  %1576 = vmatprep.mubr.msk.bf16.mxu0 (!%p363_p2), %vm1692_vm1, %v1691_v1  ;;  %499 = vst.msk [vmem:[#allocation2] sm:$0xff] (!%p363_p2), %vm498_vm3, %v1691_v1  ;;  %500 = vst.msk [vmem:[#allocation2 + $0x8] sm:$0xff] (!%p363_p2), %vm498_vm3, %v1691_v1  ;;  %v1807_v5 = vld [vmem:[%s2080_s3 + $0x1] ss:$0 sm:$0xff] (!%p363_p2)  ;;  %v1813_v8 = vld [vmem:[%s2080_s3] ss:$0 sm:$0xff] (!%p363_p2) }
   0x8   : > { %1574 = vmatprep.subr.bf16.mxu0 (!%p363_p2), %v1691_v1  ;;  %1582 = vmatprep.mubr.msk.f32.mxu1 (!%p363_p2), %vm1692_vm1, %v1691_v1  ;;  %501 = vst.msk [vmem:[#allocation2 + $0x10] sm:$0xff] (!%p363_p2), %vm498_vm3, %v1691_v1  ;;  %502 = vst.msk [vmem:[#allocation2 + $0x18] sm:$0xff] (!%p363_p2), %vm498_vm3, %v1691_v1  ;;  %v1818_v9 = vld [vmem:[%s2080_s3 + $0x2] ss:$0 sm:$0xff] (!%p363_p2)  ;;  %v1825_v13 = vld [vmem:[%s2080_s3 + $0x3] ss:$0 sm:$0xff] (!%p363_p2) }
   0x9   : > { %503 = vst.msk [vmem:[#allocation2 + $0x20] sm:$0xff] (!%p363_p2), %vm498_vm3, %v1691_v1  ;;  %504 = vst.msk [vmem:[#allocation2 + $0x28] sm:$0xff] (!%p363_p2), %vm498_vm3, %v1691_v1  ;;  %v1831_v17 = vld [vmem:[%s2080_s3 + $0x4] ss:$0 sm:$0xff] (!%p363_p2)  ;;  %v1837_v23 = vld [vmem:[%s2080_s3 + $0x5] ss:$0 sm:$0xff] (!%p363_p2) }
   0xa   : > { %505 = vst.msk [vmem:[#allocation2 + $0x30] sm:$0xff] (!%p363_p2), %vm498_vm3, %v1691_v1  ;;  %v1842_v24 = vld [vmem:[%s2080_s3 + $0x6] ss:$0 sm:$0xff] (!%p363_p2)  ;;  %v1469_v26 = vld [vmem:[%s2079_s2] ss:$0 sm:$0xff] (!%p363_p2)  ;;  %vm511_vm5 = vcmask (!%p363_p2), 785412  }
   0xb   : > { %1575 = vmatpush3.bf16.msra.mxu0 (!%p363_p2), %v445_v3  ;;  %v1852_v33 = vld [vmem:[%s2080_s3 + $0x7] ss:$0 sm:$0xff] (!%p363_p2)  ;;  %v1858_v43 = vld [vmem:[%s2080_s3 + $0x8] ss:$0 sm:$0xff] (!%p363_p2)  ;;  %v1864_v51 = vld [vmem:[%s2080_s3 + $0x9] ss:$0 sm:$0xff] (!%p363_p2) }
   0xc   : > { %1626 = vmatprep.subr.bf16.mxu0 (!%p363_p2), %v1691_v1  ;;  %v1872_v60 = vld [vmem:[%s2080_s3 + $0xa] ss:$0 sm:$0xff] (!%p363_p2)  ;;  %v1877_v61 = vld [vmem:[%s2080_s3 + $0xb] ss:$0 sm:$0xff] (!%p363_p2)  ;;  %v1882_v62 = vld [vmem:[%s2080_s3 + $0xc] ss:$0 sm:$0xff] (!%p363_p2) }
   0xd   : > { %s2091_s22 = smov (!%p403_p3, %s1461_s22), 1  ;;  %vm844_vm6 = vcmask 1042432   ;;  %vm840_vm7 = vcmask 23552   ;;  %vm923_vm8 = vcmask 779264   ;;  %vm1406_vm9 = vcmask 320512  }
   0xe   : > { %s1540_s27 = sshll.u32 %s2091_s22, 3  ;;  %v567_v6 = vld [vmem:[#allocation2] sm:$0xff]  ;;  %v621_v25 = vld [vmem:[#allocation2 + $0x8] sm:$0xff]  ;;  %s1468_s25 = sshll.u32 %s2091_s22, 1 }
   0xf   : > { %s407_s30 = scalar_lea.vmem %s2077_s0, %s1540_s27  ;;  %v582_v7 = vmul.f32 %v1807_v5, %v567_v6  ;;  %v574_v10 = vmul.f32 %v1813_v8, %v567_v6  ;;  %v593_v12 = vmul.f32 %v1818_v9, %v567_v6  ;;  %v604_v16 = vmul.f32 %v1825_v13, %v567_v6  ;;  %s411_s28 = scalar_lea.vmem %s2089_s12, %s1468_s25 }
  0x10   : > { %v1676_v4 = vld [vmem:[%s407_s30] sm:$0xff]   ;;  %v615_v20 = vmul.f32 %v1831_v17, %v567_v6  ;;  %v628_v29 = vmul.f32 %v1837_v23, %v621_v25  ;;  %v636_v30 = vmul.f32 %v1842_v24, %v621_v25  ;;  %v647_v40 = vmul.f32 %v1852_v33, %v621_v25 }
  0x11   : > { %1577 = vmatmul.mubr.msk.bf16.vlgmr.msra.gmra.mrb[0].mxu0 %vm439_vm2, %v1676_v4  ;;  %v584_v11 = vrot.slane %v582_v7, 1  ;;  %v595_v15 = vrot.slane %v593_v12, 2  ;;  %v606_v19 = vrot.slane %v604_v16, 3  ;;  %v658_v48 = vmul.f32 %v1858_v43, %v621_v25  ;;  %v1889_v4 = vld [vmem:[%s2080_s3 + $0xd] ss:$0 sm:$0xff] }
  0x12   : > { %1638 = vmatprep.mubr.msk.bf16.mxu0 %vm1692_vm1, %v1691_v1  ;;  %v617_v22 = vrot.slane %v615_v20, 4  ;;  %v638_v39 = vrot.slane %v636_v30, 1  ;;  %v649_v47 = vrot.slane %v647_v40, 2  ;;  %v669_v56 = vmul.f32 %v1864_v51, %v621_v25 }
  0x13   : > { %v586_v14 = vadd.f32 %v584_v11, %v574_v10  ;;  %v660_v55 = vrot.slane %v658_v48, 3 }
  0x14   : > { %v671_v59 = vrot.slane %v669_v56, 4 }
  0x15   : > { %v597_v18 = vadd.f32 %v595_v15, %v586_v14 }
  0x17   : > { %v608_v21 = vadd.f32 %v606_v19, %v597_v18 }
  0x19   : > { %v619_v28 = vadd.f32 %v617_v22, %v608_v21 }
  0x1b   : > { %v629_v38 = vadd.f32 %v628_v29, %v619_v28 }
  0x1d   : > { %v640_v46 = vadd.f32 %v638_v39, %v629_v38  ;;  %v1923_v38 = vld [vmem:[%s2080_s3 + $0x12] ss:$0 sm:$0xff] }
  0x1f   : > { %v651_v54 = vadd.f32 %v649_v47, %v640_v46  ;;  %v1933_v46 = vld [vmem:[%s2080_s3 + $0x13] ss:$0 sm:$0xff] }
  0x21   : > { %v662_v58 = vadd.f32 %v660_v55, %v651_v54 }
  0x23   : > { %v673_v0 = vadd.f32 %v671_v59, %v662_v58  ;;  %v1942_v58 = vld [vmem:[%s2080_s3 + $0x15] ss:$0 sm:$0xff] }
  0xe4   : > { %v481_v27 = vpop.f32.mrb[0].mxu0 }
  0xe5   : > { %v482_v31 = vadd.f32 %v1469_v26, %v481_v27  ;;  %v1578_v32 = vpop.f32.mrb[1].mxu0  ;;  %v1907_v27 = vld [vmem:[%s2080_s3 + $0x10] ss:$0 sm:$0xff] }
  0xe6   : > { %v484_v34 = vpop.f32.mrb[2].mxu0  ;;  %v1917_v32 = vld [vmem:[%s2080_s3 + $0x11] ss:$0 sm:$0xff] }
  0xe7   : > { %v488_v35 = vadd.f32 3.0, %v482_v31  ;;  %v485_v36 = vadd.f32 %v1469_v26, %v484_v34  ;;  %v1579_v37 = vpop.f32.mrb[3].mxu0 }
  0xe9   : > { %v490_v41 = vmax.f32 %v488_v35, 0.0  ;;  %v489_v42 = vadd.f32 3.0, %v485_v36 }
  0xeb   : > { %v492_v44 = vmin.f32 %v490_v41, 6.0  ;;  %v491_v45 = vmax.f32 %v489_v42, 0.0 }
  0xed   : > { %v494_v49 = vmul.f32 %v492_v44, %v482_v31  ;;  %v493_v50 = vmin.f32 %v491_v45, 6.0 }
  0xef   : > { %v496_v52 = vmul.f32 0.16666667, %v494_v49  ;;  %v495_v53 = vmul.f32 %v493_v50, %v485_v36 }
  0xf1   : > { %509 = vst.msk [vmem:[#allocation2 + $0x12] sm:$0xf] %vm508_vm4, %v496_v52  ;;  %v497_v57 = vmul.f32 0.16666667, %v495_v53 }
  0xf2   : > { %512 = vst.msk [vmem:[#allocation2 + $0x16] sm:$0xf0] %vm511_vm5, %v496_v52 }
  0xf3   : > { %514 = vst.msk [vmem:[#allocation2 + $0x22] sm:$0xf] %vm508_vm4, %v497_v57 }
  0xf4   : > { %516 = vst.msk [vmem:[#allocation2 + $0x26] sm:$0xf0] %vm511_vm5, %v497_v57 }
  0xf8   : > { %v925_v63 = vld [vmem:[#allocation2 + $0x10] sm:$0xff] }
  0xf9   : > { %v928_v2 = vmul.f32 %v1807_v5, %v925_v63  ;;  %v933_v3 = vmul.f32 %v1818_v9, %v925_v63  ;;  %v681_v6 = vmul.f32 %v1872_v60, %v925_v63  ;;  %v689_v7 = vmul.f32 %v1877_v61, %v925_v63  ;;  %v1899_v5 = vld [vmem:[%s2080_s3 + $0xe] ss:$0 sm:$0xff] }
  0xfa   : > { %v700_v10 = vmul.f32 %v1882_v62, %v925_v63  ;;  %v926_v11 = vmul.f32 %v1813_v8, %v925_v63  ;;  %v938_v14 = vmul.f32 %v1825_v13, %v925_v63  ;;  %v711_v16 = vmul.f32 %v1889_v4, %v925_v63  ;;  %v948_v13 = vld [vmem:[#allocation2 + $0x18] sm:$0xff]  ;;  %v780_v57 = vld [vmem:[#allocation2 + $0x20] sm:$0xff] }
  0xfb   : > { %v930_v12 = vrot.slane %v928_v2, 1  ;;  %v682_v9 = vadd.f32 %v681_v6, %v673_v0  ;;  %v691_v15 = vrot.slane %v689_v7, 1  ;;  %v935_v19 = vrot.slane %v933_v3, 2  ;;  %v1518_v2 = vld [vmem:[%s2080_s3 + $0x14] ss:$0 sm:$0xff] }
  0xfc   : > { %v943_v20 = vmul.f32 %v1831_v17, %v925_v63  ;;  %v702_v22 = vrot.slane %v700_v10, 2  ;;  %v722_v8 = vmul.f32 %v1899_v5, %v925_v63  ;;  %v940_v26 = vrot.slane %v938_v14, 3  ;;  %v1912_v17 = vld [vmem:[%s2080_s3 + $0xf] ss:$0 sm:$0xff]  ;;  %v1521_v14 = vld [vmem:[%s2080_s3 + $0x17] ss:$0 sm:$0xff] }
  0xfd   : > { %v932_v18 = vadd.f32 %v930_v12, %v926_v11  ;;  %v693_v21 = vadd.f32 %v691_v15, %v682_v9  ;;  %v713_v29 = vrot.slane %v711_v16, 3  ;;  %v742_v36 = vmul.f32 %v1907_v27, %v948_v13 }
  0xfe   : > { %v945_v31 = vrot.slane %v943_v20, 4  ;;  %v724_v35 = vrot.slane %v722_v8, 4  ;;  %v949_v39 = vmul.f32 %v1837_v23, %v948_v13  ;;  %v951_v40 = vmul.f32 %v1842_v24, %v948_v13 }
  0xff   : > { %v937_v25 = vadd.f32 %v935_v19, %v932_v18  ;;  %v704_v28 = vadd.f32 %v702_v22, %v693_v21  ;;  %v734_v42 = vmul.f32 %v1912_v17, %v948_v13  ;;  %v753_v44 = vmul.f32 %v1917_v32, %v948_v13 }
 0x100   : > { %v956_v45 = vmul.f32 %v1852_v33, %v948_v13  ;;  %v953_v48 = vrot.slane %v951_v40, 1  ;;  %v961_v49 = vmul.f32 %v1858_v43, %v948_v13  ;;  %v744_v23 = vrot.slane %v742_v36, 1 }
 0x101   : > { %v942_v30 = vadd.f32 %v940_v26, %v937_v25  ;;  %v715_v34 = vadd.f32 %v713_v29, %v704_v28  ;;  %v764_v24 = vmul.f32 %v1923_v38, %v948_v13  ;;  %v966_v54 = vmul.f32 %v1864_v51, %v948_v13  ;;  %v1520_v51 = vld [vmem:[%s2080_s3 + $0x16] ss:$0 sm:$0xff] }
 0x102   : > { %v958_v53 = vrot.slane %v956_v45, 2  ;;  %v755_v56 = vrot.slane %v753_v44, 2  ;;  %v775_v33 = vmul.f32 %v1933_v46, %v948_v13  ;;  %v963_v43 = vrot.slane %v961_v49, 3  ;;  %v833_v49 = vld [vmem:[%s2086_s9] sm:$0x3] }
 0x103   : > { %v947_v37 = vadd.f32 %v945_v31, %v942_v30  ;;  %v726_v41 = vadd.f32 %v724_v35, %v715_v34  ;;  %v766_v0 = vrot.slane %v764_v24, 3  ;;  %v968_v6 = vrot.slane %v966_v54, 4  ;;  %v994_v34 = vld [vmem:[#allocation2 + $0x28] sm:$0xff] }
 0x104   : > { %v974_v7 = vmul.f32 %v1877_v61, %v780_v57  ;;  %v777_v11 = vrot.slane %v775_v33, 4  ;;  %v795_v12 = vmul.f32 %v1942_v58, %v780_v57  ;;  %v972_v15 = vmul.f32 %v1872_v60, %v780_v57  ;;  %v1522_v61 = vld [vmem:[%s2080_s3 + $0x18] ss:$0 sm:$0xff] }
 0x105   : > { %v950_v47 = vadd.f32 %v949_v39, %v947_v37  ;;  %v735_v50 = vadd.f32 %v734_v42, %v726_v41  ;;  %v979_v16 = vmul.f32 %v1882_v62, %v780_v57  ;;  %v787_v19 = vmul.f32 %v1518_v2, %v780_v57 }
 0x106   : > { %v806_v20 = vmul.f32 %v1520_v51, %v780_v57  ;;  %v976_v22 = vrot.slane %v974_v7, 1  ;;  %v984_v8 = vmul.f32 %v1889_v4, %v780_v57  ;;  %v797_v26 = vrot.slane %v795_v12, 1 }
 0x107   : > { %v955_v52 = vadd.f32 %v953_v48, %v950_v47  ;;  %v746_v55 = vadd.f32 %v744_v23, %v735_v50  ;;  %v817_v13 = vmul.f32 %v1521_v14, %v780_v57  ;;  %v981_v29 = vrot.slane %v979_v16, 2 }
 0x108   : > { %v989_v60 = vmul.f32 %v1899_v5, %v780_v57  ;;  %v808_v62 = vrot.slane %v806_v20, 2  ;;  %v828_v31 = vmul.f32 %v1522_v61, %v780_v57  ;;  %v986_v36 = vrot.slane %v984_v8, 3  ;;  %v1137_v20 = vld [vmem:[%s2082_s5 + $0x20] sm:$0xff]  ;;  %v1140_v8 = vld [vmem:[%s2082_s5 + $0x38] sm:$0xff] }
 0x109   : > { %v960_v59 = vadd.f32 %v958_v53, %v955_v52  ;;  %v757_v63 = vadd.f32 %v755_v56, %v746_v55  ;;  %v819_v39 = vrot.slane %v817_v13, 3  ;;  %v997_v42 = vmul.f32 %v1907_v27, %v994_v34  ;;  %v1018_v27 = vld [vmem:[#allocation2 + $0x30] sm:$0xff]  ;;  %v1142_v13 = vld [vmem:[%s2082_s5 + $0x48] sm:$0xff] }
 0x10a   : > { %v991_v41 = vrot.slane %v989_v60, 4  ;;  %v830_v44 = vrot.slane %v828_v31, 4  ;;  %v995_v47 = vmul.f32 %v1912_v17, %v994_v34  ;;  %v1002_v5 = vmul.f32 %v1917_v32, %v994_v34  ;;  %v1144_v60 = vld [vmem:[%s2082_s5 + $0x58] sm:$0xff] }
 0x10b   : > { %v965_v3 = vadd.f32 %v963_v43, %v960_v59  ;;  %v768_v10 = vadd.f32 %v766_v0, %v757_v63  ;;  %v999_v23 = vrot.slane %v997_v42, 1  ;;  %v1007_v24 = vmul.f32 %v1923_v38, %v994_v34 }
 0x10c   : > { %v1004_v53 = vrot.slane %v1002_v5, 2  ;;  %v1012_v54 = vmul.f32 %v1933_v46, %v994_v34  ;;  %v1021_v55 = vmul.f32 %v1942_v58, %v1018_v27  ;;  %v1019_v33 = vmul.f32 %v1518_v2, %v1018_v27  ;;  %v1041_v58 = vld [vmem:[%s2086_s9] sm:$0x3] }
 0x10d   : > { %v970_v9 = vadd.f32 %v968_v6, %v965_v3  ;;  %v779_v18 = vadd.f32 %v777_v11, %v768_v10  ;;  %v1009_v32 = vrot.slane %v1007_v24, 3  ;;  %v1026_v57 = vmul.f32 %v1520_v51, %v1018_v27  ;;  %v1133_v2 = vld [vmem:[%s2082_s5] sm:$0xff]  ;;  %v1134_v51 = vld [vmem:[%s2082_s5 + $0x8] sm:$0xff] }
 0x10e   : > { %v1014_v38 = vrot.slane %v1012_v54, 4  ;;  %v1023_v43 = vrot.slane %v1021_v55, 1  ;;  %v1031_v63 = vmul.f32 %v1521_v14, %v1018_v27  ;;  %v1036_v3 = vmul.f32 %v1522_v61, %v1018_v27  ;;  %v1135_v14 = vld [vmem:[%s2082_s5 + $0x10] sm:$0xff]  ;;  %v1138_v61 = vld [vmem:[%s2082_s5 + $0x28] sm:$0xff]  ;;  %v1220_v55 = vld [vmem:[%s2084_s7] sm:$0xff] }
 0x10f   : > { %v973_v21 = vadd.f32 %v972_v15, %v970_v9  ;;  %v788_v25 = vadd.f32 %v787_v19, %v779_v18  ;;  %v1028_v46 = vrot.slane %v1026_v57, 2  ;;  %v1693_v15 = vmov 0.0|0.0   ;;  %v1136_v18 = vld [vmem:[%s2082_s5 + $0x18] sm:$0xff]  ;;  %v1222_v57 = vld [vmem:[%s2084_s7 + $0x10] sm:$0xff] }
 0x110   : > { %v1033_v7 = vrot.slane %v1031_v63, 3  ;;  %v1038_v11 = vrot.slane %v1036_v3, 4  ;;  %v1643_v16 = vpack.c.bf16 %v1134_v51, %v1133_v2  ;;  %v1646_v19 = vpack.c.bf16 %v1136_v18, %v1135_v14 }
 0x111   : > { %v978_v28 = vadd.f32 %v976_v22, %v973_v21  ;;  %v799_v30 = vadd.f32 %v797_v26, %v788_v25  ;;  %v1649_v21 = vpack.c.bf16 %v1138_v61, %v1137_v20  ;;  %v1139_v22 = vld [vmem:[%s2082_s5 + $0x30] sm:$0xff]  ;;  %v1141_v26 = vld [vmem:[%s2082_s5 + $0x40] sm:$0xff] }
 0x112   : > { %v1652_v25 = vpack.c.bf16 %v1140_v8, %v1139_v22 }
 0x113   : > { %v983_v35 = vadd.f32 %v981_v29, %v978_v28  ;;  %v810_v37 = vadd.f32 %v808_v62, %v799_v30  ;;  %v1655_v28 = vpack.c.bf16 %v1142_v13, %v1141_v26  ;;  %v1143_v29 = vld [vmem:[%s2082_s5 + $0x50] sm:$0xff]  ;;  %v1523_v62 = vld [vmem:[%s2081_s4] ss:$0 sm:$0xff] }
 0x114   : > { %v1658_v30 = vpack.c.bf16 %v1144_v60, %v1143_v29 }
 0x115   : > { %v988_v40 = vadd.f32 %v986_v36, %v983_v35  ;;  %v821_v4 = vadd.f32 %v819_v39, %v810_v37 }
 0x117   : > { %v993_v45 = vadd.f32 %v991_v41, %v988_v40  ;;  %v832_v48 = vadd.f32 %v830_v44, %v821_v4 }
 0x119   : > { %v996_v50 = vadd.f32 %v995_v47, %v993_v45  ;;  %1581 = vmatpush3.msk.msra.mxu1 %vm844_vm6, %v832_v48 }
 0x11a   : > { %1583 = vmatmul.mubr.msk.f32.vlgmr.msra.gmra.mrb[0].mxu1 %vm840_vm7, %v833_v49  ;;  %1585 = vmatprep.subr.mxu1 %v1691_v1 }
 0x11b   : > { %v1001_v52 = vadd.f32 %v999_v23, %v996_v50  ;;  %1587 = vmatprep.mubr.msk.f32.mxu1 %vm1692_vm1, %v1691_v1 }
 0x11d   : > { %v1006_v17 = vadd.f32 %v1004_v53, %v1001_v52 }
 0x11f   : > { %v1011_v56 = vadd.f32 %v1009_v32, %v1006_v17 }
 0x121   : > { %v1016_v59 = vadd.f32 %v1014_v38, %v1011_v56  ;;  %v1221_v56 = vld [vmem:[%s2084_s7 + $0x8] sm:$0xff] }
 0x122   : > { %v1661_v38 = vpack.c.bf16 %v1221_v56, %v1220_v55 }
 0x123   : > { %v1020_v0 = vadd.f32 %v1019_v33, %v1016_v59  ;;  %v1677_v33 = vld [vmem:[%s2087_s10] sm:$0xff]   ;;  %v1678_v59 = vld [vmem:[%s2087_s10 + $0x8] sm:$0xff]  }
 0x124   : > { %1627 = vmatpush3.bf16.msra.mxu0 %v1677_v33 }
 0x125   : > { %v1025_v6 = vadd.f32 %v1023_v43, %v1020_v0  ;;  %1628 = vmatprep.subr.bf16.mxu0 %v1691_v1  ;;  %v1145_v43 = vld [vmem:[%s2083_s6] sm:$0x1] }
 0x127   : > { %v1030_v10 = vadd.f32 %v1028_v46, %v1025_v6  ;;  %v1679_v6 = vld [vmem:[%s2087_s10 + $0x10] sm:$0xff]  }
 0x128   : > { %1629 = vmatpush3.bf16.msra.mxu0 %v1678_v59 }
 0x129   : > { %v1035_v12 = vadd.f32 %v1033_v7, %v1030_v10  ;;  %1630 = vmatprep.subr.bf16.mxu0 %v1691_v1  ;;  %v1680_v7 = vld [vmem:[%s2087_s10 + $0x18] sm:$0xff]   ;;  %v1681_v10 = vld [vmem:[%s2087_s10 + $0x20] sm:$0xff]  }
 0x12b   : > { %v1040_v9 = vadd.f32 %v1038_v11, %v1035_v12  ;;  %v1682_v11 = vld [vmem:[%s2087_s10 + $0x28] sm:$0xff]   ;;  %v1223_v12 = vld [vmem:[%s2085_s8] sm:$0x1] }
 0x12c   : > { %1631 = vmatpush3.bf16.msra.mxu0 %v1679_v6 }
 0x12d   : > { %1586 = vmatpush3.msk.msra.mxu1 %vm844_vm6, %v1040_v9  ;;  %1632 = vmatprep.subr.bf16.mxu0 %v1691_v1  ;;  %v1301_v9 = vlaneseq }
 0x12e   : > { %1588 = vmatmul.mubr.msk.f32.vlgmr.msra.gmra.mrb[2].mxu1 %vm840_vm7, %v1041_v58  ;;  %1642 = vmatprep.subr.bf16.mxu1 %v1693_v15 }
 0x12f   : > { %1614 = vmatprep.mubr.msk.f32.mxu1 %vm1692_vm1, %v1691_v1  ;;  %1644 = vmatpush3.bf16.msra.mxu1 %v1643_v16 }
 0x130   : > { %1645 = vmatprep.subr.bf16.mxu1 %v1693_v15  ;;  %1633 = vmatpush3.bf16.msra.mxu0 %v1680_v7 }
 0x131   : > { %1634 = vmatprep.subr.bf16.mxu0 %v1691_v1 }
 0x133   : > { %1647 = vmatpush3.bf16.msra.mxu1 %v1646_v19 }
 0x134   : > { %1648 = vmatprep.subr.bf16.mxu1 %v1693_v15  ;;  %1635 = vmatpush3.bf16.msra.mxu0 %v1681_v10 }
 0x135   : > { %1636 = vmatprep.subr.bf16.mxu0 %v1691_v1 }
 0x137   : > { %1650 = vmatpush3.bf16.msra.mxu1 %v1649_v21 }
 0x138   : > { %1651 = vmatprep.subr.bf16.mxu1 %v1693_v15  ;;  %1637 = vmatpush3.bf16.msra.mxu0 %v1682_v11 }
 0x13b   : > { %1653 = vmatpush3.bf16.msra.mxu1 %v1652_v25 }
 0x13c   : > { %1654 = vmatprep.subr.bf16.mxu1 %v1693_v15 }
 0x13f   : > { %1656 = vmatpush3.bf16.msra.mxu1 %v1655_v28 }
 0x140   : > { %1657 = vmatprep.subr.bf16.mxu1 %v1693_v15 }
 0x143   : > { %1659 = vmatpush3.bf16.msra.mxu1 %v1658_v30 }
 0x144   : > { %1660 = vmatprep.subr.bf16.mxu1 %v1693_v15  ;;  %v1302_v15 = vshrl.u32 %v1301_v9, 7 }
 0x146   : > { %v1303_v19 = vsub.s32 0, %v1302_v15 }
 0x1ed   : > { %v914_v31 = vpop.f32.mrb[0].mxu1 }
 0x1ee   : > { %v915_v34 = vadd.f32 %v1523_v62, %v914_v31  ;;  %v1584_v35 = vpop.f32.mrb[1].mxu1 }
 0x1f0   : > { %v918_v36 = vadd.f32 3.0, %v915_v34 }
 0x1f2   : > { %v919_v37 = vmax.f32 %v918_v36, 0.0 }
 0x1f4   : > { %v920_v39 = vmin.f32 %v919_v37, 6.0 }
 0x1f6   : > { %v921_v40 = vmul.f32 %v920_v39, %v915_v34 }
 0x1f8   : > { %v922_v41 = vmul.f32 0.16666667, %v921_v40 }
 0x1fa   : > { %924 = vst.msk [vmem:[#allocation3] sm:$0x3] %vm923_vm8, %v922_v41 }
 0x201   : > { %v1114_v42 = vpop.f32.mrb[2].mxu1 }
 0x202   : > { %v1115_v4 = vadd.f32 %v1523_v62, %v1114_v42  ;;  %v1589_v44 = vpop.f32.mrb[3].mxu1 }
 0x204   : > { %v1118_v45 = vadd.f32 3.0, %v1115_v4 }
 0x206   : > { %v1119_v47 = vmax.f32 %v1118_v45, 0.0 }
 0x208   : > { %v1120_v5 = vmin.f32 %v1119_v47, 6.0 }
 0x20a   : > { %v1121_v48 = vmul.f32 %v1120_v5, %v1115_v4 }
 0x20c   : > { %v1122_v49 = vmul.f32 0.16666667, %v1121_v48 }
 0x20e   : > { %1123 = vst.msk [vmem:[#allocation3 + $0x2] sm:$0x3] %vm923_vm8, %v1122_v49 }
 0x215   : > { %v1124_v50 = vld [vmem:[#allocation3] sm:$0xf] }
 0x216   : > { %v1125_v23 = vsel %vm508_vm4, %v1124_v50, 0.0 }
 0x217   : > { %v1126_v24 = vrot.slane %v1125_v23, 4 }
 0x219   : > { %v1127_v27 = vadd.f32 %v1126_v24, %v1125_v23 }
 0x21b   : > { %v1128_v52 = vrot.slane %v1127_v27, 2 }
 0x21d   : > { %v1129_v53 = vadd.f32 %v1128_v52, %v1127_v27 }
 0x21f   : > { %v1130_v54 = vrot.slane %v1129_v53, 1 }
 0x221   : > { %v1131_v17 = vadd.f32 %v1130_v54, %v1129_v53 }
 0x223   : > { %v1132_v32 = vmul.f32 0.25, %v1131_v17 }
 0x225   : > { %1615 = vmatmul.mubr.msk.f32.vlgmr.msra.gmra.mrb[4].mxu1 %vm498_vm3, %v1132_v32 }
 0x226   : > { %1623 = vmatprep.mubr.msk.f32.mxu1 %vm1692_vm1, %v1691_v1  ;;  %1662 = vmatpush3.bf16.msra.mxu1 %v1661_v38 }
 0x227   : > { %1621 = vmatprep.subr.mxu1 %v1691_v1  ;;  %v1530_v1 = vld [vmem:[%s2088_s11] ss:$0 sm:$0xff] }
 0x22a   : > { %1622 = vmatpush3.msra.mxu1 %v1222_v57 }
 0x2f8   : > { %v1215_v63 = vpop.f32.mrb[4].mxu1 }
 0x2f9   : > { %v1216_v0 = vadd.f32 %v1215_v63, %v1145_v43  ;;  %v1616_v46 = vpop.f32.mrb[5].mxu1 }
 0x2fb   : > { %v1219_v3 = vmax.f32 %v1216_v0, 0.0 }
 0x2fd   : > { %1624 = vmatmul.mubr.msk.f32.vlgmr.msra.gmra.mrb[6].mxu1 %vm439_vm2, %v1219_v3 }
 0x3d0   : > { %v1293_v58 = vpop.f32.mrb[6].mxu1 }
 0x3d1   : > { %v1294_v2 = vadd.f32 %v1293_v58, %v1223_v12  ;;  %v1625_v51 = vpop.f32.mrb[7].mxu1 }
 0x3d3   : > { %v1297_v14 = vadd.f32 3.0, %v1294_v2 }
 0x3d5   : > { %v1298_v16 = vmax.f32 %v1297_v14, 0.0 }
 0x3d7   : > { %v1299_v18 = vmin.f32 %v1298_v16, 6.0 }
 0x3d9   : > { %v1300_v20 = vmul.f32 0.16666667, %v1299_v18 }
 0x3db   : > { %v1304_v61 = vrot.slane %v1300_v20, %v1303_v19 }
 0x3dd   : > { %v1305_v21 = vmul.f32 %v1304_v61, %v1124_v50 }
 0x3df   : > { %v1306_v22 = vpack.c.bf16 %v1305_v21, %v1305_v21 }
 0x3e1   : > { %1639 = vmatmul.mubr.msk.bf16.vlgmr.msra.gmra.mrb[4].mxu0 %vm498_vm3, %v1306_v22 }
 0x4b4   : > { %v1399_v8 = vpop.f32.mrb[4].mxu0 }
 0x4b5   : > { %v1400_v25 = vadd.f32 %v1530_v1, %v1399_v8  ;;  %v1640_v26 = vpop.f32.mrb[5].mxu0 }
 0x4b6   : > { %v1402_v13 = vpop.f32.mrb[6].mxu0 }
 0x4b7   : > { %v1405_v28 = vpack.c.bf16 %v1400_v25, %v1400_v25  ;;  %v1641_v29 = vpop.f32.mrb[7].mxu0 }
 0x4b9   : > { %1407 = vst.msk [vmem:[%s411_s28] sm:$0x3] %vm1406_vm9, %v1405_v28 }
 0x4ba PF: > { %s22_s21 = sadd.s32 1, %s1689_s21  }
 0x4bb   : > { %p19_p4 = scmp.ge.s32.totalorder %s22_s21, 4  }
 0x4bd   :  { %21 = sbr.rel (!%p19_p4) target bundleno = 1 (0x1), region = 128 }

</bundles_post_ra>
